<compile_context>
chip_gen: v7x
topology: tpu7x:2x2x1
jax: 0.10.0
libtpu: 0.0.40
codegen_flags: <defaults>
</compile_context>

<pallas_src>
import functools

import jax
import jax.numpy as jnp
from jax.experimental import pallas as pl
from jax.experimental.pallas import tpu as pltpu


def _mhta_kernel(
    x_ref,      # (Bt, S, D)    input block (compute dtype)
    wqkv_ref,   # (D, 3D)       fused [Wq*scale | Wk | Wv], pre-transposed (compute dtype)
    bqk_ref,    # (1, 2D)       fused [bq*scale | bk] bias (f32); bv folded into bo
    wo_ref,     # (D, D)        output weight, pre-transposed (compute dtype)
    bo_ref,     # (1, D)        bo + bv @ Wo^T (f32)
    out_ref,    # (Bt, D_out)   pooled context, lane-dense (D zero-padded), f32
    *,
    num_heads: int,
    head_dim: int,
    block_b: int,
    seq_len: int,
    dim: int,
    out_dim: int,
):
    m = block_b * seq_len
    cdt = wqkv_ref.dtype            # MXU operand dtype (bf16 or f32); accum is f32

    xb = x_ref[...].reshape(m, dim)                                   # (M, D)

    # Fused QKV projection: one MXU pass with N = 3D, f32 accumulation.
    qkv = jnp.dot(xb, wqkv_ref[...], preferred_element_type=jnp.float32)  # (M, 3D)

    qk = qkv[:, : 2 * dim] + bqk_ref[...]            # Q (pre-scaled) / K biases
    q = qk[:, :dim].reshape(block_b, seq_len, dim)
    k = qk[:, dim:].reshape(block_b, seq_len, dim)
    v = qkv[:, 2 * dim:].reshape(block_b, seq_len, dim)   # bv folded into bo_ref

    # Per-head attention; each head's context is folded straight into the
    # output projection (context @ Wo == sum_h ctx_h @ Wo[h*hd:(h+1)*hd, :]),
    # so there is no concatenate / repack of head chunks.
    acc = jnp.zeros((m, dim), jnp.float32)
    for h in range(num_heads):
        lo = h * head_dim
        hi = lo + head_dim
        qh = q[:, :, lo:hi].astype(cdt)                               # (Bt, S, hd)
        kh = k[:, :, lo:hi].astype(cdt)
        vh = v[:, :, lo:hi].astype(cdt)

        # 1/sqrt(hd) is already folded into Wq / bq in the wrapper.
        s = jnp.einsum('bqd,bkd->bqk', qh, kh,
                       preferred_element_type=jnp.float32)            # (Bt, S, S)
        s = s - jnp.max(s, axis=-1, keepdims=True)
        p = jnp.exp(s)
        p = p * pl.reciprocal(jnp.sum(p, axis=-1, keepdims=True), approx=True)

        ctx_h = jnp.einsum('bqk,bkd->bqd', p.astype(cdt), vh,
                           preferred_element_type=jnp.float32)        # (Bt, S, hd)
        acc = acc + jnp.dot(ctx_h.reshape(m, head_dim).astype(cdt),
                            wo_ref[lo:hi, :],
                            preferred_element_type=jnp.float32)       # (M, D)

    out = acc + bo_ref[...]                                           # (M, D) f32

    # Temporal attention pooling per batch element:
    #   weights = softmax_seq(sum_d out); final = sum_seq out * weights.
    out3 = out.reshape(block_b, seq_len, dim)
    r = jnp.sum(out3, axis=-1, keepdims=True)                         # (Bt, S, 1)
    r = r - jnp.max(r, axis=1, keepdims=True)
    w = jnp.exp(r)
    w = w / jnp.sum(w, axis=1, keepdims=True)       # exact normalisation (tiny)

    final = jnp.sum(out3 * w, axis=1)                                 # (Bt, D) f32

    # Lane-dense store: zero-pad D up to out_dim (multiple of 128) so the store
    # is a full-width unmasked vst.
    if out_dim != dim:
        final = jnp.concatenate(
            [final, jnp.zeros((block_b, out_dim - dim), jnp.float32)], axis=-1)
    out_ref[...] = final.astype(out_ref.dtype)


def _choose_block_b(batch, seq_len):
    """Pick batch rows per grid step.

    Targets block_b*seq_len ~= 1024 rows so each x tile is a few hundred KB
    (amortises per-step overhead, reaches roofline-scale DMAs), keeps block_b
    a multiple of 8 (all block shapes stay (8,128)-legal), and keeps the grid
    length even when the batch is split so both v7x TensorCores stay busy.
    """
    target_rows = 1024
    blk = max(8, pl.cdiv(target_rows, seq_len))
    blk = pl.cdiv(blk, 8) * 8
    if batch <= blk:
        return pl.cdiv(batch, 8) * 8               # single grid step
    n_steps = pl.cdiv(batch, blk)
    if n_steps % 2:
        n_steps += 1                               # even grid for v7x's 2 TCs
    return pl.cdiv(pl.cdiv(batch, n_steps), 8) * 8


def multi_head_temporal_attention(x, params, *, num_heads, block_b=None,
                                  compute_dtype=jnp.bfloat16):
    """x: (B, S, D) float32. params: PyTorch nn.Linear-layout weights/biases.

    compute_dtype=bfloat16 (default) halves HBM->VMEM traffic for x / weights
    and uses the native bf16 MXU path; accumulation, softmax and pooling stay
    in float32 (so it is also safe on v5e, which lacks bf16 VPU/EUP).  Pass
    compute_dtype=jnp.float32 for a full-precision path.
    """
    B, S, D = x.shape
    assert D % num_heads == 0, "input_dim must be divisible by num_heads"
    head_dim = D // num_heads
    scale = 1.0 / (head_dim ** 0.5)
    compute_dtype = jnp.dtype(compute_dtype)

    # Fused QKV weight, pre-transposed (y = x @ W^T + b); fold the 1/sqrt(hd)
    # score scale into the Q columns / bias.
    wqkv = jnp.concatenate(
        [params["wq"].T * scale, params["wk"].T, params["wv"].T], axis=1)
    bqk = jnp.concatenate([params["bq"] * scale, params["bk"]]
                          ).reshape(1, 2 * D).astype(jnp.float32)
    wo = params["wo"].T
    # Attention rows sum to 1, so P @ (X Wv^T + bv) = P @ (X Wv^T) + bv; fold
    # the V bias into the output bias instead of carrying it per row.
    bo = (params["bo"] + params["bv"] @ params["wo"].T
          ).reshape(1, D).astype(jnp.float32)

    if block_b is None:
        block_b = _choose_block_b(B, S)
    b_pad = pl.cdiv(B, block_b) * block_b
    if b_pad != B:
        x = jnp.pad(x, ((0, b_pad - B), (0, 0), (0, 0)))

    if compute_dtype != jnp.dtype(jnp.float32):
        x = x.astype(compute_dtype)
        wqkv = wqkv.astype(compute_dtype)
        wo = wo.astype(compute_dtype)

    # Lane-dense output width (multiple of 128); wrapper slices back to D.
    d_out = D if D % 128 == 0 else pl.cdiv(D, 128) * 128

    kernel = functools.partial(
        _mhta_kernel,
        num_heads=num_heads, head_dim=head_dim,
        block_b=block_b, seq_len=S, dim=D, out_dim=d_out,
    )

    m_total = b_pad * S
    cost = pl.CostEstimate(
        flops=int(2 * m_total * D * 3 * D                        # QKV projection
                  + 4 * b_pad * num_heads * S * S * head_dim     # QK^T and P@V
                  + 2 * m_total * D * D                          # output projection
                  + 4 * m_total * D),                            # pooling
        transcendentals=int(b_pad * num_heads * S * S + b_pad * S),
        bytes_accessed=int(x.size * x.dtype.itemsize
                           + wqkv.size * wqkv.dtype.itemsize
                           + wo.size * wo.dtype.itemsize
                           + bqk.size * 4 + bo.size * 4
                           + b_pad * d_out * 4),
    )

    out = pl.pallas_call(
        kernel,
        out_shape=jax.ShapeDtypeStruct((b_pad, d_out), jnp.float32),
        grid_spec=pltpu.PrefetchScalarGridSpec(
            num_scalar_prefetch=0,
            grid=(b_pad // block_b,),
            in_specs=[
                pl.BlockSpec((block_b, S, D), lambda b: (b, 0, 0)),   # x
                pl.BlockSpec((D, 3 * D), lambda b: (0, 0)),           # fused QKV weight
                pl.BlockSpec((1, 2 * D), lambda b: (0, 0)),           # fused Q/K bias
                pl.BlockSpec((D, D), lambda b: (0, 0)),               # output weight
                pl.BlockSpec((1, D), lambda b: (0, 0)),               # output bias (+ bv@Wo^T)
            ],
            out_specs=pl.BlockSpec((block_b, d_out), lambda b: (b, 0)),
        ),
        compiler_params=pltpu.CompilerParams(
            dimension_semantics=("parallel",),
        ),
        cost_estimate=cost,
    )(x, wqkv, bqk, wo, bo)

    return out[:B, :D]


def _reference_jax(x, params, *, num_heads):
    """Pure-JAX reference mirroring the PyTorch forward."""
    B, S, D = x.shape
    hd = D // num_heads
    lin = lambda x, w, b: x @ w.T + b
    q = lin(x, params["wq"], params["bq"]).reshape(B, S, num_heads, hd).transpose(0, 2, 1, 3)
    k = lin(x, params["wk"], params["bk"]).reshape(B, S, num_heads, hd).transpose(0, 2, 1, 3)
    v = lin(x, params["wv"], params["bv"]).reshape(B, S, num_heads, hd).transpose(0, 2, 1, 3)
    scores = jnp.einsum("bhqd,bhkd->bhqk", q, k) / (hd ** 0.5)
    attn = jax.nn.softmax(scores, axis=-1)
    ctx = jnp.einsum("bhqk,bhkd->bhqd", attn, v).transpose(0, 2, 1, 3).reshape(B, S, D)
    out = lin(ctx, params["wo"], params["bo"])
    w = jax.nn.softmax(jnp.sum(out, axis=-1, keepdims=True), axis=1)
    return jnp.sum(out * w, axis=1)


if __name__ == "__main__":
    # B=20 exercises batch padding (block_b -> 24, single grid step).
    B, S, D = 20, 8, 32
    num_heads = 4

    key = jax.random.PRNGKey(0)
    keys = jax.random.split(key, 9)
    bound = 1.0 / (D ** 0.5)  # nn.Linear default init range

    params = {
        "wq": jax.random.uniform(keys[0], (D, D), jnp.float32, -bound, bound),
        "bq": jax.random.uniform(keys[1], (D,), jnp.float32, -bound, bound),
        "wk": jax.random.uniform(keys[2], (D, D), jnp.float32, -bound, bound),
        "bk": jax.random.uniform(keys[3], (D,), jnp.float32, -bound, bound),
        "wv": jax.random.uniform(keys[4], (D, D), jnp.float32, -bound, bound),
        "bv": jax.random.uniform(keys[5], (D,), jnp.float32, -bound, bound),
        "wo": jax.random.uniform(keys[6], (D, D), jnp.float32, -bound, bound),
        "bo": jax.random.uniform(keys[7], (D,), jnp.float32, -bound, bound),
    }
    x = jax.random.normal(keys[8], (B, S, D), jnp.float32)

    ref = _reference_jax(x, params, num_heads=num_heads)

    # Default (bf16 compute) path — reduced-precision sanity check.
    out_bf16 = multi_head_temporal_attention(x, params, num_heads=num_heads)
    out_bf16 = jax.block_until_ready(out_bf16)
    assert out_bf16.shape == (B, D)
    assert jnp.all(jnp.isfinite(out_bf16))
    assert jnp.allclose(out_bf16, ref, atol=1e-1, rtol=1e-1), "bf16 kernel out of ballpark"

    # f32 compute path — tight check (tolerance covers the approx reciprocal).
    out_f32 = multi_head_temporal_attention(
        x, params, num_heads=num_heads, compute_dtype=jnp.float32)
    out_f32 = jax.block_until_ready(out_f32)
    assert out_f32.shape == (B, D)
    assert jnp.allclose(out_f32, ref, atol=2e-3, rtol=2e-3), "f32 kernel mismatch vs reference"

    print("KERNEL_OK")
</pallas_src>

<mosaic_0001>
module attributes {stable_mosaic.version = 11 : i64} {
  func.func @_mhta_kernel(%arg0: i32, %arg1: memref<24x8x32xbf16, #tpu.memory_space<vmem>>, %arg2: memref<32x96xbf16, #tpu.memory_space<vmem>>, %arg3: memref<1x64xf32, #tpu.memory_space<vmem>>, %arg4: memref<32x32xbf16, #tpu.memory_space<vmem>>, %arg5: memref<1x32xf32, #tpu.memory_space<vmem>>, %arg6: memref<24x128xf32, #tpu.memory_space<vmem>>) attributes {dimension_semantics = [#tpu.dimension_semantics<parallel>], iteration_bounds = array<i64: 1>, scalar_prefetch = 0 : i64, scratch_operands = 0 : i64, tpu.core_type = #tpu.core_type<tc>, window_params = [{transform_indices = @transform_0, window_bounds = array<i64: 24, 8, 32>}, {pipeline_mode = #tpu.pipeline_mode<synchronous>, transform_indices = @transform_1, window_bounds = array<i64: 32, 96>}, {pipeline_mode = #tpu.pipeline_mode<synchronous>, transform_indices = @transform_2, window_bounds = array<i64: 1, 64>}, {pipeline_mode = #tpu.pipeline_mode<synchronous>, transform_indices = @transform_3, window_bounds = array<i64: 32, 32>}, {pipeline_mode = #tpu.pipeline_mode<synchronous>, transform_indices = @transform_4, window_bounds = array<i64: 1, 32>}, {transform_indices = @transform_5, window_bounds = array<i64: 24, 128>}]} {
    %c0 = arith.constant 0 : index
    %c0_0 = arith.constant 0 : index
    %c0_1 = arith.constant 0 : index
    %0 = vector.load %arg1[%c0, %c0_0, %c0_1] : memref<24x8x32xbf16, #tpu.memory_space<vmem>>, vector<24x8x32xbf16>
    %1 = vector.shape_cast %0 : vector<24x8x32xbf16> to vector<192x32xbf16>
    %c0_2 = arith.constant 0 : index
    %c0_3 = arith.constant 0 : index
    %2 = vector.load %arg2[%c0_2, %c0_3] : memref<32x96xbf16, #tpu.memory_space<vmem>>, vector<32x96xbf16>
    %cst = arith.constant dense<0.000000e+00> : vector<192x96xf32>
    %3 = tpu.matmul %1, %2, %cst {dimension_numbers = #tpu.dot_dimension_numbers<[1], [0], [0], [1], [0, 0, 1, 1], [], []>} : vector<192x32xbf16>, vector<32x96xbf16>, vector<192x96xf32> -> vector<192x96xf32>
    %4 = vector.extract_strided_slice %3 {offsets = [0, 0], sizes = [192, 64], strides = [1, 1]} : vector<192x96xf32> to vector<192x64xf32>
    %c0_4 = arith.constant 0 : index
    %c0_5 = arith.constant 0 : index
    %5 = vector.load %arg3[%c0_4, %c0_5] : memref<1x64xf32, #tpu.memory_space<vmem>>, vector<1x64xf32>
    %6 = vector.broadcast %5 : vector<1x64xf32> to vector<192x64xf32>
    %7 = arith.addf %4, %6 : vector<192x64xf32>
    %8 = vector.extract_strided_slice %7 {offsets = [0, 0], sizes = [192, 32], strides = [1, 1]} : vector<192x64xf32> to vector<192x32xf32>
    %9 = vector.shape_cast %8 : vector<192x32xf32> to vector<24x8x32xf32>
    %10 = vector.extract_strided_slice %7 {offsets = [0, 32], sizes = [192, 32], strides = [1, 1]} : vector<192x64xf32> to vector<192x32xf32>
    %11 = vector.shape_cast %10 : vector<192x32xf32> to vector<24x8x32xf32>
    %12 = vector.extract_strided_slice %3 {offsets = [0, 64], sizes = [192, 32], strides = [1, 1]} : vector<192x96xf32> to vector<192x32xf32>
    %13 = vector.shape_cast %12 : vector<192x32xf32> to vector<24x8x32xf32>
    %cst_6 = arith.constant 0.000000e+00 : f32
    %14 = vector.broadcast %cst_6 : f32 to vector<192x32xf32>
    %15 = vector.extract_strided_slice %9 {offsets = [0, 0, 0], sizes = [24, 8, 8], strides = [1, 1, 1]} : vector<24x8x32xf32> to vector<24x8x8xf32>
    %16 = arith.truncf %15 : vector<24x8x8xf32> to vector<24x8x8xbf16>
    %17 = vector.extract_strided_slice %11 {offsets = [0, 0, 0], sizes = [24, 8, 8], strides = [1, 1, 1]} : vector<24x8x32xf32> to vector<24x8x8xf32>
    %18 = arith.truncf %17 : vector<24x8x8xf32> to vector<24x8x8xbf16>
    %19 = vector.extract_strided_slice %13 {offsets = [0, 0, 0], sizes = [24, 8, 8], strides = [1, 1, 1]} : vector<24x8x32xf32> to vector<24x8x8xf32>
    %20 = arith.truncf %19 : vector<24x8x8xf32> to vector<24x8x8xbf16>
    "tpu.trace_start"() <{level = 10 : i32, message = "bqd,bkd->bqk"}> : () -> ()
    %cst_7 = arith.constant dense<0.000000e+00> : vector<24x8x8xf32>
    %21 = tpu.matmul %16, %18, %cst_7 {dimension_numbers = #tpu.dot_dimension_numbers<[2], [2], [1], [1], [0, 0, 0, 1, 1, 1], [0], [0]>} : vector<24x8x8xbf16>, vector<24x8x8xbf16>, vector<24x8x8xf32> -> vector<24x8x8xf32>
    "tpu.trace_stop"() : () -> ()
    %cst_8 = arith.constant dense<0xFF800000> : vector<24x8xf32>
    %22 = vector.multi_reduction <maximumf>, %21, %cst_8 [2] : vector<24x8x8xf32> to vector<24x8xf32>
    %23 = vector.shape_cast %22 : vector<24x8xf32> to vector<24x8x1xf32>
    %24 = vector.broadcast %23 : vector<24x8x1xf32> to vector<24x8x8xf32>
    %25 = arith.subf %21, %24 : vector<24x8x8xf32>
    %26 = math.exp %25 : vector<24x8x8xf32>
    %cst_9 = arith.constant dense<0.000000e+00> : vector<24x8xf32>
    %27 = vector.multi_reduction <add>, %26, %cst_9 [2] : vector<24x8x8xf32> to vector<24x8xf32>
    %28 = vector.shape_cast %27 : vector<24x8xf32> to vector<24x8x1xf32>
    %29 = tpu.reciprocal %28 {approx = true} : vector<24x8x1xf32> -> vector<24x8x1xf32>
    %30 = vector.broadcast %29 : vector<24x8x1xf32> to vector<24x8x8xf32>
    %31 = arith.mulf %26, %30 : vector<24x8x8xf32>
    %32 = arith.truncf %31 : vector<24x8x8xf32> to vector<24x8x8xbf16>
    "tpu.trace_start"() <{level = 10 : i32, message = "bqk,bkd->bqd"}> : () -> ()
    %cst_10 = arith.constant dense<0.000000e+00> : vector<24x8x8xf32>
    %33 = tpu.matmul %32, %20, %cst_10 {dimension_numbers = #tpu.dot_dimension_numbers<[2], [1], [1], [2], [0, 0, 0, 1, 1, 2], [0], [0]>} : vector<24x8x8xbf16>, vector<24x8x8xbf16>, vector<24x8x8xf32> -> vector<24x8x8xf32>
    "tpu.trace_stop"() : () -> ()
    %34 = vector.shape_cast %33 : vector<24x8x8xf32> to vector<192x8xf32>
    %35 = arith.truncf %34 : vector<192x8xf32> to vector<192x8xbf16>
    %c0_11 = arith.constant 0 : index
    %c0_12 = arith.constant 0 : index
    %36 = vector.load %arg4[%c0_11, %c0_12] : memref<32x32xbf16, #tpu.memory_space<vmem>>, vector<8x32xbf16>
    %cst_13 = arith.constant dense<0.000000e+00> : vector<192x32xf32>
    %37 = tpu.matmul %35, %36, %cst_13 {dimension_numbers = #tpu.dot_dimension_numbers<[1], [0], [0], [1], [0, 0, 1, 1], [], []>} : vector<192x8xbf16>, vector<8x32xbf16>, vector<192x32xf32> -> vector<192x32xf32>
    %38 = arith.addf %14, %37 : vector<192x32xf32>
    %39 = vector.extract_strided_slice %9 {offsets = [0, 0, 8], sizes = [24, 8, 8], strides = [1, 1, 1]} : vector<24x8x32xf32> to vector<24x8x8xf32>
    %40 = arith.truncf %39 : vector<24x8x8xf32> to vector<24x8x8xbf16>
    %41 = vector.extract_strided_slice %11 {offsets = [0, 0, 8], sizes = [24, 8, 8], strides = [1, 1, 1]} : vector<24x8x32xf32> to vector<24x8x8xf32>
    %42 = arith.truncf %41 : vector<24x8x8xf32> to vector<24x8x8xbf16>
    %43 = vector.extract_strided_slice %13 {offsets = [0, 0, 8], sizes = [24, 8, 8], strides = [1, 1, 1]} : vector<24x8x32xf32> to vector<24x8x8xf32>
    %44 = arith.truncf %43 : vector<24x8x8xf32> to vector<24x8x8xbf16>
    "tpu.trace_start"() <{level = 10 : i32, message = "bqd,bkd->bqk"}> : () -> ()
    %cst_14 = arith.constant dense<0.000000e+00> : vector<24x8x8xf32>
    %45 = tpu.matmul %40, %42, %cst_14 {dimension_numbers = #tpu.dot_dimension_numbers<[2], [2], [1], [1], [0, 0, 0, 1, 1, 1], [0], [0]>} : vector<24x8x8xbf16>, vector<24x8x8xbf16>, vector<24x8x8xf32> -> vector<24x8x8xf32>
    "tpu.trace_stop"() : () -> ()
    %cst_15 = arith.constant dense<0xFF800000> : vector<24x8xf32>
    %46 = vector.multi_reduction <maximumf>, %45, %cst_15 [2] : vector<24x8x8xf32> to vector<24x8xf32>
    %47 = vector.shape_cast %46 : vector<24x8xf32> to vector<24x8x1xf32>
    %48 = vector.broadcast %47 : vector<24x8x1xf32> to vector<24x8x8xf32>
    %49 = arith.subf %45, %48 : vector<24x8x8xf32>
    %50 = math.exp %49 : vector<24x8x8xf32>
    %cst_16 = arith.constant dense<0.000000e+00> : vector<24x8xf32>
    %51 = vector.multi_reduction <add>, %50, %cst_16 [2] : vector<24x8x8xf32> to vector<24x8xf32>
    %52 = vector.shape_cast %51 : vector<24x8xf32> to vector<24x8x1xf32>
    %53 = tpu.reciprocal %52 {approx = true} : vector<24x8x1xf32> -> vector<24x8x1xf32>
    %54 = vector.broadcast %53 : vector<24x8x1xf32> to vector<24x8x8xf32>
    %55 = arith.mulf %50, %54 : vector<24x8x8xf32>
    %56 = arith.truncf %55 : vector<24x8x8xf32> to vector<24x8x8xbf16>
    "tpu.trace_start"() <{level = 10 : i32, message = "bqk,bkd->bqd"}> : () -> ()
    %cst_17 = arith.constant dense<0.000000e+00> : vector<24x8x8xf32>
    %57 = tpu.matmul %56, %44, %cst_17 {dimension_numbers = #tpu.dot_dimension_numbers<[2], [1], [1], [2], [0, 0, 0, 1, 1, 2], [0], [0]>} : vector<24x8x8xbf16>, vector<24x8x8xbf16>, vector<24x8x8xf32> -> vector<24x8x8xf32>
    "tpu.trace_stop"() : () -> ()
    %58 = vector.shape_cast %57 : vector<24x8x8xf32> to vector<192x8xf32>
    %59 = arith.truncf %58 : vector<192x8xf32> to vector<192x8xbf16>
    %c8 = arith.constant 8 : index
    %c0_18 = arith.constant 0 : index
    %60 = vector.load %arg4[%c8, %c0_18] : memref<32x32xbf16, #tpu.memory_space<vmem>>, vector<8x32xbf16>
    %cst_19 = arith.constant dense<0.000000e+00> : vector<192x32xf32>
    %61 = tpu.matmul %59, %60, %cst_19 {dimension_numbers = #tpu.dot_dimension_numbers<[1], [0], [0], [1], [0, 0, 1, 1], [], []>} : vector<192x8xbf16>, vector<8x32xbf16>, vector<192x32xf32> -> vector<192x32xf32>
    %62 = arith.addf %38, %61 : vector<192x32xf32>
    %63 = vector.extract_strided_slice %9 {offsets = [0, 0, 16], sizes = [24, 8, 8], strides = [1, 1, 1]} : vector<24x8x32xf32> to vector<24x8x8xf32>
    %64 = arith.truncf %63 : vector<24x8x8xf32> to vector<24x8x8xbf16>
    %65 = vector.extract_strided_slice %11 {offsets = [0, 0, 16], sizes = [24, 8, 8], strides = [1, 1, 1]} : vector<24x8x32xf32> to vector<24x8x8xf32>
    %66 = arith.truncf %65 : vector<24x8x8xf32> to vector<24x8x8xbf16>
    %67 = vector.extract_strided_slice %13 {offsets = [0, 0, 16], sizes = [24, 8, 8], strides = [1, 1, 1]} : vector<24x8x32xf32> to vector<24x8x8xf32>
    %68 = arith.truncf %67 : vector<24x8x8xf32> to vector<24x8x8xbf16>
    "tpu.trace_start"() <{level = 10 : i32, message = "bqd,bkd->bqk"}> : () -> ()
    %cst_20 = arith.constant dense<0.000000e+00> : vector<24x8x8xf32>
    %69 = tpu.matmul %64, %66, %cst_20 {dimension_numbers = #tpu.dot_dimension_numbers<[2], [2], [1], [1], [0, 0, 0, 1, 1, 1], [0], [0]>} : vector<24x8x8xbf16>, vector<24x8x8xbf16>, vector<24x8x8xf32> -> vector<24x8x8xf32>
    "tpu.trace_stop"() : () -> ()
    %cst_21 = arith.constant dense<0xFF800000> : vector<24x8xf32>
    %70 = vector.multi_reduction <maximumf>, %69, %cst_21 [2] : vector<24x8x8xf32> to vector<24x8xf32>
    %71 = vector.shape_cast %70 : vector<24x8xf32> to vector<24x8x1xf32>
    %72 = vector.broadcast %71 : vector<24x8x1xf32> to vector<24x8x8xf32>
    %73 = arith.subf %69, %72 : vector<24x8x8xf32>
    %74 = math.exp %73 : vector<24x8x8xf32>
    %cst_22 = arith.constant dense<0.000000e+00> : vector<24x8xf32>
    %75 = vector.multi_reduction <add>, %74, %cst_22 [2] : vector<24x8x8xf32> to vector<24x8xf32>
    %76 = vector.shape_cast %75 : vector<24x8xf32> to vector<24x8x1xf32>
    %77 = tpu.reciprocal %76 {approx = true} : vector<24x8x1xf32> -> vector<24x8x1xf32>
    %78 = vector.broadcast %77 : vector<24x8x1xf32> to vector<24x8x8xf32>
    %79 = arith.mulf %74, %78 : vector<24x8x8xf32>
    %80 = arith.truncf %79 : vector<24x8x8xf32> to vector<24x8x8xbf16>
    "tpu.trace_start"() <{level = 10 : i32, message = "bqk,bkd->bqd"}> : () -> ()
    %cst_23 = arith.constant dense<0.000000e+00> : vector<24x8x8xf32>
    %81 = tpu.matmul %80, %68, %cst_23 {dimension_numbers = #tpu.dot_dimension_numbers<[2], [1], [1], [2], [0, 0, 0, 1, 1, 2], [0], [0]>} : vector<24x8x8xbf16>, vector<24x8x8xbf16>, vector<24x8x8xf32> -> vector<24x8x8xf32>
    "tpu.trace_stop"() : () -> ()
    %82 = vector.shape_cast %81 : vector<24x8x8xf32> to vector<192x8xf32>
    %83 = arith.truncf %82 : vector<192x8xf32> to vector<192x8xbf16>
    %c16 = arith.constant 16 : index
    %c0_24 = arith.constant 0 : index
    %84 = vector.load %arg4[%c16, %c0_24] : memref<32x32xbf16, #tpu.memory_space<vmem>>, vector<8x32xbf16>
    %cst_25 = arith.constant dense<0.000000e+00> : vector<192x32xf32>
    %85 = tpu.matmul %83, %84, %cst_25 {dimension_numbers = #tpu.dot_dimension_numbers<[1], [0], [0], [1], [0, 0, 1, 1], [], []>} : vector<192x8xbf16>, vector<8x32xbf16>, vector<192x32xf32> -> vector<192x32xf32>
    %86 = arith.addf %62, %85 : vector<192x32xf32>
    %87 = vector.extract_strided_slice %9 {offsets = [0, 0, 24], sizes = [24, 8, 8], strides = [1, 1, 1]} : vector<24x8x32xf32> to vector<24x8x8xf32>
    %88 = arith.truncf %87 : vector<24x8x8xf32> to vector<24x8x8xbf16>
    %89 = vector.extract_strided_slice %11 {offsets = [0, 0, 24], sizes = [24, 8, 8], strides = [1, 1, 1]} : vector<24x8x32xf32> to vector<24x8x8xf32>
    %90 = arith.truncf %89 : vector<24x8x8xf32> to vector<24x8x8xbf16>
    %91 = vector.extract_strided_slice %13 {offsets = [0, 0, 24], sizes = [24, 8, 8], strides = [1, 1, 1]} : vector<24x8x32xf32> to vector<24x8x8xf32>
    %92 = arith.truncf %91 : vector<24x8x8xf32> to vector<24x8x8xbf16>
    "tpu.trace_start"() <{level = 10 : i32, message = "bqd,bkd->bqk"}> : () -> ()
    %cst_26 = arith.constant dense<0.000000e+00> : vector<24x8x8xf32>
    %93 = tpu.matmul %88, %90, %cst_26 {dimension_numbers = #tpu.dot_dimension_numbers<[2], [2], [1], [1], [0, 0, 0, 1, 1, 1], [0], [0]>} : vector<24x8x8xbf16>, vector<24x8x8xbf16>, vector<24x8x8xf32> -> vector<24x8x8xf32>
    "tpu.trace_stop"() : () -> ()
    %cst_27 = arith.constant dense<0xFF800000> : vector<24x8xf32>
    %94 = vector.multi_reduction <maximumf>, %93, %cst_27 [2] : vector<24x8x8xf32> to vector<24x8xf32>
    %95 = vector.shape_cast %94 : vector<24x8xf32> to vector<24x8x1xf32>
    %96 = vector.broadcast %95 : vector<24x8x1xf32> to vector<24x8x8xf32>
    %97 = arith.subf %93, %96 : vector<24x8x8xf32>
    %98 = math.exp %97 : vector<24x8x8xf32>
    %cst_28 = arith.constant dense<0.000000e+00> : vector<24x8xf32>
    %99 = vector.multi_reduction <add>, %98, %cst_28 [2] : vector<24x8x8xf32> to vector<24x8xf32>
    %100 = vector.shape_cast %99 : vector<24x8xf32> to vector<24x8x1xf32>
    %101 = tpu.reciprocal %100 {approx = true} : vector<24x8x1xf32> -> vector<24x8x1xf32>
    %102 = vector.broadcast %101 : vector<24x8x1xf32> to vector<24x8x8xf32>
    %103 = arith.mulf %98, %102 : vector<24x8x8xf32>
    %104 = arith.truncf %103 : vector<24x8x8xf32> to vector<24x8x8xbf16>
    "tpu.trace_start"() <{level = 10 : i32, message = "bqk,bkd->bqd"}> : () -> ()
    %cst_29 = arith.constant dense<0.000000e+00> : vector<24x8x8xf32>
    %105 = tpu.matmul %104, %92, %cst_29 {dimension_numbers = #tpu.dot_dimension_numbers<[2], [1], [1], [2], [0, 0, 0, 1, 1, 2], [0], [0]>} : vector<24x8x8xbf16>, vector<24x8x8xbf16>, vector<24x8x8xf32> -> vector<24x8x8xf32>
    "tpu.trace_stop"() : () -> ()
    %106 = vector.shape_cast %105 : vector<24x8x8xf32> to vector<192x8xf32>
    %107 = arith.truncf %106 : vector<192x8xf32> to vector<192x8xbf16>
    %c24 = arith.constant 24 : index
    %c0_30 = arith.constant 0 : index
    %108 = vector.load %arg4[%c24, %c0_30] : memref<32x32xbf16, #tpu.memory_space<vmem>>, vector<8x32xbf16>
    %cst_31 = arith.constant dense<0.000000e+00> : vector<192x32xf32>
    %109 = tpu.matmul %107, %108, %cst_31 {dimension_numbers = #tpu.dot_dimension_numbers<[1], [0], [0], [1], [0, 0, 1, 1], [], []>} : vector<192x8xbf16>, vector<8x32xbf16>, vector<192x32xf32> -> vector<192x32xf32>
    %110 = arith.addf %86, %109 : vector<192x32xf32>
    %c0_32 = arith.constant 0 : index
    %c0_33 = arith.constant 0 : index
    %111 = vector.load %arg5[%c0_32, %c0_33] : memref<1x32xf32, #tpu.memory_space<vmem>>, vector<1x32xf32>
    %112 = vector.broadcast %111 : vector<1x32xf32> to vector<192x32xf32>
    %113 = arith.addf %110, %112 : vector<192x32xf32>
    %114 = vector.shape_cast %113 : vector<192x32xf32> to vector<24x8x32xf32>
    %cst_34 = arith.constant dense<0.000000e+00> : vector<24x8xf32>
    %115 = vector.multi_reduction <add>, %114, %cst_34 [2] : vector<24x8x32xf32> to vector<24x8xf32>
    %116 = vector.shape_cast %115 : vector<24x8xf32> to vector<24x8x1xf32>
    %cst_35 = arith.constant dense<0xFF800000> : vector<24x1xf32>
    %117 = vector.multi_reduction <maximumf>, %116, %cst_35 [1] : vector<24x8x1xf32> to vector<24x1xf32>
    %118 = vector.shape_cast %117 : vector<24x1xf32> to vector<24x1x1xf32>
    %119 = vector.broadcast %118 : vector<24x1x1xf32> to vector<24x8x1xf32>
    %120 = arith.subf %116, %119 : vector<24x8x1xf32>
    %121 = math.exp %120 : vector<24x8x1xf32>
    %cst_36 = arith.constant dense<0.000000e+00> : vector<24x1xf32>
    %122 = vector.multi_reduction <add>, %121, %cst_36 [1] : vector<24x8x1xf32> to vector<24x1xf32>
    %123 = vector.shape_cast %122 : vector<24x1xf32> to vector<24x1x1xf32>
    %124 = vector.broadcast %123 : vector<24x1x1xf32> to vector<24x8x1xf32>
    %125 = arith.divf %121, %124 : vector<24x8x1xf32>
    %126 = vector.broadcast %125 : vector<24x8x1xf32> to vector<24x8x32xf32>
    %127 = arith.mulf %114, %126 : vector<24x8x32xf32>
    %cst_37 = arith.constant dense<0.000000e+00> : vector<24x32xf32>
    %128 = vector.multi_reduction <add>, %127, %cst_37 [1] : vector<24x8x32xf32> to vector<24x32xf32>
    %cst_38 = arith.constant 0.000000e+00 : f32
    %129 = vector.broadcast %cst_38 : f32 to vector<24x96xf32>
    %130 = tpu.concatenate %128, %129 in 1 : vector<24x32xf32>, vector<24x96xf32> -> vector<24x128xf32>
    %c0_39 = arith.constant 0 : index
    %c0_40 = arith.constant 0 : index
    %131 = vector.load %arg6[%c0_39, %c0_40] : memref<24x128xf32, #tpu.memory_space<vmem>>, vector<24x128xf32>
    tpu.vector_store %arg6[%c0_39, %c0_40], %130 {strides = array<i32>} : memref<24x128xf32, #tpu.memory_space<vmem>>, vector<24x128xf32>,
    return
  }
  func.func @transform_0(%arg0: i32) -> (i32, i32, i32) {
    %c0_i32 = arith.constant 0 : i32
    %c0_i32_0 = arith.constant 0 : i32
    %c0_i32_1 = arith.constant 0 : i32
    return %arg0, %c0_i32, %c0_i32_0 : i32, i32, i32
  }
  func.func @transform_1(%arg0: i32) -> (i32, i32) {
    %c0_i32 = arith.constant 0 : i32
    %c0_i32_0 = arith.constant 0 : i32
    %c0_i32_1 = arith.constant 0 : i32
    return %c0_i32, %c0_i32_0 : i32, i32
  }
  func.func @transform_2(%arg0: i32) -> (i32, i32) {
    %c0_i32 = arith.constant 0 : i32
    %c0_i32_0 = arith.constant 0 : i32
    %c0_i32_1 = arith.constant 0 : i32
    return %c0_i32, %c0_i32_0 : i32, i32
  }
  func.func @transform_3(%arg0: i32) -> (i32, i32) {
    %c0_i32 = arith.constant 0 : i32
    %c0_i32_0 = arith.constant 0 : i32
    %c0_i32_1 = arith.constant 0 : i32
    return %c0_i32, %c0_i32_0 : i32, i32
  }
  func.func @transform_4(%arg0: i32) -> (i32, i32) {
    %c0_i32 = arith.constant 0 : i32
    %c0_i32_0 = arith.constant 0 : i32
    %c0_i32_1 = arith.constant 0 : i32
    return %c0_i32, %c0_i32_0 : i32, i32
  }
  func.func @transform_5(%arg0: i32) -> (i32, i32) {
    %c0_i32 = arith.constant 0 : i32
    %c0_i32_0 = arith.constant 0 : i32
    return %arg0, %c0_i32 : i32, i32
  }
}

</mosaic_0001>

<bundles_post_ra>
// kernel: tpu_custom_call.1
= control target key start
LH: loop header
LB: loop body
LE: loop exit
PB: predicated region body
PF: predicated region fallthrough
CT: control target
= control target key end

     0   :  { %10 = vsyncpa [#allocation3], 0  ;;  %s19122_s0 = inlined_call_operand.hbm [shape: bf16[24,8,32], index: 0, kind: input, shape index: {}]   ;;  %s19123_s1 = inlined_call_operand.hbm [shape: bf16[32,96], index: 1, kind: input, shape index: {}]   ;;  %s19124_s2 = inlined_call_operand.vmem [shape: f32[1,64], index: 2, kind: input, shape index: {}]   ;;  %s19125_s3 = inlined_call_operand.hbm [shape: bf16[32,32], index: 3, kind: input, shape index: {}]   ;;  %s19126_s4 = inlined_call_operand.vmem [shape: f32[1,32], index: 4, kind: input, shape index: {}]   ;;  %s19127_s5 = inlined_call_operand.hbm [shape: f32[24,128], index: 5, kind: output, shape index: {}]  }
   0x1   :  { %11 = vsyncpa [#allocation6], 0 }
   0x2   :  { %12 = vsyncpa [#allocation4], 0  ;;  %s15214_s18 = smov [#allocation5]   ;;  %s15215_s20 = smov [#allocation2]  }
   0x3   :  { %s30_s19 = sshll.u32 %s15214_s18, 4  ;;  %s18_s21 = sshll.u32 %s15215_s20, 4  ;;  %s31_s19 = int_to_ptr.vmem [resolvable:$true] %s30_s19  ;;  %s15264_s21 = int_to_ptr.vmem [resolvable:$true] %s18_s21 }
   0x4   :  { %s15120_s24 = scalar_lea.hbm %s19123_s1, 256 }
   0x5   :  { %p15121_p0 = scmp.ne.s32.totalorder %s19123_s1, %s15120_s24  ;;  %p15124_p1 = scmp.lt.u32.totalorder %s15120_s24, %s19123_s1 }
   0x7   :  { %p15126_p2 = pnand %p15124_p1, %p15121_p0 }
   0x9   :  { %15129 = shalt.err (!%p15126_p2)
}
   0xa   :  { %s15130_s29 = scalar_lea.vmem %s31_s19, 256  ;;  %p15135_p4 = scmp.lt.s32.totalorder %s31_s19, %s31_s19 }
   0xb   :  { %p15131_p3 = scmp.ne.s32.totalorder %s31_s19, %s15130_s29  ;;  %p15136_p5 = scmp.lt.s32.totalorder %s15130_s29, %s15130_s29 }
   0xd   :  { %p15137_p6 = por %p15136_p5, %p15135_p4 }
   0xf   :  { %p15138_p7 = pnand %p15137_p6, %p15131_p3 }
  0x11   :  { %15141 = shalt.err (!%p15138_p7)
}
  0x12   :  { %s15216_s30 = smov 64   ;;  %s15217_s6 = smov 4  }
  0x13   :  { %36 = dma.hbm_to_vmem [thread:$0]  %s19123_s1, 256, %s31_s19, [#allocation6], %s15216_s30, %s15216_s30, %s15217_s6  }
  0x14   :  { %s15142_s11 = scalar_lea.hbm %s19122_s0, 1536 }
  0x15   :  { %p15143_p8 = scmp.ne.s32.totalorder %s19122_s0, %s15142_s11  ;;  %p15146_p9 = scmp.lt.u32.totalorder %s15142_s11, %s19122_s0 }
  0x17   :  { %p15148_p10 = pnand %p15146_p9, %p15143_p8 }
  0x19   :  { %15151 = shalt.err (!%p15148_p10)
}
  0x1a   :  { %s15152_s16 = scalar_lea.vmem %s15264_s21, 1536  ;;  %p15157_p12 = scmp.lt.s32.totalorder %s15264_s21, %s15264_s21 }
  0x1b   :  { %p15153_p11 = scmp.ne.s32.totalorder %s15264_s21, %s15152_s16  ;;  %p15158_p13 = scmp.lt.s32.totalorder %s15152_s16, %s15152_s16 }
  0x1d   :  { %p15159_p0 = por %p15158_p13, %p15157_p12 }
  0x1f   :  { %p15160_p1 = pnand %p15159_p0, %p15153_p11 }
  0x21   :  { %15163 = shalt.err (!%p15160_p1)
}
  0x22   :  { %24 = dma.hbm_to_vmem [thread:$0]  %s19122_s0, 1536, %s15264_s21, [#allocation3], %s15216_s30, %s15216_s30, %s15217_s6  }
  0x23   :  { %s15218_s18 = smov [#allocation7]   ;;  %s15164_s23 = scalar_lea.hbm %s19125_s3, 256 }
  0x24   :  { %s44_s19 = sshll.u32 %s15218_s18, 4  ;;  %p15165_p2 = scmp.ne.s32.totalorder %s19125_s3, %s15164_s23  ;;  %s45_s19 = int_to_ptr.vmem [resolvable:$true] %s44_s19 }
  0x25   :  { %p15168_p3 = scmp.lt.u32.totalorder %s15164_s23, %s19125_s3 }
  0x27   :  { %p15170_p4 = pnand %p15168_p3, %p15165_p2 }
  0x29   :  { %15173 = shalt.err (!%p15170_p4)
}
  0x2a   :  { %s15174_s28 = scalar_lea.vmem %s45_s19, 256  ;;  %p15179_p6 = scmp.lt.s32.totalorder %s45_s19, %s45_s19 }
  0x2b   :  { %p15175_p5 = scmp.ne.s32.totalorder %s45_s19, %s15174_s28  ;;  %p15180_p7 = scmp.lt.s32.totalorder %s15174_s28, %s15174_s28 }
  0x2d   :  { %p15181_p8 = por %p15180_p7, %p15179_p6 }
  0x2f   :  { %p15182_p9 = pnand %p15181_p8, %p15175_p5 }
  0x31   :  { %15185 = shalt.err (!%p15182_p9)
}
  0x32   :  { %50 = dma.hbm_to_vmem [thread:$0]  %s19125_s3, 256, %s45_s19, [#allocation6], %s15216_s30, %s15216_s30, %s15217_s6  }
  0x33   :  { %15208 = dma.done.wait [#allocation3], 1536  }
  0x34   :  { %15209 = vsyncadd [#allocation3], 4294965760 }
  0x35   :  { %15210 = dma.done.wait [#allocation6], 512  }
  0x36   :  { %15211 = vsyncadd [#allocation6], 4294966784  ;;  %v14626_v0 = vld [vmem:[#allocation5] sm:$0xff]   ;;  %v14627_v1 = vld [vmem:[#allocation5 + $0x8] sm:$0xff]   ;;  %vm163_vm0 = vcmask 261120   ;;  %v19128_v14 = vmov 0.0  }
  0x37   :  { %13242 = vmatprep.subr.bf16.mxu0 %v14626_v0  ;;  %v14628_v2 = vld [vmem:[#allocation2] sm:$0xff]   ;;  %14526 = vmatprep.subr.bf16.mxu1 %v14626_v0  ;;  %v14629_v3 = vld [vmem:[#allocation2 + $0x8] sm:$0xff]   ;;  %v14630_v4 = vld [vmem:[#allocation2 + $0x10] sm:$0xff]   ;;  %vm15220_vm1 = vmmov 0   ;;  %vm411_vm2 = vcmask 64512   ;;  %vm1879_vm3 = vcmask 1043456  }
  0x38   :  { %13243 = vmatpush3.bf16.msra.mxu0 %v14626_v0  ;;  %14528 = vmatpush3.bf16.msra.mxu1 %v14626_v0  ;;  %v14634_v5 = vld [vmem:[#allocation2 + $0x30] sm:$0xff]   ;;  %v14635_v6 = vld [vmem:[#allocation2 + $0x38] sm:$0xff]   ;;  %v14636_v7 = vld [vmem:[#allocation2 + $0x40] sm:$0xff]   ;;  %s15222_s6 = smov 88   ;;  %s15224_s7 = smov 56   ;;  %vm12469_vm4 = vcmask 1041409  }
  0x39   :  { %13244 = vmatprep.subr.bf16.mxu0 %v14627_v1  ;;  %13246 = vmatprep.mubr.msk.bf16.mxu0 %vm163_vm0, %v14628_v2  ;;  %v14631_v8 = vld [vmem:[#allocation2 + $0x18] sm:$0xff]   ;;  %v14632_v9 = vld [vmem:[#allocation2 + $0x20] sm:$0xff]   ;;  %v14637_v10 = vld [vmem:[#allocation2 + $0x48] sm:$0xff]   ;;  %s15225_s8 = smov 112   ;;  %s15226_s9 = smov 80   ;;  %vm12471_vm5 = vcmask 1042434  }
  0x3a   :  { %14527 = vmatprep.subr.bf16.mxu1 %v14627_v1  ;;  %13258 = vmatprep.mubr.msk.bf16.mxu1 %vm163_vm0, %v14634_v5  ;;  %v14638_v11 = vld [vmem:[#allocation2 + $0x50] sm:$0xff]   ;;  %v14633_v12 = vld [vmem:[#allocation2 + $0x28] sm:$0xff]   ;;  %v14639_v13 = vld [vmem:[#allocation2 + $0x58] sm:$0xff]   ;;  %s15227_s10 = smov 48   ;;  %s15228_s11 = smov 72   ;;  %vm12473_vm6 = vcmask 1043459  }
  0x3b   :  { %v15333_v15 = vld [vmem:[%s19124_s2] ss:$0 sm:$0xff]  ;;  %s15221_s2 = smov 96   ;;  %s15229_s12 = smov 104   ;;  %vm12475_vm7 = vcmask 1044484   ;;  %vm12477_vm8 = vcmask 1045509  }
  0x3c   :  { %13245 = vmatpush3.bf16.msra.mxu0 %v14627_v1  ;;  %14529 = vmatpush3.bf16.msra.mxu1 %v14627_v1  ;;  %s15230_s13 = smov 40   ;;  %vm12479_vm9 = vcmask 1046534   ;;  %vm12481_vm10 = vcmask 1047559  }
  0x3d   :  { %13270 = vmatprep.subr.bf16.mxu1 %v19128_v14  ;;  %13306 = vmatprep.subr.bf16.mxu0 %v19128_v14 }
  0x3f   :  { %13247 = vmatmul.mubr.msk.bf16.vlgmr.msra.gmra.mrb[0].mxu0 %vm163_vm0, %v14629_v3  ;;  %13259 = vmatmul.mubr.msk.bf16.vlgmr.msra.gmra.mrb[0].mxu1 %vm163_vm0, %v14635_v6 }
  0x40   :  { %13250 = vmatprep.mubr.msk.bf16.mxu0 %vm163_vm0, %v14630_v4  ;;  %13262 = vmatprep.mubr.msk.bf16.mxu1 %vm163_vm0, %v14636_v7 }
  0x47   :  { %13251 = vmatmul.mubr.msk.bf16.gmra.mrb[4].mxu0 %vm163_vm0, %v14631_v8  ;;  %13263 = vmatmul.mubr.msk.bf16.gmra.mrb[4].mxu1 %vm163_vm0, %v14637_v10 }
  0x48   :  { %13254 = vmatprep.mubr.msk.bf16.mxu0 %vm163_vm0, %v14632_v9  ;;  %13266 = vmatprep.mubr.msk.bf16.mxu1 %vm163_vm0, %v14638_v11 }
  0x4f   :  { %13255 = vmatmul.mubr.msk.bf16.gmra.mrb[8].mxu0 %vm163_vm0, %v14633_v12  ;;  %13267 = vmatmul.mubr.msk.bf16.gmra.mrb[8].mxu1 %vm163_vm0, %v14639_v13 }
  0x50   :  { %13272 = vmatprep.mubr.msk.bf16.mxu1 %vm15220_vm1, %v19128_v14  ;;  %13308 = vmatprep.mubr.msk.bf16.mxu0 %vm15220_vm1, %v19128_v14 }
 0x112   :  { %v15339_v16 = vpop.f32.mrb[0].mxu0  ;;  %v15345_v19 = vpop.f32.mrb[0].mxu1 }
 0x113   :  { %v338_v17 = vadd.f32 %v15339_v16, %v15333_v15  ;;  %v15343_v18 = vpop.f32.mrb[1].mxu0  ;;  %v15351_v22 = vpop.f32.mrb[1].mxu1  ;;  %v350_v2 = vadd.f32 %v15345_v19, %v15333_v15 }
 0x114   :  { %v336_v20 = vadd.f32 %v15333_v15, %v15343_v18  ;;  %v15349_v21 = vpop.f32.mrb[2].mxu0  ;;  %v15359_v26 = vpop.f32.mrb[2].mxu1  ;;  %v348_v63 = vadd.f32 %v15333_v15, %v15351_v22 }
 0x115   :  { %v15353_v23 = vpack.c.bf16 %v338_v17, %v338_v17  ;;  %v339_v24 = vadd.f32 %v15349_v21, %v15333_v15  ;;  %v15357_v25 = vpop.f32.mrb[3].mxu0  ;;  %v15365_v29 = vpop.f32.mrb[3].mxu1  ;;  %v351_v4 = vadd.f32 %v15359_v26, %v15333_v15  ;;  %v15471_v6 = vpack.c.bf16 %v350_v2, %v350_v2 }
 0x116   :  { %v15361_v27 = vpack.c.bf16 %v336_v20, %v336_v20  ;;  %v337_v28 = vadd.f32 %v15333_v15, %v15357_v25  ;;  %v349_v1 = vadd.f32 %v15333_v15, %v15365_v29  ;;  %v15461_v3 = vpack.c.bf16 %v348_v63, %v348_v63 }
 0x117   :  { %508 = vrot.lane.b32.xlu1 %v15353_v23, %s15221_s2  ;;  %v15371_v30 = vpack.c.bf16 %v339_v24, %v339_v24  ;;  %19273 = vst [vmem:[#allocation21_spill] sm:$0xff] %v15471_v6  ;;  %v15477_v8 = vpack.c.bf16 %v351_v4, %v351_v4 }
 0x118   :  { %409 = vrot.lane.b32.xlu0 %v15361_v27, %s15221_s2  ;;  %v15373_v31 = vpack.c.bf16 %v337_v28, %v337_v28  ;;  %19271 = vst [vmem:[#allocation19_spill] sm:$0xff] %v15461_v3  ;;  %v15467_v5 = vpack.c.bf16 %v349_v1, %v349_v1 }
 0x119   :  { %19274 = vst [vmem:[#allocation22_spill] sm:$0xff] %v15477_v8 }
 0x11a   :  { %v15375_v32 = vpop.f32.mrb[4].mxu0  ;;  %v15381_v34 = vpop.f32.mrb[4].mxu1  ;;  %19272 = vst [vmem:[#allocation20_spill] sm:$0xff] %v15467_v5 }
 0x11b   :  { %557 = vrot.lane.b32.xlu1 %v15371_v30, %s15221_s2  ;;  %v15379_v33 = vpop.f32.mrb[5].mxu0  ;;  %v342_v35 = vadd.f32 %v15375_v32, %v15333_v15  ;;  %v15391_v38 = vpop.f32.mrb[5].mxu1  ;;  %v354_v10 = vadd.f32 %v15381_v34, %v15333_v15 }
 0x11c   :  { %v340_v36 = vadd.f32 %v15333_v15, %v15379_v33  ;;  %459 = vrot.lane.b32.xlu0 %v15373_v31, %s15221_s2  ;;  %v15389_v37 = vpop.f32.mrb[6].mxu0  ;;  %v15395_v40 = vpop.f32.mrb[6].mxu1  ;;  %v352_v7 = vadd.f32 %v15333_v15, %v15391_v38 }
 0x11d   :  { %v15393_v39 = vpop.f32.mrb[7].mxu0  ;;  %v343_v42 = vadd.f32 %v15389_v37, %v15333_v15  ;;  %v15403_v44 = vpop.f32.mrb[7].mxu1  ;;  %v15405_v45 = vpack.c.bf16 %v342_v35, %v342_v35  ;;  %v355_v12 = vadd.f32 %v15395_v40, %v15333_v15  ;;  %v15495_v17 = vpack.c.bf16 %v354_v10, %v354_v10 }
 0x11e   :  { %v15397_v41 = vpack.c.bf16 %v340_v36, %v340_v36  ;;  %v341_v43 = vadd.f32 %v15333_v15, %v15393_v39  ;;  %v353_v9 = vadd.f32 %v15333_v15, %v15403_v44  ;;  %v15485_v11 = vpack.c.bf16 %v352_v7, %v352_v7 }
 0x11f   :  { %19265 = vst [vmem:[#allocation13_spill] sm:$0xff] %v15405_v45  ;;  %v15411_v47 = vpack.c.bf16 %v343_v42, %v343_v42  ;;  %19277 = vst [vmem:[#allocation25_spill] sm:$0xff] %v15495_v17  ;;  %v15501_v24 = vpack.c.bf16 %v355_v12, %v355_v12  ;;  %v15625_v63 = vpack.c.bf16 %v15403_v44, %v15403_v44 }
 0x120   :  { %19264 = vst [vmem:[#allocation12_spill] sm:$0xff] %v15397_v41  ;;  %v15407_v46 = vpack.c.bf16 %v341_v43, %v341_v43  ;;  %606 = vrot.lane.b32.xlu0 %v15397_v41, %s15221_s2  ;;  %19275 = vst [vmem:[#allocation23_spill] sm:$0xff] %v15485_v11  ;;  %v15491_v13 = vpack.c.bf16 %v353_v9, %v353_v9 }
 0x121   :  { %19266 = vst [vmem:[#allocation14_spill] sm:$0xff] %v15411_v47  ;;  %19278 = vst [vmem:[#allocation26_spill] sm:$0xff] %v15501_v24 }
 0x122   :  { %655 = vrot.lane.b32.xlu1 %v15407_v46, %s15221_s2  ;;  %v15415_v48 = vpop.f32.mrb[8].mxu0  ;;  %v15419_v50 = vpop.f32.mrb[8].mxu1  ;;  %19276 = vst [vmem:[#allocation24_spill] sm:$0xff] %v15491_v13  ;;  %19299 = vst [vmem:[#allocation47_spill] sm:$0xff] %v15625_v63 }
 0x123   :  { %v15417_v49 = vpop.f32.mrb[9].mxu0  ;;  %v346_v51 = vadd.f32 %v15415_v48, %v15333_v15  ;;  %v15429_v54 = vpop.f32.mrb[9].mxu1  ;;  %v358_v35 = vadd.f32 %v15419_v50, %v15333_v15 }
 0x124   :  { %v344_v52 = vadd.f32 %v15333_v15, %v15417_v49  ;;  %704 = vrot.lane.b32.xlu0 %v15405_v45, %s15221_s2  ;;  %v15427_v53 = vpop.f32.mrb[10].mxu0  ;;  %v15433_v56 = vpop.f32.mrb[10].mxu1  ;;  %v356_v20 = vadd.f32 %v15333_v15, %v15429_v54 }
 0x125   :  { %v15431_v55 = vpop.f32.mrb[11].mxu0  ;;  %v347_v58 = vadd.f32 %v15427_v53, %v15333_v15  ;;  %v15443_v60 = vpop.f32.mrb[11].mxu1  ;;  %v15445_v61 = vpack.c.bf16 %v346_v51, %v346_v51  ;;  %v359_v42 = vadd.f32 %v15433_v56, %v15333_v15  ;;  %v15519_v51 = vpack.c.bf16 %v358_v35, %v358_v35 }
 0x126   :  { %v15435_v57 = vpack.c.bf16 %v344_v52, %v344_v52  ;;  %v345_v59 = vadd.f32 %v15333_v15, %v15431_v55  ;;  %753 = vrot.lane.b32.xlu1 %v15411_v47, %s15221_s2  ;;  %v357_v28 = vadd.f32 %v15333_v15, %v15443_v60  ;;  %v15509_v36 = vpack.c.bf16 %v356_v20, %v356_v20 }
 0x127   :  { %19268 = vst [vmem:[#allocation16_spill] sm:$0xff] %v15445_v61  ;;  %v15453_v0 = vpack.c.bf16 %v347_v58, %v347_v58  ;;  %19281 = vst [vmem:[#allocation29_spill] sm:$0xff] %v15519_v51  ;;  %v15523_v52 = vpack.c.bf16 %v359_v42, %v359_v42  ;;  %v15531_v15 = vpack.c.bf16 %v15357_v25, %v15357_v25 }
 0x128   :  { %19267 = vst [vmem:[#allocation15_spill] sm:$0xff] %v15435_v57  ;;  %v15447_v62 = vpack.c.bf16 %v345_v59, %v345_v59  ;;  %802 = vrot.lane.b32.xlu0 %v15435_v57, %s15221_s2  ;;  %19279 = vst [vmem:[#allocation27_spill] sm:$0xff] %v15509_v36  ;;  %v15515_v43 = vpack.c.bf16 %v357_v28, %v357_v28  ;;  %v15537_v58 = vpack.c.bf16 %v15343_v18, %v15343_v18 }
 0x129   :  { %19270 = vst [vmem:[#allocation18_spill] sm:$0xff] %v15453_v0  ;;  %19282 = vst [vmem:[#allocation30_spill] sm:$0xff] %v15523_v52  ;;  %v15543_v59 = vpack.c.bf16 %v15349_v21, %v15349_v21  ;;  %v15549_v25 = vpack.c.bf16 %v15339_v16, %v15339_v16  ;;  %v15555_v18 = vpack.c.bf16 %v15393_v39, %v15393_v39 }
 0x12a   :  { %19269 = vst [vmem:[#allocation17_spill] sm:$0xff] %v15447_v62  ;;  %851 = vrot.lane.b32.xlu1 %v15447_v62, %s15221_s2  ;;  %19280 = vst [vmem:[#allocation28_spill] sm:$0xff] %v15515_v43  ;;  %v15561_v21 = vpack.c.bf16 %v15379_v33, %v15379_v33  ;;  %v15567_v16 = vpack.c.bf16 %v15389_v37, %v15389_v37  ;;  %v15573_v39 = vpack.c.bf16 %v15375_v32, %v15375_v32 }
 0x12b   :  { %19283 = vst [vmem:[#allocation31_spill] sm:$0xff] %v15531_v15  ;;  %19284 = vst [vmem:[#allocation32_spill] sm:$0xff] %v15537_v58  ;;  %v15579_v33 = vpack.c.bf16 %v15431_v55, %v15431_v55  ;;  %v15585_v37 = vpack.c.bf16 %v15417_v49, %v15417_v49  ;;  %v15591_v32 = vpack.c.bf16 %v15427_v53, %v15427_v53 }
 0x12c   :  { %900 = vrot.lane.b32.xlu0 %v15445_v61, %s15221_s2  ;;  %19285 = vst [vmem:[#allocation33_spill] sm:$0xff] %v15543_v59  ;;  %19286 = vst [vmem:[#allocation34_spill] sm:$0xff] %v15549_v25  ;;  %v15597_v55 = vpack.c.bf16 %v15415_v48, %v15415_v48  ;;  %v15603_v49 = vpack.c.bf16 %v15365_v29, %v15365_v29  ;;  %v15609_v53 = vpack.c.bf16 %v15351_v22, %v15351_v22 }
 0x12d   :  { %19287 = vst [vmem:[#allocation35_spill] sm:$0xff] %v15555_v18  ;;  %19288 = vst [vmem:[#allocation36_spill] sm:$0xff] %v15561_v21  ;;  %v15615_v48 = vpack.c.bf16 %v15359_v26, %v15359_v26  ;;  %v15621_v29 = vpack.c.bf16 %v15345_v19, %v15345_v19  ;;  %v15631_v22 = vpack.c.bf16 %v15391_v38, %v15391_v38 }
 0x12e   :  { %949 = vrot.lane.b32.xlu1 %v15453_v0, %s15221_s2  ;;  %19289 = vst [vmem:[#allocation37_spill] sm:$0xff] %v15567_v16  ;;  %19290 = vst [vmem:[#allocation38_spill] sm:$0xff] %v15573_v39  ;;  %v15641_v19 = vpack.c.bf16 %v15381_v34, %v15381_v34 }
 0x12f   :  { %19291 = vst [vmem:[#allocation39_spill] sm:$0xff] %v15579_v33  ;;  %19292 = vst [vmem:[#allocation40_spill] sm:$0xff] %v15585_v37 }
 0x130   :  { %998 = vrot.lane.b32.xlu0 %v15461_v3, %s15221_s2  ;;  %19293 = vst [vmem:[#allocation41_spill] sm:$0xff] %v15591_v32  ;;  %19294 = vst [vmem:[#allocation42_spill] sm:$0xff] %v15597_v55 }
 0x131   :  { %19295 = vst [vmem:[#allocation43_spill] sm:$0xff] %v15603_v49  ;;  %19296 = vst [vmem:[#allocation44_spill] sm:$0xff] %v15609_v53 }
 0x132   :  { %1047 = vrot.lane.b32.xlu1 %v15467_v5, %s15221_s2  ;;  %19297 = vst [vmem:[#allocation45_spill] sm:$0xff] %v15615_v48  ;;  %19298 = vst [vmem:[#allocation46_spill] sm:$0xff] %v15621_v29 }
 0x133   :  { %19300 = vst [vmem:[#allocation48_spill] sm:$0xff] %v15631_v22  ;;  %19301 = vst [vmem:[#allocation49_spill] sm:$0xff] %v15641_v19 }
 0x134   :  { %1096 = vrot.lane.b32.xlu0 %v15471_v6, %s15221_s2 }
 0x136   :  { %1145 = vrot.lane.b32.xlu1 %v15477_v8, %s15221_s2 }
 0x138   :  { %1194 = vrot.lane.b32.xlu0 %v15485_v11, %s15221_s2 }
 0x13a   :  { %1243 = vrot.lane.b32.xlu1 %v15491_v13, %s15221_s2 }
 0x13c   :  { %1292 = vrot.lane.b32.xlu0 %v15495_v17, %s15221_s2 }
 0x13e   :  { %1341 = vrot.lane.b32.xlu1 %v15501_v24, %s15221_s2 }
 0x140   :  { %1390 = vrot.lane.b32.xlu0 %v15509_v36, %s15221_s2 }
 0x142   :  { %1439 = vrot.lane.b32.xlu1 %v15515_v43, %s15221_s2 }
 0x144   :  { %1488 = vrot.lane.b32.xlu0 %v15519_v51, %s15221_s2 }
 0x146   :  { %1537 = vrot.lane.b32.xlu1 %v15523_v52, %s15221_s2 }
 0x148   :  { %1924 = vrot.lane.b32.xlu0 %v15531_v15, %s15216_s30 }
 0x14a   :  { %1874 = vrot.lane.b32.xlu1 %v15537_v58, %s15216_s30 }
 0x14c   :  { %2022 = vrot.lane.b32.xlu0 %v15543_v59, %s15216_s30 }
 0x14e   :  { %1973 = vrot.lane.b32.xlu1 %v15549_v25, %s15216_s30 }
 0x150   :  { %2120 = vrot.lane.b32.xlu0 %v15555_v18, %s15216_s30 }
 0x152   :  { %2071 = vrot.lane.b32.xlu1 %v15561_v21, %s15216_s30 }
 0x154   :  { %2218 = vrot.lane.b32.xlu0 %v15567_v16, %s15216_s30 }
 0x156   :  { %2169 = vrot.lane.b32.xlu1 %v15573_v39, %s15216_s30 }
 0x158   :  { %2316 = vrot.lane.b32.xlu0 %v15579_v33, %s15216_s30 }
 0x15a   :  { %2267 = vrot.lane.b32.xlu1 %v15585_v37, %s15216_s30 }
 0x15c   :  { %2414 = vrot.lane.b32.xlu0 %v15591_v32, %s15216_s30 }
 0x15e   :  { %2365 = vrot.lane.b32.xlu1 %v15597_v55, %s15216_s30 }
 0x160   :  { %2512 = vrot.lane.b32.xlu0 %v15603_v49, %s15216_s30 }
 0x162   :  { %2463 = vrot.lane.b32.xlu1 %v15609_v53, %s15216_s30 }
 0x164   :  { %2610 = vrot.lane.b32.xlu0 %v15615_v48, %s15216_s30 }
 0x166   :  { %2561 = vrot.lane.b32.xlu1 %v15621_v29, %s15216_s30 }
 0x168   :  { %2708 = vrot.lane.b32.xlu0 %v15625_v63, %s15216_s30 }
 0x16a   :  { %2659 = vrot.lane.b32.xlu1 %v15631_v22, %s15216_s30 }
 0x16e   :  { %2757 = vrot.lane.b32.xlu1 %v15641_v19, %s15216_s30 }
 0x189   :  { %v509_v34 = vpop.permute.xlu1 %508 }
 0x18a   :  { %v410_v26 = vpop.permute.xlu0 %409  ;;  %v514_v9 = vsel %vm411_vm2, %v509_v34, 0 }
 0x18b   :  { %v416_v38 = vsel %vm411_vm2, %v410_v26, 0 }
 0x18c   :  { %13271 = vmatpush3.bf16.xpose.msra.mxu1 %v416_v38 }
 0x18d   :  { %13276 = vmatprep.subr.bf16.mxu1 %v19128_v14  ;;  %v558_v10 = vpop.permute.xlu1 %557 }
 0x18e   :  { %v460_v44 = vpop.permute.xlu0 %459  ;;  %v563_v35 = vsel %vm411_vm2, %v558_v10, 0 }
 0x18f   :  { %v465_v2 = vsel %vm411_vm2, %v460_v44, 0 }
 0x192   :  { %v607_v1 = vpop.permute.xlu0 %606 }
 0x193   :  { %13273 = vmatmul.mubr.msk.bf16.vlgmr.msra.gmra.mrb[12].mxu1 %vm411_vm2, %v15361_v27  ;;  %v612_v44 = vsel %vm411_vm2, %v607_v1, 0 }
 0x194   :  { %13277 = vmatpush3.bf16.xpose.msra.mxu1 %v465_v2  ;;  %13278 = vmatprep.mubr.msk.bf16.mxu1 %vm15220_vm1, %v19128_v14  ;;  %v656_v28 = vpop.permute.xlu1 %655 }
 0x195   :  { %13282 = vmatprep.subr.bf16.mxu1 %v19128_v14 }
 0x196   :  { %v705_v4 = vpop.permute.xlu0 %704 }
 0x197   :  { %v710_v7 = vsel %vm411_vm2, %v705_v4, 0 }
 0x198   :  { %13307 = vmatpush3.bf16.xpose.msra.mxu0 %v710_v7  ;;  %v754_v38 = vpop.permute.xlu1 %753  ;;  %v661_v7 = vsel %vm411_vm2, %v656_v28, 0 }
 0x199   :  { %13318 = vmatprep.subr.bf16.mxu0 %v19128_v14 }
 0x19a   :  { %v803_v12 = vpop.permute.xlu0 %802 }
 0x19b   :  { %13279 = vmatmul.mubr.msk.bf16.vlgmr.msra.gmra.mrb[16].mxu1 %vm411_vm2, %v15373_v31  ;;  %v808_v20 = vsel %vm411_vm2, %v803_v12, 0 }
 0x19c   :  { %13283 = vmatpush3.bf16.xpose.msra.mxu1 %v514_v9  ;;  %13284 = vmatprep.mubr.msk.bf16.mxu1 %vm15220_vm1, %v19128_v14  ;;  %v852_v2 = vpop.permute.xlu1 %851 }
 0x19d   :  { %13288 = vmatprep.subr.bf16.mxu1 %v19128_v14 }
 0x19e   :  { %v901_v42 = vpop.permute.xlu0 %900 }
 0x19f   :  { %13309 = vmatmul.mubr.msk.bf16.vlgmr.msra.gmra.mrb[12].mxu0 %vm411_vm2, %v15405_v45  ;;  %v906_v26 = vsel %vm411_vm2, %v901_v42, 0 }
 0x1a0   :  { %13319 = vmatpush3.bf16.xpose.msra.mxu0 %v808_v20  ;;  %13320 = vmatprep.mubr.msk.bf16.mxu0 %vm15220_vm1, %v19128_v14  ;;  %v950_v1 = vpop.permute.xlu1 %949  ;;  %v759_v20 = vsel %vm411_vm2, %v754_v38, 0 }
 0x1a1   :  { %13330 = vmatprep.subr.bf16.mxu0 %v19128_v14 }
 0x1a2   :  { %v999_v34 = vpop.permute.xlu0 %998 }
 0x1a3   :  { %13285 = vmatmul.mubr.msk.bf16.vlgmr.msra.gmra.mrb[20].mxu1 %vm411_vm2, %v15353_v23  ;;  %v1004_v4 = vsel %vm411_vm2, %v999_v34, 0 }
 0x1a4   :  { %13289 = vmatpush3.bf16.xpose.msra.mxu1 %v563_v35  ;;  %13290 = vmatprep.mubr.msk.bf16.mxu1 %vm15220_vm1, %v19128_v14  ;;  %v1048_v12 = vpop.permute.xlu1 %1047 }
 0x1a5   :  { %13294 = vmatprep.subr.bf16.mxu1 %v19128_v14 }
 0x1a6   :  { %v1097_v9 = vpop.permute.xlu0 %1096 }
 0x1a7   :  { %13321 = vmatmul.mubr.msk.bf16.vlgmr.msra.gmra.mrb[16].mxu0 %vm411_vm2, %v15435_v57  ;;  %v1102_v10 = vsel %vm411_vm2, %v1097_v9, 0 }
 0x1a8   :  { %13331 = vmatpush3.bf16.xpose.msra.mxu0 %v906_v26  ;;  %13332 = vmatprep.mubr.msk.bf16.mxu0 %vm15220_vm1, %v19128_v14  ;;  %v1146_v42 = vpop.permute.xlu1 %1145  ;;  %v857_v26 = vsel %vm411_vm2, %v852_v2, 0 }
 0x1a9   :  { %13342 = vmatprep.subr.bf16.mxu0 %v19128_v14 }
 0x1aa   :  { %v1195_v28 = vpop.permute.xlu0 %1194 }
 0x1ab   :  { %13291 = vmatmul.mubr.msk.bf16.vlgmr.msra.gmra.mrb[24].mxu1 %vm411_vm2, %v15371_v30  ;;  %v1200_v35 = vsel %vm411_vm2, %v1195_v28, 0 }
 0x1ac   :  { %13295 = vmatpush3.bf16.xpose.msra.mxu1 %v612_v44  ;;  %13296 = vmatprep.mubr.msk.bf16.mxu1 %vm15220_vm1, %v19128_v14  ;;  %v1244_v38 = vpop.permute.xlu1 %1243 }
 0x1ad   :  { %13300 = vmatprep.subr.bf16.mxu1 %v19128_v14 }
 0x1ae   :  { %v1293_v44 = vpop.permute.xlu0 %1292 }
 0x1af   :  { %13333 = vmatmul.mubr.msk.bf16.vlgmr.msra.gmra.mrb[20].mxu0 %vm411_vm2, %v15445_v61  ;;  %v1298_v34 = vsel %vm411_vm2, %v1293_v44, 0 }
 0x1b0   :  { %13343 = vmatpush3.bf16.xpose.msra.mxu0 %v1004_v4  ;;  %13344 = vmatprep.mubr.msk.bf16.mxu0 %vm15220_vm1, %v19128_v14  ;;  %v1342_v2 = vpop.permute.xlu1 %1341  ;;  %v955_v4 = vsel %vm411_vm2, %v950_v1, 0  ;;  %v1053_v1 = vsel %vm411_vm2, %v1048_v12, 0  ;;  %v1151_v12 = vsel %vm411_vm2, %v1146_v42, 0  ;;  %v1249_v42 = vsel %vm411_vm2, %v1244_v38, 0 }
 0x1b1   :  { %13354 = vmatprep.subr.bf16.mxu0 %v19128_v14 }
 0x1b3   :  { %13297 = vmatmul.mubr.msk.bf16.vlgmr.msra.gmra.mrb[28].mxu1 %vm411_vm2, %v15397_v41 }
 0x1b4   :  { %13301 = vmatpush3.bf16.xpose.msra.mxu1 %v661_v7  ;;  %13302 = vmatprep.mubr.msk.bf16.mxu1 %vm15220_vm1, %v19128_v14  ;;  %v1391_v7 = vpop.permute.xlu0 %1390 }
 0x1b5   :  { %13312 = vmatprep.subr.bf16.mxu1 %v19128_v14  ;;  %v1396_v9 = vsel %vm411_vm2, %v1391_v7, 0 }
 0x1b7   :  { %13345 = vmatmul.mubr.msk.bf16.vlgmr.msra.gmra.mrb[24].mxu0 %vm411_vm2, %v15461_v3 }
 0x1b8   :  { %13355 = vmatpush3.bf16.xpose.msra.mxu0 %v1102_v10  ;;  %13356 = vmatprep.mubr.msk.bf16.mxu0 %vm15220_vm1, %v19128_v14  ;;  %v1440_v10 = vpop.permute.xlu1 %1439 }
 0x1b9   :  { %13366 = vmatprep.subr.bf16.mxu0 %v19128_v14  ;;  %v1445_v38 = vsel %vm411_vm2, %v1440_v10, 0 }
 0x1bb   :  { %13303 = vmatmul.mubr.msk.bf16.vlgmr.msra.gmra.mrb[32].mxu1 %vm411_vm2, %v15407_v46 }
 0x1bc   :  { %13313 = vmatpush3.bf16.xpose.msra.mxu1 %v759_v20  ;;  %13314 = vmatprep.mubr.msk.bf16.mxu1 %vm15220_vm1, %v19128_v14  ;;  %v1489_v20 = vpop.permute.xlu0 %1488 }
 0x1bd   :  { %13324 = vmatprep.subr.bf16.mxu1 %v19128_v14  ;;  %v1494_v28 = vsel %vm411_vm2, %v1489_v20, 0 }
 0x1bf   :  { %13357 = vmatmul.mubr.msk.bf16.vlgmr.msra.gmra.mrb[28].mxu0 %vm411_vm2, %v15471_v6 }
 0x1c0   :  { %13367 = vmatpush3.bf16.xpose.msra.mxu0 %v1200_v35  ;;  %13368 = vmatprep.mubr.msk.bf16.mxu0 %vm15220_vm1, %v19128_v14  ;;  %v1538_v35 = vpop.permute.xlu1 %1537 }
 0x1c1   :  { %13378 = vmatprep.subr.bf16.mxu0 %v19128_v14 }
 0x1c3   :  { %13315 = vmatmul.mubr.msk.bf16.vlgmr.msra.gmra.mrb[36].mxu1 %vm411_vm2, %v15411_v47 }
 0x1c4   :  { %13325 = vmatpush3.bf16.xpose.msra.mxu1 %v857_v26  ;;  %13326 = vmatprep.mubr.msk.bf16.mxu1 %vm15220_vm1, %v19128_v14  ;;  %v1875_v26 = vpop.permute.xlu1 %1874 }
 0x1c5   :  { %13336 = vmatprep.subr.bf16.mxu1 %v19128_v14  ;;  %v1881_v44 = vsel %vm1879_vm3, %v1875_v26, 0 }
 0x1c7   :  { %13369 = vmatmul.mubr.msk.bf16.vlgmr.msra.gmra.mrb[32].mxu0 %vm411_vm2, %v15485_v11 }
 0x1c8   :  { %13379 = vmatpush3.bf16.xpose.msra.mxu0 %v1298_v34  ;;  %13380 = vmatprep.mubr.msk.bf16.mxu0 %vm15220_vm1, %v19128_v14  ;;  %v1347_v34 = vsel %vm411_vm2, %v1342_v2, 0  ;;  %v1543_v2 = vsel %vm411_vm2, %v1538_v35, 0 }
 0x1c9   :  { %13390 = vmatprep.subr.bf16.mxu0 %v19128_v14 }
 0x1cb   :  { %13327 = vmatmul.mubr.msk.bf16.vlgmr.msra.gmra.mrb[40].mxu1 %vm411_vm2, %v15447_v62 }
 0x1cc   :  { %13337 = vmatpush3.bf16.xpose.msra.mxu1 %v955_v4  ;;  %13338 = vmatprep.mubr.msk.bf16.mxu1 %vm15220_vm1, %v19128_v14  ;;  %v1925_v4 = vpop.permute.xlu0 %1924 }
 0x1cd   :  { %13348 = vmatprep.subr.bf16.mxu1 %v19128_v14  ;;  %v1930_v7 = vsel %vm1879_vm3, %v1925_v4, 0 }
 0x1cf   :  { %13381 = vmatmul.mubr.msk.bf16.vlgmr.msra.gmra.mrb[36].mxu0 %vm411_vm2, %v15495_v17 }
 0x1d0   :  { %13391 = vmatpush3.bf16.xpose.msra.mxu0 %v1396_v9  ;;  %13392 = vmatprep.mubr.msk.bf16.mxu0 %vm15220_vm1, %v19128_v14 }
 0x1d1   :  { %13402 = vmatprep.subr.bf16.mxu0 %v19128_v14 }
 0x1d3   :  { %13339 = vmatmul.mubr.msk.bf16.vlgmr.msra.gmra.mrb[44].mxu1 %vm411_vm2, %v15453_v0 }
 0x1d4   :  { %13349 = vmatpush3.bf16.xpose.msra.mxu1 %v1053_v1  ;;  %13350 = vmatprep.mubr.msk.bf16.mxu1 %vm15220_vm1, %v19128_v14 }
 0x1d5   :  { %13360 = vmatprep.subr.bf16.mxu1 %v19128_v14 }
 0x1d7   :  { %13393 = vmatmul.mubr.msk.bf16.vlgmr.msra.gmra.mrb[40].mxu0 %vm411_vm2, %v15509_v36 }
 0x1d8   :  { %13403 = vmatpush3.bf16.xpose.msra.mxu0 %v1494_v28  ;;  %13404 = vmatprep.mubr.msk.bf16.mxu0 %vm15220_vm1, %v19128_v14 }
 0x1d9   :  { %13414 = vmatprep.subr.bf16.mxu0 %v19128_v14 }
 0x1db   :  { %13351 = vmatmul.mubr.msk.bf16.vlgmr.msra.gmra.mrb[48].mxu1 %vm411_vm2, %v15467_v5 }
 0x1dc   :  { %13361 = vmatpush3.bf16.xpose.msra.mxu1 %v1151_v12  ;;  %13362 = vmatprep.mubr.msk.bf16.mxu1 %vm15220_vm1, %v19128_v14 }
 0x1dd   :  { %13372 = vmatprep.subr.bf16.mxu1 %v19128_v14 }
 0x1df   :  { %13405 = vmatmul.mubr.msk.bf16.vlgmr.msra.gmra.mrb[44].mxu0 %vm411_vm2, %v15519_v51 }
 0x1e0   :  { %13415 = vmatpush3.bf16.msra.mxu0 %v1881_v44  ;;  %13416 = vmatprep.mubr.msk.bf16.mxu0 %vm15220_vm1, %v19128_v14 }
 0x1e1   :  { %13426 = vmatprep.subr.bf16.mxu0 %v19128_v14 }
 0x1e3   :  { %13363 = vmatmul.mubr.msk.bf16.vlgmr.msra.gmra.mrb[52].mxu1 %vm411_vm2, %v15477_v8 }
 0x1e4   :  { %13373 = vmatpush3.bf16.xpose.msra.mxu1 %v1249_v42  ;;  %13374 = vmatprep.mubr.msk.bf16.mxu1 %vm15220_vm1, %v19128_v14 }
 0x1e5   :  { %13384 = vmatprep.subr.bf16.mxu1 %v19128_v14 }
 0x1eb   :  { %13375 = vmatmul.mubr.msk.bf16.vlgmr.msra.gmra.mrb[56].mxu1 %vm411_vm2, %v15491_v13 }
 0x1ec   :  { %13385 = vmatpush3.bf16.xpose.msra.mxu1 %v1347_v34  ;;  %13386 = vmatprep.mubr.msk.bf16.mxu1 %vm15220_vm1, %v19128_v14 }
 0x1ed   :  { %13396 = vmatprep.subr.bf16.mxu1 %v19128_v14 }
 0x1f3   :  { %13387 = vmatmul.mubr.msk.bf16.vlgmr.msra.gmra.mrb[60].mxu1 %vm411_vm2, %v15501_v24 }
 0x1f4   :  { %13397 = vmatpush3.bf16.xpose.msra.mxu1 %v1445_v38  ;;  %13398 = vmatprep.mubr.msk.bf16.mxu1 %vm15220_vm1, %v19128_v14 }
 0x1f5   :  { %13408 = vmatprep.subr.bf16.mxu1 %v19128_v14 }
 0x1fb   :  { %13399 = vmatmul.mubr.msk.bf16.vlgmr.msra.gmra.mrb[64].mxu1 %vm411_vm2, %v15515_v43 }
 0x1fc   :  { %13409 = vmatpush3.bf16.xpose.msra.mxu1 %v1543_v2  ;;  %13410 = vmatprep.mubr.msk.bf16.mxu1 %vm15220_vm1, %v19128_v14 }
 0x1fd   :  { %13420 = vmatprep.subr.bf16.mxu1 %v19128_v14 }
 0x203   :  { %13411 = vmatmul.mubr.msk.bf16.vlgmr.msra.gmra.mrb[68].mxu1 %vm411_vm2, %v15523_v52 }
 0x204   :  { %13421 = vmatpush3.bf16.msra.mxu1 %v1930_v7  ;;  %13422 = vmatprep.mubr.msk.bf16.mxu1 %vm15220_vm1, %v19128_v14 }
 0x205   :  { %13432 = vmatprep.subr.bf16.mxu1 %v19128_v14 }
 0x266   :  { %v15793_v9 = vpop.f32.mrb[12].mxu1 }
 0x267   :  { %v13274_v10 = vpop.f32.mrb[13].mxu1  ;;  %v1585_v1 = vsel %vm411_vm2, %v15793_v9, -inf }
 0x268   :  { %v455_v20 = vpop.f32.mrb[14].mxu1  ;;  %1586 = vmax.xlane.f32.xlu0 %v1585_v1 }
 0x269   :  { %v13275_v28 = vpop.f32.mrb[15].mxu1 }
 0x26e   :  { %v15797_v35 = vpop.f32.mrb[16].mxu1 }
 0x26f   :  { %v13280_v12 = vpop.f32.mrb[17].mxu1  ;;  %v1588_v20 = vsel %vm411_vm2, %v15797_v35, -inf }
 0x270   :  { %v504_v26 = vpop.f32.mrb[18].mxu1 }
 0x271   :  { %v13281_v44 = vpop.f32.mrb[19].mxu1 }
 0x272   :  { %v15799_v42 = vpop.f32.mrb[12].mxu0 }
 0x273   :  { %v13310_v34 = vpop.f32.mrb[13].mxu0  ;;  %v1603_v38 = vsel %vm411_vm2, %v15799_v42, -inf }
 0x274   :  { %v749_v2 = vpop.f32.mrb[14].mxu0  ;;  %1604 = vmax.xlane.f32.xlu1 %v1603_v38 }
 0x275   :  { %v13311_v4 = vpop.f32.mrb[15].mxu0 }
 0x276   :  { %v15803_v7 = vpop.f32.mrb[20].mxu1 }
 0x277   :  { %v13286_v10 = vpop.f32.mrb[21].mxu1  ;;  %v1591_v1 = vsel %vm411_vm2, %v15803_v7, -inf }
 0x278   :  { %v553_v28 = vpop.f32.mrb[22].mxu1  ;;  %1592 = vmax.xlane.f32.xlu0 %v1591_v1  ;;  %1589 = vmax.xlane.f32.xlu1 %v1588_v20 }
 0x279   :  { %v13287_v12 = vpop.f32.mrb[23].mxu1 }
 0x27a   :  { %v15809_v26 = vpop.f32.mrb[16].mxu0 }
 0x27b   :  { %v13322_v44 = vpop.f32.mrb[17].mxu0  ;;  %v1609_v34 = vsel %vm411_vm2, %v15809_v26, -inf }
 0x27c   :  { %v847_v38 = vpop.f32.mrb[18].mxu0  ;;  %1610 = vmax.xlane.f32.xlu1 %v1609_v34 }
 0x27d   :  { %v13323_v2 = vpop.f32.mrb[19].mxu0 }
 0x27e   :  { %v15813_v4 = vpop.f32.mrb[24].mxu1 }
 0x27f   :  { %v13292_v10 = vpop.f32.mrb[25].mxu1  ;;  %v1594_v14 = vsel %vm411_vm2, %v15813_v4, -inf }
 0x280   :  { %v602_v63 = vpop.f32.mrb[26].mxu1  ;;  %1595 = vmax.xlane.f32.xlu0 %v1594_v14 }
 0x281   :  { %v13293_v1 = vpop.f32.mrb[27].mxu1 }
 0x282   :  { %v15817_v20 = vpop.f32.mrb[20].mxu0 }
 0x283   :  { %v13334_v28 = vpop.f32.mrb[21].mxu0  ;;  %v1615_v12 = vsel %vm411_vm2, %v15817_v20, -inf }
 0x284   :  { %v945_v44 = vpop.f32.mrb[22].mxu0  ;;  %1616 = vmax.xlane.f32.xlu1 %v1615_v12 }
 0x285   :  { %v13335_v38 = vpop.f32.mrb[23].mxu0 }
 0x286   :  { %v15821_v34 = vpop.f32.mrb[28].mxu1 }
 0x287   :  { %v13298_v2 = vpop.f32.mrb[29].mxu1  ;;  %v1597_v10 = vsel %vm411_vm2, %v15821_v34, -inf }
 0x288   :  { %v651_v19 = vpop.f32.mrb[30].mxu1  ;;  %1598 = vmax.xlane.f32.xlu1 %v1597_v10 }
 0x289   :  { %v13299_v63 = vpop.f32.mrb[31].mxu1 }
 0x28a   :  { %v15825_v14 = vpop.f32.mrb[24].mxu0 }
 0x28b   :  { %v13346_v1 = vpop.f32.mrb[25].mxu0 }
 0x28c   :  { %v1043_v48 = vpop.f32.mrb[26].mxu0 }
 0x28d   :  { %v13347_v28 = vpop.f32.mrb[27].mxu0  ;;  %v15837_v48 = vpack.c.bf16 %v15395_v40, %v15395_v40 }
 0x28e   :  { %v15827_v49 = vpop.f32.mrb[32].mxu1 }
 0x28f   :  { %v13304_v32 = vpop.f32.mrb[33].mxu1  ;;  %v1600_v12 = vsel %vm411_vm2, %v15827_v49, -inf  ;;  %19302 = vst [vmem:[#allocation50_spill] sm:$0xff] %v15837_v48 }
 0x290   :  { %v700_v44 = vpop.f32.mrb[34].mxu1  ;;  %1601 = vmax.xlane.f32.xlu0 %v1600_v12 }
 0x291   :  { %v13305_v38 = vpop.f32.mrb[35].mxu1 }
 0x292   :  { %v15831_v2 = vpop.f32.mrb[28].mxu0 }
 0x293   :  { %v13358_v33 = vpop.f32.mrb[29].mxu0 }
 0x294   :  { %v1141_v19 = vpop.f32.mrb[30].mxu0 }
 0x295   :  { %v13359_v10 = vpop.f32.mrb[31].mxu0 }
 0x296   :  { %v15833_v63 = vpop.f32.mrb[36].mxu1 }
 0x297   :  { %v13316_v1 = vpop.f32.mrb[37].mxu1  ;;  %v1606_v32 = vsel %vm411_vm2, %v15833_v63, -inf }
 0x298   :  { %v798_v28 = vpop.f32.mrb[38].mxu1  ;;  %1607 = vmax.xlane.f32.xlu0 %v1606_v32 }
 0x299   :  { %v13317_v44 = vpop.f32.mrb[39].mxu1  ;;  %2806 = vrot.lane.b32.xlu1 %v15837_v48, %s15216_s30 }
 0x29a   :  { %v15843_v12 = vpop.f32.mrb[32].mxu0 }
 0x29b   :  { %v13370_v33 = vpop.f32.mrb[33].mxu0 }
 0x29c   :  { %v1239_v38 = vpop.f32.mrb[34].mxu0 }
 0x29d   :  { %v13371_v19 = vpop.f32.mrb[35].mxu0 }
 0x29e   :  { %v15845_v10 = vpop.f32.mrb[40].mxu1 }
 0x29f   :  { %v13328_v16 = vpop.f32.mrb[41].mxu1  ;;  %v1612_v40 = vsel %vm411_vm2, %v15845_v10, -inf }
 0x2a0   :  { %1613 = vmax.xlane.f32.xlu0 %v1612_v40  ;;  %v896_v1 = vpop.f32.mrb[42].mxu1 }
 0x2a1   :  { %v13329_v18 = vpop.f32.mrb[43].mxu1 }
 0x2a2   :  { %v15849_v28 = vpop.f32.mrb[36].mxu0 }
 0x2a3   :  { %v13382_v32 = vpop.f32.mrb[37].mxu0 }
 0x2a4   :  { %v1337_v44 = vpop.f32.mrb[38].mxu0 }
 0x2a5   :  { %v13383_v59 = vpop.f32.mrb[39].mxu0 }
 0x2a6   :  { %v15851_v48 = vpop.f32.mrb[44].mxu1 }
 0x2a7   :  { %v13340_v15 = vpop.f32.mrb[45].mxu1  ;;  %v1618_v33 = vsel %vm411_vm2, %v15851_v48, -inf }
 0x2a8   :  { %1619 = vmax.xlane.f32.xlu0 %v1618_v33  ;;  %v994_v38 = vpop.f32.mrb[46].mxu1 }
 0x2a9   :  { %v13341_v16 = vpop.f32.mrb[47].mxu1 }
 0x2aa   :  { %v15855_v19 = vpop.f32.mrb[40].mxu0 }
 0x2ab   :  { %v13394_v51 = vpop.f32.mrb[41].mxu0 }
 0x2ac   :  { %v1435_v40 = vpop.f32.mrb[42].mxu0 }
 0x2ad   :  { %v13395_v1 = vpop.f32.mrb[43].mxu0 }
 0x2ae   :  { %v15857_v18 = vpop.f32.mrb[48].mxu1  ;;  %v1621_v1 = vsel %vm411_vm2, %v15825_v14, -inf }
 0x2af   :  { %v13352_v22 = vpop.f32.mrb[49].mxu1  ;;  %v1624_v59 = vsel %vm411_vm2, %v15857_v18, -inf }
 0x2b0   :  { %1625 = vmax.xlane.f32.xlu0 %v1624_v59  ;;  %v1092_v32 = vpop.f32.mrb[50].mxu1 }
 0x2b1   :  { %v13353_v15 = vpop.f32.mrb[51].mxu1 }
 0x2b2   :  { %v15861_v44 = vpop.f32.mrb[44].mxu0 }
 0x2b3   :  { %v13406_v36 = vpop.f32.mrb[45].mxu0 }
 0x2b4   :  { %v1533_v33 = vpop.f32.mrb[46].mxu0 }
 0x2b5   :  { %v13407_v38 = vpop.f32.mrb[47].mxu0 }
 0x2b6   :  { %v15863_v16 = vpop.f32.mrb[52].mxu1  ;;  %v1633_v38 = vsel %vm411_vm2, %v15843_v12, -inf }
 0x2b7   :  { %v13364_v29 = vpop.f32.mrb[53].mxu1  ;;  %v1630_v51 = vsel %vm411_vm2, %v15863_v16, -inf }
 0x2b8   :  { %1631 = vmax.xlane.f32.xlu0 %v1630_v51  ;;  %v1190_v40 = vpop.f32.mrb[54].mxu1  ;;  %v1627_v29 = vsel %vm411_vm2, %v15831_v2, -inf }
 0x2b9   :  { %v13365_v22 = vpop.f32.mrb[55].mxu1 }
 0x2bd   :  { %1622 = vmax.xlane.f32.xlu1 %v1621_v1  ;;  %v1639_v1 = vsel %vm411_vm2, %v15849_v28, -inf }
 0x2be   :  { %v15869_v59 = vpop.f32.mrb[56].mxu1 }
 0x2bf   :  { %v13376_v32 = vpop.f32.mrb[57].mxu1  ;;  %v1636_v36 = vsel %vm411_vm2, %v15869_v59, -inf }
 0x2c0   :  { %1637 = vmax.xlane.f32.xlu0 %v1636_v36  ;;  %v1288_v15 = vpop.f32.mrb[58].mxu1  ;;  %v15881_v32 = vpop.permute.xlu0 %2022 }
 0x2c1   :  { %1628 = vmax.xlane.f32.xlu1 %v1627_v29  ;;  %v13377_v33 = vpop.f32.mrb[59].mxu1  ;;  %v1645_v15 = vsel %vm411_vm2, %v15855_v19, -inf  ;;  %v15885_v29 = vpop.permute.xlu1 %1973 }
 0x2c5   :  { %1634 = vmax.xlane.f32.xlu1 %v1633_v38  ;;  %v15889_v38 = vpop.permute.xlu0 %2120  ;;  %v15893_v55 = vpop.permute.xlu1 %2071 }
 0x2c6   :  { %v15877_v51 = vpop.f32.mrb[60].mxu1 }
 0x2c7   :  { %v13388_v40 = vpop.f32.mrb[61].mxu1 }
 0x2c8   :  { %v1386_v22 = vpop.f32.mrb[62].mxu1 }
 0x2c9   :  { %1640 = vmax.xlane.f32.xlu1 %v1639_v1  ;;  %v13389_v36 = vpop.f32.mrb[63].mxu1  ;;  %v1651_v22 = vsel %vm411_vm2, %v15861_v44, -inf  ;;  %v15897_v1 = vpack.c.bf16 %v15429_v54, %v15429_v54  ;;  %v15905_v37 = vpop.permute.xlu1 %2169 }
 0x2ca   :  { %v15899_v36 = vpop.permute.xlu0 %2218 }
 0x2cb   :  { %19303 = vst [vmem:[#allocation51_spill] sm:$0xff] %v15897_v1 }
 0x2cd   :  { %1646 = vmax.xlane.f32.xlu1 %v1645_v15 }
 0x2ce   :  { %v15887_v33 = vpop.f32.mrb[64].mxu1 }
 0x2cf   :  { %v13400_v53 = vpop.f32.mrb[65].mxu1  ;;  %v1648_v61 = vsel %vm411_vm2, %v15887_v33, -inf }
 0x2d0   :  { %v1484_v40 = vpop.f32.mrb[66].mxu1 }
 0x2d1   :  { %1652 = vmax.xlane.f32.xlu1 %v1651_v22  ;;  %v13401_v17 = vpop.f32.mrb[67].mxu1  ;;  %v15907_v22 = vpop.permute.xlu0 %2316 }
 0x2d2   :  { %v15909_v17 = vpop.permute.xlu1 %2267 }
 0x2d5   :  { %v15911_v39 = vpop.permute.xlu0 %2414 }
 0x2d6   :  { %2855 = vrot.lane.b32.xlu0 %v15897_v1, %s15216_s30  ;;  %v15903_v15 = vpop.f32.mrb[68].mxu1  ;;  %v15913_v54 = vpop.permute.xlu1 %2365 }
 0x2d7   :  { %v13412_v53 = vpop.f32.mrb[69].mxu1  ;;  %v1654_v43 = vsel %vm411_vm2, %v15903_v15, -inf }
 0x2d8   :  { %v1582_v40 = vpop.f32.mrb[70].mxu1 }
 0x2d9   :  { %v13413_v11 = vpop.f32.mrb[71].mxu1  ;;  %v15915_v21 = vpop.permute.xlu0 %2512 }
 0x2da   :  { %v15917_v6 = vpop.permute.xlu1 %2463  ;;  %v1642_v11 = vsel %vm411_vm2, %v15877_v51, -inf }
 0x2dd   :  { %v15919_v1 = vpop.permute.xlu0 %2610 }
 0x2de   :  { %v15921_v25 = vpop.permute.xlu1 %2561 }
 0x2df   :  { %19304 = vst [vmem:[#allocation52_spill] sm:$0xff] %v15921_v25 }
 0x2e1   :  { %v15923_v53 = vpop.permute.xlu0 %2708 }
 0x2e2   :  { %19305 = vst [vmem:[#allocation53_spill] sm:$0xff] %v15923_v53  ;;  %v15928_v3 = vpop.permute.xlu1 %2659 }
 0x2e3   :  { %19306 = vst [vmem:[#allocation54_spill] sm:$0xff] %v15928_v3 }
 0x2e6   :  { %v15934_v57 = vpop.permute.xlu1 %2757 }
 0x2e7   :  { %19307 = vst [vmem:[#allocation55_spill] sm:$0xff] %v15934_v57 }
 0x2f5   :  { %v1587_v40 = vpop.xlane.xlu0 %1586  ;;  %1643 = vmax.xlane.f32.xlu0 %v1642_v11 }
 0x2f6   :  { %v1657_v58 = vsub.f32 %v15793_v9, %v1587_v40 }
 0x2f8   :  { %v1681_v52 = vmul.f32 1.442695, %v1657_v58 }
 0x2f9   :  { %1649 = vmax.xlane.f32.xlu0 %v1648_v61 }
 0x2fa   :  { %14640 = vpow2.f32 %v1681_v52 }
 0x2fd   :  { %1655 = vmax.xlane.f32.xlu0 %v1654_v43 }
 0x301   :  { %v1605_v24 = vpop.xlane.xlu1 %1604 }
 0x302   :  { %v1663_v45 = vsub.f32 %v15799_v42, %v1605_v24 }
 0x304   :  { %v15937_v11 = vpop.eup %14640  ;;  %v1693_v9 = vmul.f32 1.442695, %v1663_v45 }
 0x305   :  { %v1593_v40 = vpop.xlane.xlu0 %1592  ;;  %v1590_v3 = vpop.xlane.xlu1 %1589  ;;  %v1729_v58 = vsel %vm411_vm2, %v15937_v11, 0.0 }
 0x306   :  { %14642 = vpow2.f32 %v1693_v9  ;;  %v1659_v61 = vsub.f32 %v15803_v7, %v1593_v40  ;;  %v1658_v52 = vsub.f32 %v15797_v35, %v1590_v3  ;;  %1730 = vadd.xlane.f32.xlu1 %v1729_v58 }
 0x308   :  { %v1685_v25 = vmul.f32 1.442695, %v1659_v61  ;;  %v1683_v57 = vmul.f32 1.442695, %v1658_v52 }
 0x309   :  { %v1611_v43 = vpop.xlane.xlu1 %1610 }
 0x30a   :  { %14644 = vpow2.f32 %v1685_v25  ;;  %v1665_v24 = vsub.f32 %v15809_v26, %v1611_v43 }
 0x30b   :  { %14646 = vpow2.f32 %v1683_v57 }
 0x30c   :  { %v1697_v42 = vmul.f32 1.442695, %v1665_v24 }
 0x30d   :  { %v1596_v45 = vpop.xlane.xlu0 %1595 }
 0x30e   :  { %14648 = vpow2.f32 %v1697_v42  ;;  %v1660_v13 = vsub.f32 %v15813_v4, %v1596_v45 }
 0x310   :  { %v15945_v41 = vpop.eup %14642  ;;  %v1687_v9 = vmul.f32 1.442695, %v1660_v13 }
 0x311   :  { %v1617_v53 = vpop.xlane.xlu1 %1616  ;;  %v1747_v3 = vsel %vm411_vm2, %v15945_v41, 0.0 }
 0x312   :  { %14650 = vpow2.f32 %v1687_v9  ;;  %v1667_v35 = vsub.f32 %v15817_v20, %v1617_v53  ;;  %1748 = vadd.xlane.f32.xlu1 %v1747_v3 }
 0x314   :  { %v15950_v25 = vpop.eup %14644  ;;  %v1701_v7 = vmul.f32 1.442695, %v1667_v35 }
 0x315   :  { %v15952_v57 = vpop.eup %14646  ;;  %v1599_v26 = vpop.xlane.xlu1 %1598  ;;  %v1735_v4 = vsel %vm411_vm2, %v15950_v25, 0.0 }
 0x316   :  { %14652 = vpow2.f32 %v1701_v7  ;;  %v1661_v13 = vsub.f32 %v15821_v34, %v1599_v26  ;;  %1736 = vadd.xlane.f32.xlu1 %v1735_v4  ;;  %v1732_v40 = vsel %vm411_vm2, %v15952_v57, 0.0 }
 0x317   :  { %1733 = vadd.xlane.f32.xlu0 %v1732_v40 }
 0x318   :  { %v15959_v58 = vpop.eup %14648  ;;  %v1689_v20 = vmul.f32 1.442695, %v1661_v13 }
 0x319   :  { %v1753_v53 = vsel %vm411_vm2, %v15959_v58, 0.0 }
 0x31a   :  { %14654 = vpow2.f32 %v1689_v20  ;;  %1754 = vadd.xlane.f32.xlu1 %v1753_v53 }
 0x31c   :  { %v15963_v61 = vpop.eup %14650 }
 0x31d   :  { %v1602_v52 = vpop.xlane.xlu0 %1601  ;;  %v1738_v43 = vsel %vm411_vm2, %v15963_v61, 0.0 }
 0x31e   :  { %v1662_v34 = vsub.f32 %v15827_v49, %v1602_v52  ;;  %1739 = vadd.xlane.f32.xlu0 %v1738_v43 }
 0x320   :  { %v15968_v24 = vpop.eup %14652  ;;  %v1691_v42 = vmul.f32 1.442695, %v1662_v34 }
 0x321   :  { %v1759_v45 = vsel %vm411_vm2, %v15968_v24, 0.0 }
 0x322   :  { %14656 = vpow2.f32 %v1691_v42  ;;  %1760 = vadd.xlane.f32.xlu1 %v1759_v45 }
 0x324   :  { %v15972_v9 = vpop.eup %14654 }
 0x325   :  { %v1608_v3 = vpop.xlane.xlu0 %1607  ;;  %v1741_v35 = vsel %vm411_vm2, %v15972_v9, 0.0 }
 0x326   :  { %v1664_v7 = vsub.f32 %v15833_v63, %v1608_v3  ;;  %1742 = vadd.xlane.f32.xlu1 %v1741_v35 }
 0x328   :  { %v1695_v26 = vmul.f32 1.442695, %v1664_v7 }
 0x32a   :  { %14658 = vpow2.f32 %v1695_v26 }
 0x32c   :  { %v15977_v49 = vpop.eup %14656 }
 0x32d   :  { %v1614_v4 = vpop.xlane.xlu0 %1613  ;;  %v1744_v13 = vsel %vm411_vm2, %v15977_v49, 0.0 }
 0x32e   :  { %v1666_v40 = vsub.f32 %v15845_v10, %v1614_v4  ;;  %1745 = vadd.xlane.f32.xlu0 %v1744_v13  ;;  %v15996_v4 = vpop.permute.xlu1 %2806 }
 0x32f   :  { %19308 = vst [vmem:[#allocation56_spill] sm:$0xff] %v15996_v4 }
 0x330   :  { %v1699_v20 = vmul.f32 1.442695, %v1666_v40 }
 0x332   :  { %14660 = vpow2.f32 %v1699_v20 }
 0x334   :  { %v15982_v53 = vpop.eup %14658 }
 0x335   :  { %v1620_v52 = vpop.xlane.xlu0 %1619  ;;  %v1750_v63 = vsel %vm411_vm2, %v15982_v53, 0.0 }
 0x336   :  { %v1668_v43 = vsub.f32 %v15851_v48, %v1620_v52  ;;  %1751 = vadd.xlane.f32.xlu0 %v1750_v63 }
 0x338   :  { %v1703_v34 = vmul.f32 1.442695, %v1668_v43 }
 0x33a   :  { %14662 = vpow2.f32 %v1703_v34 }
 0x33c   :  { %v15987_v42 = vpop.eup %14660 }
 0x33d   :  { %v1626_v45 = vpop.xlane.xlu0 %1625  ;;  %v1756_v10 = vsel %vm411_vm2, %v15987_v42, 0.0 }
 0x33e   :  { %v1670_v3 = vsub.f32 %v15857_v18, %v1626_v45  ;;  %1757 = vadd.xlane.f32.xlu0 %v1756_v10 }
 0x340   :  { %v1707_v35 = vmul.f32 1.442695, %v1670_v3 }
 0x342   :  { %14664 = vpow2.f32 %v1707_v35 }
 0x344   :  { %v15992_v7 = vpop.eup %14662 }
 0x345   :  { %v1632_v26 = vpop.xlane.xlu0 %1631  ;;  %v1762_v48 = vsel %vm411_vm2, %v15992_v7, 0.0 }
 0x346   :  { %v1672_v13 = vsub.f32 %v15863_v16, %v1632_v26  ;;  %1763 = vadd.xlane.f32.xlu0 %v1762_v48  ;;  %v16019_v48 = vpack.c.bf16 %v15443_v60, %v15443_v60 }
 0x348   :  { %v1711_v40 = vmul.f32 1.442695, %v1672_v13  ;;  %19309 = vst [vmem:[#allocation57_spill] sm:$0xff] %v16019_v48 }
 0x34a   :  { %14666 = vpow2.f32 %v1711_v40  ;;  %v1623_v20 = vpop.xlane.xlu1 %1622 }
 0x34b   :  { %v1669_v52 = vsub.f32 %v15825_v14, %v1623_v20 }
 0x34c   :  { %v16000_v18 = vpop.eup %14664 }
 0x34d   :  { %v1705_v63 = vmul.f32 1.442695, %v1669_v52  ;;  %v1638_v43 = vpop.xlane.xlu0 %1637  ;;  %v1768_v34 = vsel %vm411_vm2, %v16000_v18, 0.0 }
 0x34e   :  { %v1674_v45 = vsub.f32 %v15869_v59, %v1638_v43  ;;  %1769 = vadd.xlane.f32.xlu0 %v1768_v34  ;;  %v1629_v13 = vpop.xlane.xlu1 %1628 }
 0x34f   :  { %14668 = vpow2.f32 %v1705_v63  ;;  %v1671_v20 = vsub.f32 %v15831_v2, %v1629_v13 }
 0x350   :  { %v1715_v10 = vmul.f32 1.442695, %v1674_v45 }
 0x351   :  { %v1709_v63 = vmul.f32 1.442695, %v1671_v20  ;;  %v16024_v43 = vpop.permute.xlu0 %2855 }
 0x352   :  { %14670 = vpow2.f32 %v1715_v10  ;;  %v1635_v40 = vpop.xlane.xlu1 %1634  ;;  %19310 = vst [vmem:[#allocation58_spill] sm:$0xff] %v16024_v43 }
 0x353   :  { %v1673_v34 = vsub.f32 %v15843_v12, %v1635_v40  ;;  %14672 = vpow2.f32 %v1709_v63 }
 0x354   :  { %v16005_v16 = vpop.eup %14666 }
 0x355   :  { %v1774_v3 = vsel %vm411_vm2, %v16005_v16, 0.0  ;;  %v1713_v10 = vmul.f32 1.442695, %v1673_v34 }
 0x356   :  { %1775 = vadd.xlane.f32.xlu0 %v1774_v3  ;;  %v1641_v52 = vpop.xlane.xlu1 %1640 }
 0x357   :  { %v1675_v3 = vsub.f32 %v15849_v28, %v1641_v52  ;;  %14674 = vpow2.f32 %v1713_v10 }
 0x359   :  { %v16009_v14 = vpop.eup %14668 }
 0x35a   :  { %v1765_v35 = vsel %vm411_vm2, %v16009_v14, 0.0  ;;  %v1647_v45 = vpop.xlane.xlu1 %1646 }
 0x35b   :  { %1766 = vadd.xlane.f32.xlu1 %v1765_v35  ;;  %v1677_v4 = vsub.f32 %v15855_v19, %v1647_v45 }
 0x35c   :  { %v16013_v26 = vpop.eup %14670 }
 0x35d   :  { %v1780_v59 = vsel %vm411_vm2, %v16013_v26, 0.0  ;;  %v1721_v12 = vmul.f32 1.442695, %v1677_v4  ;;  %v16032_v28 = vpop.eup %14672 }
 0x35e   :  { %1781 = vadd.xlane.f32.xlu0 %v1780_v59  ;;  %v1653_v13 = vpop.xlane.xlu1 %1652  ;;  %v1771_v52 = vsel %vm411_vm2, %v16032_v28, 0.0 }
 0x35f   :  { %v1679_v40 = vsub.f32 %v15861_v44, %v1653_v13 }
 0x361   :  { %v16036_v63 = vpop.eup %14674 }
 0x362   :  { %v1777_v44 = vsel %vm411_vm2, %v16036_v63, 0.0 }
 0x36c   :  { %2904 = vrot.lane.b32.xlu1 %v16019_v48, %s15216_s30  ;;  %v1717_v48 = vmul.f32 1.442695, %v1675_v3 }
 0x382   :  { %v1644_v60 = vpop.xlane.xlu0 %1643 }
 0x383   :  { %v1676_v35 = vsub.f32 %v15877_v51, %v1644_v60  ;;  %v1725_v51 = vmul.f32 1.442695, %v1679_v40  ;;  %v1979_v40 = vsel %vm1879_vm3, %v15885_v29, 0 }
 0x385   :  { %v1719_v59 = vmul.f32 1.442695, %v1676_v35 }
 0x386   :  { %v1650_v2 = vpop.xlane.xlu0 %1649 }
 0x387   :  { %14676 = vpow2.f32 %v1719_v59  ;;  %v1678_v20 = vsub.f32 %v15887_v33, %v1650_v2 }
 0x388   :  { %14678 = vpow2.f32 %v1717_v48 }
 0x389   :  { %v1723_v43 = vmul.f32 1.442695, %v1678_v20 }
 0x38a   :  { %v1656_v20 = vpop.xlane.xlu0 %1655 }
 0x38b   :  { %14680 = vpow2.f32 %v1723_v43 }
 0x38c   :  { %14682 = vpow2.f32 %v1721_v12 }
 0x38d   :  { %14684 = vpow2.f32 %v1725_v51 }
 0x390   :  { %1772 = vadd.xlane.f32.xlu1 %v1771_v52 }
 0x391   :  { %v16038_v19 = vpop.eup %14676 }
 0x392   :  { %v1786_v33 = vsel %vm411_vm2, %v16038_v19, 0.0  ;;  %v16044_v48 = vpop.eup %14678 }
 0x393   :  { %1787 = vadd.xlane.f32.xlu0 %v1786_v33  ;;  %v1731_v4 = vpop.xlane.xlu1 %1730  ;;  %v1783_v45 = vsel %vm411_vm2, %v16044_v48, 0.0  ;;  %v19311_v33 = vmov 0.0  }
 0x394   :  { %14686 = vrcp.f32 %v1731_v4  ;;  %1778 = vadd.xlane.f32.xlu1 %v1777_v44 }
 0x395   :  { %v16046_v43 = vpop.eup %14680 }
 0x396   :  { %v1792_v34 = vsel %vm411_vm2, %v16046_v43, 0.0  ;;  %v16052_v10 = vpop.eup %14682 }
 0x397   :  { %1793 = vadd.xlane.f32.xlu0 %v1792_v34  ;;  %v1789_v3 = vsel %vm411_vm2, %v16052_v10, 0.0  ;;  %v16056_v60 = vpop.eup %14684 }
 0x398   :  { %1784 = vadd.xlane.f32.xlu1 %v1783_v45  ;;  %v1795_v2 = vsel %vm411_vm2, %v16056_v60, 0.0  ;;  %v16075_v45 = vpack.c.bf16 %v15433_v56, %v15433_v56  ;;  %v2028_v56 = vsel %vm1879_vm3, %v15881_v32, 0 }
 0x39a   :  { %19312 = vst [vmem:[#allocation59_spill] sm:$0xff] %v16075_v45 }
 0x39c   :  { %1790 = vadd.xlane.f32.xlu1 %v1789_v3 }
 0x39e   :  { %v14687_v35 = vpop.eup %14686 }
 0x39f   :  { %v1749_v59 = vpop.xlane.xlu1 %1748  ;;  %v1825_v13 = vmul.f32 %v14687_v35, %v15937_v11  ;;  %v16069_v11 = vpack.c.bf16 %v15419_v50, %v15419_v50 }
 0x3a0   :  { %1796 = vadd.xlane.f32.xlu1 %v1795_v2 }
 0x3a1   :  { %v1849_v12 = vpack.c.bf16 %v1825_v13, %v1825_v13 }
 0x3a3   :  { %13417 = vmatmul.mubr.msk.bf16.vlgmr.msra.gmra.mrb[48].mxu0 %vm411_vm2, %v1849_v12  ;;  %v1737_v51 = vpop.xlane.xlu1 %1736  ;;  %v2077_v12 = vsel %vm1879_vm3, %v15893_v55, 0  ;;  %v1680_v55 = vsub.f32 %v15903_v15, %v1656_v20  ;;  %v2175_v20 = vsel %vm1879_vm3, %v15905_v37, 0 }
 0x3a4   :  { %v1734_v52 = vpop.xlane.xlu0 %1733  ;;  %13427 = vmatpush3.bf16.msra.mxu0 %v1979_v40  ;;  %14688 = vrcp.f32 %v1737_v51  ;;  %13428 = vmatprep.mubr.msk.bf16.mxu0 %vm15220_vm1, %v19311_v33 }
 0x3a5   :  { %14690 = vrcp.f32 %v1734_v52  ;;  %13438 = vmatprep.subr.bf16.mxu0 %v19311_v33  ;;  %v1727_v51 = vmul.f32 1.442695, %v1680_v55  ;;  %v2371_v55 = vsel %vm1879_vm3, %v15913_v54, 0 }
 0x3a7   :  { %v1755_v4 = vpop.xlane.xlu1 %1754 }
 0x3ab   :  { %v1740_v44 = vpop.xlane.xlu0 %1739 }
 0x3ac   :  { %14692 = vrcp.f32 %v1740_v44  ;;  %v2126_v44 = vsel %vm1879_vm3, %v15889_v38, 0 }
 0x3ad   :  { %2953 = vrot.lane.b32.xlu0 %v16069_v11, %s15216_s30 }
 0x3ae   :  { %v14689_v29 = vpop.eup %14688 }
 0x3af   :  { %v14691_v34 = vpop.eup %14690  ;;  %v1761_v3 = vpop.xlane.xlu1 %1760  ;;  %v1827_v35 = vmul.f32 %v14689_v29, %v15950_v25 }
 0x3b0   :  { %v1826_v2 = vmul.f32 %v14691_v34, %v15952_v57 }
 0x3b1   :  { %3002 = vrot.lane.b32.xlu1 %v16075_v45, %s15216_s30  ;;  %v1851_v50 = vpack.c.bf16 %v1827_v35, %v1827_v35  ;;  %s15223_s30 = smov 120  }
 0x3b2   :  { %v1850_v13 = vpack.c.bf16 %v1826_v2, %v1826_v2 }
 0x3b3   :  { %13429 = vmatmul.mubr.msk.bf16.vlgmr.msra.gmra.mrb[52].mxu0 %vm411_vm2, %v1851_v50  ;;  %v1743_v40 = vpop.xlane.xlu1 %1742 }
 0x3b4   :  { %13423 = vmatmul.mubr.msk.bf16.vlgmr.msra.gmra.mrb[72].mxu1 %vm411_vm2, %v1850_v13  ;;  %13439 = vmatpush3.bf16.msra.mxu0 %v2077_v12  ;;  %14694 = vrcp.f32 %v1743_v40  ;;  %v2224_v13 = vsel %vm1879_vm3, %v15899_v36, 0  ;;  %v2273_v12 = vsel %vm1879_vm3, %v15909_v17, 0 }
 0x3b5   :  { %13433 = vmatpush3.bf16.msra.mxu1 %v2028_v56  ;;  %3115 = vrot.lane.b32.xlu1 %v15373_v31, %s15222_s6  ;;  %14696 = vrcp.f32 %v1749_v59 }
 0x3b6   :  { %v14693_v25 = vpop.eup %14692  ;;  %13434 = vmatprep.mubr.msk.bf16.mxu1 %vm15220_vm1, %v19311_v33  ;;  %13444 = vmatprep.subr.bf16.mxu1 %v19311_v33 }
 0x3b7   :  { %v1828_v57 = vmul.f32 %v14693_v25, %v15963_v61  ;;  %13440 = vmatprep.mubr.msk.bf16.mxu0 %vm15220_vm1, %v19311_v33  ;;  %13450 = vmatprep.subr.bf16.mxu0 %v19311_v33 }
 0x3b9   :  { %3113 = vrot.lane.b32.xlu1 %v15373_v31, %s15223_s30  ;;  %v1852_v32 = vpack.c.bf16 %v1828_v57, %v1828_v57 }
 0x3bb   :  { %v1746_v52 = vpop.xlane.xlu0 %1745 }
 0x3bc   :  { %13435 = vmatmul.mubr.msk.bf16.vlgmr.msra.gmra.mrb[76].mxu1 %vm411_vm2, %v1852_v32  ;;  %14698 = vrcp.f32 %v1746_v52  ;;  %v2420_v52 = vsel %vm1879_vm3, %v15911_v39, 0 }
 0x3bd   :  { %13445 = vmatpush3.bf16.msra.mxu1 %v2126_v44  ;;  %3215 = vrot.lane.b32.xlu1 %v15371_v30, %s15222_s6  ;;  %14700 = vpow2.f32 %v1727_v51 }
 0x3be   :  { %v14695_v15 = vpop.eup %14694  ;;  %13446 = vmatprep.mubr.msk.bf16.mxu1 %vm15220_vm1, %v19311_v33  ;;  %13456 = vmatprep.subr.bf16.mxu1 %v19311_v33  ;;  %14702 = vrcp.f32 %v1755_v4 }
 0x3bf   :  { %v1829_v61 = vmul.f32 %v14695_v15, %v15972_v9  ;;  %v14697_v59 = vpop.eup %14696  ;;  %v2518_v15 = vsel %vm1879_vm3, %v15915_v21, 0 }
 0x3c0   :  { %v1831_v9 = vmul.f32 %v14697_v59, %v15945_v41 }
 0x3c1   :  { %3213 = vrot.lane.b32.xlu1 %v15371_v30, %s15223_s30  ;;  %v1853_v38 = vpack.c.bf16 %v1829_v61, %v1829_v61 }
 0x3c2   :  { %v1855_v2 = vpack.c.bf16 %v1831_v9, %v1831_v9 }
 0x3c3   :  { %v1752_v29 = vpop.xlane.xlu0 %1751  ;;  %13441 = vmatmul.mubr.msk.bf16.vlgmr.msra.gmra.mrb[56].mxu0 %vm411_vm2, %v1853_v38 }
 0x3c4   :  { %14704 = vrcp.f32 %v1752_v29  ;;  %13451 = vmatpush3.bf16.msra.mxu0 %v2175_v20  ;;  %13452 = vmatprep.mubr.msk.bf16.mxu0 %vm15220_vm1, %v19311_v33  ;;  %v2616_v20 = vsel %vm1879_vm3, %v15919_v1, 0 }
 0x3c5   :  { %3315 = vrot.lane.b32.xlu1 %v15407_v46, %s15222_s6  ;;  %13462 = vmatprep.subr.bf16.mxu0 %v19311_v33  ;;  %14706 = vrcp.f32 %v1761_v3 }
 0x3c6   :  { %v14699_v4 = vpop.eup %14698 }
 0x3c7   :  { %v1830_v34 = vmul.f32 %v14699_v4, %v15977_v49  ;;  %v16120_v37 = vpop.eup %14700 }
 0x3c8   :  { %v14703_v50 = vpop.eup %14702  ;;  %v1798_v49 = vsel %vm411_vm2, %v16120_v37, 0.0 }
 0x3c9   :  { %3313 = vrot.lane.b32.xlu1 %v15407_v46, %s15223_s30  ;;  %v1854_v35 = vpack.c.bf16 %v1830_v34, %v1830_v34  ;;  %v1833_v36 = vmul.f32 %v14703_v50, %v15959_v58  ;;  %v2322_v58 = vsel %vm1879_vm3, %v15907_v22, 0  ;;  %v19313_v34 = vld [vmem:[#allocation53_spill] sm:$0xff] }
 0x3cb   :  { %13447 = vmatmul.mubr.msk.bf16.vlgmr.msra.gmra.mrb[80].mxu1 %vm411_vm2, %v1854_v35  ;;  %v1758_v41 = vpop.xlane.xlu0 %1757  ;;  %13453 = vmatmul.mubr.msk.bf16.vlgmr.msra.gmra.mrb[60].mxu0 %vm411_vm2, %v1855_v2  ;;  %v1857_v56 = vpack.c.bf16 %v1833_v36, %v1833_v36  ;;  %v2714_v35 = vsel %vm1879_vm3, %v19313_v34, 0  ;;  %v19314_v2 = vld [vmem:[#allocation12_spill] sm:$0xff] }
 0x3cc   :  { %13457 = vmatpush3.bf16.msra.mxu1 %v2224_v13  ;;  %14708 = vrcp.f32 %v1758_v41  ;;  %13463 = vmatpush3.bf16.msra.mxu0 %v2273_v12 }
 0x3cd   :  { %1799 = vadd.xlane.f32.xlu0 %v1798_v49  ;;  %3415 = vrot.lane.b32.xlu1 %v15411_v47, %s15222_s6  ;;  %v19316_v49 = vld [vmem:[#allocation52_spill] sm:$0xff] }
 0x3ce   :  { %v14705_v3 = vpop.eup %14704  ;;  %13458 = vmatprep.mubr.msk.bf16.mxu1 %vm15220_vm1, %v19311_v33  ;;  %13464 = vmatprep.mubr.msk.bf16.mxu0 %vm15220_vm1, %v19311_v33  ;;  %v2567_v36 = vsel %vm1879_vm3, %v19316_v49, 0 }
 0x3cf   :  { %13468 = vmatprep.subr.bf16.mxu1 %v19311_v33  ;;  %13474 = vmatprep.subr.bf16.mxu0 %v19311_v33  ;;  %v1832_v17 = vmul.f32 %v14705_v3, %v15982_v53  ;;  %v14707_v25 = vpop.eup %14706  ;;  %v19317_v3 = vld [vmem:[#allocation56_spill] sm:$0xff] }
 0x3d0   :  { %v1835_v53 = vmul.f32 %v14707_v25, %v15968_v24  ;;  %v2469_v24 = vsel %vm1879_vm3, %v15917_v6, 0  ;;  %v19321_v25 = vld [vmem:[#allocation28_spill] sm:$0xff] }
 0x3d1   :  { %3413 = vrot.lane.b32.xlu1 %v15411_v47, %s15223_s30  ;;  %v1856_v40 = vpack.c.bf16 %v1832_v17, %v1832_v17  ;;  %v2812_v17 = vsel %vm1879_vm3, %v19317_v3, 0 }
 0x3d2   :  { %v1859_v51 = vpack.c.bf16 %v1835_v53, %v1835_v53  ;;  %v19325_v53 = vld [vmem:[#allocation32_spill] sm:$0xff] }
 0x3d3   :  { %13459 = vmatmul.mubr.msk.bf16.vlgmr.msra.gmra.mrb[84].mxu1 %vm411_vm2, %v1856_v40  ;;  %v1764_v57 = vpop.xlane.xlu0 %1763  ;;  %13465 = vmatmul.mubr.msk.bf16.vlgmr.msra.gmra.mrb[64].mxu0 %vm411_vm2, %v1857_v56  ;;  %v19319_v40 = vld [vmem:[#allocation26_spill] sm:$0xff]  ;;  %v19320_v56 = vld [vmem:[#allocation15_spill] sm:$0xff] }
 0x3d4   :  { %13469 = vmatpush3.bf16.msra.mxu1 %v2322_v58  ;;  %14710 = vrcp.f32 %v1764_v57  ;;  %13475 = vmatpush3.bf16.msra.mxu0 %v2371_v55  ;;  %v19322_v58 = vld [vmem:[#allocation16_spill] sm:$0xff]  ;;  %v19323_v55 = vld [vmem:[#allocation30_spill] sm:$0xff]  ;;  %v19324_v57 = vld [vmem:[#allocation19_spill] sm:$0xff] }
 0x3d5   :  { %3515 = vrot.lane.b32.xlu1 %v15447_v62, %s15222_s6  ;;  %13470 = vmatprep.mubr.msk.bf16.mxu1 %vm15220_vm1, %v19311_v33 }
 0x3d6   :  { %v14709_v22 = vpop.eup %14708  ;;  %13476 = vmatprep.mubr.msk.bf16.mxu0 %vm15220_vm1, %v19311_v33  ;;  %13480 = vmatprep.subr.bf16.mxu1 %v19311_v33 }
 0x3d7   :  { %13486 = vmatprep.subr.bf16.mxu0 %v19311_v33  ;;  %v1834_v54 = vmul.f32 %v14709_v22, %v15987_v42 }
 0x3d9   :  { %3513 = vrot.lane.b32.xlu1 %v15447_v62, %s15223_s30  ;;  %v1858_v32 = vpack.c.bf16 %v1834_v54, %v1834_v54  ;;  %v19326_v54 = vld [vmem:[#allocation34_spill] sm:$0xff] }
 0x3db   :  { %13471 = vmatmul.mubr.msk.bf16.vlgmr.msra.gmra.mrb[88].mxu1 %vm411_vm2, %v1858_v32  ;;  %v1770_v44 = vpop.xlane.xlu0 %1769  ;;  %13477 = vmatmul.mubr.msk.bf16.vlgmr.msra.gmra.mrb[68].mxu0 %vm411_vm2, %v1859_v51  ;;  %v19327_v32 = vld [vmem:[#allocation21_spill] sm:$0xff]  ;;  %v19328_v51 = vld [vmem:[#allocation36_spill] sm:$0xff] }
 0x3dc   :  { %13481 = vmatpush3.bf16.msra.mxu1 %v2420_v52  ;;  %14712 = vrcp.f32 %v1770_v44  ;;  %13487 = vmatpush3.bf16.msra.mxu0 %v2469_v24  ;;  %v19329_v44 = vld [vmem:[#allocation38_spill] sm:$0xff] }
 0x3dd   :  { %3615 = vrot.lane.b32.xlu1 %v15453_v0, %s15222_s6  ;;  %13482 = vmatprep.mubr.msk.bf16.mxu1 %vm15220_vm1, %v19311_v33 }
 0x3de   :  { %v14711_v42 = vpop.eup %14710  ;;  %13492 = vmatprep.subr.bf16.mxu1 %v19311_v33  ;;  %13488 = vmatprep.mubr.msk.bf16.mxu0 %vm15220_vm1, %v19311_v33 }
 0x3df   :  { %v1836_v6 = vmul.f32 %v14711_v42, %v15992_v7  ;;  %13498 = vmatprep.subr.bf16.mxu0 %v19311_v33 }
 0x3e1   :  { %3613 = vrot.lane.b32.xlu1 %v15453_v0, %s15223_s30  ;;  %v1860_v39 = vpack.c.bf16 %v1836_v6, %v1836_v6  ;;  %v19330_v6 = vld [vmem:[#allocation23_spill] sm:$0xff] }
 0x3e3   :  { %3065 = vrot.lane.b32.xlu0 %v15361_v27, %s15222_s6  ;;  %13483 = vmatmul.mubr.msk.bf16.vlgmr.msra.gmra.mrb[92].mxu1 %vm411_vm2, %v1860_v39  ;;  %v1776_v61 = vpop.xlane.xlu0 %1775 }
 0x3e4   :  { %13493 = vmatpush3.bf16.msra.mxu1 %v2518_v15  ;;  %14714 = vrcp.f32 %v1776_v61  ;;  %13494 = vmatprep.mubr.msk.bf16.mxu1 %vm15220_vm1, %v19311_v33  ;;  %v19331_v15 = vld [vmem:[#allocation40_spill] sm:$0xff] }
 0x3e5   :  { %3715 = vrot.lane.b32.xlu1 %v15467_v5, %s15222_s6  ;;  %13504 = vmatprep.subr.bf16.mxu1 %v19311_v33 }
 0x3e6   :  { %v14713_v7 = vpop.eup %14712 }
 0x3e7   :  { %3063 = vrot.lane.b32.xlu0 %v15361_v27, %s15223_s30  ;;  %v1838_v21 = vmul.f32 %v14713_v7, %v16000_v18 }
 0x3e8   :  { %v1767_v38 = vpop.xlane.xlu1 %1766 }
 0x3e9   :  { %14716 = vrcp.f32 %v1767_v38  ;;  %3713 = vrot.lane.b32.xlu1 %v15467_v5, %s15223_s30  ;;  %v1862_v59 = vpack.c.bf16 %v1838_v21, %v1838_v21  ;;  %v19332_v21 = vld [vmem:[#allocation42_spill] sm:$0xff] }
 0x3eb   :  { %3165 = vrot.lane.b32.xlu0 %v15353_v23, %s15222_s6  ;;  %13495 = vmatmul.mubr.msk.bf16.vlgmr.msra.gmra.mrb[96].mxu1 %vm411_vm2, %v1862_v59  ;;  %v1782_v29 = vpop.xlane.xlu0 %1781 }
 0x3ec   :  { %13505 = vmatpush3.bf16.msra.mxu1 %v2616_v20  ;;  %14718 = vrcp.f32 %v1782_v29  ;;  %13506 = vmatprep.mubr.msk.bf16.mxu1 %vm15220_vm1, %v19311_v33  ;;  %v2905_v22 = vpop.permute.xlu1 %2904  ;;  %v19333_v29 = vld [vmem:[#allocation25_spill] sm:$0xff] }
 0x3ed   :  { %3815 = vrot.lane.b32.xlu1 %v15477_v8, %s15222_s6  ;;  %13516 = vmatprep.subr.bf16.mxu1 %v19311_v33 }
 0x3ee   :  { %v14715_v18 = vpop.eup %14714 }
 0x3ef   :  { %3163 = vrot.lane.b32.xlu0 %v15353_v23, %s15223_s30  ;;  %v1840_v1 = vmul.f32 %v14715_v18, %v16005_v16  ;;  %v19315_v16 = vld [vmem:[#allocation24_spill] sm:$0xff] }
 0x3f1   :  { %3813 = vrot.lane.b32.xlu1 %v15477_v8, %s15223_s30  ;;  %v1864_v9 = vpack.c.bf16 %v1840_v1, %v1840_v1 }
 0x3f3   :  { %v14717_v4 = vpop.eup %14716  ;;  %3265 = vrot.lane.b32.xlu0 %v19314_v2, %s15222_s6  ;;  %13507 = vmatmul.mubr.msk.bf16.vlgmr.msra.gmra.mrb[100].mxu1 %vm411_vm2, %v1864_v9 }
 0x3f4   :  { %13517 = vmatpush3.bf16.msra.mxu1 %v2714_v35  ;;  %v1837_v50 = vmul.f32 %v14717_v4, %v16009_v14  ;;  %13518 = vmatprep.mubr.msk.bf16.mxu1 %vm15220_vm1, %v19311_v33  ;;  %v19334_v4 = vld [vmem:[#allocation54_spill] sm:$0xff]  ;;  %v19335_v35 = vld [vmem:[#allocation44_spill] sm:$0xff] }
 0x3f5   :  { %3915 = vrot.lane.b32.xlu1 %v19315_v16, %s15222_s6  ;;  %13528 = vmatprep.subr.bf16.mxu1 %v19311_v33  ;;  %v2665_v34 = vsel %vm1879_vm3, %v19334_v4, 0 }
 0x3f6   :  { %v14719_v13 = vpop.eup %14718  ;;  %v1861_v12 = vpack.c.bf16 %v1837_v50, %v1837_v50 }
 0x3f7   :  { %3263 = vrot.lane.b32.xlu0 %v19314_v2, %s15223_s30  ;;  %v1842_v41 = vmul.f32 %v14719_v13, %v16013_v26  ;;  %v19318_v26 = vld [vmem:[#allocation13_spill] sm:$0xff] }
 0x3f8   :  { %13489 = vmatmul.mubr.msk.bf16.vlgmr.msra.gmra.mrb[72].mxu0 %vm411_vm2, %v1861_v12  ;;  %v2910_v12 = vsel %vm1879_vm3, %v2905_v22, 0 }
 0x3f9   :  { %13499 = vmatpush3.bf16.msra.mxu0 %v2567_v36  ;;  %3913 = vrot.lane.b32.xlu1 %v19315_v16, %s15223_s30  ;;  %v1866_v14 = vpack.c.bf16 %v1842_v41, %v1842_v41  ;;  %v19336_v41 = vld [vmem:[#allocation46_spill] sm:$0xff] }
 0x3fa   :  { %13500 = vmatprep.mubr.msk.bf16.mxu0 %vm15220_vm1, %v19311_v33  ;;  %13510 = vmatprep.subr.bf16.mxu0 %v19311_v33 }
 0x3fb   :  { %3365 = vrot.lane.b32.xlu0 %v19318_v26, %s15222_s6  ;;  %13519 = vmatmul.mubr.msk.bf16.vlgmr.msra.gmra.mrb[104].mxu1 %vm411_vm2, %v1866_v14  ;;  %v19337_v14 = vld [vmem:[#allocation27_spill] sm:$0xff] }
 0x3fc   :  { %13529 = vmatpush3.bf16.msra.mxu1 %v2812_v17  ;;  %13530 = vmatprep.mubr.msk.bf16.mxu1 %vm15220_vm1, %v19311_v33  ;;  %v19338_v17 = vld [vmem:[#allocation55_spill] sm:$0xff] }
 0x3fd   :  { %4015 = vrot.lane.b32.xlu1 %v19319_v40, %s15222_s6  ;;  %13540 = vmatprep.subr.bf16.mxu1 %v19311_v33  ;;  %v2763_v22 = vsel %vm1879_vm3, %v19338_v17, 0  ;;  %v19345_v17 = vld [vmem:[#allocation37_spill] sm:$0xff] }
 0x3ff   :  { %3363 = vrot.lane.b32.xlu0 %v19318_v26, %s15223_s30 }
 0x401   :  { %4013 = vrot.lane.b32.xlu1 %v19319_v40, %s15223_s30 }
 0x403   :  { %3465 = vrot.lane.b32.xlu0 %v19320_v56, %s15222_s6 }
 0x405   :  { %4115 = vrot.lane.b32.xlu1 %v19321_v25, %s15222_s6 }
 0x407   :  { %3463 = vrot.lane.b32.xlu0 %v19320_v56, %s15223_s30 }
 0x409   :  { %4113 = vrot.lane.b32.xlu1 %v19321_v25, %s15223_s30 }
 0x40b   :  { %3565 = vrot.lane.b32.xlu0 %v19322_v58, %s15222_s6 }
 0x40d   :  { %4215 = vrot.lane.b32.xlu1 %v19323_v55, %s15222_s6 }
 0x40f   :  { %3563 = vrot.lane.b32.xlu0 %v19322_v58, %s15223_s30 }
 0x411   :  { %4213 = vrot.lane.b32.xlu1 %v19323_v55, %s15223_s30 }
 0x413   :  { %3665 = vrot.lane.b32.xlu0 %v19324_v57, %s15222_s6 }
 0x415   :  { %4551 = vrot.lane.b32.xlu1 %v19325_v53, %s15224_s7 }
 0x417   :  { %3663 = vrot.lane.b32.xlu0 %v19324_v57, %s15223_s30 }
 0x419   :  { %4647 = vrot.lane.b32.xlu1 %v19326_v54, %s15224_s7 }
 0x41b   :  { %3765 = vrot.lane.b32.xlu0 %v19327_v32, %s15222_s6 }
 0x41d   :  { %4743 = vrot.lane.b32.xlu1 %v19328_v51, %s15224_s7  ;;  %v1773_v52 = vpop.xlane.xlu1 %1772 }
 0x41e   :  { %14720 = vrcp.f32 %v1773_v52  ;;  %v19339_v52 = vld [vmem:[#allocation48_spill] sm:$0xff] }
 0x41f   :  { %3763 = vrot.lane.b32.xlu0 %v19327_v32, %s15223_s30 }
 0x420   :  { %v1788_v24 = vpop.xlane.xlu0 %1787 }
 0x421   :  { %14722 = vrcp.f32 %v1788_v24  ;;  %4839 = vrot.lane.b32.xlu1 %v19329_v44, %s15224_s7  ;;  %v1779_v42 = vpop.xlane.xlu1 %1778 }
 0x422   :  { %14724 = vrcp.f32 %v1779_v42 }
 0x423   :  { %3865 = vrot.lane.b32.xlu0 %v19330_v6, %s15222_s6 }
 0x424   :  { %v1794_v39 = vpop.xlane.xlu0 %1793 }
 0x425   :  { %14726 = vrcp.f32 %v1794_v39  ;;  %4935 = vrot.lane.b32.xlu1 %v19331_v15, %s15224_s7  ;;  %v1785_v61 = vpop.xlane.xlu1 %1784 }
 0x426   :  { %14728 = vrcp.f32 %v1785_v61 }
 0x427   :  { %3863 = vrot.lane.b32.xlu0 %v19330_v6, %s15223_s30 }
 0x428   :  { %v14721_v7 = vpop.eup %14720  ;;  %v2954_v4 = vpop.permute.xlu0 %2953 }
 0x429   :  { %5031 = vrot.lane.b32.xlu1 %v19332_v21, %s15224_s7  ;;  %v1791_v38 = vpop.xlane.xlu1 %1790  ;;  %v1839_v59 = vmul.f32 %v14721_v7, %v16032_v28  ;;  %v19340_v7 = vld [vmem:[#allocation29_spill] sm:$0xff] }
 0x42a   :  { %14730 = vrcp.f32 %v1791_v38 }
 0x42b   :  { %v14723_v20 = vpop.eup %14722  ;;  %3965 = vrot.lane.b32.xlu0 %v19333_v29, %s15222_s6  ;;  %v1863_v18 = vpack.c.bf16 %v1839_v59, %v1839_v59 }
 0x42c   :  { %v14725_v1 = vpop.eup %14724  ;;  %v1844_v9 = vmul.f32 %v14723_v20, %v16038_v19  ;;  %v19341_v20 = vld [vmem:[#allocation58_spill] sm:$0xff] }
 0x42d   :  { %5127 = vrot.lane.b32.xlu1 %v19335_v35, %s15224_s7  ;;  %13501 = vmatmul.mubr.msk.bf16.vlgmr.msra.gmra.mrb[76].mxu0 %vm411_vm2, %v1863_v18  ;;  %v1797_v50 = vpop.xlane.xlu1 %1796  ;;  %v1841_v19 = vmul.f32 %v14725_v1, %v16036_v63 }
 0x42e   :  { %13511 = vmatpush3.bf16.msra.mxu0 %v2665_v34  ;;  %v1868_v28 = vpack.c.bf16 %v1844_v9, %v1844_v9  ;;  %13512 = vmatprep.mubr.msk.bf16.mxu0 %vm15220_vm1, %v19311_v33  ;;  %14732 = vrcp.f32 %v1797_v50  ;;  %v19342_v34 = vld [vmem:[#allocation31_spill] sm:$0xff] }
 0x42f   :  { %v14727_v13 = vpop.eup %14726  ;;  %3963 = vrot.lane.b32.xlu0 %v19333_v29, %s15223_s30  ;;  %13522 = vmatprep.subr.bf16.mxu0 %v19311_v33  ;;  %v1865_v63 = vpack.c.bf16 %v1841_v19, %v1841_v19 }
 0x430   :  { %13531 = vmatmul.mubr.msk.bf16.vlgmr.msra.gmra.mrb[108].mxu1 %vm411_vm2, %v1868_v28  ;;  %v1846_v36 = vmul.f32 %v14727_v13, %v16046_v43  ;;  %v14729_v3 = vpop.eup %14728  ;;  %v2959_v13 = vsel %vm1879_vm3, %v2954_v4, 0 }
 0x431   :  { %13541 = vmatpush3.bf16.msra.mxu1 %v2910_v12  ;;  %5223 = vrot.lane.b32.xlu1 %v19336_v41, %s15224_s7  ;;  %v3003_v49 = vpop.permute.xlu1 %3002  ;;  %v1843_v43 = vmul.f32 %v14729_v3, %v16044_v48  ;;  %v2861_v48 = vsel %vm1879_vm3, %v19341_v20, 0 }
 0x432   :  { %13542 = vmatprep.mubr.msk.bf16.mxu1 %vm15220_vm1, %v19311_v33  ;;  %13552 = vmatprep.subr.bf16.mxu1 %v19311_v33  ;;  %v1870_v42 = vpack.c.bf16 %v1846_v36, %v1846_v36  ;;  %v3008_v39 = vsel %vm1879_vm3, %v3003_v49, 0  ;;  %v19344_v36 = vld [vmem:[#allocation35_spill] sm:$0xff] }
 0x433   :  { %4065 = vrot.lane.b32.xlu0 %v19337_v14, %s15222_s6  ;;  %v1867_v38 = vpack.c.bf16 %v1843_v43, %v1843_v43  ;;  %v19347_v43 = vld [vmem:[#allocation41_spill] sm:$0xff] }
 0x434   :  { %v14731_v59 = vpop.eup %14730 }
 0x435   :  { %5319 = vrot.lane.b32.xlu1 %v19339_v52, %s15224_s7  ;;  %13513 = vmatmul.mubr.msk.bf16.vlgmr.msra.gmra.mrb[80].mxu0 %vm411_vm2, %v1865_v63  ;;  %v16315_v24 = vpop.permute.xlu1 %3115  ;;  %v1845_v1 = vmul.f32 %v14731_v59, %v16052_v10  ;;  %v19343_v10 = vld [vmem:[#allocation33_spill] sm:$0xff]  ;;  %v19348_v59 = vld [vmem:[#allocation43_spill] sm:$0xff] }
 0x436   :  { %13523 = vmatpush3.bf16.msra.mxu0 %v2763_v22  ;;  %13524 = vmatprep.mubr.msk.bf16.mxu0 %vm15220_vm1, %v19311_v33 }
 0x437   :  { %4063 = vrot.lane.b32.xlu0 %v19337_v14, %s15223_s30  ;;  %13534 = vmatprep.subr.bf16.mxu0 %v19311_v33  ;;  %v1869_v50 = vpack.c.bf16 %v1845_v1, %v1845_v1  ;;  %v19349_v1 = vld [vmem:[#allocation45_spill] sm:$0xff] }
 0x438   :  { %13543 = vmatmul.mubr.msk.bf16.vlgmr.msra.gmra.mrb[112].mxu1 %vm411_vm2, %v1870_v42  ;;  %v14733_v28 = vpop.eup %14732 }
 0x439   :  { %13553 = vmatpush3.bf16.msra.mxu1 %v3008_v39  ;;  %v16325_v61 = vpop.permute.xlu1 %3113  ;;  %13554 = vmatprep.mubr.msk.bf16.mxu1 %vm15220_vm1, %v19311_v33  ;;  %v1847_v12 = vmul.f32 %v14733_v28, %v16056_v60  ;;  %v19346_v60 = vld [vmem:[#allocation39_spill] sm:$0xff] }
 0x43a   :  { %13564 = vmatprep.subr.bf16.mxu1 %v19311_v33 }
 0x43b   :  { %4165 = vrot.lane.b32.xlu0 %v19340_v7, %s15222_s6  ;;  %v1871_v63 = vpack.c.bf16 %v1847_v12, %v1847_v12 }
 0x43d   :  { %13525 = vmatmul.mubr.msk.bf16.vlgmr.msra.gmra.mrb[84].mxu0 %vm411_vm2, %v1867_v38  ;;  %v16335_v18 = vpop.permute.xlu1 %3215 }
 0x43e   :  { %13535 = vmatpush3.bf16.msra.mxu0 %v2861_v48  ;;  %13536 = vmatprep.mubr.msk.bf16.mxu0 %vm15220_vm1, %v19311_v33 }
 0x43f   :  { %4163 = vrot.lane.b32.xlu0 %v19340_v7, %s15223_s30  ;;  %13546 = vmatprep.subr.bf16.mxu0 %v19311_v33 }
 0x441   :  { %v16343_v9 = vpop.permute.xlu1 %3213 }
 0x443   :  { %4599 = vrot.lane.b32.xlu0 %v19342_v34, %s15224_s7 }
 0x445   :  { %13537 = vmatmul.mubr.msk.bf16.vlgmr.msra.gmra.mrb[88].mxu0 %vm411_vm2, %v1869_v50  ;;  %v16349_v19 = vpop.permute.xlu1 %3315 }
 0x446   :  { %13547 = vmatpush3.bf16.msra.mxu0 %v2959_v13  ;;  %13548 = vmatprep.mubr.msk.bf16.mxu0 %vm15220_vm1, %v19311_v33 }
 0x447   :  { %4695 = vrot.lane.b32.xlu0 %v19343_v10, %s15224_s7  ;;  %13558 = vmatprep.subr.bf16.mxu0 %v19311_v33 }
 0x449   :  { %v16357_v49 = vpop.permute.xlu1 %3313 }
 0x44b   :  { %4791 = vrot.lane.b32.xlu0 %v19344_v36, %s15224_s7 }
 0x44d   :  { %13549 = vmatmul.mubr.msk.bf16.vlgmr.msra.gmra.mrb[92].mxu0 %vm411_vm2, %v1871_v63  ;;  %v16362_v3 = vpop.permute.xlu1 %3415 }
 0x44e   :  { %13560 = vmatprep.mubr.msk.bf16.mxu0 %vm15220_vm1, %v19311_v33 }
 0x44f   :  { %4887 = vrot.lane.b32.xlu0 %v19345_v17, %s15224_s7 }
 0x451   :  { %v16368_v22 = vpop.permute.xlu1 %3413 }
 0x453   :  { %4983 = vrot.lane.b32.xlu0 %v19346_v60, %s15224_s7 }
 0x455   :  { %v16372_v42 = vpop.permute.xlu1 %3515 }
 0x457   :  { %5079 = vrot.lane.b32.xlu0 %v19347_v43, %s15224_s7 }
 0x459   :  { %v16376_v38 = vpop.permute.xlu1 %3513 }
 0x45a   :  { %v1800_v39 = vpop.xlane.xlu0 %1799 }
 0x45b   :  { %14734 = vrcp.f32 %v1800_v39  ;;  %5175 = vrot.lane.b32.xlu0 %v19348_v59, %s15224_s7 }
 0x45d   :  { %v16383_v4 = vpop.permute.xlu1 %3615 }
 0x45e   :  { %v3066_v20 = vpop.permute.xlu0 %3065 }
 0x45f   :  { %v3071_v48 = vsel %vm411_vm2, %v3066_v20, 0  ;;  %5271 = vrot.lane.b32.xlu0 %v19349_v1, %s15224_s7 }
 0x460   :  { %13559 = vmatpush3.bf16.xpose.msra.mxu0 %v3071_v48  ;;  %v3121_v48 = vsel %vm411_vm2, %v16315_v24, 0  ;;  %v3221_v24 = vsel %vm411_vm2, %v16335_v18, 0 }
 0x461   :  { %13570 = vmatprep.subr.bf16.mxu0 %v19311_v33  ;;  %v16387_v63 = vpop.permute.xlu1 %3613 }
 0x462   :  { %v3064_v50 = vpop.permute.xlu0 %3063 }
 0x465   :  { %v14735_v28 = vpop.eup %14734 }
 0x466   :  { %v3166_v13 = vpop.permute.xlu0 %3165  ;;  %v1848_v12 = vmul.f32 %v14735_v28, %v16120_v37  ;;  %v16400_v37 = vpop.permute.xlu1 %3715 }
 0x467   :  { %v3171_v39 = vsel %vm411_vm2, %v3166_v13, 0  ;;  %13561 = vmatmul.mubr.msk.bf16.vlgmr.msra.gmra.mrb[96].mxu0 %vm411_vm2, %v3064_v50 }
 0x468   :  { %13571 = vmatpush3.bf16.xpose.msra.mxu0 %v3171_v39  ;;  %v1872_v20 = vpack.c.bf16 %v1848_v12, %v1848_v12  ;;  %13572 = vmatprep.mubr.msk.bf16.mxu0 %vm15220_vm1, %v19311_v33 }
 0x469   :  { %13582 = vmatprep.subr.bf16.mxu0 %v19311_v33 }
 0x46a   :  { %v3164_v1 = vpop.permute.xlu0 %3163  ;;  %13555 = vmatmul.mubr.msk.bf16.vlgmr.msra.gmra.mrb[116].mxu1 %vm411_vm2, %v1872_v20  ;;  %v16411_v12 = vpop.permute.xlu1 %3713 }
 0x46b   :  { %13565 = vmatpush3.bf16.xpose.msra.mxu1 %v3121_v48  ;;  %13566 = vmatprep.mubr.msk.bf16.mxu1 %vm15220_vm1, %v19311_v33 }
 0x46c   :  { %13576 = vmatprep.subr.bf16.mxu1 %v19311_v33 }
 0x46e   :  { %v3266_v50 = vpop.permute.xlu0 %3265 }
 0x46f   :  { %v3271_v28 = vsel %vm411_vm2, %v3266_v50, 0  ;;  %13573 = vmatmul.mubr.msk.bf16.vlgmr.msra.gmra.mrb[100].mxu0 %vm411_vm2, %v3164_v1 }
 0x470   :  { %13583 = vmatpush3.bf16.xpose.msra.mxu0 %v3271_v28  ;;  %13584 = vmatprep.mubr.msk.bf16.mxu0 %vm15220_vm1, %v19311_v33  ;;  %v3321_v28 = vsel %vm411_vm2, %v16349_v19, 0 }
 0x471   :  { %13594 = vmatprep.subr.bf16.mxu0 %v19311_v33 }
 0x472   :  { %v3264_v13 = vpop.permute.xlu0 %3263  ;;  %13567 = vmatmul.mubr.msk.bf16.vlgmr.msra.gmra.mrb[120].mxu1 %vm411_vm2, %v16325_v61  ;;  %v16422_v61 = vpop.permute.xlu1 %3815 }
 0x473   :  { %13577 = vmatpush3.bf16.xpose.msra.mxu1 %v3221_v24  ;;  %13578 = vmatprep.mubr.msk.bf16.mxu1 %vm15220_vm1, %v19311_v33 }
 0x474   :  { %13588 = vmatprep.subr.bf16.mxu1 %v19311_v33 }
 0x476   :  { %v3366_v1 = vpop.permute.xlu0 %3365  ;;  %v16416_v39 = vpop.f32.mrb[48].mxu0 }
 0x477   :  { %19350 = vst [vmem:[#allocation53_spill] sm:$0xff] %v16416_v39  ;;  %v3371_v20 = vsel %vm411_vm2, %v3366_v1, 0  ;;  %13585 = vmatmul.mubr.msk.bf16.vlgmr.msra.gmra.mrb[104].mxu0 %vm411_vm2, %v3264_v13  ;;  %v13418_v18 = vpop.f32.mrb[49].mxu0  ;;  %v16432_v1 = vpop.permute.xlu1 %3813 }
 0x478   :  { %13595 = vmatpush3.bf16.xpose.msra.mxu0 %v3371_v20  ;;  %v1920_v48 = vpop.f32.mrb[50].mxu0  ;;  %13596 = vmatprep.mubr.msk.bf16.mxu0 %vm15220_vm1, %v19311_v33 }
 0x479   :  { %v13419_v50 = vpop.f32.mrb[51].mxu0  ;;  %13606 = vmatprep.subr.bf16.mxu0 %v19311_v33 }
 0x47a   :  { %v3364_v24 = vpop.permute.xlu0 %3363  ;;  %13579 = vmatmul.mubr.msk.bf16.vlgmr.msra.gmra.mrb[124].mxu1 %vm411_vm2, %v16343_v9  ;;  %v3421_v9 = vsel %vm411_vm2, %v16362_v3, 0 }
 0x47b   :  { %13589 = vmatpush3.bf16.xpose.msra.mxu1 %v3321_v28  ;;  %13590 = vmatprep.mubr.msk.bf16.mxu1 %vm15220_vm1, %v19311_v33  ;;  %v16446_v18 = vpop.permute.xlu1 %3915 }
 0x47c   :  { %13600 = vmatprep.subr.bf16.mxu1 %v19311_v33 }
 0x47e   :  { %v3466_v13 = vpop.permute.xlu0 %3465 }
 0x47f   :  { %v3471_v20 = vsel %vm411_vm2, %v3466_v13, 0  ;;  %13597 = vmatmul.mubr.msk.bf16.vlgmr.msra.gmra.mrb[108].mxu0 %vm411_vm2, %v3364_v24 }
 0x480   :  { %13607 = vmatpush3.bf16.xpose.msra.mxu0 %v3471_v20  ;;  %13608 = vmatprep.mubr.msk.bf16.mxu0 %vm15220_vm1, %v19311_v33 }
 0x481   :  { %13618 = vmatprep.subr.bf16.mxu0 %v19311_v33 }
 0x482   :  { %v3464_v19 = vpop.permute.xlu0 %3463  ;;  %13591 = vmatmul.mubr.msk.bf16.vlgmr.msra.gmra.mrb[128].mxu1 %vm411_vm2, %v16357_v49 }
 0x483   :  { %13601 = vmatpush3.bf16.xpose.msra.mxu1 %v3421_v9  ;;  %13602 = vmatprep.mubr.msk.bf16.mxu1 %vm15220_vm1, %v19311_v33 }
 0x484   :  { %13612 = vmatprep.subr.bf16.mxu1 %v19311_v33 }
 0x486   :  { %v3566_v48 = vpop.permute.xlu0 %3565  ;;  %v16448_v50 = vpop.f32.mrb[52].mxu0 }
 0x487   :  { %19351 = vst [vmem:[#allocation12_spill] sm:$0xff] %v16448_v50  ;;  %v3571_v28 = vsel %vm411_vm2, %v3566_v48, 0  ;;  %v16451_v24 = vpop.f32.mrb[72].mxu1  ;;  %13609 = vmatmul.mubr.msk.bf16.vlgmr.msra.gmra.mrb[112].mxu0 %vm411_vm2, %v3464_v19  ;;  %v13430_v3 = vpop.f32.mrb[53].mxu0  ;;  %v3521_v48 = vsel %vm411_vm2, %v16372_v42, 0 }
 0x488   :  { %19352 = vst [vmem:[#allocation52_spill] sm:$0xff] %v16451_v24  ;;  %v13424_v13 = vpop.f32.mrb[73].mxu1  ;;  %13619 = vmatpush3.bf16.xpose.msra.mxu0 %v3571_v28  ;;  %v2018_v20 = vpop.f32.mrb[54].mxu0  ;;  %13620 = vmatprep.mubr.msk.bf16.mxu0 %vm15220_vm1, %v19311_v33 }
 0x489   :  { %v1969_v9 = vpop.f32.mrb[74].mxu1  ;;  %v13431_v52 = vpop.f32.mrb[55].mxu0  ;;  %13630 = vmatprep.subr.bf16.mxu0 %v19311_v33  ;;  %v3621_v13 = vsel %vm411_vm2, %v16383_v4, 0 }
 0x48a   :  { %v13425_v59 = vpop.f32.mrb[75].mxu1  ;;  %v3564_v43 = vpop.permute.xlu0 %3563  ;;  %13603 = vmatmul.mubr.msk.bf16.vlgmr.msra.gmra.mrb[132].mxu1 %vm411_vm2, %v16368_v22 }
 0x48b   :  { %13613 = vmatpush3.bf16.xpose.msra.mxu1 %v3521_v48  ;;  %13614 = vmatprep.mubr.msk.bf16.mxu1 %vm15220_vm1, %v19311_v33  ;;  %v16466_v19 = vpop.permute.xlu1 %3913 }
 0x48c   :  { %13624 = vmatprep.subr.bf16.mxu1 %v19311_v33 }
 0x48e   :  { %v3666_v28 = vpop.permute.xlu0 %3665 }
 0x48f   :  { %v3671_v52 = vsel %vm411_vm2, %v3666_v28, 0  ;;  %v16469_v3 = vpop.f32.mrb[76].mxu1  ;;  %13621 = vmatmul.mubr.msk.bf16.vlgmr.msra.gmra.mrb[116].mxu0 %vm411_vm2, %v3564_v43  ;;  %v16481_v43 = vpop.permute.xlu1 %4015 }
 0x490   :  { %19353 = vst [vmem:[#allocation56_spill] sm:$0xff] %v16469_v3  ;;  %v13436_v59 = vpop.f32.mrb[77].mxu1  ;;  %13631 = vmatpush3.bf16.xpose.msra.mxu0 %v3671_v52  ;;  %13632 = vmatprep.mubr.msk.bf16.mxu0 %vm15220_vm1, %v19311_v33 }
 0x491   :  { %v2067_v22 = vpop.f32.mrb[78].mxu1  ;;  %13642 = vmatprep.subr.bf16.mxu0 %v19311_v33 }
 0x492   :  { %v13437_v20 = vpop.f32.mrb[79].mxu1  ;;  %v3664_v9 = vpop.permute.xlu0 %3663  ;;  %13615 = vmatmul.mubr.msk.bf16.vlgmr.msra.gmra.mrb[136].mxu1 %vm411_vm2, %v16376_v38 }
 0x493   :  { %13625 = vmatpush3.bf16.xpose.msra.mxu1 %v3621_v13  ;;  %13626 = vmatprep.mubr.msk.bf16.mxu1 %vm15220_vm1, %v19311_v33  ;;  %v16492_v38 = vpop.permute.xlu1 %4013  ;;  %v3721_v13 = vsel %vm411_vm2, %v16400_v37, 0 }
 0x494   :  { %13636 = vmatprep.subr.bf16.mxu1 %v19311_v33 }
 0x496   :  { %v3766_v48 = vpop.permute.xlu0 %3765  ;;  %v16486_v28 = vpop.f32.mrb[56].mxu0 }
 0x497   :  { %19354 = vst [vmem:[#allocation13_spill] sm:$0xff] %v16486_v28  ;;  %v3771_v52 = vsel %vm411_vm2, %v3766_v48, 0  ;;  %13633 = vmatmul.mubr.msk.bf16.vlgmr.msra.gmra.mrb[120].mxu0 %vm411_vm2, %v3664_v9  ;;  %v13442_v4 = vpop.f32.mrb[57].mxu0 }
 0x498   :  { %13643 = vmatpush3.bf16.xpose.msra.mxu0 %v3771_v52  ;;  %v2116_v59 = vpop.f32.mrb[58].mxu0  ;;  %13644 = vmatprep.mubr.msk.bf16.mxu0 %vm15220_vm1, %v19311_v33  ;;  %v16504_v52 = vpop.permute.xlu1 %4115 }
 0x499   :  { %v13443_v22 = vpop.f32.mrb[59].mxu0  ;;  %13654 = vmatprep.subr.bf16.mxu0 %v19311_v33 }
 0x49a   :  { %v3764_v20 = vpop.permute.xlu0 %3763  ;;  %13627 = vmatmul.mubr.msk.bf16.vlgmr.msra.gmra.mrb[140].mxu1 %vm411_vm2, %v16387_v63 }
 0x49b   :  { %13637 = vmatpush3.bf16.xpose.msra.mxu1 %v3721_v13  ;;  %13638 = vmatprep.mubr.msk.bf16.mxu1 %vm15220_vm1, %v19311_v33 }
 0x49c   :  { %13648 = vmatprep.subr.bf16.mxu1 %v19311_v33 }
 0x49e   :  { %v3866_v9 = vpop.permute.xlu0 %3865  ;;  %v16502_v48 = vpop.f32.mrb[80].mxu1 }
 0x49f   :  { %19355 = vst [vmem:[#allocation54_spill] sm:$0xff] %v16502_v48  ;;  %v3871_v4 = vsel %vm411_vm2, %v3866_v9, 0  ;;  %v16509_v59 = vpop.f32.mrb[60].mxu0  ;;  %13645 = vmatmul.mubr.msk.bf16.vlgmr.msra.gmra.mrb[124].mxu0 %vm411_vm2, %v3764_v20  ;;  %v13448_v63 = vpop.f32.mrb[81].mxu1  ;;  %v3821_v9 = vsel %vm411_vm2, %v16422_v61, 0 }
 0x4a0   :  { %19356 = vst [vmem:[#allocation55_spill] sm:$0xff] %v16509_v59  ;;  %v13454_v22 = vpop.f32.mrb[61].mxu0  ;;  %13655 = vmatpush3.bf16.xpose.msra.mxu0 %v3871_v4  ;;  %13656 = vmatprep.mubr.msk.bf16.mxu0 %vm15220_vm1, %v19311_v33  ;;  %v2165_v13 = vpop.f32.mrb[82].mxu1 }
 0x4a1   :  { %v2214_v42 = vpop.f32.mrb[62].mxu0  ;;  %13666 = vmatprep.subr.bf16.mxu0 %v19311_v33  ;;  %v13449_v49 = vpop.f32.mrb[83].mxu1 }
 0x4a2   :  { %v3864_v50 = vpop.permute.xlu0 %3863  ;;  %13639 = vmatmul.mubr.msk.bf16.vlgmr.msra.gmra.mrb[144].mxu1 %vm411_vm2, %v16411_v12  ;;  %v13455_v37 = vpop.f32.mrb[63].mxu0 }
 0x4a3   :  { %13649 = vmatpush3.bf16.xpose.msra.mxu1 %v3821_v9  ;;  %13650 = vmatprep.mubr.msk.bf16.mxu1 %vm15220_vm1, %v19311_v33  ;;  %v16524_v42 = vpop.permute.xlu1 %4113  ;;  %v3921_v9 = vsel %vm411_vm2, %v16446_v18, 0 }
 0x4a4   :  { %13660 = vmatprep.subr.bf16.mxu1 %v19311_v33 }
 0x4a6   :  { %v3966_v20 = vpop.permute.xlu0 %3965  ;;  %v16522_v4 = vpop.f32.mrb[84].mxu1 }
 0x4a7   :  { %19357 = vst [vmem:[#allocation58_spill] sm:$0xff] %v16522_v4  ;;  %v3971_v63 = vsel %vm411_vm2, %v3966_v20, 0  ;;  %v16529_v49 = vpop.f32.mrb[64].mxu0  ;;  %13657 = vmatmul.mubr.msk.bf16.vlgmr.msra.gmra.mrb[128].mxu0 %vm411_vm2, %v3864_v50  ;;  %v13460_v12 = vpop.f32.mrb[85].mxu1 }
 0x4a8   :  { %19358 = vst [vmem:[#allocation60_spill] sm:$0xff] %v16529_v49  ;;  %v13466_v37 = vpop.f32.mrb[65].mxu0  ;;  %13667 = vmatpush3.bf16.xpose.msra.mxu0 %v3971_v63  ;;  %13668 = vmatprep.mubr.msk.bf16.mxu0 %vm15220_vm1, %v19311_v33  ;;  %v2263_v22 = vpop.f32.mrb[86].mxu1 }
 0x4a9   :  { %v2312_v13 = vpop.f32.mrb[66].mxu0  ;;  %13678 = vmatprep.subr.bf16.mxu0 %v19311_v33  ;;  %v13461_v20 = vpop.f32.mrb[87].mxu1 }
 0x4aa   :  { %v3964_v28 = vpop.permute.xlu0 %3963  ;;  %13651 = vmatmul.mubr.msk.bf16.vlgmr.msra.gmra.mrb[148].mxu1 %vm411_vm2, %v16432_v1  ;;  %v13467_v61 = vpop.f32.mrb[67].mxu0  ;;  %v4021_v20 = vsel %vm411_vm2, %v16481_v43, 0 }
 0x4ab   :  { %13661 = vmatpush3.bf16.xpose.msra.mxu1 %v3921_v9  ;;  %13662 = vmatprep.mubr.msk.bf16.mxu1 %vm15220_vm1, %v19311_v33  ;;  %v4216_v12 = vpop.permute.xlu1 %4215 }
 0x4ac   :  { %13672 = vmatprep.subr.bf16.mxu1 %v19311_v33 }
 0x4ae   :  { %v4066_v50 = vpop.permute.xlu0 %4065  ;;  %v16542_v63 = vpop.f32.mrb[88].mxu1 }
 0x4af   :  { %19359 = vst [vmem:[#allocation61_spill] sm:$0xff] %v16542_v63  ;;  %v4071_v37 = vsel %vm411_vm2, %v4066_v50, 0  ;;  %v16547_v22 = vpop.f32.mrb[68].mxu0  ;;  %13669 = vmatmul.mubr.msk.bf16.vlgmr.msra.gmra.mrb[132].mxu0 %vm411_vm2, %v3964_v28  ;;  %v13472_v1 = vpop.f32.mrb[89].mxu1 }
 0x4b0   :  { %19360 = vst [vmem:[#allocation62_spill] sm:$0xff] %v16547_v22  ;;  %v13478_v61 = vpop.f32.mrb[69].mxu0  ;;  %13679 = vmatpush3.bf16.xpose.msra.mxu0 %v4071_v37  ;;  %13680 = vmatprep.mubr.msk.bf16.mxu0 %vm15220_vm1, %v19311_v33  ;;  %v2361_v13 = vpop.f32.mrb[90].mxu1 }
 0x4b1   :  { %v2410_v9 = vpop.f32.mrb[70].mxu0  ;;  %13690 = vmatprep.subr.bf16.mxu0 %v19311_v33  ;;  %v13473_v50 = vpop.f32.mrb[91].mxu1 }
 0x4b2   :  { %v4064_v59 = vpop.permute.xlu0 %4063  ;;  %13663 = vmatmul.mubr.msk.bf16.vlgmr.msra.gmra.mrb[152].mxu1 %vm411_vm2, %v16466_v19  ;;  %v13479_v18 = vpop.f32.mrb[71].mxu0  ;;  %v4121_v9 = vsel %vm411_vm2, %v16504_v52, 0 }
 0x4b3   :  { %13673 = vmatpush3.bf16.xpose.msra.mxu1 %v4021_v20  ;;  %13674 = vmatprep.mubr.msk.bf16.mxu1 %vm15220_vm1, %v19311_v33  ;;  %v4214_v28 = vpop.permute.xlu1 %4213 }
 0x4b4   :  { %13684 = vmatprep.subr.bf16.mxu1 %v19311_v33 }
 0x4b6   :  { %v4166_v37 = vpop.permute.xlu0 %4165  ;;  %v16560_v1 = vpop.f32.mrb[92].mxu1 }
 0x4b7   :  { %19361 = vst [vmem:[#allocation63_spill] sm:$0xff] %v16560_v1  ;;  %v4171_v61 = vsel %vm411_vm2, %v4166_v37, 0  ;;  %13681 = vmatmul.mubr.msk.bf16.vlgmr.msra.gmra.mrb[136].mxu0 %vm411_vm2, %v4064_v59  ;;  %v13484_v13 = vpop.f32.mrb[93].mxu1  ;;  %v4552_v59 = vpop.permute.xlu1 %4551 }
 0x4b8   :  { %13691 = vmatpush3.bf16.xpose.msra.mxu0 %v4171_v61  ;;  %v2459_v19 = vpop.f32.mrb[94].mxu1  ;;  %13692 = vmatprep.mubr.msk.bf16.mxu0 %vm15220_vm1, %v19311_v33  ;;  %v4557_v37 = vsel %vm1879_vm3, %v4552_v59, 0  ;;  %v4221_v13 = vsel %vm411_vm2, %v4216_v12, 0 }
 0x4b9   :  { %v13485_v18 = vpop.f32.mrb[95].mxu1  ;;  %13702 = vmatprep.subr.bf16.mxu0 %v19311_v33 }
 0x4ba   :  { %13675 = vmatmul.mubr.msk.bf16.vlgmr.msra.gmra.mrb[156].mxu1 %vm411_vm2, %v16492_v38  ;;  %v4164_v20 = vpop.permute.xlu0 %4163 }
 0x4bb   :  { %13685 = vmatpush3.bf16.xpose.msra.mxu1 %v4121_v9  ;;  %13686 = vmatprep.mubr.msk.bf16.mxu1 %vm15220_vm1, %v19311_v33 }
 0x4bc   :  { %13696 = vmatprep.subr.bf16.mxu1 %v19311_v33 }
 0x4be   :  { %v16576_v50 = vpop.f32.mrb[96].mxu1  ;;  %v4600_v18 = vpop.permute.xlu0 %4599 }
 0x4bf   :  { %19362 = vst [vmem:[#allocation64_spill] sm:$0xff] %v16576_v50  ;;  %13693 = vmatmul.mubr.msk.bf16.vlgmr.msra.gmra.mrb[140].mxu0 %vm411_vm2, %v4164_v20  ;;  %v13496_v61 = vpop.f32.mrb[97].mxu1 }
 0x4c0   :  { %13703 = vmatpush3.bf16.msra.mxu0 %v4557_v37  ;;  %v2557_v52 = vpop.f32.mrb[98].mxu1  ;;  %13704 = vmatprep.mubr.msk.bf16.mxu0 %vm15220_vm1, %v19311_v33  ;;  %v4605_v37 = vsel %vm1879_vm3, %v4600_v18, 0 }
 0x4c1   :  { %v13497_v38 = vpop.f32.mrb[99].mxu1  ;;  %13714 = vmatprep.subr.bf16.mxu0 %v19311_v33 }
 0x4c2   :  { %13687 = vmatmul.mubr.msk.bf16.vlgmr.msra.gmra.mrb[160].mxu1 %vm411_vm2, %v16524_v42 }
 0x4c3   :  { %13697 = vmatpush3.bf16.xpose.msra.mxu1 %v4221_v13  ;;  %13698 = vmatprep.mubr.msk.bf16.mxu1 %vm15220_vm1, %v19311_v33 }
 0x4c4   :  { %13708 = vmatprep.subr.bf16.mxu1 %v19311_v33 }
 0x4c6   :  { %v16589_v19 = vpop.f32.mrb[100].mxu1 }
 0x4c7   :  { %19363 = vst [vmem:[#allocation65_spill] sm:$0xff] %v16589_v19  ;;  %v13508_v9 = vpop.f32.mrb[101].mxu1 }
 0x4c8   :  { %v2655_v59 = vpop.f32.mrb[102].mxu1 }
 0x4c9   :  { %v13509_v20 = vpop.f32.mrb[103].mxu1 }
 0x4ca   :  { %13699 = vmatmul.mubr.msk.bf16.vlgmr.msra.gmra.mrb[164].mxu1 %vm411_vm2, %v4214_v28 }
 0x4cb   :  { %13709 = vmatpush3.bf16.msra.mxu1 %v4605_v37  ;;  %v16593_v12 = vpop.f32.mrb[72].mxu0  ;;  %13710 = vmatprep.mubr.msk.bf16.mxu1 %vm15220_vm1, %v19311_v33 }
 0x4cc   :  { %19364 = vst [vmem:[#allocation66_spill] sm:$0xff] %v16593_v12  ;;  %v13490_v61 = vpop.f32.mrb[73].mxu0  ;;  %13720 = vmatprep.subr.bf16.mxu1 %v19311_v33 }
 0x4cd   :  { %v2508_v52 = vpop.f32.mrb[74].mxu0 }
 0x4ce   :  { %v13491_v38 = vpop.f32.mrb[75].mxu0  ;;  %v16600_v13 = vpop.f32.mrb[104].mxu1 }
 0x4cf   :  { %19365 = vst [vmem:[#allocation67_spill] sm:$0xff] %v16600_v13  ;;  %v13520_v9 = vpop.f32.mrb[105].mxu1 }
 0x4d0   :  { %v2753_v18 = vpop.f32.mrb[106].mxu1 }
 0x4d1   :  { %v13521_v59 = vpop.f32.mrb[107].mxu1 }
 0x500   :  { %v16602_v28 = vpop.f32.mrb[76].mxu0 }
 0x501   :  { %19366 = vst [vmem:[#allocation68_spill] sm:$0xff] %v16602_v28  ;;  %v13502_v37 = vpop.f32.mrb[77].mxu0 }
 0x502   :  { %v2606_v43 = vpop.f32.mrb[78].mxu0 }
 0x503   :  { %v13503_v22 = vpop.f32.mrb[79].mxu0  ;;  %v16606_v1 = vpop.f32.mrb[108].mxu1 }
 0x504   :  { %19367 = vst [vmem:[#allocation69_spill] sm:$0xff] %v16606_v1  ;;  %v13532_v61 = vpop.f32.mrb[109].mxu1 }
 0x505   :  { %v2851_v42 = vpop.f32.mrb[110].mxu1 }
 0x506   :  { %v13533_v12 = vpop.f32.mrb[111].mxu1 }
 0x508   :  { %v16608_v52 = vpop.f32.mrb[80].mxu0 }
 0x509   :  { %19368 = vst [vmem:[#allocation70_spill] sm:$0xff] %v16608_v52  ;;  %v13514_v9 = vpop.f32.mrb[81].mxu0 }
 0x50a   :  { %v2704_v18 = vpop.f32.mrb[82].mxu0 }
 0x50b   :  { %v13515_v59 = vpop.f32.mrb[83].mxu0  ;;  %v16612_v50 = vpop.f32.mrb[112].mxu1 }
 0x50c   :  { %19369 = vst [vmem:[#allocation71_spill] sm:$0xff] %v16612_v50  ;;  %v13544_v49 = vpop.f32.mrb[113].mxu1 }
 0x50d   :  { %v2949_v20 = vpop.f32.mrb[114].mxu1 }
 0x50e   :  { %v13545_v37 = vpop.f32.mrb[115].mxu1 }
 0x510   :  { %v16614_v43 = vpop.f32.mrb[84].mxu0 }
 0x511   :  { %19370 = vst [vmem:[#allocation72_spill] sm:$0xff] %v16614_v43  ;;  %v13526_v42 = vpop.f32.mrb[85].mxu0 }
 0x512   :  { %v2802_v12 = vpop.f32.mrb[86].mxu0 }
 0x513   :  { %v13527_v61 = vpop.f32.mrb[87].mxu0 }
 0x518   :  { %v16618_v28 = vpop.f32.mrb[88].mxu0 }
 0x519   :  { %19371 = vst [vmem:[#allocation73_spill] sm:$0xff] %v16618_v28  ;;  %v13538_v18 = vpop.f32.mrb[89].mxu0 }
 0x51a   :  { %v2900_v59 = vpop.f32.mrb[90].mxu0 }
 0x51b   :  { %v13539_v38 = vpop.f32.mrb[91].mxu0 }
 0x520   :  { %v16622_v52 = vpop.f32.mrb[92].mxu0 }
 0x521   :  { %19372 = vst [vmem:[#allocation74_spill] sm:$0xff] %v16622_v52  ;;  %v13550_v49 = vpop.f32.mrb[93].mxu0 }
 0x522   :  { %v2998_v20 = vpop.f32.mrb[94].mxu0 }
 0x523   :  { %v13551_v37 = vpop.f32.mrb[95].mxu0 }
 0x53a   :  { %v16624_v13 = vpop.f32.mrb[96].mxu0 }
 0x53b   :  { %v13562_v19 = vpop.f32.mrb[97].mxu0  ;;  %v4263_v42 = vsel %vm411_vm2, %v16624_v13, -inf }
 0x53c   :  { %4264 = vmax.xlane.f32.xlu0 %v4263_v42  ;;  %v3110_v12 = vpop.f32.mrb[98].mxu0 }
 0x53d   :  { %v16628_v61 = vpop.f32.mrb[116].mxu1  ;;  %v13563_v22 = vpop.f32.mrb[99].mxu0 }
 0x53e   :  { %19373 = vst [vmem:[#allocation75_spill] sm:$0xff] %v16628_v61  ;;  %v13556_v38 = vpop.f32.mrb[117].mxu1 }
 0x53f   :  { %v3047_v59 = vpop.f32.mrb[118].mxu1 }
 0x540   :  { %v13557_v9 = vpop.f32.mrb[119].mxu1 }
 0x542   :  { %v16632_v49 = vpop.f32.mrb[100].mxu0 }
 0x543   :  { %v13574_v20 = vpop.f32.mrb[101].mxu0  ;;  %v4269_v19 = vsel %vm411_vm2, %v16632_v49, -inf }
 0x544   :  { %4270 = vmax.xlane.f32.xlu0 %v4269_v19  ;;  %v3210_v37 = vpop.f32.mrb[102].mxu0 }
 0x545   :  { %v16636_v28 = vpop.f32.mrb[120].mxu1  ;;  %v13575_v42 = vpop.f32.mrb[103].mxu0 }
 0x546   :  { %v13568_v12 = vpop.f32.mrb[121].mxu1  ;;  %v4266_v22 = vsel %vm411_vm2, %v16636_v28, -inf }
 0x547   :  { %4267 = vmax.xlane.f32.xlu1 %v4266_v22  ;;  %v3160_v18 = vpop.f32.mrb[122].mxu1 }
 0x548   :  { %v13569_v38 = vpop.f32.mrb[123].mxu1 }
 0x54a   :  { %v16640_v59 = vpop.f32.mrb[104].mxu0 }
 0x54b   :  { %v13586_v9 = vpop.f32.mrb[105].mxu0  ;;  %v4275_v20 = vsel %vm411_vm2, %v16640_v59, -inf }
 0x54c   :  { %v3310_v52 = vpop.f32.mrb[106].mxu0  ;;  %4276 = vmax.xlane.f32.xlu1 %v4275_v20 }
 0x54d   :  { %v16644_v19 = vpop.f32.mrb[124].mxu1  ;;  %v13587_v37 = vpop.f32.mrb[107].mxu0 }
 0x54e   :  { %v13580_v61 = vpop.f32.mrb[125].mxu1  ;;  %v4272_v42 = vsel %vm411_vm2, %v16644_v19, -inf }
 0x54f   :  { %4273 = vmax.xlane.f32.xlu0 %v4272_v42  ;;  %v3260_v12 = vpop.f32.mrb[126].mxu1 }
 0x550   :  { %v13581_v22 = vpop.f32.mrb[127].mxu1 }
 0x552   :  { %v16648_v18 = vpop.f32.mrb[108].mxu0 }
 0x553   :  { %v13598_v38 = vpop.f32.mrb[109].mxu0  ;;  %v4281_v9 = vsel %vm411_vm2, %v16648_v18, -inf }
 0x554   :  { %v3410_v50 = vpop.f32.mrb[110].mxu0  ;;  %4282 = vmax.xlane.f32.xlu1 %v4281_v9 }
 0x555   :  { %v16652_v52 = vpop.f32.mrb[128].mxu1  ;;  %v13599_v20 = vpop.f32.mrb[111].mxu0 }
 0x556   :  { %v13592_v43 = vpop.f32.mrb[129].mxu1  ;;  %v4278_v61 = vsel %vm411_vm2, %v16652_v52, -inf }
 0x557   :  { %4279 = vmax.xlane.f32.xlu0 %v4278_v61  ;;  %v3360_v37 = vpop.f32.mrb[130].mxu1 }
 0x558   :  { %v13593_v42 = vpop.f32.mrb[131].mxu1 }
 0x55a   :  { %v16656_v12 = vpop.f32.mrb[112].mxu0 }
 0x55b   :  { %v13610_v22 = vpop.f32.mrb[113].mxu0  ;;  %v4287_v38 = vsel %vm411_vm2, %v16656_v12, -inf }
 0x55c   :  { %v3510_v1 = vpop.f32.mrb[114].mxu0  ;;  %4288 = vmax.xlane.f32.xlu1 %v4287_v38 }
 0x55d   :  { %v16660_v50 = vpop.f32.mrb[132].mxu1  ;;  %v13611_v9 = vpop.f32.mrb[115].mxu0 }
 0x55e   :  { %v13604_v63 = vpop.f32.mrb[133].mxu1  ;;  %v4284_v43 = vsel %vm411_vm2, %v16660_v50, -inf }
 0x55f   :  { %4285 = vmax.xlane.f32.xlu0 %v4284_v43  ;;  %v3460_v20 = vpop.f32.mrb[134].mxu1 }
 0x560   :  { %v13605_v61 = vpop.f32.mrb[135].mxu1 }
 0x562   :  { %v16664_v37 = vpop.f32.mrb[116].mxu0 }
 0x563   :  { %v13622_v42 = vpop.f32.mrb[117].mxu0  ;;  %v4293_v22 = vsel %vm411_vm2, %v16664_v37, -inf }
 0x564   :  { %v3610_v4 = vpop.f32.mrb[118].mxu0  ;;  %4294 = vmax.xlane.f32.xlu1 %v4293_v22 }
 0x565   :  { %v16668_v1 = vpop.f32.mrb[136].mxu1  ;;  %v13623_v38 = vpop.f32.mrb[119].mxu0 }
 0x566   :  { %v13616_v48 = vpop.f32.mrb[137].mxu1  ;;  %v4290_v63 = vsel %vm411_vm2, %v16668_v1, -inf }
 0x567   :  { %4291 = vmax.xlane.f32.xlu0 %v4290_v63  ;;  %v3560_v9 = vpop.f32.mrb[138].mxu1 }
 0x568   :  { %v13617_v43 = vpop.f32.mrb[139].mxu1 }
 0x56a   :  { %v16672_v20 = vpop.f32.mrb[120].mxu0 }
 0x56b   :  { %v13634_v61 = vpop.f32.mrb[121].mxu0  ;;  %v4299_v42 = vsel %vm411_vm2, %v16672_v20, -inf }
 0x56c   :  { %v3710_v3 = vpop.f32.mrb[122].mxu0  ;;  %4300 = vmax.xlane.f32.xlu1 %v4299_v42 }
 0x56d   :  { %v16676_v4 = vpop.f32.mrb[140].mxu1  ;;  %v13635_v22 = vpop.f32.mrb[123].mxu0 }
 0x56e   :  { %v13628_v39 = vpop.f32.mrb[141].mxu1  ;;  %v4296_v48 = vsel %vm411_vm2, %v16676_v4, -inf }
 0x56f   :  { %4297 = vmax.xlane.f32.xlu0 %v4296_v48  ;;  %v3660_v38 = vpop.f32.mrb[142].mxu1 }
 0x570   :  { %v13629_v63 = vpop.f32.mrb[143].mxu1 }
 0x572   :  { %v16680_v9 = vpop.f32.mrb[124].mxu0 }
 0x573   :  { %v13646_v43 = vpop.f32.mrb[125].mxu0  ;;  %v4305_v61 = vsel %vm411_vm2, %v16680_v9, -inf }
 0x574   :  { %v3810_v24 = vpop.f32.mrb[126].mxu0  ;;  %4306 = vmax.xlane.f32.xlu1 %v4305_v61 }
 0x575   :  { %v16684_v3 = vpop.f32.mrb[144].mxu1  ;;  %v13647_v42 = vpop.f32.mrb[127].mxu0 }
 0x576   :  { %v13640_v41 = vpop.f32.mrb[145].mxu1  ;;  %v4302_v39 = vsel %vm411_vm2, %v16684_v3, -inf }
 0x577   :  { %4303 = vmax.xlane.f32.xlu0 %v4302_v39  ;;  %v3760_v22 = vpop.f32.mrb[146].mxu1 }
 0x578   :  { %v13641_v48 = vpop.f32.mrb[147].mxu1 }
 0x579   :  { %v19374_v48 = vld [vmem:[#allocation49_spill] sm:$0xff] }
 0x57a   :  { %v16688_v38 = vpop.f32.mrb[128].mxu0 }
 0x57b   :  { %v13658_v63 = vpop.f32.mrb[129].mxu0 }
 0x57c   :  { %v3910_v60 = vpop.f32.mrb[130].mxu0 }
 0x57d   :  { %v16690_v43 = vpop.f32.mrb[148].mxu1  ;;  %v13659_v35 = vpop.f32.mrb[131].mxu0 }
 0x57e   :  { %v13652_v17 = vpop.f32.mrb[149].mxu1  ;;  %v4308_v24 = vsel %vm411_vm2, %v16690_v43, -inf }
 0x57f   :  { %4309 = vmax.xlane.f32.xlu0 %v4308_v24  ;;  %v3860_v61 = vpop.f32.mrb[150].mxu1  ;;  %v19375_v17 = vld [vmem:[#allocation50_spill] sm:$0xff] }
 0x580   :  { %v13653_v41 = vpop.f32.mrb[151].mxu1 }
 0x582   :  { %v16694_v42 = vpop.f32.mrb[132].mxu0 }
 0x583   :  { %v13670_v21 = vpop.f32.mrb[133].mxu0 }
 0x584   :  { %v4010_v39 = vpop.f32.mrb[134].mxu0 }
 0x585   :  { %v13671_v22 = vpop.f32.mrb[135].mxu0  ;;  %5415 = vrot.lane.b32.xlu1 %v19374_v48, %s15224_s7  ;;  %v16698_v63 = vpop.f32.mrb[152].mxu1 }
 0x586   :  { %v13664_v60 = vpop.f32.mrb[153].mxu1 }
 0x587   :  { %v3960_v36 = vpop.f32.mrb[154].mxu1 }
 0x588   :  { %v13665_v35 = vpop.f32.mrb[155].mxu1  ;;  %v19376_v36 = vld [vmem:[#allocation47_spill] sm:$0xff] }
 0x589   :  { %5463 = vrot.lane.b32.xlu1 %v19375_v17, %s15224_s7 }
 0x58a   :  { %v16702_v15 = vpop.f32.mrb[136].mxu0 }
 0x58b   :  { %v13682_v24 = vpop.f32.mrb[137].mxu0 }
 0x58c   :  { %v4110_v61 = vpop.f32.mrb[138].mxu0 }
 0x58d   :  { %v16704_v41 = vpop.f32.mrb[156].mxu1  ;;  %v13683_v21 = vpop.f32.mrb[139].mxu0 }
 0x58e   :  { %v13676_v39 = vpop.f32.mrb[157].mxu1 }
 0x58f   :  { %v4060_v22 = vpop.f32.mrb[158].mxu1 }
 0x590   :  { %v13677_v10 = vpop.f32.mrb[159].mxu1  ;;  %v16714_v22 = vpop.permute.xlu0 %4695 }
 0x591   :  { %v16716_v10 = vpop.permute.xlu1 %4647 }
 0x592   :  { %v16706_v44 = vpop.f32.mrb[140].mxu0 }
 0x593   :  { %v13694_v48 = vpop.f32.mrb[141].mxu0 }
 0x594   :  { %v4210_v34 = vpop.f32.mrb[142].mxu0  ;;  %v16718_v48 = vpop.permute.xlu0 %4791 }
 0x595   :  { %v13695_v60 = vpop.f32.mrb[143].mxu0  ;;  %5367 = vrot.lane.b32.xlu0 %v19376_v36, %s15224_s7  ;;  %v16710_v35 = vpop.f32.mrb[160].mxu1 }
 0x596   :  { %v13688_v17 = vpop.f32.mrb[161].mxu1  ;;  %v16720_v34 = vpop.permute.xlu1 %4743  ;;  %v4311_v60 = vsel %vm411_vm2, %v16688_v38, -inf  ;;  %v4326_v53 = vsel %vm411_vm2, %v16710_v35, -inf }
 0x597   :  { %v4160_v51 = vpop.f32.mrb[162].mxu1 }
 0x598   :  { %v13689_v24 = vpop.f32.mrb[163].mxu1  ;;  %v16724_v36 = vpop.permute.xlu0 %4887  ;;  %v4317_v51 = vsel %vm411_vm2, %v16694_v42, -inf }
 0x599   :  { %v4314_v24 = vsel %vm411_vm2, %v16698_v63, -inf }
 0x59c   :  { %v16730_v17 = vpop.permute.xlu0 %4983 }
 0x59d   :  { %v16712_v61 = vpop.f32.mrb[164].mxu1 }
 0x59e   :  { %v13700_v54 = vpop.f32.mrb[165].mxu1 }
 0x59f   :  { %v4260_v21 = vpop.f32.mrb[166].mxu1  ;;  %v16728_v54 = vpop.permute.xlu1 %4839 }
 0x5a0   :  { %v13701_v39 = vpop.f32.mrb[167].mxu1  ;;  %v4323_v21 = vsel %vm411_vm2, %v16702_v15, -inf  ;;  %v16742_v7 = vpop.permute.xlu0 %5079 }
 0x5a1   :  { %v4320_v39 = vsel %vm411_vm2, %v16704_v41, -inf }
 0x5a4   :  { %v16748_v14 = vpop.permute.xlu0 %5175 }
 0x5ad   :  { %4312 = vmax.xlane.f32.xlu1 %v4311_v60  ;;  %v16738_v60 = vpop.permute.xlu1 %4935 }
 0x5b1   :  { %4318 = vmax.xlane.f32.xlu1 %v4317_v51  ;;  %v4329_v51 = vsel %vm411_vm2, %v16706_v44, -inf }
 0x5b4   :  { %4315 = vmax.xlane.f32.xlu0 %v4314_v24  ;;  %v16746_v24 = vpop.permute.xlu1 %5031 }
 0x5b5   :  { %4324 = vmax.xlane.f32.xlu1 %v4323_v21  ;;  %v4332_v21 = vsel %vm411_vm2, %v16712_v61, -inf }
 0x5b8   :  { %4321 = vmax.xlane.f32.xlu0 %v4320_v39  ;;  %v16752_v55 = vpop.permute.xlu1 %5127  ;;  %v16754_v39 = vpop.permute.xlu0 %5271 }
 0x5b9   :  { %4330 = vmax.xlane.f32.xlu1 %v4329_v51 }
 0x5bc   :  { %4327 = vmax.xlane.f32.xlu0 %v4326_v53  ;;  %v16756_v25 = vpop.permute.xlu1 %5223 }
 0x5c0   :  { %4333 = vmax.xlane.f32.xlu0 %v4332_v21  ;;  %v16759_v53 = vpop.permute.xlu1 %5319 }
 0x5c9   :  { %v4265_v29 = vpop.xlane.xlu0 %4264 }
 0x5ca   :  { %v4335_v51 = vsub.f32 %v16624_v13, %v4265_v29 }
 0x5cc   :  { %v4359_v6 = vmul.f32 1.442695, %v4335_v51 }
 0x5ce   :  { %14736 = vpow2.f32 %v4359_v6 }
 0x5d1   :  { %v4271_v40 = vpop.xlane.xlu0 %4270 }
 0x5d2   :  { %v4337_v32 = vsub.f32 %v16632_v49, %v4271_v40 }
 0x5d4   :  { %v4363_v16 = vmul.f32 1.442695, %v4337_v32  ;;  %v4268_v57 = vpop.xlane.xlu1 %4267 }
 0x5d5   :  { %v4336_v21 = vsub.f32 %v16636_v28, %v4268_v57 }
 0x5d6   :  { %14738 = vpow2.f32 %v4363_v16 }
 0x5d7   :  { %v4361_v8 = vmul.f32 1.442695, %v4336_v21 }
 0x5d8   :  { %v16763_v5 = vpop.eup %14736 }
 0x5d9   :  { %14740 = vpow2.f32 %v4361_v8  ;;  %v4277_v0 = vpop.xlane.xlu1 %4276  ;;  %v4407_v29 = vsel %vm411_vm2, %v16763_v5, 0.0 }
 0x5da   :  { %v4339_v6 = vsub.f32 %v16640_v59, %v4277_v0  ;;  %4408 = vadd.xlane.f32.xlu1 %v4407_v29 }
 0x5dc   :  { %v4367_v13 = vmul.f32 1.442695, %v4339_v6  ;;  %v4274_v51 = vpop.xlane.xlu0 %4273 }
 0x5dd   :  { %v4338_v40 = vsub.f32 %v16644_v19, %v4274_v51 }
 0x5de   :  { %14742 = vpow2.f32 %v4367_v13 }
 0x5df   :  { %v4365_v32 = vmul.f32 1.442695, %v4338_v40 }
 0x5e0   :  { %v16769_v49 = vpop.eup %14738 }
 0x5e1   :  { %14744 = vpow2.f32 %v4365_v32  ;;  %v4283_v16 = vpop.xlane.xlu1 %4282  ;;  %v4413_v8 = vsel %vm411_vm2, %v16769_v49, 0.0 }
 0x5e2   :  { %v4341_v57 = vsub.f32 %v16648_v18, %v4283_v16  ;;  %4414 = vadd.xlane.f32.xlu1 %v4413_v8 }
 0x5e3   :  { %v16774_v28 = vpop.eup %14740 }
 0x5e4   :  { %v4371_v0 = vmul.f32 1.442695, %v4341_v57  ;;  %v4280_v59 = vpop.xlane.xlu0 %4279  ;;  %v4410_v21 = vsel %vm411_vm2, %v16774_v28, 0.0 }
 0x5e5   :  { %v4340_v19 = vsub.f32 %v16652_v52, %v4280_v59  ;;  %4411 = vadd.xlane.f32.xlu0 %v4410_v21 }
 0x5e6   :  { %14746 = vpow2.f32 %v4371_v0 }
 0x5e7   :  { %v4369_v29 = vmul.f32 1.442695, %v4340_v19 }
 0x5e8   :  { %v16779_v6 = vpop.eup %14742 }
 0x5e9   :  { %14748 = vpow2.f32 %v4369_v29  ;;  %v4289_v13 = vpop.xlane.xlu1 %4288  ;;  %v4419_v18 = vsel %vm411_vm2, %v16779_v6, 0.0 }
 0x5ea   :  { %v4343_v51 = vsub.f32 %v16656_v12, %v4289_v13  ;;  %4420 = vadd.xlane.f32.xlu1 %v4419_v18 }
 0x5eb   :  { %v16784_v40 = vpop.eup %14744 }
 0x5ec   :  { %v4375_v32 = vmul.f32 1.442695, %v4343_v51  ;;  %v4286_v16 = vpop.xlane.xlu0 %4285  ;;  %v4416_v52 = vsel %vm411_vm2, %v16784_v40, 0.0 }
 0x5ed   :  { %v4342_v8 = vsub.f32 %v16660_v50, %v4286_v16  ;;  %4417 = vadd.xlane.f32.xlu0 %v4416_v52 }
 0x5ee   :  { %14750 = vpow2.f32 %v4375_v32 }
 0x5ef   :  { %v4373_v57 = vmul.f32 1.442695, %v4342_v8 }
 0x5f0   :  { %v16789_v0 = vpop.eup %14746 }
 0x5f1   :  { %14752 = vpow2.f32 %v4373_v57  ;;  %v4295_v59 = vpop.xlane.xlu1 %4294  ;;  %v4425_v12 = vsel %vm411_vm2, %v16789_v0, 0.0 }
 0x5f2   :  { %v4345_v21 = vsub.f32 %v16664_v37, %v4295_v59  ;;  %4426 = vadd.xlane.f32.xlu1 %v4425_v12 }
 0x5f3   :  { %v16794_v19 = vpop.eup %14748 }
 0x5f4   :  { %v4379_v29 = vmul.f32 1.442695, %v4345_v21  ;;  %v4292_v13 = vpop.xlane.xlu0 %4291  ;;  %v4422_v50 = vsel %vm411_vm2, %v16794_v19, 0.0 }
 0x5f5   :  { %v4344_v18 = vsub.f32 %v16668_v1, %v4292_v13  ;;  %4423 = vadd.xlane.f32.xlu0 %v4422_v50 }
 0x5f6   :  { %14754 = vpow2.f32 %v4379_v29 }
 0x5f7   :  { %v4377_v51 = vmul.f32 1.442695, %v4344_v18 }
 0x5f8   :  { %v16799_v32 = vpop.eup %14750 }
 0x5f9   :  { %14756 = vpow2.f32 %v4377_v51  ;;  %v4301_v16 = vpop.xlane.xlu1 %4300  ;;  %v4431_v37 = vsel %vm411_vm2, %v16799_v32, 0.0 }
 0x5fa   :  { %v4347_v52 = vsub.f32 %v16672_v20, %v4301_v16  ;;  %4432 = vadd.xlane.f32.xlu1 %v4431_v37 }
 0x5fb   :  { %v16804_v8 = vpop.eup %14752 }
 0x5fc   :  { %v4383_v57 = vmul.f32 1.442695, %v4347_v52  ;;  %v4298_v59 = vpop.xlane.xlu0 %4297  ;;  %v4428_v1 = vsel %vm411_vm2, %v16804_v8, 0.0 }
 0x5fd   :  { %v4346_v12 = vsub.f32 %v16676_v4, %v4298_v59  ;;  %4429 = vadd.xlane.f32.xlu0 %v4428_v1 }
 0x5fe   :  { %14758 = vpow2.f32 %v4383_v57 }
 0x5ff   :  { %v4381_v21 = vmul.f32 1.442695, %v4346_v12 }
 0x600   :  { %v16809_v29 = vpop.eup %14754 }
 0x601   :  { %14760 = vpow2.f32 %v4381_v21  ;;  %v4307_v13 = vpop.xlane.xlu1 %4306  ;;  %v4437_v20 = vsel %vm411_vm2, %v16809_v29, 0.0 }
 0x602   :  { %v4349_v50 = vsub.f32 %v16680_v9, %v4307_v13  ;;  %4438 = vadd.xlane.f32.xlu1 %v4437_v20 }
 0x603   :  { %v16814_v18 = vpop.eup %14756 }
 0x604   :  { %v4387_v51 = vmul.f32 1.442695, %v4349_v50  ;;  %v4304_v16 = vpop.xlane.xlu0 %4303  ;;  %v4434_v4 = vsel %vm411_vm2, %v16814_v18, 0.0 }
 0x605   :  { %v4348_v37 = vsub.f32 %v16684_v3, %v4304_v16  ;;  %4435 = vadd.xlane.f32.xlu0 %v4434_v4  ;;  %v16840_v4 = vpop.permute.xlu1 %5415 }
 0x606   :  { %14762 = vpow2.f32 %v4387_v51  ;;  %19377 = vst [vmem:[#allocation76_spill] sm:$0xff] %v16840_v4 }
 0x607   :  { %v4385_v52 = vmul.f32 1.442695, %v4348_v37 }
 0x608   :  { %v16819_v57 = vpop.eup %14758 }
 0x609   :  { %14764 = vpow2.f32 %v4385_v52  ;;  %v4443_v59 = vsel %vm411_vm2, %v16819_v57, 0.0  ;;  %v16842_v37 = vpop.permute.xlu1 %5463 }
 0x60a   :  { %4444 = vadd.xlane.f32.xlu1 %v4443_v59  ;;  %19378 = vst [vmem:[#allocation77_spill] sm:$0xff] %v16842_v37 }
 0x60b   :  { %v16823_v9 = vpop.eup %14760 }
 0x60c   :  { %v4310_v1 = vpop.xlane.xlu0 %4309  ;;  %v4440_v12 = vsel %vm411_vm2, %v16823_v9, 0.0 }
 0x60d   :  { %v4350_v21 = vsub.f32 %v16690_v43, %v4310_v1  ;;  %4441 = vadd.xlane.f32.xlu0 %v4440_v12 }
 0x60f   :  { %v4389_v3 = vmul.f32 1.442695, %v4350_v21 }
 0x610   :  { %v16828_v13 = vpop.eup %14762  ;;  %v16845_v1 = vpop.permute.xlu0 %5367 }
 0x611   :  { %14766 = vpow2.f32 %v4389_v3  ;;  %v4449_v20 = vsel %vm411_vm2, %v16828_v13, 0.0 }
 0x612   :  { %4450 = vadd.xlane.f32.xlu1 %v4449_v20 }
 0x613   :  { %v16832_v50 = vpop.eup %14764 }
 0x614   :  { %v4446_v51 = vsel %vm411_vm2, %v16832_v50, 0.0 }
 0x615   :  { %4447 = vadd.xlane.f32.xlu0 %v4446_v51 }
 0x61b   :  { %v16836_v16 = vpop.eup %14766 }
 0x61c   :  { %v4452_v43 = vsel %vm411_vm2, %v16836_v16, 0.0 }
 0x61d   :  { %4453 = vadd.xlane.f32.xlu0 %v4452_v43 }
 0x63a   :  { %v4313_v52 = vpop.xlane.xlu1 %4312 }
 0x63b   :  { %v4351_v59 = vsub.f32 %v16688_v38, %v4313_v52 }
 0x63d   :  { %v4391_v12 = vmul.f32 1.442695, %v4351_v59 }
 0x63e   :  { %v4319_v21 = vpop.xlane.xlu1 %4318 }
 0x63f   :  { %14768 = vpow2.f32 %v4391_v12  ;;  %v4353_v3 = vsub.f32 %v16694_v42, %v4319_v21 }
 0x641   :  { %v4395_v20 = vmul.f32 1.442695, %v4353_v3  ;;  %v4316_v51 = vpop.xlane.xlu0 %4315  ;;  %v19382_v3 = vld [vmem:[#allocation51_spill] sm:$0xff] }
 0x642   :  { %v4352_v58 = vsub.f32 %v16698_v63, %v4316_v51 }
 0x643   :  { %14770 = vpow2.f32 %v4395_v20 }
 0x644   :  { %v4393_v43 = vmul.f32 1.442695, %v4352_v58 }
 0x645   :  { %v4322_v62 = vpop.xlane.xlu0 %4321 }
 0x646   :  { %14772 = vpow2.f32 %v4393_v43  ;;  %v4354_v37 = vsub.f32 %v16704_v41, %v4322_v62 }
 0x648   :  { %v4397_v4 = vmul.f32 1.442695, %v4354_v37  ;;  %v19381_v37 = vld [vmem:[#allocation57_spill] sm:$0xff] }
 0x649   :  { %v16850_v56 = vpop.eup %14768  ;;  %v4328_v21 = vpop.xlane.xlu0 %4327 }
 0x64a   :  { %14774 = vpow2.f32 %v4397_v4  ;;  %v4455_v38 = vsel %vm411_vm2, %v16850_v56, 0.0  ;;  %v4325_v4 = vpop.xlane.xlu1 %4324 }
 0x64b   :  { %4456 = vadd.xlane.f32.xlu1 %v4455_v38  ;;  %v4355_v20 = vsub.f32 %v16702_v15, %v4325_v4 }
 0x64d   :  { %v16854_v52 = vpop.eup %14770  ;;  %v4334_v51 = vpop.xlane.xlu0 %4333 }
 0x64e   :  { %v4461_v42 = vsel %vm411_vm2, %v16854_v52, 0.0  ;;  %v4331_v59 = vpop.xlane.xlu1 %4330  ;;  %v4358_v4 = vsub.f32 %v16712_v61, %v4334_v51 }
 0x64f   :  { %4462 = vadd.xlane.f32.xlu1 %v4461_v42  ;;  %v4399_v42 = vmul.f32 1.442695, %v4355_v20 }
 0x650   :  { %v16858_v63 = vpop.eup %14772 }
 0x651   :  { %19379 = vst [vmem:[#allocation78_spill] sm:$0xff] %v16858_v63  ;;  %v4458_v58 = vsel %vm411_vm2, %v16858_v63, 0.0 }
 0x652   :  { %4459 = vadd.xlane.f32.xlu0 %v4458_v58  ;;  %v4357_v58 = vsub.f32 %v16706_v44, %v4331_v59 }
 0x654   :  { %v16862_v62 = vpop.eup %14774 }
 0x655   :  { %19380 = vst [vmem:[#allocation79_spill] sm:$0xff] %v16862_v62  ;;  %v4464_v41 = vsel %vm411_vm2, %v16862_v62, 0.0  ;;  %v4356_v62 = vsub.f32 %v16710_v35, %v4328_v21 }
 0x656   :  { %4465 = vadd.xlane.f32.xlu0 %v4464_v41 }
 0x657   :  { %v4401_v44 = vmul.f32 1.442695, %v4356_v62 }
 0x660   :  { %5559 = vrot.lane.b32.xlu1 %v19381_v37, %s15224_s7 }
 0x667   :  { %v4409_v12 = vpop.xlane.xlu1 %4408 }
 0x668   :  { %14776 = vrcp.f32 %v4409_v12  ;;  %v4403_v12 = vmul.f32 1.442695, %v4357_v58 }
 0x66c   :  { %5511 = vrot.lane.b32.xlu0 %v19382_v3, %s15224_s7  ;;  %v4653_v3 = vsel %vm1879_vm3, %v16716_v10, 0 }
 0x66f   :  { %v4415_v43 = vpop.xlane.xlu1 %4414 }
 0x670   :  { %14778 = vrcp.f32 %v4415_v43 }
 0x672   :  { %v14777_v38 = vpop.eup %14776  ;;  %v4412_v41 = vpop.xlane.xlu0 %4411 }
 0x673   :  { %14780 = vrcp.f32 %v4412_v41  ;;  %v4503_v37 = vmul.f32 %v14777_v38, %v16763_v5 }
 0x674   :  { %14782 = vpow2.f32 %v4399_v42 }
 0x675   :  { %v4527_v63 = vpack.c.bf16 %v4503_v37, %v4503_v37 }
 0x677   :  { %13705 = vmatmul.mubr.msk.bf16.vlgmr.msra.gmra.mrb[144].mxu0 %vm411_vm2, %v4527_v63  ;;  %v4421_v15 = vpop.xlane.xlu1 %4420  ;;  %v4405_v63 = vmul.f32 1.442695, %v4358_v4  ;;  %v4797_v4 = vsel %vm1879_vm3, %v16718_v48, 0 }
 0x678   :  { %13715 = vmatpush3.bf16.msra.mxu0 %v4653_v3  ;;  %14784 = vrcp.f32 %v4421_v15  ;;  %13716 = vmatprep.mubr.msk.bf16.mxu0 %vm15220_vm1, %v19311_v33  ;;  %v4749_v3 = vsel %vm1879_vm3, %v16720_v34, 0 }
 0x679   :  { %13726 = vmatprep.subr.bf16.mxu0 %v19311_v33  ;;  %14786 = vpow2.f32 %v4403_v12  ;;  %v4845_v12 = vsel %vm1879_vm3, %v16728_v54, 0 }
 0x67a   :  { %v14779_v5 = vpop.eup %14778  ;;  %v4418_v35 = vpop.xlane.xlu0 %4417 }
 0x67b   :  { %14788 = vrcp.f32 %v4418_v35  ;;  %v4505_v37 = vmul.f32 %v14779_v5, %v16769_v49 }
 0x67c   :  { %14790 = vpow2.f32 %v4401_v44 }
 0x67d   :  { %v14781_v10 = vpop.eup %14780  ;;  %v4529_v59 = vpack.c.bf16 %v4505_v37, %v4505_v37 }
 0x67e   :  { %v4504_v21 = vmul.f32 %v14781_v10, %v16774_v28  ;;  %v16886_v62 = vpop.eup %14782  ;;  %v4701_v28 = vsel %vm1879_vm3, %v16714_v22, 0 }
 0x67f   :  { %13717 = vmatmul.mubr.msk.bf16.vlgmr.msra.gmra.mrb[148].mxu0 %vm411_vm2, %v4529_v59  ;;  %v4427_v61 = vpop.xlane.xlu1 %4426  ;;  %v4467_v51 = vsel %vm411_vm2, %v16886_v62, 0.0 }
 0x680   :  { %13727 = vmatpush3.bf16.msra.mxu0 %v4749_v3  ;;  %14792 = vrcp.f32 %v4427_v61  ;;  %v4528_v20 = vpack.c.bf16 %v4504_v21, %v4504_v21  ;;  %13728 = vmatprep.mubr.msk.bf16.mxu0 %vm15220_vm1, %v19311_v33  ;;  %v4941_v21 = vsel %vm1879_vm3, %v16738_v60, 0 }
 0x681   :  { %14794 = vpow2.f32 %v4405_v63  ;;  %13738 = vmatprep.subr.bf16.mxu0 %v19311_v33 }
 0x682   :  { %v14785_v49 = vpop.eup %14784  ;;  %13711 = vmatmul.mubr.msk.bf16.vlgmr.msra.gmra.mrb[168].mxu1 %vm411_vm2, %v4528_v20  ;;  %v4424_v34 = vpop.xlane.xlu0 %4423  ;;  %v4893_v20 = vsel %vm1879_vm3, %v16724_v36, 0 }
 0x683   :  { %13721 = vmatpush3.bf16.msra.mxu1 %v4701_v28  ;;  %14796 = vrcp.f32 %v4424_v34  ;;  %v4507_v43 = vmul.f32 %v14785_v49, %v16779_v6  ;;  %13722 = vmatprep.mubr.msk.bf16.mxu1 %vm15220_vm1, %v19311_v33  ;;  %v16899_v38 = vpop.eup %14786 }
 0x684   :  { %4468 = vadd.xlane.f32.xlu1 %v4467_v51  ;;  %13732 = vmatprep.subr.bf16.mxu1 %v19311_v33  ;;  %v4473_v15 = vsel %vm411_vm2, %v16899_v38, 0.0  ;;  %v5037_v51 = vsel %vm1879_vm3, %v16746_v24, 0 }
 0x685   :  { %v14789_v42 = vpop.eup %14788  ;;  %v4531_v22 = vpack.c.bf16 %v4507_v43, %v4507_v43 }
 0x686   :  { %v4506_v58 = vmul.f32 %v14789_v42, %v16784_v40  ;;  %v16903_v41 = vpop.eup %14790 }
 0x687   :  { %13729 = vmatmul.mubr.msk.bf16.vlgmr.msra.gmra.mrb[152].mxu0 %vm411_vm2, %v4531_v22  ;;  %v4433_v6 = vpop.xlane.xlu1 %4432  ;;  %v4470_v5 = vsel %vm411_vm2, %v16903_v41, 0.0 }
 0x688   :  { %13739 = vmatpush3.bf16.msra.mxu0 %v4845_v12  ;;  %14798 = vrcp.f32 %v4433_v6  ;;  %4474 = vadd.xlane.f32.xlu1 %v4473_v15  ;;  %v4530_v44 = vpack.c.bf16 %v4506_v58, %v4506_v58  ;;  %v5133_v12 = vsel %vm1879_vm3, %v16752_v55, 0 }
 0x689   :  { %13740 = vmatprep.mubr.msk.bf16.mxu0 %vm15220_vm1, %v19311_v33  ;;  %13750 = vmatprep.subr.bf16.mxu0 %v19311_v33 }
 0x68a   :  { %v14793_v40 = vpop.eup %14792  ;;  %13723 = vmatmul.mubr.msk.bf16.vlgmr.msra.gmra.mrb[172].mxu1 %vm411_vm2, %v4530_v44  ;;  %v4430_v54 = vpop.xlane.xlu0 %4429 }
 0x68b   :  { %v16918_v35 = vpop.eup %14794  ;;  %13733 = vmatpush3.bf16.msra.mxu1 %v4797_v4  ;;  %14800 = vrcp.f32 %v4430_v54  ;;  %4471 = vadd.xlane.f32.xlu0 %v4470_v5  ;;  %v4509_v37 = vmul.f32 %v14793_v40, %v16789_v0  ;;  %v5229_v54 = vsel %vm1879_vm3, %v16756_v25, 0 }
 0x68c   :  { %13734 = vmatprep.mubr.msk.bf16.mxu1 %vm15220_vm1, %v19311_v33  ;;  %13744 = vmatprep.subr.bf16.mxu1 %v19311_v33  ;;  %v4476_v63 = vsel %vm411_vm2, %v16918_v35, 0.0 }
 0x68d   :  { %v14797_v10 = vpop.eup %14796  ;;  %v4533_v48 = vpack.c.bf16 %v4509_v37, %v4509_v37 }
 0x68e   :  { %v4508_v59 = vmul.f32 %v14797_v10, %v16794_v19 }
 0x68f   :  { %4477 = vadd.xlane.f32.xlu0 %v4476_v63  ;;  %13741 = vmatmul.mubr.msk.bf16.vlgmr.msra.gmra.mrb[156].mxu0 %vm411_vm2, %v4533_v48  ;;  %v4439_v3 = vpop.xlane.xlu1 %4438  ;;  %v5325_v63 = vsel %vm1879_vm3, %v16759_v53, 0 }
 0x690   :  { %13751 = vmatpush3.bf16.msra.mxu0 %v4941_v21  ;;  %14802 = vrcp.f32 %v4439_v3  ;;  %v4532_v0 = vpack.c.bf16 %v4508_v59, %v4508_v59  ;;  %13752 = vmatprep.mubr.msk.bf16.mxu0 %vm15220_vm1, %v19311_v33  ;;  %v5277_v59 = vsel %vm1879_vm3, %v16754_v39, 0  ;;  %v5373_v21 = vsel %vm1879_vm3, %v16845_v1, 0  ;;  %v19384_v3 = vld [vmem:[#allocation17_spill] sm:$0xff]  ;;  %v19385_v1 = vld [vmem:[#allocation16_spill] sm:$0xff] }
 0x691   :  { %13762 = vmatprep.subr.bf16.mxu0 %v19311_v33 }
 0x692   :  { %v14799_v61 = vpop.eup %14798  ;;  %13735 = vmatmul.mubr.msk.bf16.vlgmr.msra.gmra.mrb[176].mxu1 %vm411_vm2, %v4532_v0  ;;  %v4436_v19 = vpop.xlane.xlu0 %4435  ;;  %v19386_v0 = vld [vmem:[#allocation18_spill] sm:$0xff] }
 0x693   :  { %13745 = vmatpush3.bf16.msra.mxu1 %v4893_v20  ;;  %14804 = vrcp.f32 %v4436_v19  ;;  %v4511_v60 = vmul.f32 %v14799_v61, %v16799_v32  ;;  %13746 = vmatprep.mubr.msk.bf16.mxu1 %vm15220_vm1, %v19311_v33  ;;  %v19387_v61 = vld [vmem:[#allocation20_spill] sm:$0xff]  ;;  %v19388_v20 = vld [vmem:[#allocation22_spill] sm:$0xff] }
 0x694   :  { %13756 = vmatprep.subr.bf16.mxu1 %v19311_v33 }
 0x695   :  { %v14801_v49 = vpop.eup %14800  ;;  %v4535_v28 = vpack.c.bf16 %v4511_v60, %v4511_v60  ;;  %v19389_v60 = vld [vmem:[#allocation19_spill] sm:$0xff] }
 0x696   :  { %v4510_v34 = vmul.f32 %v14801_v49, %v16804_v8  ;;  %v4989_v8 = vsel %vm1879_vm3, %v16730_v17, 0 }
 0x697   :  { %13753 = vmatmul.mubr.msk.bf16.vlgmr.msra.gmra.mrb[160].mxu0 %vm411_vm2, %v4535_v28  ;;  %v4445_v36 = vpop.xlane.xlu1 %4444  ;;  %v19390_v28 = vld [vmem:[#allocation24_spill] sm:$0xff] }
 0x698   :  { %13763 = vmatpush3.bf16.msra.mxu0 %v5037_v51  ;;  %14806 = vrcp.f32 %v4445_v36  ;;  %v4534_v43 = vpack.c.bf16 %v4510_v34, %v4510_v34  ;;  %13764 = vmatprep.mubr.msk.bf16.mxu0 %vm15220_vm1, %v19311_v33  ;;  %v19391_v51 = vld [vmem:[#allocation21_spill] sm:$0xff] }
 0x699   :  { %5655 = vrot.lane.b32.xlu1 %v16075_v45, %s15224_s7  ;;  %13774 = vmatprep.subr.bf16.mxu0 %v19311_v33 }
 0x69a   :  { %v14803_v32 = vpop.eup %14802  ;;  %13747 = vmatmul.mubr.msk.bf16.vlgmr.msra.gmra.mrb[180].mxu1 %vm411_vm2, %v4534_v43  ;;  %v4442_v24 = vpop.xlane.xlu0 %4441 }
 0x69b   :  { %13757 = vmatpush3.bf16.msra.mxu1 %v4989_v8  ;;  %14808 = vrcp.f32 %v4442_v24  ;;  %v4513_v42 = vmul.f32 %v14803_v32, %v16809_v29  ;;  %13758 = vmatprep.mubr.msk.bf16.mxu1 %vm15220_vm1, %v19311_v33  ;;  %v19392_v8 = vld [vmem:[#allocation26_spill] sm:$0xff] }
 0x69c   :  { %13768 = vmatprep.subr.bf16.mxu1 %v19311_v33 }
 0x69d   :  { %v14805_v22 = vpop.eup %14804  ;;  %6052 = vrot.lane.b32.xlu1 %v15361_v27, %s15225_s8  ;;  %v4537_v58 = vpack.c.bf16 %v4513_v42, %v4513_v42 }
 0x69e   :  { %v4512_v17 = vmul.f32 %v14805_v22, %v16814_v18  ;;  %v5085_v18 = vsel %vm1879_vm3, %v16742_v7, 0  ;;  %v19393_v22 = vld [vmem:[#allocation76_spill] sm:$0xff] }
 0x69f   :  { %13765 = vmatmul.mubr.msk.bf16.vlgmr.msra.gmra.mrb[164].mxu0 %vm411_vm2, %v4537_v58  ;;  %v4451_v6 = vpop.xlane.xlu1 %4450  ;;  %v5421_v58 = vsel %vm1879_vm3, %v19393_v22, 0  ;;  %v19415_v22 = vld [vmem:[#allocation46_spill] sm:$0xff] }
 0x6a0   :  { %13775 = vmatpush3.bf16.msra.mxu0 %v5133_v12  ;;  %14810 = vrcp.f32 %v4451_v6  ;;  %v4536_v29 = vpack.c.bf16 %v4512_v17, %v4512_v17  ;;  %13776 = vmatprep.mubr.msk.bf16.mxu0 %vm15220_vm1, %v19311_v33  ;;  %v19394_v17 = vld [vmem:[#allocation23_spill] sm:$0xff]  ;;  %v19395_v6 = vld [vmem:[#allocation78_spill] sm:$0xff] }
 0x6a1   :  { %6102 = vrot.lane.b32.xlu1 %v15373_v31, %s15225_s8  ;;  %13786 = vmatprep.subr.bf16.mxu0 %v19311_v33 }
 0x6a2   :  { %v14807_v15 = vpop.eup %14806  ;;  %13759 = vmatmul.mubr.msk.bf16.vlgmr.msra.gmra.mrb[184].mxu1 %vm411_vm2, %v4536_v29  ;;  %v4448_v55 = vpop.xlane.xlu0 %4447 }
 0x6a3   :  { %13769 = vmatpush3.bf16.msra.mxu1 %v5085_v18  ;;  %14812 = vrcp.f32 %v4448_v55  ;;  %v4515_v44 = vmul.f32 %v14807_v15, %v16819_v57  ;;  %13770 = vmatprep.mubr.msk.bf16.mxu1 %vm15220_vm1, %v19311_v33 }
 0x6a4   :  { %13780 = vmatprep.subr.bf16.mxu1 %v19311_v33 }
 0x6a5   :  { %v14809_v40 = vpop.eup %14808  ;;  %5607 = vrot.lane.b32.xlu0 %v16069_v11, %s15224_s7  ;;  %6152 = vrot.lane.b32.xlu1 %v15353_v23, %s15225_s8  ;;  %v4539_v7 = vpack.c.bf16 %v4515_v44, %v4515_v44  ;;  %v19396_v44 = vld [vmem:[#allocation28_spill] sm:$0xff] }
 0x6a6   :  { %v4514_v4 = vmul.f32 %v14809_v40, %v16823_v9  ;;  %v5181_v9 = vsel %vm1879_vm3, %v16748_v14, 0 }
 0x6a7   :  { %13777 = vmatmul.mubr.msk.bf16.vlgmr.msra.gmra.mrb[168].mxu0 %vm411_vm2, %v4539_v7  ;;  %v19397_v7 = vld [vmem:[#allocation77_spill] sm:$0xff] }
 0x6a8   :  { %13787 = vmatpush3.bf16.msra.mxu0 %v5229_v54  ;;  %v4538_v57 = vpack.c.bf16 %v4514_v4, %v4514_v4  ;;  %13788 = vmatprep.mubr.msk.bf16.mxu0 %vm15220_vm1, %v19311_v33  ;;  %v5469_v4 = vsel %vm1879_vm3, %v19397_v7, 0  ;;  %v19398_v54 = vld [vmem:[#allocation25_spill] sm:$0xff]  ;;  %v19417_v7 = vld [vmem:[#allocation43_spill] sm:$0xff] }
 0x6a9   :  { %6054 = vrot.lane.b32.xlu0 %v15361_v27, %s15226_s9  ;;  %6202 = vrot.lane.b32.xlu1 %v15371_v30, %s15225_s8 }
 0x6aa   :  { %v14811_v5 = vpop.eup %14810  ;;  %13771 = vmatmul.mubr.msk.bf16.vlgmr.msra.gmra.mrb[188].mxu1 %vm411_vm2, %v4538_v57  ;;  %v4454_v25 = vpop.xlane.xlu0 %4453  ;;  %13798 = vmatprep.subr.bf16.mxu0 %v19311_v33  ;;  %v19399_v57 = vld [vmem:[#allocation79_spill] sm:$0xff] }
 0x6ab   :  { %13781 = vmatpush3.bf16.msra.mxu1 %v5181_v9  ;;  %14814 = vrcp.f32 %v4454_v25  ;;  %v4517_v37 = vmul.f32 %v14811_v5, %v16828_v13  ;;  %13782 = vmatprep.mubr.msk.bf16.mxu1 %vm15220_vm1, %v19311_v33 }
 0x6ac   :  { %13792 = vmatprep.subr.bf16.mxu1 %v19311_v33 }
 0x6ad   :  { %v14813_v10 = vpop.eup %14812  ;;  %6104 = vrot.lane.b32.xlu0 %v15373_v31, %s15226_s9  ;;  %6252 = vrot.lane.b32.xlu1 %v19314_v2, %s15225_s8  ;;  %v4541_v14 = vpack.c.bf16 %v4517_v37, %v4517_v37  ;;  %v19400_v37 = vld [vmem:[#allocation30_spill] sm:$0xff] }
 0x6ae   :  { %v4516_v48 = vmul.f32 %v14813_v10, %v16832_v50 }
 0x6af   :  { %13789 = vmatmul.mubr.msk.bf16.vlgmr.msra.gmra.mrb[172].mxu0 %vm411_vm2, %v4541_v14  ;;  %v19401_v14 = vld [vmem:[#allocation27_spill] sm:$0xff] }
 0x6b0   :  { %13799 = vmatpush3.bf16.msra.mxu0 %v5325_v63  ;;  %v4540_v13 = vpack.c.bf16 %v4516_v48, %v4516_v48  ;;  %13800 = vmatprep.mubr.msk.bf16.mxu0 %vm15220_vm1, %v19311_v33  ;;  %v19402_v48 = vld [vmem:[#allocation32_spill] sm:$0xff]  ;;  %v19403_v63 = vld [vmem:[#allocation29_spill] sm:$0xff] }
 0x6b1   :  { %6154 = vrot.lane.b32.xlu0 %v15353_v23, %s15226_s9  ;;  %6302 = vrot.lane.b32.xlu1 %v15407_v46, %s15225_s8 }
 0x6b2   :  { %13783 = vmatmul.mubr.msk.bf16.vlgmr.msra.gmra.mrb[192].mxu1 %vm411_vm2, %v4540_v13  ;;  %13810 = vmatprep.subr.bf16.mxu0 %v19311_v33  ;;  %v19404_v13 = vld [vmem:[#allocation34_spill] sm:$0xff] }
 0x6b3   :  { %13793 = vmatpush3.bf16.msra.mxu1 %v5277_v59  ;;  %13794 = vmatprep.mubr.msk.bf16.mxu1 %vm15220_vm1, %v19311_v33  ;;  %v19405_v59 = vld [vmem:[#allocation36_spill] sm:$0xff] }
 0x6b4   :  { %13804 = vmatprep.subr.bf16.mxu1 %v19311_v33 }
 0x6b5   :  { %v14815_v53 = vpop.eup %14814  ;;  %6204 = vrot.lane.b32.xlu0 %v15371_v30, %s15226_s9  ;;  %6352 = vrot.lane.b32.xlu1 %v19318_v26, %s15225_s8 }
 0x6b6   :  { %v4518_v50 = vmul.f32 %v14815_v53, %v16836_v16  ;;  %v19383_v16 = vld [vmem:[#allocation15_spill] sm:$0xff] }
 0x6b7   :  { %v19406_v53 = vld [vmem:[#allocation31_spill] sm:$0xff] }
 0x6b8   :  { %v4542_v39 = vpack.c.bf16 %v4518_v50, %v4518_v50  ;;  %v19407_v50 = vld [vmem:[#allocation38_spill] sm:$0xff] }
 0x6b9   :  { %6254 = vrot.lane.b32.xlu0 %v19314_v2, %s15226_s9  ;;  %6402 = vrot.lane.b32.xlu1 %v15411_v47, %s15225_s8 }
 0x6ba   :  { %13795 = vmatmul.mubr.msk.bf16.vlgmr.msra.gmra.mrb[196].mxu1 %vm411_vm2, %v4542_v39  ;;  %v19408_v39 = vld [vmem:[#allocation33_spill] sm:$0xff] }
 0x6bb   :  { %13805 = vmatpush3.bf16.msra.mxu1 %v5373_v21  ;;  %13806 = vmatprep.mubr.msk.bf16.mxu1 %vm15220_vm1, %v19311_v33  ;;  %v19409_v21 = vld [vmem:[#allocation40_spill] sm:$0xff] }
 0x6bc   :  { %13816 = vmatprep.subr.bf16.mxu1 %v19311_v33 }
 0x6bd   :  { %6304 = vrot.lane.b32.xlu0 %v15407_v46, %s15226_s9  ;;  %6452 = vrot.lane.b32.xlu1 %v19383_v16, %s15225_s8 }
 0x6c1   :  { %6354 = vrot.lane.b32.xlu0 %v19318_v26, %s15226_s9  ;;  %6502 = vrot.lane.b32.xlu1 %v19384_v3, %s15225_s8 }
 0x6c5   :  { %6404 = vrot.lane.b32.xlu0 %v15411_v47, %s15226_s9  ;;  %6552 = vrot.lane.b32.xlu1 %v19385_v1, %s15225_s8 }
 0x6c9   :  { %6454 = vrot.lane.b32.xlu0 %v19383_v16, %s15226_s9  ;;  %6602 = vrot.lane.b32.xlu1 %v19386_v0, %s15225_s8 }
 0x6cd   :  { %6504 = vrot.lane.b32.xlu0 %v19384_v3, %s15226_s9  ;;  %6704 = vrot.lane.b32.xlu1 %v19387_v61, %s15226_s9 }
 0x6d1   :  { %6554 = vrot.lane.b32.xlu0 %v19385_v1, %s15226_s9  ;;  %6702 = vrot.lane.b32.xlu1 %v19387_v61, %s15225_s8 }
 0x6d5   :  { %6604 = vrot.lane.b32.xlu0 %v19386_v0, %s15226_s9  ;;  %6804 = vrot.lane.b32.xlu1 %v19388_v20, %s15226_s9 }
 0x6d8   :  { %v4457_v19 = vpop.xlane.xlu1 %4456 }
 0x6d9   :  { %14816 = vrcp.f32 %v4457_v19  ;;  %6654 = vrot.lane.b32.xlu0 %v19389_v60, %s15226_s9  ;;  %6802 = vrot.lane.b32.xlu1 %v19388_v20, %s15225_s8  ;;  %v19410_v19 = vld [vmem:[#allocation35_spill] sm:$0xff] }
 0x6dc   :  { %v4463_v49 = vpop.xlane.xlu1 %4462 }
 0x6dd   :  { %14818 = vrcp.f32 %v4463_v49  ;;  %6652 = vrot.lane.b32.xlu0 %v19389_v60, %s15225_s8  ;;  %6904 = vrot.lane.b32.xlu1 %v19390_v28, %s15226_s9 }
 0x6df   :  { %v4460_v34 = vpop.xlane.xlu0 %4459 }
 0x6e0   :  { %14820 = vrcp.f32 %v4460_v34  ;;  %v5560_v9 = vpop.permute.xlu1 %5559  ;;  %v19411_v34 = vld [vmem:[#allocation42_spill] sm:$0xff] }
 0x6e1   :  { %6754 = vrot.lane.b32.xlu0 %v19391_v51, %s15226_s9  ;;  %6902 = vrot.lane.b32.xlu1 %v19390_v28, %s15225_s8  ;;  %v5565_v10 = vsel %vm1879_vm3, %v5560_v9, 0 }
 0x6e3   :  { %v14817_v36 = vpop.eup %14816  ;;  %v4466_v43 = vpop.xlane.xlu0 %4465 }
 0x6e4   :  { %14822 = vrcp.f32 %v4466_v43  ;;  %v4519_v32 = vmul.f32 %v14817_v36, %v16850_v56  ;;  %v19412_v36 = vld [vmem:[#allocation37_spill] sm:$0xff] }
 0x6e5   :  { %6752 = vrot.lane.b32.xlu0 %v19391_v51, %s15225_s8  ;;  %7004 = vrot.lane.b32.xlu1 %v19392_v8, %s15226_s9 }
 0x6e6   :  { %v4543_v24 = vpack.c.bf16 %v4519_v32, %v4519_v32  ;;  %v19413_v32 = vld [vmem:[#allocation44_spill] sm:$0xff] }
 0x6e7   :  { %v14819_v42 = vpop.eup %14818  ;;  %v5512_v15 = vpop.permute.xlu0 %5511 }
 0x6e8   :  { %13801 = vmatmul.mubr.msk.bf16.vlgmr.msra.gmra.mrb[176].mxu0 %vm411_vm2, %v4543_v24  ;;  %v4521_v56 = vmul.f32 %v14819_v42, %v16854_v52  ;;  %v5517_v52 = vsel %vm1879_vm3, %v5512_v15, 0  ;;  %v19414_v42 = vld [vmem:[#allocation39_spill] sm:$0xff] }
 0x6e9   :  { %13811 = vmatpush3.bf16.msra.mxu0 %v5421_v58  ;;  %6854 = vrot.lane.b32.xlu0 %v19394_v17, %s15226_s9 }
 0x6ea   :  { %v14821_v12 = vpop.eup %14820  ;;  %7002 = vrot.lane.b32.xlu1 %v19392_v8, %s15225_s8  ;;  %13812 = vmatprep.mubr.msk.bf16.mxu0 %vm15220_vm1, %v19311_v33  ;;  %v4545_v40 = vpack.c.bf16 %v4521_v56, %v4521_v56  ;;  %v19416_v56 = vld [vmem:[#allocation41_spill] sm:$0xff] }
 0x6eb   :  { %v4520_v29 = vmul.f32 %v14821_v12, %v19395_v6  ;;  %13822 = vmatprep.subr.bf16.mxu0 %v19311_v33 }
 0x6ed   :  { %6852 = vrot.lane.b32.xlu0 %v19394_v17, %s15225_s8  ;;  %v4544_v18 = vpack.c.bf16 %v4520_v29, %v4520_v29 }
 0x6ee   :  { %v14823_v55 = vpop.eup %14822  ;;  %7104 = vrot.lane.b32.xlu1 %v19396_v44, %s15226_s9 }
 0x6ef   :  { %13807 = vmatmul.mubr.msk.bf16.vlgmr.msra.gmra.mrb[200].mxu1 %vm411_vm2, %v4544_v18  ;;  %v4522_v5 = vmul.f32 %v14823_v55, %v19399_v57  ;;  %v5715_v55 = vld [vmem:[#allocation7 + $0x4] sm:$0xf] }
 0x6f0   :  { %13817 = vmatpush3.bf16.msra.mxu1 %v5469_v4  ;;  %13813 = vmatmul.mubr.msk.bf16.vlgmr.msra.gmra.mrb[180].mxu0 %vm411_vm2, %v4545_v40 }
 0x6f1   :  { %13823 = vmatpush3.bf16.msra.mxu0 %v5517_v52  ;;  %6954 = vrot.lane.b32.xlu0 %v19398_v54, %s15226_s9  ;;  %v4546_v25 = vpack.c.bf16 %v4522_v5, %v4522_v5 }
 0x6f2   :  { %7102 = vrot.lane.b32.xlu1 %v19396_v44, %s15225_s8  ;;  %13818 = vmatprep.mubr.msk.bf16.mxu1 %vm15220_vm1, %v19311_v33 }
 0x6f3   :  { %13828 = vmatprep.subr.bf16.mxu1 %v19311_v33  ;;  %13824 = vmatprep.mubr.msk.bf16.mxu0 %vm15220_vm1, %v19311_v33 }
 0x6f4   :  { %13834 = vmatprep.subr.bf16.mxu0 %v19311_v33 }
 0x6f5   :  { %6952 = vrot.lane.b32.xlu0 %v19398_v54, %s15225_s8 }
 0x6f6   :  { %7204 = vrot.lane.b32.xlu1 %v19400_v37, %s15226_s9 }
 0x6f7   :  { %13819 = vmatmul.mubr.msk.bf16.vlgmr.msra.gmra.mrb[204].mxu1 %vm411_vm2, %v4546_v25 }
 0x6f8   :  { %13829 = vmatpush3.bf16.msra.mxu1 %v5565_v10  ;;  %13830 = vmatprep.mubr.msk.bf16.mxu1 %vm15220_vm1, %v19311_v33 }
 0x6f9   :  { %7054 = vrot.lane.b32.xlu0 %v19401_v14, %s15226_s9  ;;  %13840 = vmatprep.subr.bf16.mxu1 %v19311_v33 }
 0x6fa   :  { %7202 = vrot.lane.b32.xlu1 %v19400_v37, %s15225_s8 }
 0x6fd   :  { %7052 = vrot.lane.b32.xlu0 %v19401_v14, %s15225_s8 }
 0x6fe   :  { %7540 = vrot.lane.b32.xlu1 %v19402_v48, %s15227_s10 }
 0x701   :  { %7154 = vrot.lane.b32.xlu0 %v19403_v63, %s15226_s9 }
 0x702   :  { %7636 = vrot.lane.b32.xlu1 %v19404_v13, %s15227_s10 }
 0x705   :  { %7152 = vrot.lane.b32.xlu0 %v19403_v63, %s15225_s8 }
 0x706   :  { %7732 = vrot.lane.b32.xlu1 %v19405_v59, %s15227_s10 }
 0x709   :  { %7588 = vrot.lane.b32.xlu0 %v19406_v53, %s15227_s10 }
 0x70a   :  { %7828 = vrot.lane.b32.xlu1 %v19407_v50, %s15227_s10 }
 0x70d   :  { %7684 = vrot.lane.b32.xlu0 %v19408_v39, %s15227_s10 }
 0x70e   :  { %7924 = vrot.lane.b32.xlu1 %v19409_v21, %s15227_s10 }
 0x711   :  { %7780 = vrot.lane.b32.xlu0 %v19410_v19, %s15227_s10  ;;  %v4469_v49 = vpop.xlane.xlu1 %4468 }
 0x712   :  { %8020 = vrot.lane.b32.xlu1 %v19411_v34, %s15227_s10  ;;  %14824 = vrcp.f32 %v4469_v49  ;;  %v5753_v49 = vsel %vm1879_vm3, %v5715_v55, 0 }
 0x715   :  { %7876 = vrot.lane.b32.xlu0 %v19412_v36, %s15227_s10  ;;  %v4475_v43 = vpop.xlane.xlu1 %4474 }
 0x716   :  { %8116 = vrot.lane.b32.xlu1 %v19413_v32, %s15227_s10  ;;  %14826 = vrcp.f32 %v4475_v43 }
 0x718   :  { %v4472_v24 = vpop.xlane.xlu0 %4471 }
 0x719   :  { %14828 = vrcp.f32 %v4472_v24  ;;  %7972 = vrot.lane.b32.xlu0 %v19414_v42, %s15227_s10  ;;  %v5656_v57 = vpop.permute.xlu1 %5655 }
 0x71a   :  { %8212 = vrot.lane.b32.xlu1 %v19415_v22, %s15227_s10  ;;  %v5661_v10 = vsel %vm1879_vm3, %v5656_v57, 0 }
 0x71c   :  { %v14825_v58 = vpop.eup %14824  ;;  %v4478_v12 = vpop.xlane.xlu0 %4477 }
 0x71d   :  { %14830 = vrcp.f32 %v4478_v12  ;;  %8068 = vrot.lane.b32.xlu0 %v19416_v56, %s15227_s10  ;;  %v4523_v6 = vmul.f32 %v14825_v58, %v16886_v62  ;;  %v6053_v58 = vpop.permute.xlu1 %6052 }
 0x71f   :  { %v4547_v29 = vpack.c.bf16 %v4523_v6, %v4523_v6 }
 0x720   :  { %v14827_v15 = vpop.eup %14826  ;;  %v5608_v18 = vpop.permute.xlu0 %5607 }
 0x721   :  { %v5613_v40 = vsel %vm1879_vm3, %v5608_v18, 0  ;;  %8164 = vrot.lane.b32.xlu0 %v19417_v7, %s15227_s10  ;;  %13825 = vmatmul.mubr.msk.bf16.vlgmr.msra.gmra.mrb[184].mxu0 %vm411_vm2, %v4547_v29  ;;  %v4525_v52 = vmul.f32 %v14827_v15, %v16899_v38  ;;  %v6103_v6 = vpop.permute.xlu1 %6102 }
 0x722   :  { %13835 = vmatpush3.bf16.msra.mxu0 %v5613_v40  ;;  %13836 = vmatprep.mubr.msk.bf16.mxu0 %vm15220_vm1, %v19311_v33 }
 0x723   :  { %v14829_v4 = vpop.eup %14828  ;;  %14602 = vmatprep.subr.msk.bf16.mxu0 %vm1879_vm3, %v5715_v55  ;;  %v4549_v25 = vpack.c.bf16 %v4525_v52, %v4525_v52 }
 0x724   :  { %v4524_v62 = vmul.f32 %v14829_v4, %v16903_v41  ;;  %v6055_v41 = vpop.permute.xlu0 %6054 }
 0x725   :  { %v6060_v24 = vsel %vm411_vm2, %v6055_v41, 0  ;;  %v6153_v15 = vpop.permute.xlu1 %6152 }
 0x726   :  { %v4548_v5 = vpack.c.bf16 %v4524_v62, %v4524_v62 }
 0x727   :  { %v14831_v9 = vpop.eup %14830 }
 0x728   :  { %13831 = vmatmul.mubr.msk.bf16.vlgmr.msra.gmra.mrb[208].mxu1 %vm411_vm2, %v4548_v5  ;;  %v4526_v38 = vmul.f32 %v14831_v9, %v16918_v35  ;;  %v6105_v12 = vpop.permute.xlu0 %6104 }
 0x729   :  { %13841 = vmatpush3.bf16.msra.mxu1 %v5661_v10  ;;  %13837 = vmatmul.mubr.msk.bf16.vlgmr.msra.gmra.mrb[188].mxu0 %vm411_vm2, %v4549_v25  ;;  %v6110_v35 = vsel %vm411_vm2, %v6105_v12, 0  ;;  %v6203_v40 = vpop.permute.xlu1 %6202 }
 0x72a   :  { %13842 = vmatprep.mubr.msk.bf16.mxu1 %vm15220_vm1, %v19311_v33  ;;  %13898 = vmatprep.subr.bf16.mxu1 %v19311_v33  ;;  %v4550_v43 = vpack.c.bf16 %v4526_v38, %v4526_v38 }
 0x72b   :  { %13847 = vmatpush3.bf16.msra.mxu0 %v5753_v49  ;;  %v3062_v49 = vld [vmem:[#allocation7] sm:$0xf] }
 0x72c   :  { %v6155_v29 = vpop.permute.xlu0 %6154  ;;  %14603 = vmatprep.subr.msk.bf16.mxu0 %vm1879_vm3, %v3062_v49 }
 0x72d   :  { %v6160_v55 = vsel %vm411_vm2, %v6155_v29, 0  ;;  %v6253_v62 = vpop.permute.xlu1 %6252 }
 0x730   :  { %13843 = vmatmul.mubr.msk.bf16.vlgmr.msra.gmra.mrb[212].mxu1 %vm411_vm2, %v4550_v43  ;;  %v6205_v18 = vpop.permute.xlu0 %6204 }
 0x731   :  { %13900 = vmatprep.mubr.msk.bf16.mxu1 %vm15220_vm1, %v19311_v33  ;;  %v6210_v52 = vsel %vm411_vm2, %v6205_v18, 0  ;;  %v6303_v38 = vpop.permute.xlu1 %6302 }
 0x732   :  { %13899 = vmatpush3.bf16.xpose.msra.mxu1 %v6060_v24 }
 0x733   :  { %13904 = vmatprep.subr.bf16.mxu1 %v19311_v33 }
 0x734   :  { %v6255_v4 = vpop.permute.xlu0 %6254 }
 0x735   :  { %v6260_v41 = vsel %vm411_vm2, %v6255_v4, 0  ;;  %v6353_v29 = vpop.permute.xlu1 %6352 }
 0x738   :  { %v6305_v9 = vpop.permute.xlu0 %6304 }
 0x739   :  { %13901 = vmatmul.mubr.msk.bf16.vlgmr.msra.gmra.mrb[216].mxu1 %vm411_vm2, %v6053_v58 }
 0x73a   :  { %13905 = vmatpush3.bf16.xpose.msra.mxu1 %v6110_v35  ;;  %13906 = vmatprep.mubr.msk.bf16.mxu1 %vm15220_vm1, %v19311_v33 }
 0x73b   :  { %13910 = vmatprep.subr.bf16.mxu1 %v19311_v33 }
 0x73c   :  { %v6355_v43 = vpop.permute.xlu0 %6354 }
 0x741   :  { %13907 = vmatmul.mubr.msk.bf16.vlgmr.msra.gmra.mrb[220].mxu1 %vm411_vm2, %v6103_v6 }
 0x742   :  { %13911 = vmatpush3.bf16.xpose.msra.mxu1 %v6160_v55  ;;  %13912 = vmatprep.mubr.msk.bf16.mxu1 %vm15220_vm1, %v19311_v33 }
 0x743   :  { %13916 = vmatprep.subr.bf16.mxu1 %v19311_v33 }
 0x749   :  { %13913 = vmatmul.mubr.msk.bf16.vlgmr.msra.gmra.mrb[224].mxu1 %vm411_vm2, %v6153_v15 }
 0x74a   :  { %13917 = vmatpush3.bf16.xpose.msra.mxu1 %v6210_v52  ;;  %v4593_v57 = vpop.f32.mrb[144].mxu0  ;;  %13918 = vmatprep.mubr.msk.bf16.mxu1 %vm15220_vm1, %v19311_v33  ;;  %v6405_v52 = vpop.permute.xlu0 %6404 }
 0x74b   :  { %v13706_v5 = vpop.f32.mrb[145].mxu0  ;;  %13922 = vmatprep.subr.bf16.mxu1 %v19311_v33 }
 0x74c   :  { %v4596_v25 = vpop.f32.mrb[146].mxu0 }
 0x74d   :  { %v13707_v10 = vpop.f32.mrb[147].mxu0 }
 0x74e   :  { %v6403_v10 = vpop.permute.xlu1 %6402 }
 0x751   :  { %13919 = vmatmul.mubr.msk.bf16.vlgmr.msra.gmra.mrb[228].mxu1 %vm411_vm2, %v6203_v40  ;;  %v6310_v40 = vsel %vm411_vm2, %v6305_v9, 0 }
 0x752   :  { %13923 = vmatpush3.bf16.xpose.msra.mxu1 %v6260_v41  ;;  %v4689_v24 = vpop.f32.mrb[148].mxu0  ;;  %13924 = vmatprep.mubr.msk.bf16.mxu1 %vm15220_vm1, %v19311_v33 }
 0x753   :  { %v13718_v58 = vpop.f32.mrb[149].mxu0  ;;  %13928 = vmatprep.subr.bf16.mxu1 %v19311_v33 }
 0x754   :  { %v4692_v12 = vpop.f32.mrb[150].mxu0 }
 0x755   :  { %v4641_v6 = vpop.f32.mrb[168].mxu1  ;;  %v13719_v35 = vpop.f32.mrb[151].mxu0 }
 0x756   :  { %v5703_v15 = vpack.c.bf16 %v4641_v6, %v4593_v57  ;;  %v13712_v18 = vpop.f32.mrb[169].mxu1  ;;  %v6455_v12 = vpop.permute.xlu0 %6454 }
 0x757   :  { %v4644_v55 = vpop.f32.mrb[170].mxu1 }
 0x758   :  { %v13713_v4 = vpop.f32.mrb[171].mxu1  ;;  %13848 = vmatprep.mubr.msk.bf16.mxu0 %vm411_vm2, %v5703_v15  ;;  %v5921_v15 = vsel %vm1879_vm3, %v3062_v49, 0  ;;  %v6453_v55 = vpop.permute.xlu1 %6452 }
 0x759   :  { %13925 = vmatmul.mubr.msk.bf16.vlgmr.msra.gmra.mrb[232].mxu1 %vm411_vm2, %v6253_v62  ;;  %v6360_v62 = vsel %vm411_vm2, %v6355_v43, 0 }
 0x75a   :  { %13929 = vmatpush3.bf16.xpose.msra.mxu1 %v6310_v40  ;;  %v4785_v5 = vpop.f32.mrb[152].mxu0  ;;  %13930 = vmatprep.mubr.msk.bf16.mxu1 %vm15220_vm1, %v19311_v33  ;;  %v6505_v49 = vpop.permute.xlu0 %6504 }
 0x75b   :  { %v13730_v25 = vpop.f32.mrb[153].mxu0  ;;  %13934 = vmatprep.subr.bf16.mxu1 %v19311_v33 }
 0x75c   :  { %v4788_v57 = vpop.f32.mrb[154].mxu0 }
 0x75d   :  { %v4737_v41 = vpop.f32.mrb[172].mxu1  ;;  %v13731_v58 = vpop.f32.mrb[155].mxu0 }
 0x75e   :  { %v5704_v6 = vpack.c.bf16 %v4737_v41, %v4689_v24  ;;  %v13724_v35 = vpop.f32.mrb[173].mxu1 }
 0x75f   :  { %v4740_v9 = vpop.f32.mrb[174].mxu1  ;;  %v6410_v35 = vsel %vm411_vm2, %v6405_v52, 0 }
 0x760   :  { %v13725_v18 = vpop.f32.mrb[175].mxu1  ;;  %13849 = vmatmul.mubr.msk.bf16.vlgmr.msra.gmra.mrb[192].mxu0 %vm411_vm2, %v5704_v6 }
 0x761   :  { %13931 = vmatmul.mubr.msk.bf16.vlgmr.msra.gmra.mrb[236].mxu1 %vm411_vm2, %v6303_v38  ;;  %13873 = vmatpush3.bf16.msra.mxu0 %v5921_v15  ;;  %v6503_v38 = vpop.permute.xlu1 %6502  ;;  %v6555_v15 = vpop.permute.xlu0 %6554 }
 0x762   :  { %13935 = vmatpush3.bf16.xpose.msra.mxu1 %v6360_v62  ;;  %v4881_v4 = vpop.f32.mrb[156].mxu0  ;;  %13936 = vmatprep.mubr.msk.bf16.mxu1 %vm15220_vm1, %v19311_v33 }
 0x763   :  { %v13742_v40 = vpop.f32.mrb[157].mxu0  ;;  %13940 = vmatprep.subr.bf16.mxu1 %v19311_v33  ;;  %13970 = vmatprep.subr.bf16.mxu0 %v19311_v33 }
 0x764   :  { %v4884_v24 = vpop.f32.mrb[158].mxu0 }
 0x765   :  { %v4833_v25 = vpop.f32.mrb[176].mxu1  ;;  %v13743_v57 = vpop.f32.mrb[159].mxu0 }
 0x766   :  { %v5705_v41 = vpack.c.bf16 %v4833_v25, %v4785_v5  ;;  %v13736_v43 = vpop.f32.mrb[177].mxu1  ;;  %v6553_v24 = vpop.permute.xlu1 %6552 }
 0x767   :  { %v4836_v58 = vpop.f32.mrb[178].mxu1  ;;  %v6605_v43 = vpop.permute.xlu0 %6604 }
 0x768   :  { %v13737_v6 = vpop.f32.mrb[179].mxu1  ;;  %13852 = vmatprep.mubr.msk.bf16.mxu0 %vm411_vm2, %v5705_v41 }
 0x769   :  { %13937 = vmatmul.mubr.msk.bf16.vlgmr.msra.gmra.mrb[240].mxu1 %vm411_vm2, %v6353_v29  ;;  %v6460_v29 = vsel %vm411_vm2, %v6455_v12, 0 }
 0x76a   :  { %13941 = vmatpush3.bf16.xpose.msra.mxu1 %v6410_v35  ;;  %v4977_v9 = vpop.f32.mrb[160].mxu0  ;;  %13942 = vmatprep.mubr.msk.bf16.mxu1 %vm15220_vm1, %v19311_v33  ;;  %v6603_v35 = vpop.permute.xlu1 %6602 }
 0x76b   :  { %v13754_v18 = vpop.f32.mrb[161].mxu0  ;;  %13946 = vmatprep.subr.bf16.mxu1 %v19311_v33 }
 0x76c   :  { %v4980_v5 = vpop.f32.mrb[162].mxu0 }
 0x76d   :  { %v4929_v62 = vpop.f32.mrb[180].mxu1  ;;  %v13755_v40 = vpop.f32.mrb[163].mxu0 }
 0x76e   :  { %v5706_v25 = vpack.c.bf16 %v4929_v62, %v4881_v4  ;;  %v13748_v57 = vpop.f32.mrb[181].mxu1  ;;  %v17226_v62 = vpop.permute.xlu0 %6654 }
 0x76f   :  { %v4932_v41 = vpop.f32.mrb[182].mxu1 }
 0x770   :  { %v13749_v52 = vpop.f32.mrb[183].mxu1  ;;  %13853 = vmatmul.mubr.msk.bf16.gmra.mrb[196].mxu0 %vm411_vm2, %v5706_v25  ;;  %v6705_v41 = vpop.permute.xlu1 %6704 }
 0x771   :  { %13943 = vmatmul.mubr.msk.bf16.vlgmr.msra.gmra.mrb[244].mxu1 %vm411_vm2, %v6403_v10  ;;  %v6510_v10 = vsel %vm411_vm2, %v6505_v49, 0 }
 0x772   :  { %13947 = vmatpush3.bf16.xpose.msra.mxu1 %v6460_v29  ;;  %v5073_v58 = vpop.f32.mrb[164].mxu0  ;;  %13948 = vmatprep.mubr.msk.bf16.mxu1 %vm15220_vm1, %v19311_v33 }
 0x773   :  { %v13766_v6 = vpop.f32.mrb[165].mxu0  ;;  %13952 = vmatprep.subr.bf16.mxu1 %v19311_v33 }
 0x774   :  { %v5076_v4 = vpop.f32.mrb[166].mxu0  ;;  %v17234_v6 = vpop.permute.xlu0 %6652 }
 0x775   :  { %v5025_v18 = vpop.f32.mrb[184].mxu1  ;;  %v13767_v5 = vpop.f32.mrb[167].mxu0 }
 0x776   :  { %v5707_v40 = vpack.c.bf16 %v5025_v18, %v4977_v9  ;;  %v13760_v25 = vpop.f32.mrb[185].mxu1  ;;  %v6703_v49 = vpop.permute.xlu1 %6702 }
 0x777   :  { %v5028_v57 = vpop.f32.mrb[186].mxu1 }
 0x778   :  { %v13761_v12 = vpop.f32.mrb[187].mxu1  ;;  %13856 = vmatprep.mubr.msk.bf16.mxu0 %vm411_vm2, %v5707_v40 }
 0x779   :  { %13949 = vmatmul.mubr.msk.bf16.vlgmr.msra.gmra.mrb[248].mxu1 %vm411_vm2, %v6453_v55  ;;  %v6560_v55 = vsel %vm411_vm2, %v6555_v15, 0  ;;  %v17239_v12 = vpop.permute.xlu0 %6754 }
 0x77a   :  { %13953 = vmatpush3.bf16.xpose.msra.mxu1 %v6510_v10  ;;  %v5169_v52 = vpop.f32.mrb[168].mxu0  ;;  %13954 = vmatprep.mubr.msk.bf16.mxu1 %vm15220_vm1, %v19311_v33 }
 0x77b   :  { %v13778_v29 = vpop.f32.mrb[169].mxu0  ;;  %13958 = vmatprep.subr.bf16.mxu1 %v19311_v33 }
 0x77c   :  { %v5172_v9 = vpop.f32.mrb[170].mxu0 }
 0x77d   :  { %v5121_v4 = vpop.f32.mrb[188].mxu1  ;;  %v13779_v18 = vpop.f32.mrb[171].mxu0 }
 0x77e   :  { %v5708_v5 = vpack.c.bf16 %v5121_v4, %v5073_v58  ;;  %v13772_v40 = vpop.f32.mrb[189].mxu1  ;;  %v6805_v18 = vpop.permute.xlu1 %6804 }
 0x77f   :  { %v5124_v25 = vpop.f32.mrb[190].mxu1  ;;  %v17244_v15 = vpop.permute.xlu0 %6752 }
 0x780   :  { %v13773_v57 = vpop.f32.mrb[191].mxu1  ;;  %13857 = vmatmul.mubr.msk.bf16.gmra.mrb[200].mxu0 %vm411_vm2, %v5708_v5 }
 0x781   :  { %13955 = vmatmul.mubr.msk.bf16.vlgmr.msra.gmra.mrb[252].mxu1 %vm411_vm2, %v6503_v38  ;;  %v6610_v57 = vsel %vm411_vm2, %v6605_v43, 0  ;;  %v6710_v43 = vsel %vm411_vm2, %v6705_v41, 0 }
 0x782   :  { %13959 = vmatpush3.bf16.xpose.msra.mxu1 %v6560_v55  ;;  %v5265_v10 = vpop.f32.mrb[172].mxu0  ;;  %13960 = vmatprep.mubr.msk.bf16.mxu1 %vm15220_vm1, %v19311_v33  ;;  %v6803_v55 = vpop.permute.xlu1 %6802 }
 0x783   :  { %v13790_v29 = vpop.f32.mrb[173].mxu0  ;;  %13964 = vmatprep.subr.bf16.mxu1 %v19311_v33 }
 0x784   :  { %v5268_v58 = vpop.f32.mrb[174].mxu0 }
 0x785   :  { %v5217_v9 = vpop.f32.mrb[192].mxu1  ;;  %v13791_v4 = vpop.f32.mrb[175].mxu0 }
 0x786   :  { %v5709_v40 = vpack.c.bf16 %v5217_v9, %v5169_v52  ;;  %v13784_v5 = vpop.f32.mrb[193].mxu1  ;;  %v17252_v52 = vpop.permute.xlu0 %6854 }
 0x787   :  { %v5220_v25 = vpop.f32.mrb[194].mxu1 }
 0x788   :  { %v13785_v38 = vpop.f32.mrb[195].mxu1  ;;  %13860 = vmatprep.mubr.msk.bf16.mxu0 %vm411_vm2, %v5709_v40 }
 0x789   :  { %13961 = vmatmul.mubr.msk.bf16.vlgmr.msra.gmra.mrb[0].mxu1 %vm411_vm2, %v6553_v24  ;;  %v6905_v24 = vpop.permute.xlu1 %6904 }
 0x78a   :  { %13965 = vmatpush3.bf16.xpose.msra.mxu1 %v6610_v57  ;;  %13966 = vmatprep.mubr.msk.bf16.mxu1 %vm15220_vm1, %v19311_v33  ;;  %v17260_v40 = vpop.permute.xlu0 %6852  ;;  %v6910_v57 = vsel %vm411_vm2, %v6905_v24, 0 }
 0x78b   :  { %13976 = vmatprep.subr.bf16.mxu1 %v19311_v33 }
 0x78d   :  { %v5313_v29 = vpop.f32.mrb[196].mxu1  ;;  %v6903_v25 = vpop.permute.xlu1 %6902 }
 0x78e   :  { %v5710_v58 = vpack.c.bf16 %v5313_v29, %v5265_v10  ;;  %v13796_v9 = vpop.f32.mrb[197].mxu1  ;;  %v6810_v10 = vsel %vm411_vm2, %v6805_v18, 0  ;;  %v17264_v38 = vpop.permute.xlu0 %6954 }
 0x78f   :  { %v5316_v4 = vpop.f32.mrb[198].mxu1 }
 0x790   :  { %v13797_v5 = vpop.f32.mrb[199].mxu1  ;;  %13861 = vmatmul.mubr.msk.bf16.gmra.mrb[204].mxu0 %vm411_vm2, %v5710_v58 }
 0x791   :  { %13967 = vmatmul.mubr.msk.bf16.vlgmr.msra.gmra.mrb[4].mxu1 %vm411_vm2, %v6603_v35  ;;  %v7005_v35 = vpop.permute.xlu1 %7004 }
 0x792   :  { %13977 = vmatpush3.bf16.xpose.msra.mxu1 %v6710_v43  ;;  %13978 = vmatprep.mubr.msk.bf16.mxu1 %vm15220_vm1, %v19311_v33  ;;  %v17269_v41 = vpop.permute.xlu0 %6952  ;;  %v7010_v29 = vsel %vm411_vm2, %v7005_v35, 0 }
 0x793   :  { %13988 = vmatprep.subr.bf16.mxu1 %v19311_v33 }
 0x796   :  { %v17276_v18 = vpop.permute.xlu0 %7054 }
 0x799   :  { %13979 = vmatmul.mubr.msk.bf16.vlgmr.msra.gmra.mrb[8].mxu1 %vm411_vm2, %v6703_v49  ;;  %v7003_v49 = vpop.permute.xlu1 %7002 }
 0x79a   :  { %13989 = vmatpush3.bf16.xpose.msra.mxu1 %v6810_v10  ;;  %13990 = vmatprep.mubr.msk.bf16.mxu1 %vm15220_vm1, %v19311_v33 }
 0x79b   :  { %14000 = vmatprep.subr.bf16.mxu1 %v19311_v33 }
 0x79d   :  { %v7105_v58 = vpop.permute.xlu1 %7104 }
 0x79e   :  { %v7110_v4 = vsel %vm411_vm2, %v7105_v58, 0 }
 0x7a1   :  { %13991 = vmatmul.mubr.msk.bf16.vlgmr.msra.gmra.mrb[12].mxu1 %vm411_vm2, %v6803_v55  ;;  %v17283_v55 = vpop.permute.xlu0 %7052  ;;  %v7103_v9 = vpop.permute.xlu1 %7102 }
 0x7a2   :  { %14001 = vmatpush3.bf16.xpose.msra.mxu1 %v6910_v57  ;;  %14002 = vmatprep.mubr.msk.bf16.mxu1 %vm15220_vm1, %v19311_v33 }
 0x7a3   :  { %14012 = vmatprep.subr.bf16.mxu1 %v19311_v33 }
 0x7a5   :  { %v17287_v5 = vpop.permute.xlu0 %7154  ;;  %v7205_v43 = vpop.permute.xlu1 %7204 }
 0x7a9   :  { %14003 = vmatmul.mubr.msk.bf16.vlgmr.msra.gmra.mrb[16].mxu1 %vm411_vm2, %v6903_v25  ;;  %v17292_v24 = vpop.permute.xlu0 %7152  ;;  %v7210_v25 = vsel %vm411_vm2, %v7205_v43, 0  ;;  %v7203_v58 = vpop.permute.xlu1 %7202 }
 0x7aa   :  { %14013 = vmatpush3.bf16.xpose.msra.mxu1 %v7010_v29  ;;  %14014 = vmatprep.mubr.msk.bf16.mxu1 %vm15220_vm1, %v19311_v33 }
 0x7ab   :  { %14024 = vmatprep.subr.bf16.mxu1 %v19311_v33 }
 0x7b1   :  { %14015 = vmatmul.mubr.msk.bf16.vlgmr.msra.gmra.mrb[20].mxu1 %vm411_vm2, %v7003_v49  ;;  %v7589_v49 = vpop.permute.xlu0 %7588 }
 0x7b2   :  { %14025 = vmatpush3.bf16.xpose.msra.mxu1 %v7110_v4  ;;  %14026 = vmatprep.mubr.msk.bf16.mxu1 %vm15220_vm1, %v19311_v33  ;;  %v7594_v4 = vsel %vm1879_vm3, %v7589_v49, 0 }
 0x7b3   :  { %14036 = vmatprep.subr.bf16.mxu1 %v19311_v33 }
 0x7b9   :  { %14027 = vmatmul.mubr.msk.bf16.vlgmr.msra.gmra.mrb[24].mxu1 %vm411_vm2, %v7103_v9 }
 0x7ba   :  { %14037 = vmatpush3.bf16.xpose.msra.mxu1 %v7210_v25  ;;  %14038 = vmatprep.mubr.msk.bf16.mxu1 %vm15220_vm1, %v19311_v33 }
 0x7bb   :  { %v5361_v10 = vpop.f32.mrb[176].mxu0  ;;  %14048 = vmatprep.subr.bf16.mxu1 %v19311_v33 }
 0x7bc   :  { %v13802_v35 = vpop.f32.mrb[177].mxu0 }
 0x7bd   :  { %v5364_v57 = vpop.f32.mrb[178].mxu0 }
 0x7be   :  { %v13803_v29 = vpop.f32.mrb[179].mxu0 }
 0x7c1   :  { %14039 = vmatmul.mubr.msk.bf16.vlgmr.msra.gmra.mrb[28].mxu1 %vm411_vm2, %v7203_v58 }
 0x7c2   :  { %14049 = vmatpush3.bf16.msra.mxu1 %v7594_v4  ;;  %v5409_v43 = vpop.f32.mrb[200].mxu1  ;;  %14050 = vmatprep.mubr.msk.bf16.mxu1 %vm15220_vm1, %v19311_v33 }
 0x7c3   :  { %v5711_v9 = vpack.c.bf16 %v5409_v43, %v5361_v10  ;;  %v13808_v25 = vpop.f32.mrb[201].mxu1  ;;  %v5457_v22 = vpop.f32.mrb[180].mxu0  ;;  %14060 = vmatprep.subr.bf16.mxu1 %v19311_v33 }
 0x7c4   :  { %v5412_v32 = vpop.f32.mrb[202].mxu1  ;;  %v13814_v35 = vpop.f32.mrb[181].mxu0 }
 0x7c5   :  { %v13809_v57 = vpop.f32.mrb[203].mxu1  ;;  %v5460_v34 = vpop.f32.mrb[182].mxu0  ;;  %13864 = vmatprep.mubr.msk.bf16.mxu0 %vm411_vm2, %v5711_v9 }
 0x7c6   :  { %v13815_v29 = vpop.f32.mrb[183].mxu0 }
 0x7ca   :  { %v5505_v49 = vpop.f32.mrb[204].mxu1 }
 0x7cb   :  { %v5712_v21 = vpack.c.bf16 %v5505_v49, %v5457_v22  ;;  %v13820_v58 = vpop.f32.mrb[205].mxu1 }
 0x7cc   :  { %v5508_v4 = vpop.f32.mrb[206].mxu1 }
 0x7cd   :  { %v13821_v50 = vpop.f32.mrb[207].mxu1  ;;  %13865 = vmatmul.mubr.msk.bf16.gmra.mrb[208].mxu0 %vm411_vm2, %v5712_v21  ;;  %v19418_v4 = vld [vmem:[#allocation52_spill] sm:$0xff] }
 0x7f4   :  { %v5553_v59 = vpop.f32.mrb[184].mxu0 }
 0x7f5   :  { %v13826_v10 = vpop.f32.mrb[185].mxu0 }
 0x7f6   :  { %v5556_v43 = vpop.f32.mrb[186].mxu0  ;;  %v19419_v10 = vld [vmem:[#allocation53_spill] sm:$0xff] }
 0x7f7   :  { %v13827_v25 = vpop.f32.mrb[187].mxu0  ;;  %v19420_v43 = vpack.c.bf16 %v19418_v4, %v19419_v10  ;;  %v19428_v4 = vld [vmem:[#allocation55_spill] sm:$0xff] }
 0x7fb   :  { %v5601_v13 = vpop.f32.mrb[208].mxu1 }
 0x7fc   :  { %v5713_v48 = vpack.c.bf16 %v5601_v13, %v5553_v59  ;;  %v13832_v32 = vpop.f32.mrb[209].mxu1  ;;  %v5649_v35 = vpop.f32.mrb[188].mxu0 }
 0x7fd   :  { %v5604_v57 = vpop.f32.mrb[210].mxu1  ;;  %v13838_v34 = vpop.f32.mrb[189].mxu0  ;;  %v19421_v32 = vld [vmem:[#allocation56_spill] sm:$0xff] }
 0x7fe   :  { %v13833_v37 = vpop.f32.mrb[211].mxu1  ;;  %v5652_v9 = vpop.f32.mrb[190].mxu0  ;;  %13868 = vmatprep.mubr.msk.bf16.mxu0 %vm411_vm2, %v5713_v48  ;;  %v6660_v48 = vsel %vm411_vm2, %v17226_v62, 0 }
 0x7ff   :  { %v13839_v22 = vpop.f32.mrb[191].mxu0  ;;  %v19424_v9 = vld [vmem:[#allocation54_spill] sm:$0xff] }
 0x800   :  { %v19425_v22 = vld [vmem:[#allocation13_spill] sm:$0xff] }
 0x803   :  { %v5697_v29 = vpop.f32.mrb[212].mxu1 }
 0x804   :  { %v5714_v49 = vpack.c.bf16 %v5697_v29, %v5649_v35  ;;  %v13844_v50 = vpop.f32.mrb[213].mxu1  ;;  %v19422_v35 = vld [vmem:[#allocation12_spill] sm:$0xff]  ;;  %v19426_v29 = vpack.c.bf16 %v19424_v9, %v19425_v22  ;;  %v19434_v9 = vld [vmem:[#allocation62_spill] sm:$0xff] }
 0x805   :  { %v5700_v58 = vpop.f32.mrb[214].mxu1  ;;  %v19423_v57 = vpack.c.bf16 %v19421_v32, %v19422_v35 }
 0x806   :  { %v13845_v21 = vpop.f32.mrb[215].mxu1  ;;  %13869 = vmatmul.mubr.msk.bf16.gmra.mrb[212].mxu0 %vm411_vm2, %v5714_v49 }
 0x807   :  { %13874 = vmatprep.mubr.msk.bf16.mxu0 %vm411_vm2, %v19420_v43  ;;  %v19427_v21 = vld [vmem:[#allocation58_spill] sm:$0xff] }
 0x808   :  { %v19429_v10 = vpack.c.bf16 %v19427_v21, %v19428_v4 }
 0x80c   :  { %v17312_v13 = vpop.f32.mrb[216].mxu1 }
 0x80d   :  { %v13902_v59 = vpop.f32.mrb[217].mxu1  ;;  %v7252_v37 = vsel %vm411_vm2, %v17312_v13, -inf }
 0x80e   :  { %7253 = vmax.xlane.f32.xlu0 %v7252_v37  ;;  %v6099_v25 = vpop.f32.mrb[218].mxu1  ;;  %13875 = vmatmul.mubr.msk.bf16.vlgmr.msra.gmra.mrb[192].mxu0 %vm411_vm2, %v19423_v57  ;;  %v19430_v59 = vld [vmem:[#allocation61_spill] sm:$0xff]  ;;  %v19431_v37 = vld [vmem:[#allocation60_spill] sm:$0xff] }
 0x80f   :  { %v13903_v34 = vpop.f32.mrb[219].mxu1  ;;  %13971 = vmatpush3.bf16.xpose.msra.mxu0 %v6660_v48  ;;  %13878 = vmatprep.mubr.msk.bf16.mxu0 %vm411_vm2, %v19426_v29  ;;  %v19432_v48 = vpack.c.bf16 %v19430_v59, %v19431_v37  ;;  %v19439_v59 = vld [vmem:[#allocation65_spill] sm:$0xff]  ;;  %v19440_v37 = vld [vmem:[#allocation68_spill] sm:$0xff] }
 0x810   :  { %13982 = vmatprep.subr.bf16.mxu0 %v19311_v33  ;;  %v19433_v34 = vld [vmem:[#allocation63_spill] sm:$0xff] }
 0x811   :  { %v19435_v22 = vpack.c.bf16 %v19433_v34, %v19434_v9 }
 0x814   :  { %v17327_v49 = vpop.f32.mrb[220].mxu1 }
 0x815   :  { %v13908_v50 = vpop.f32.mrb[221].mxu1  ;;  %v7255_v62 = vsel %vm411_vm2, %v17327_v49, -inf }
 0x816   :  { %7256 = vmax.xlane.f32.xlu1 %v7255_v62  ;;  %v6149_v58 = vpop.f32.mrb[222].mxu1  ;;  %13879 = vmatmul.mubr.msk.bf16.gmra.mrb[196].mxu0 %vm411_vm2, %v19429_v10  ;;  %v19436_v50 = vld [vmem:[#allocation64_spill] sm:$0xff]  ;;  %v19437_v62 = vld [vmem:[#allocation66_spill] sm:$0xff] }
 0x817   :  { %v13909_v43 = vpop.f32.mrb[223].mxu1  ;;  %13882 = vmatprep.mubr.msk.bf16.mxu0 %vm411_vm2, %v19432_v48  ;;  %v19438_v58 = vpack.c.bf16 %v19436_v50, %v19437_v62  ;;  %v19441_v48 = vpack.c.bf16 %v19439_v59, %v19440_v37  ;;  %v19445_v62 = vld [vmem:[#allocation69_spill] sm:$0xff] }
 0x818   :  { %v19449_v59 = vld [vmem:[#allocation73_spill] sm:$0xff] }
 0x81c   :  { %v17339_v25 = vpop.f32.mrb[224].mxu1 }
 0x81d   :  { %v13914_v32 = vpop.f32.mrb[225].mxu1  ;;  %v7258_v35 = vsel %vm411_vm2, %v17339_v25, -inf }
 0x81e   :  { %7259 = vmax.xlane.f32.xlu0 %v7258_v35  ;;  %v6199_v57 = vpop.f32.mrb[226].mxu1  ;;  %13883 = vmatmul.mubr.msk.bf16.gmra.mrb[200].mxu0 %vm411_vm2, %v19435_v22  ;;  %v19442_v35 = vld [vmem:[#allocation67_spill] sm:$0xff] }
 0x81f   :  { %v13915_v29 = vpop.f32.mrb[227].mxu1  ;;  %13886 = vmatprep.mubr.msk.bf16.mxu0 %vm411_vm2, %v19438_v58  ;;  %v19443_v57 = vld [vmem:[#allocation70_spill] sm:$0xff]  ;;  %v19446_v58 = vld [vmem:[#allocation72_spill] sm:$0xff] }
 0x820   :  { %v19444_v34 = vpack.c.bf16 %v19442_v35, %v19443_v57 }
 0x824   :  { %v17351_v21 = vpop.f32.mrb[228].mxu1 }
 0x825   :  { %v13920_v4 = vpop.f32.mrb[229].mxu1  ;;  %v7261_v10 = vsel %vm411_vm2, %v17351_v21, -inf }
 0x826   :  { %7262 = vmax.xlane.f32.xlu0 %v7261_v10  ;;  %v6249_v43 = vpop.f32.mrb[230].mxu1  ;;  %13887 = vmatmul.mubr.msk.bf16.gmra.mrb[204].mxu0 %vm411_vm2, %v19441_v48  ;;  %v19447_v4 = vpack.c.bf16 %v19445_v62, %v19446_v58 }
 0x827   :  { %v13921_v32 = vpop.f32.mrb[231].mxu1  ;;  %13890 = vmatprep.mubr.msk.bf16.mxu0 %vm411_vm2, %v19444_v34  ;;  %v19448_v43 = vld [vmem:[#allocation71_spill] sm:$0xff] }
 0x828   :  { %v19450_v37 = vpack.c.bf16 %v19448_v43, %v19449_v59  ;;  %v19451_v34 = vld [vmem:[#allocation75_spill] sm:$0xff] }
 0x82c   :  { %v17363_v9 = vpop.f32.mrb[232].mxu1 }
 0x82d   :  { %v13926_v22 = vpop.f32.mrb[233].mxu1  ;;  %v7264_v29 = vsel %vm411_vm2, %v17363_v9, -inf }
 0x82e   :  { %7265 = vmax.xlane.f32.xlu1 %v7264_v29  ;;  %v6299_v50 = vpop.f32.mrb[234].mxu1  ;;  %13891 = vmatmul.mubr.msk.bf16.gmra.mrb[208].mxu0 %vm411_vm2, %v19447_v4  ;;  %v19452_v22 = vld [vmem:[#allocation74_spill] sm:$0xff] }
 0x82f   :  { %v13927_v10 = vpop.f32.mrb[235].mxu1  ;;  %13894 = vmatprep.mubr.msk.bf16.mxu0 %vm411_vm2, %v19450_v37  ;;  %v19453_v29 = vpack.c.bf16 %v19451_v34, %v19452_v22 }
 0x830   :  { %v6760_v10 = vsel %vm411_vm2, %v17239_v12, 0  ;;  %v6860_v12 = vsel %vm411_vm2, %v17252_v52, 0  ;;  %v6960_v52 = vsel %vm411_vm2, %v17264_v38, 0  ;;  %v7060_v38 = vsel %vm411_vm2, %v17276_v18, 0 }
 0x831   :  { %v7160_v18 = vsel %vm411_vm2, %v17287_v5, 0 }
 0x834   :  { %v17375_v48 = vpop.f32.mrb[236].mxu1 }
 0x835   :  { %v13932_v32 = vpop.f32.mrb[237].mxu1  ;;  %v7267_v35 = vsel %vm411_vm2, %v17375_v48, -inf }
 0x836   :  { %7268 = vmax.xlane.f32.xlu0 %v7267_v35  ;;  %v6349_v57 = vpop.f32.mrb[238].mxu1  ;;  %13895 = vmatmul.mubr.msk.bf16.gmra.mrb[212].mxu0 %vm411_vm2, %v19453_v29 }
 0x837   :  { %v13933_v50 = vpop.f32.mrb[239].mxu1  ;;  %13972 = vmatprep.mubr.msk.bf16.mxu0 %vm15220_vm1, %v19311_v33 }
 0x83c   :  { %v17385_v62 = vpop.f32.mrb[240].mxu1 }
 0x83d   :  { %v13938_v58 = vpop.f32.mrb[241].mxu1  ;;  %v7270_v4 = vsel %vm411_vm2, %v17385_v62, -inf }
 0x83e   :  { %7271 = vmax.xlane.f32.xlu1 %v7270_v4  ;;  %v6399_v43 = vpop.f32.mrb[242].mxu1  ;;  %13973 = vmatmul.mubr.msk.bf16.vlgmr.msra.gmra.mrb[216].mxu0 %vm411_vm2, %v17234_v6 }
 0x83f   :  { %v13939_v59 = vpop.f32.mrb[243].mxu1  ;;  %13983 = vmatpush3.bf16.xpose.msra.mxu0 %v6760_v10  ;;  %13984 = vmatprep.mubr.msk.bf16.mxu0 %vm15220_vm1, %v19311_v33 }
 0x840   :  { %13994 = vmatprep.subr.bf16.mxu0 %v19311_v33 }
 0x844   :  { %v17396_v37 = vpop.f32.mrb[244].mxu1 }
 0x845   :  { %v13944_v32 = vpop.f32.mrb[245].mxu1  ;;  %v7273_v35 = vsel %vm411_vm2, %v17396_v37, -inf }
 0x846   :  { %7274 = vmax.xlane.f32.xlu0 %v7273_v35  ;;  %v6449_v57 = vpop.f32.mrb[246].mxu1  ;;  %13985 = vmatmul.mubr.msk.bf16.vlgmr.msra.gmra.mrb[220].mxu0 %vm411_vm2, %v17244_v15 }
 0x847   :  { %v13945_v6 = vpop.f32.mrb[247].mxu1  ;;  %13995 = vmatpush3.bf16.xpose.msra.mxu0 %v6860_v12  ;;  %13996 = vmatprep.mubr.msk.bf16.mxu0 %vm15220_vm1, %v19311_v33  ;;  %v7541_v57 = vpop.permute.xlu1 %7540 }
 0x848   :  { %14006 = vmatprep.subr.bf16.mxu0 %v19311_v33  ;;  %v7546_v5 = vsel %vm1879_vm3, %v7541_v57, 0 }
 0x84c   :  { %v17407_v34 = vpop.f32.mrb[248].mxu1 }
 0x84d   :  { %v13950_v22 = vpop.f32.mrb[249].mxu1  ;;  %v7276_v29 = vsel %vm411_vm2, %v17407_v34, -inf }
 0x84e   :  { %7277 = vmax.xlane.f32.xlu1 %v7276_v29  ;;  %v6499_v50 = vpop.f32.mrb[250].mxu1  ;;  %13997 = vmatmul.mubr.msk.bf16.vlgmr.msra.gmra.mrb[224].mxu0 %vm411_vm2, %v17260_v40 }
 0x84f   :  { %v13951_v15 = vpop.f32.mrb[251].mxu1  ;;  %14007 = vmatpush3.bf16.xpose.msra.mxu0 %v6960_v52  ;;  %14008 = vmatprep.mubr.msk.bf16.mxu0 %vm15220_vm1, %v19311_v33 }
 0x850   :  { %14018 = vmatprep.subr.bf16.mxu0 %v19311_v33 }
 0x854   :  { %v17418_v58 = vpop.f32.mrb[252].mxu1 }
 0x855   :  { %v13956_v4 = vpop.f32.mrb[253].mxu1  ;;  %v7279_v10 = vsel %vm411_vm2, %v17418_v58, -inf }
 0x856   :  { %7280 = vmax.xlane.f32.xlu0 %v7279_v10  ;;  %v6549_v43 = vpop.f32.mrb[254].mxu1  ;;  %14009 = vmatmul.mubr.msk.bf16.vlgmr.msra.gmra.mrb[228].mxu0 %vm411_vm2, %v17269_v41  ;;  %v19454_v10 = vld [vmem:[#allocation48_spill] sm:$0xff] }
 0x857   :  { %v13957_v40 = vpop.f32.mrb[255].mxu1  ;;  %14019 = vmatpush3.bf16.xpose.msra.mxu0 %v7060_v38  ;;  %14020 = vmatprep.mubr.msk.bf16.mxu0 %vm15220_vm1, %v19311_v33 }
 0x858   :  { %14030 = vmatprep.subr.bf16.mxu0 %v19311_v33 }
 0x85c   :  { %v17429_v59 = vpop.f32.mrb[0].mxu1 }
 0x85d   :  { %v13962_v32 = vpop.f32.mrb[1].mxu1  ;;  %v7282_v35 = vsel %vm411_vm2, %v17429_v59, -inf }
 0x85e   :  { %7283 = vmax.xlane.f32.xlu1 %v7282_v35  ;;  %v6599_v12 = vpop.f32.mrb[2].mxu1  ;;  %14021 = vmatmul.mubr.msk.bf16.vlgmr.msra.gmra.mrb[232].mxu0 %vm411_vm2, %v17283_v55  ;;  %v17456_v35 = vpop.permute.xlu0 %7684 }
 0x85f   :  { %v13963_v41 = vpop.f32.mrb[3].mxu1  ;;  %14031 = vmatpush3.bf16.xpose.msra.mxu0 %v7160_v18  ;;  %14032 = vmatprep.mubr.msk.bf16.mxu0 %vm15220_vm1, %v19311_v33  ;;  %v17458_v18 = vpop.permute.xlu1 %7636  ;;  %v19455_v12 = vld [vmem:[#allocation45_spill] sm:$0xff] }
 0x860   :  { %14042 = vmatprep.subr.bf16.mxu0 %v19311_v33 }
 0x864   :  { %v17440_v6 = vpop.f32.mrb[4].mxu1 }
 0x865   :  { %v13968_v22 = vpop.f32.mrb[5].mxu1  ;;  %v7285_v29 = vsel %vm411_vm2, %v17440_v6, -inf }
 0x866   :  { %7286 = vmax.xlane.f32.xlu0 %v7285_v29  ;;  %v6649_v52 = vpop.f32.mrb[6].mxu1  ;;  %14033 = vmatmul.mubr.msk.bf16.vlgmr.msra.gmra.mrb[236].mxu0 %vm411_vm2, %v17292_v24  ;;  %v17464_v29 = vpop.permute.xlu0 %7780 }
 0x867   :  { %v13969_v55 = vpop.f32.mrb[7].mxu1  ;;  %14043 = vmatpush3.bf16.msra.mxu0 %v7546_v5  ;;  %14044 = vmatprep.mubr.msk.bf16.mxu0 %vm15220_vm1, %v19311_v33  ;;  %v17466_v52 = vpop.permute.xlu1 %7732 }
 0x868   :  { %14054 = vmatprep.subr.bf16.mxu0 %v19311_v33 }
 0x86c   :  { %v17450_v50 = vpop.f32.mrb[8].mxu1 }
 0x86d   :  { %v13980_v15 = vpop.f32.mrb[9].mxu1  ;;  %v7291_v0 = vsel %vm411_vm2, %v17450_v50, -inf }
 0x86e   :  { %v6749_v4 = vpop.f32.mrb[10].mxu1  ;;  %v17470_v15 = vpop.permute.xlu0 %7876 }
 0x86f   :  { %8308 = vrot.lane.b32.xlu1 %v19454_v10, %s15227_s10  ;;  %v13981_v38 = vpop.f32.mrb[11].mxu1 }
 0x874   :  { %v17454_v43 = vpop.f32.mrb[12].mxu1 }
 0x875   :  { %v13992_v40 = vpop.f32.mrb[13].mxu1 }
 0x876   :  { %v6849_v32 = vpop.f32.mrb[14].mxu1  ;;  %v17472_v40 = vpop.permute.xlu1 %7828 }
 0x877   :  { %v13993_v24 = vpop.f32.mrb[15].mxu1 }
 0x878   :  { %v17474_v24 = vpop.permute.xlu0 %7972 }
 0x87c   :  { %8260 = vrot.lane.b32.xlu0 %v19455_v12, %s15227_s10  ;;  %v17462_v41 = vpop.f32.mrb[16].mxu1  ;;  %v17480_v44 = vpop.permute.xlu0 %8068 }
 0x87d   :  { %v14004_v57 = vpop.f32.mrb[17].mxu1 }
 0x87e   :  { %v6949_v22 = vpop.f32.mrb[18].mxu1  ;;  %v17478_v57 = vpop.permute.xlu1 %7924 }
 0x87f   :  { %v14005_v5 = vpop.f32.mrb[19].mxu1 }
 0x880   :  { %v17486_v20 = vpop.permute.xlu0 %8164 }
 0x882   :  { %v17482_v8 = vpop.permute.xlu1 %8020 }
 0x884   :  { %v17468_v55 = vpop.f32.mrb[20].mxu1 }
 0x885   :  { %v14016_v4 = vpop.f32.mrb[21].mxu1 }
 0x886   :  { %v7049_v38 = vpop.f32.mrb[22].mxu1  ;;  %v17488_v61 = vpop.permute.xlu1 %8116 }
 0x887   :  { %v14017_v32 = vpop.f32.mrb[23].mxu1 }
 0x88a   :  { %v17495_v47 = vpop.permute.xlu1 %8212 }
 0x88b   :  { %19456 = vst [vmem:[#allocation15_spill] sm:$0xff] %v17495_v47 }
 0x88c   :  { %v17476_v12 = vpop.f32.mrb[24].mxu1 }
 0x88d   :  { %v14028_v22 = vpop.f32.mrb[25].mxu1 }
 0x88e   :  { %v7149_v10 = vpop.f32.mrb[26].mxu1 }
 0x88f   :  { %v14029_v5 = vpop.f32.mrb[27].mxu1 }
 0x890   :  { %v7297_v5 = vsel %vm411_vm2, %v17454_v43, -inf }
 0x894   :  { %v17484_v28 = vpop.f32.mrb[28].mxu1 }
 0x895   :  { %v14040_v4 = vpop.f32.mrb[29].mxu1 }
 0x896   :  { %v7249_v38 = vpop.f32.mrb[30].mxu1  ;;  %v7303_v4 = vsel %vm411_vm2, %v17462_v41, -inf }
 0x897   :  { %v14041_v32 = vpop.f32.mrb[31].mxu1 }
 0x89b   :  { %v7254_v3 = vpop.xlane.xlu0 %7253  ;;  %7292 = vmax.xlane.f32.xlu0 %v7291_v0  ;;  %v7309_v0 = vsel %vm411_vm2, %v17468_v55, -inf }
 0x89c   :  { %v7324_v10 = vsub.f32 %v17312_v13, %v7254_v3  ;;  %v7315_v13 = vsel %vm411_vm2, %v17476_v12, -inf }
 0x89e   :  { %v7348_v22 = vmul.f32 1.442695, %v7324_v10 }
 0x89f   :  { %7298 = vmax.xlane.f32.xlu0 %v7297_v5 }
 0x8a0   :  { %14832 = vpow2.f32 %v7348_v22 }
 0x8a3   :  { %7304 = vmax.xlane.f32.xlu0 %v7303_v4  ;;  %v7257_v38 = vpop.xlane.xlu1 %7256  ;;  %v7321_v4 = vsel %vm411_vm2, %v17484_v28, -inf }
 0x8a4   :  { %v7325_v32 = vsub.f32 %v17327_v49, %v7257_v38 }
 0x8a6   :  { %v7350_v45 = vmul.f32 1.442695, %v7325_v32 }
 0x8a7   :  { %7310 = vmax.xlane.f32.xlu0 %v7309_v0 }
 0x8a8   :  { %14834 = vpow2.f32 %v7350_v45 }
 0x8aa   :  { %v17502_v3 = vpop.eup %14832 }
 0x8ab   :  { %v7260_v10 = vpop.xlane.xlu0 %7259  ;;  %7316 = vmax.xlane.f32.xlu0 %v7315_v13  ;;  %v7396_v22 = vsel %vm411_vm2, %v17502_v3, 0.0 }
 0x8ac   :  { %v7326_v5 = vsub.f32 %v17339_v25, %v7260_v10  ;;  %7397 = vadd.xlane.f32.xlu1 %v7396_v22 }
 0x8ae   :  { %v7352_v49 = vmul.f32 1.442695, %v7326_v5 }
 0x8af   :  { %7322 = vmax.xlane.f32.xlu0 %v7321_v4 }
 0x8b0   :  { %14836 = vpow2.f32 %v7352_v49 }
 0x8b2   :  { %v17511_v45 = vpop.eup %14834 }
 0x8b3   :  { %v7263_v38 = vpop.xlane.xlu0 %7262  ;;  %v7399_v32 = vsel %vm411_vm2, %v17511_v45, 0.0 }
 0x8b4   :  { %v7327_v0 = vsub.f32 %v17351_v21, %v7263_v38  ;;  %7400 = vadd.xlane.f32.xlu0 %v7399_v32 }
 0x8b6   :  { %v7354_v13 = vmul.f32 1.442695, %v7327_v0 }
 0x8b8   :  { %14838 = vpow2.f32 %v7354_v13 }
 0x8ba   :  { %v17516_v47 = vpop.eup %14836 }
 0x8bb   :  { %v7266_v25 = vpop.xlane.xlu1 %7265  ;;  %v7402_v10 = vsel %vm411_vm2, %v17516_v47, 0.0 }
 0x8bc   :  { %v7328_v22 = vsub.f32 %v17363_v9, %v7266_v25  ;;  %7403 = vadd.xlane.f32.xlu1 %v7402_v10 }
 0x8be   :  { %v7356_v5 = vmul.f32 1.442695, %v7328_v22 }
 0x8c0   :  { %14840 = vpow2.f32 %v7356_v5 }
 0x8c2   :  { %v17521_v49 = vpop.eup %14838 }
 0x8c3   :  { %v7269_v4 = vpop.xlane.xlu0 %7268  ;;  %v7405_v21 = vsel %vm411_vm2, %v17521_v49, 0.0 }
 0x8c4   :  { %v7329_v38 = vsub.f32 %v17375_v48, %v7269_v4  ;;  %7406 = vadd.xlane.f32.xlu0 %v7405_v21 }
 0x8c6   :  { %v7358_v32 = vmul.f32 1.442695, %v7329_v38 }
 0x8c8   :  { %14842 = vpow2.f32 %v7358_v32 }
 0x8ca   :  { %v17526_v0 = vpop.eup %14840 }
 0x8cb   :  { %v7272_v13 = vpop.xlane.xlu1 %7271  ;;  %v7408_v9 = vsel %vm411_vm2, %v17526_v0, 0.0 }
 0x8cc   :  { %v7330_v25 = vsub.f32 %v17385_v62, %v7272_v13  ;;  %7409 = vadd.xlane.f32.xlu1 %v7408_v9 }
 0x8ce   :  { %v7360_v10 = vmul.f32 1.442695, %v7330_v25 }
 0x8d0   :  { %14844 = vpow2.f32 %v7360_v10 }
 0x8d2   :  { %v17531_v22 = vpop.eup %14842 }
 0x8d3   :  { %v7275_v5 = vpop.xlane.xlu0 %7274  ;;  %v7411_v48 = vsel %vm411_vm2, %v17531_v22, 0.0 }
 0x8d4   :  { %v7331_v4 = vsub.f32 %v17396_v37, %v7275_v5  ;;  %7412 = vadd.xlane.f32.xlu0 %v7411_v48 }
 0x8d6   :  { %v7362_v21 = vmul.f32 1.442695, %v7331_v4 }
 0x8d8   :  { %14846 = vpow2.f32 %v7362_v21 }
 0x8da   :  { %v17536_v38 = vpop.eup %14844 }
 0x8db   :  { %v7278_v32 = vpop.xlane.xlu1 %7277  ;;  %v7414_v62 = vsel %vm411_vm2, %v17536_v38, 0.0 }
 0x8dc   :  { %v7332_v13 = vsub.f32 %v17407_v34, %v7278_v32  ;;  %7415 = vadd.xlane.f32.xlu1 %v7414_v62 }
 0x8de   :  { %v7364_v9 = vmul.f32 1.442695, %v7332_v13 }
 0x8e0   :  { %14848 = vpow2.f32 %v7364_v9 }
 0x8e2   :  { %v17541_v25 = vpop.eup %14846 }
 0x8e3   :  { %v7281_v10 = vpop.xlane.xlu0 %7280  ;;  %v7417_v37 = vsel %vm411_vm2, %v17541_v25, 0.0 }
 0x8e4   :  { %v7333_v5 = vsub.f32 %v17418_v58, %v7281_v10  ;;  %7418 = vadd.xlane.f32.xlu0 %v7417_v37 }
 0x8e6   :  { %v7366_v48 = vmul.f32 1.442695, %v7333_v5 }
 0x8e8   :  { %14850 = vpow2.f32 %v7366_v48 }
 0x8ea   :  { %v17546_v4 = vpop.eup %14848 }
 0x8eb   :  { %v7284_v21 = vpop.xlane.xlu1 %7283  ;;  %v7420_v34 = vsel %vm411_vm2, %v17546_v4, 0.0 }
 0x8ec   :  { %v7334_v32 = vsub.f32 %v17429_v59, %v7284_v21  ;;  %7421 = vadd.xlane.f32.xlu1 %v7420_v34 }
 0x8ee   :  { %v7368_v62 = vmul.f32 1.442695, %v7334_v32 }
 0x8f0   :  { %14852 = vpow2.f32 %v7368_v62 }
 0x8f2   :  { %v17551_v13 = vpop.eup %14850 }
 0x8f3   :  { %v7287_v9 = vpop.xlane.xlu0 %7286  ;;  %v7423_v58 = vsel %vm411_vm2, %v17551_v13, 0.0 }
 0x8f4   :  { %v7335_v10 = vsub.f32 %v17440_v6, %v7287_v9  ;;  %7424 = vadd.xlane.f32.xlu0 %v7423_v58 }
 0x8f6   :  { %v7370_v37 = vmul.f32 1.442695, %v7335_v10 }
 0x8f7   :  { %v17572_v36 = vpop.permute.xlu0 %8260 }
 0x8f8   :  { %14854 = vpow2.f32 %v7370_v37 }
 0x8fa   :  { %v17556_v5 = vpop.eup %14852 }
 0x8fb   :  { %v7426_v48 = vsel %vm411_vm2, %v17556_v5, 0.0 }
 0x8fc   :  { %7427 = vadd.xlane.f32.xlu1 %v7426_v48 }
 0x902   :  { %v17560_v59 = vpop.eup %14854 }
 0x903   :  { %v7429_v21 = vsel %vm411_vm2, %v17560_v59, 0.0 }
 0x904   :  { %7430 = vadd.xlane.f32.xlu0 %v7429_v21 }
 0x911   :  { %v17564_v34 = vpop.f32.mrb[216].mxu0 }
 0x912   :  { %v13974_v32 = vpop.f32.mrb[217].mxu0  ;;  %v7288_v6 = vsel %vm411_vm2, %v17564_v34, -inf }
 0x913   :  { %v6699_v62 = vpop.f32.mrb[218].mxu0  ;;  %7289 = vmax.xlane.f32.xlu1 %v7288_v6  ;;  %v19457_v32 = vld [vmem:[#allocation49_spill] sm:$0xff] }
 0x914   :  { %v13975_v9 = vpop.f32.mrb[219].mxu0 }
 0x919   :  { %v17568_v58 = vpop.f32.mrb[220].mxu0 }
 0x91a   :  { %v13986_v10 = vpop.f32.mrb[221].mxu0  ;;  %v7294_v54 = vsel %vm411_vm2, %v17568_v58, -inf }
 0x91b   :  { %v6799_v37 = vpop.f32.mrb[222].mxu0 }
 0x91c   :  { %v13987_v48 = vpop.f32.mrb[223].mxu0 }
 0x921   :  { %v17570_v7 = vpop.f32.mrb[224].mxu0 }
 0x922   :  { %v13998_v56 = vpop.f32.mrb[225].mxu0 }
 0x923   :  { %v6899_v42 = vpop.f32.mrb[226].mxu0 }
 0x924   :  { %v13999_v21 = vpop.f32.mrb[227].mxu0  ;;  %8404 = vrot.lane.b32.xlu1 %v19457_v32, %s15227_s10 }
 0x928   :  { %v7293_v19 = vpop.xlane.xlu0 %7292 }
 0x929   :  { %v7337_v62 = vsub.f32 %v17450_v50, %v7293_v19  ;;  %v17577_v6 = vpop.f32.mrb[228].mxu0  ;;  %v17586_v50 = vpop.permute.xlu1 %8308 }
 0x92a   :  { %v14010_v9 = vpop.f32.mrb[229].mxu0  ;;  %19458 = vst [vmem:[#allocation16_spill] sm:$0xff] %v17586_v50 }
 0x92b   :  { %v7374_v39 = vmul.f32 1.442695, %v7337_v62  ;;  %v6999_v10 = vpop.f32.mrb[230].mxu0 }
 0x92c   :  { %v7299_v37 = vpop.xlane.xlu0 %7298  ;;  %v14011_v48 = vpop.f32.mrb[231].mxu0 }
 0x92d   :  { %14856 = vpow2.f32 %v7374_v39  ;;  %v7339_v56 = vsub.f32 %v17454_v43, %v7299_v37 }
 0x92f   :  { %v7378_v42 = vmul.f32 1.442695, %v7339_v56 }
 0x930   :  { %v17580_v53 = vpop.xlane.xlu0 %7304 }
 0x931   :  { %14858 = vpow2.f32 %v7378_v42  ;;  %v17582_v21 = vpop.f32.mrb[232].mxu0 }
 0x932   :  { %v14022_v32 = vpop.f32.mrb[233].mxu0 }
 0x933   :  { %v7099_v63 = vpop.f32.mrb[234].mxu0 }
 0x934   :  { %v17584_v14 = vpop.xlane.xlu0 %7310  ;;  %v14023_v19 = vpop.f32.mrb[235].mxu0 }
 0x937   :  { %v17588_v62 = vpop.eup %14856 }
 0x938   :  { %v17590_v9 = vpop.xlane.xlu0 %7316  ;;  %v7435_v39 = vsel %vm411_vm2, %v17588_v62, 0.0 }
 0x939   :  { %7436 = vadd.xlane.f32.xlu0 %v7435_v39  ;;  %v7398_v43 = vpop.xlane.xlu1 %7397  ;;  %v17594_v10 = vpop.f32.mrb[236].mxu0 }
 0x93a   :  { %14860 = vrcp.f32 %v7398_v43  ;;  %v14034_v37 = vpop.f32.mrb[237].mxu0 }
 0x93b   :  { %v17596_v32 = vpop.eup %14858  ;;  %v7199_v63 = vpop.f32.mrb[238].mxu0  ;;  %v7642_v37 = vsel %vm1879_vm3, %v17458_v18, 0  ;;  %v7306_v18 = vsel %vm411_vm2, %v17577_v6, -inf }
 0x93c   :  { %v17598_v48 = vpop.xlane.xlu0 %7322  ;;  %v14035_v56 = vpop.f32.mrb[239].mxu0  ;;  %v7441_v42 = vsel %vm411_vm2, %v17596_v32, 0.0 }
 0x93d   :  { %7442 = vadd.xlane.f32.xlu0 %v7441_v42  ;;  %v7300_v56 = vsel %vm411_vm2, %v17570_v7, -inf  ;;  %v7690_v42 = vsel %vm1879_vm3, %v17456_v35, 0 }
 0x941   :  { %v7401_v19 = vpop.xlane.xlu0 %7400 }
 0x942   :  { %14862 = vrcp.f32 %v7401_v19 }
 0x944   :  { %v14861_v50 = vpop.eup %14860 }
 0x945   :  { %v7492_v39 = vmul.f32 %v14861_v50, %v17502_v3 }
 0x947   :  { %v7516_v43 = vpack.c.bf16 %v7492_v39, %v7492_v39  ;;  %v19459_v39 = vld [vmem:[#allocation47_spill] sm:$0xff] }
 0x948   :  { %7295 = vmax.xlane.f32.xlu1 %v7294_v54 }
 0x949   :  { %14045 = vmatmul.mubr.msk.bf16.vlgmr.msra.gmra.mrb[240].mxu0 %vm411_vm2, %v7516_v43  ;;  %v7404_v63 = vpop.xlane.xlu1 %7403 }
 0x94a   :  { %14055 = vmatpush3.bf16.msra.mxu0 %v7642_v37  ;;  %14864 = vrcp.f32 %v7404_v63  ;;  %14056 = vmatprep.mubr.msk.bf16.mxu0 %vm15220_vm1, %v19311_v33  ;;  %v7318_v37 = vsel %vm411_vm2, %v17594_v10, -inf }
 0x94b   :  { %14066 = vmatprep.subr.bf16.mxu0 %v19311_v33 }
 0x94c   :  { %v14863_v3 = vpop.eup %14862  ;;  %7301 = vmax.xlane.f32.xlu1 %v7300_v56  ;;  %v7738_v56 = vsel %vm1879_vm3, %v17466_v52, 0  ;;  %v7343_v52 = vsub.f32 %v17468_v55, %v17584_v14 }
 0x94d   :  { %v7493_v54 = vmul.f32 %v14863_v3, %v17511_v45  ;;  %v7312_v45 = vsel %vm411_vm2, %v17582_v21, -inf }
 0x94f   :  { %v7517_v50 = vpack.c.bf16 %v7493_v54, %v7493_v54 }
 0x950   :  { %7307 = vmax.xlane.f32.xlu1 %v7306_v18 }
 0x951   :  { %14051 = vmatmul.mubr.msk.bf16.vlgmr.msra.gmra.mrb[32].mxu1 %vm411_vm2, %v7517_v50  ;;  %v7407_v19 = vpop.xlane.xlu0 %7406 }
 0x952   :  { %14061 = vmatpush3.bf16.msra.mxu1 %v7690_v42  ;;  %14866 = vrcp.f32 %v7407_v19  ;;  %14062 = vmatprep.mubr.msk.bf16.mxu1 %vm15220_vm1, %v19311_v33  ;;  %v7786_v19 = vsel %vm1879_vm3, %v17464_v29, 0 }
 0x953   :  { %8356 = vrot.lane.b32.xlu0 %v19459_v39, %s15227_s10  ;;  %14072 = vmatprep.subr.bf16.mxu1 %v19311_v33 }
 0x954   :  { %v14865_v43 = vpop.eup %14864  ;;  %7313 = vmax.xlane.f32.xlu1 %v7312_v45 }
 0x955   :  { %v7494_v35 = vmul.f32 %v14865_v43, %v17516_v47  ;;  %v7341_v47 = vsub.f32 %v17462_v41, %v17580_v53  ;;  %v7386_v41 = vmul.f32 1.442695, %v7343_v52  ;;  %v7347_v43 = vsub.f32 %v17484_v28, %v17598_v48 }
 0x956   :  { %v7882_v48 = vsel %vm1879_vm3, %v17470_v15, 0 }
 0x957   :  { %v7518_v63 = vpack.c.bf16 %v7494_v35, %v7494_v35  ;;  %v7382_v42 = vmul.f32 1.442695, %v7341_v47  ;;  %v7834_v35 = vsel %vm1879_vm3, %v17472_v40, 0 }
 0x958   :  { %7319 = vmax.xlane.f32.xlu1 %v7318_v37 }
 0x959   :  { %14057 = vmatmul.mubr.msk.bf16.vlgmr.msra.gmra.mrb[244].mxu0 %vm411_vm2, %v7518_v63  ;;  %v7410_v3 = vpop.xlane.xlu1 %7409  ;;  %v19460_v63 = vld [vmem:[#allocation50_spill] sm:$0xff] }
 0x95a   :  { %14067 = vmatpush3.bf16.msra.mxu0 %v7738_v56  ;;  %14868 = vrcp.f32 %v7410_v3  ;;  %14068 = vmatprep.mubr.msk.bf16.mxu0 %vm15220_vm1, %v19311_v33 }
 0x95b   :  { %14078 = vmatprep.subr.bf16.mxu0 %v19311_v33 }
 0x95c   :  { %v14867_v54 = vpop.eup %14866 }
 0x95d   :  { %v7495_v50 = vmul.f32 %v14867_v54, %v17521_v49  ;;  %v7345_v49 = vsub.f32 %v17476_v12, %v17590_v9 }
 0x95f   :  { %v7519_v18 = vpack.c.bf16 %v7495_v50, %v7495_v50  ;;  %v7390_v29 = vmul.f32 1.442695, %v7345_v49  ;;  %v7978_v49 = vsel %vm1879_vm3, %v17474_v24, 0 }
 0x961   :  { %14063 = vmatmul.mubr.msk.bf16.vlgmr.msra.gmra.mrb[36].mxu1 %vm411_vm2, %v7519_v18  ;;  %v7413_v45 = vpop.xlane.xlu0 %7412 }
 0x962   :  { %14073 = vmatpush3.bf16.msra.mxu1 %v7786_v19  ;;  %14870 = vrcp.f32 %v7413_v45  ;;  %14074 = vmatprep.mubr.msk.bf16.mxu1 %vm15220_vm1, %v19311_v33 }
 0x963   :  { %14084 = vmatprep.subr.bf16.mxu1 %v19311_v33  ;;  %14872 = vpow2.f32 %v7382_v42  ;;  %v7930_v42 = vsel %vm1879_vm3, %v17478_v57, 0 }
 0x964   :  { %v14869_v53 = vpop.eup %14868  ;;  %14874 = vpow2.f32 %v7386_v41 }
 0x965   :  { %v7496_v14 = vmul.f32 %v14869_v53, %v17526_v0  ;;  %v7394_v0 = vmul.f32 1.442695, %v7347_v43  ;;  %v8026_v43 = vsel %vm1879_vm3, %v17482_v8, 0 }
 0x967   :  { %v7520_v55 = vpack.c.bf16 %v7496_v14, %v7496_v14 }
 0x969   :  { %14069 = vmatmul.mubr.msk.bf16.vlgmr.msra.gmra.mrb[248].mxu0 %vm411_vm2, %v7520_v55  ;;  %v7416_v37 = vpop.xlane.xlu1 %7415  ;;  %8452 = vrot.lane.b32.xlu1 %v19460_v63, %s15227_s10 }
 0x96a   :  { %14079 = vmatpush3.bf16.msra.mxu0 %v7834_v35  ;;  %14876 = vrcp.f32 %v7416_v37  ;;  %14080 = vmatprep.mubr.msk.bf16.mxu0 %vm15220_vm1, %v19311_v33 }
 0x96b   :  { %14090 = vmatprep.subr.bf16.mxu0 %v19311_v33  ;;  %14878 = vpow2.f32 %v7390_v29 }
 0x96c   :  { %v14871_v12 = vpop.eup %14870  ;;  %14880 = vpow2.f32 %v7394_v0 }
 0x96d   :  { %v7497_v28 = vmul.f32 %v14871_v12, %v17531_v22  ;;  %v17660_v9 = vpop.eup %14872 }
 0x96e   :  { %v7447_v3 = vsel %vm411_vm2, %v17660_v9, 0.0  ;;  %v17667_v54 = vpop.eup %14874 }
 0x96f   :  { %v7521_v40 = vpack.c.bf16 %v7497_v28, %v7497_v28  ;;  %v7453_v15 = vsel %vm411_vm2, %v17667_v54, 0.0  ;;  %v19461_v28 = vld [vmem:[#allocation51_spill] sm:$0xff] }
 0x971   :  { %14075 = vmatmul.mubr.msk.bf16.vlgmr.msra.gmra.mrb[40].mxu1 %vm411_vm2, %v7521_v40  ;;  %v7419_v56 = vpop.xlane.xlu0 %7418 }
 0x972   :  { %14085 = vmatpush3.bf16.msra.mxu1 %v7882_v48  ;;  %14882 = vrcp.f32 %v7419_v56  ;;  %7448 = vadd.xlane.f32.xlu0 %v7447_v3  ;;  %v8170_v3 = vsel %vm1879_vm3, %v17486_v20, 0 }
 0x973   :  { %14086 = vmatprep.mubr.msk.bf16.mxu1 %vm15220_vm1, %v19311_v33  ;;  %14096 = vmatprep.subr.bf16.mxu1 %v19311_v33 }
 0x974   :  { %v14877_v22 = vpop.eup %14876 }
 0x975   :  { %v7498_v47 = vmul.f32 %v14877_v22, %v17536_v38  ;;  %v17675_v50 = vpop.eup %14878 }
 0x976   :  { %7454 = vadd.xlane.f32.xlu0 %v7453_v15  ;;  %v7459_v19 = vsel %vm411_vm2, %v17675_v50, 0.0  ;;  %v17682_v45 = vpop.eup %14880 }
 0x977   :  { %v7522_v18 = vpack.c.bf16 %v7498_v47, %v7498_v47  ;;  %v7465_v57 = vsel %vm411_vm2, %v17682_v45, 0.0 }
 0x979   :  { %14081 = vmatmul.mubr.msk.bf16.vlgmr.msra.gmra.mrb[252].mxu0 %vm411_vm2, %v7522_v18  ;;  %v7422_v52 = vpop.xlane.xlu1 %7421 }
 0x97a   :  { %14091 = vmatpush3.bf16.msra.mxu0 %v7930_v42  ;;  %14884 = vrcp.f32 %v7422_v52  ;;  %7460 = vadd.xlane.f32.xlu0 %v7459_v19 }
 0x97b   :  { %14092 = vmatprep.mubr.msk.bf16.mxu0 %vm15220_vm1, %v19311_v33  ;;  %14102 = vmatprep.subr.bf16.mxu0 %v19311_v33 }
 0x97c   :  { %v14883_v38 = vpop.eup %14882 }
 0x97d   :  { %v7499_v53 = vmul.f32 %v14883_v38, %v17541_v25 }
 0x97e   :  { %7466 = vadd.xlane.f32.xlu0 %v7465_v57 }
 0x97f   :  { %v7523_v41 = vpack.c.bf16 %v7499_v53, %v7499_v53 }
 0x981   :  { %14087 = vmatmul.mubr.msk.bf16.vlgmr.msra.gmra.mrb[44].mxu1 %vm411_vm2, %v7523_v41  ;;  %v7425_v14 = vpop.xlane.xlu0 %7424 }
 0x982   :  { %14097 = vmatpush3.bf16.msra.mxu1 %v7978_v49  ;;  %14886 = vrcp.f32 %v7425_v14  ;;  %14098 = vmatprep.mubr.msk.bf16.mxu1 %vm15220_vm1, %v19311_v33 }
 0x983   :  { %14108 = vmatprep.subr.bf16.mxu1 %v19311_v33 }
 0x984   :  { %v14885_v55 = vpop.eup %14884 }
 0x985   :  { %v7500_v25 = vmul.f32 %v14885_v55, %v17546_v4  ;;  %v8074_v4 = vsel %vm1879_vm3, %v17480_v44, 0  ;;  %v8122_v44 = vsel %vm1879_vm3, %v17488_v61, 0 }
 0x987   :  { %v7524_v29 = vpack.c.bf16 %v7500_v25, %v7500_v25  ;;  %v19464_v25 = vld [vmem:[#allocation29_spill] sm:$0xff] }
 0x989   :  { %14093 = vmatmul.mubr.msk.bf16.vlgmr.msra.gmra.mrb[0].mxu0 %vm411_vm2, %v7524_v29  ;;  %v7428_v24 = vpop.xlane.xlu1 %7427 }
 0x98a   :  { %14103 = vmatpush3.bf16.msra.mxu0 %v8026_v43  ;;  %14888 = vrcp.f32 %v7428_v24  ;;  %14104 = vmatprep.mubr.msk.bf16.mxu0 %vm15220_vm1, %v19311_v33  ;;  %v19465_v43 = vld [vmem:[#allocation57_spill] sm:$0xff]  ;;  %v19466_v24 = vld [vmem:[#allocation31_spill] sm:$0xff] }
 0x98b   :  { %14114 = vmatprep.subr.bf16.mxu0 %v19311_v33 }
 0x98c   :  { %v14887_v35 = vpop.eup %14886 }
 0x98d   :  { %v7501_v37 = vmul.f32 %v14887_v35, %v17551_v13 }
 0x98f   :  { %v7525_v12 = vpack.c.bf16 %v7501_v37, %v7501_v37 }
 0x991   :  { %14099 = vmatmul.mubr.msk.bf16.vlgmr.msra.gmra.mrb[48].mxu1 %vm411_vm2, %v7525_v12  ;;  %v7431_v8 = vpop.xlane.xlu0 %7430  ;;  %v19467_v12 = vld [vmem:[#allocation33_spill] sm:$0xff] }
 0x992   :  { %14109 = vmatpush3.bf16.msra.mxu1 %v8074_v4  ;;  %14890 = vrcp.f32 %v7431_v8  ;;  %14110 = vmatprep.mubr.msk.bf16.mxu1 %vm15220_vm1, %v19311_v33  ;;  %v19468_v8 = vld [vmem:[#allocation35_spill] sm:$0xff] }
 0x993   :  { %14120 = vmatprep.subr.bf16.mxu1 %v19311_v33 }
 0x994   :  { %v14889_v0 = vpop.eup %14888  ;;  %8500 = vrot.lane.b32.xlu0 %v19461_v28, %s15227_s10 }
 0x995   :  { %v7502_v13 = vmul.f32 %v14889_v0, %v17556_v5 }
 0x997   :  { %v7526_v40 = vpack.c.bf16 %v7502_v13, %v7502_v13  ;;  %v19469_v13 = vld [vmem:[#allocation37_spill] sm:$0xff] }
 0x998   :  { %8596 = vrot.lane.b32.xlu0 %v16069_v11, %s15227_s10 }
 0x999   :  { %14105 = vmatmul.mubr.msk.bf16.vlgmr.msra.gmra.mrb[4].mxu0 %vm411_vm2, %v7526_v40 }
 0x99a   :  { %14115 = vmatpush3.bf16.msra.mxu0 %v8122_v44  ;;  %14116 = vmatprep.mubr.msk.bf16.mxu0 %vm15220_vm1, %v19311_v33 }
 0x99b   :  { %14126 = vmatprep.subr.bf16.mxu0 %v19311_v33 }
 0x99c   :  { %v14891_v48 = vpop.eup %14890  ;;  %8899 = vrot.lane.b32.xlu0 %v15361_v27, %s15228_s11 }
 0x99d   :  { %v7503_v5 = vmul.f32 %v14891_v48, %v17560_v59 }
 0x99f   :  { %v7527_v56 = vpack.c.bf16 %v7503_v5, %v7503_v5 }
 0x9a0   :  { %8949 = vrot.lane.b32.xlu0 %v15373_v31, %s15228_s11  ;;  %v7290_v61 = vpop.xlane.xlu1 %7289 }
 0x9a1   :  { %14111 = vmatmul.mubr.msk.bf16.vlgmr.msra.gmra.mrb[52].mxu1 %vm411_vm2, %v7527_v56  ;;  %v7336_v22 = vsub.f32 %v17564_v34, %v7290_v61  ;;  %v19470_v56 = vld [vmem:[#allocation39_spill] sm:$0xff] }
 0x9a2   :  { %14121 = vmatpush3.bf16.msra.mxu1 %v8170_v3  ;;  %14122 = vmatprep.mubr.msk.bf16.mxu1 %vm15220_vm1, %v19311_v33 }
 0x9a3   :  { %v7372_v15 = vmul.f32 1.442695, %v7336_v22  ;;  %14132 = vmatprep.subr.bf16.mxu1 %v19311_v33 }
 0x9a4   :  { %8999 = vrot.lane.b32.xlu0 %v15353_v23, %s15228_s11  ;;  %v17761_v18 = vpop.permute.xlu1 %8404 }
 0x9a5   :  { %14892 = vpow2.f32 %v7372_v15 }
 0x9a8   :  { %9049 = vrot.lane.b32.xlu0 %v15371_v30, %s15228_s11 }
 0x9ac   :  { %9099 = vrot.lane.b32.xlu0 %v19314_v2, %s15228_s11 }
 0x9af   :  { %v17739_v20 = vpop.eup %14892 }
 0x9b0   :  { %9149 = vrot.lane.b32.xlu0 %v15407_v46, %s15228_s11  ;;  %v7432_v59 = vsel %vm411_vm2, %v17739_v20, 0.0 }
 0x9b1   :  { %7433 = vadd.xlane.f32.xlu1 %v7432_v59 }
 0x9b4   :  { %9199 = vrot.lane.b32.xlu0 %v19318_v26, %s15228_s11 }
 0x9b8   :  { %9197 = vrot.lane.b32.xlu0 %v19318_v26, %s15229_s12 }
 0x9bc   :  { %9299 = vrot.lane.b32.xlu0 %v19383_v16, %s15228_s11 }
 0x9c0   :  { %9297 = vrot.lane.b32.xlu0 %v19383_v16, %s15229_s12 }
 0x9c4   :  { %9399 = vrot.lane.b32.xlu0 %v19385_v1, %s15228_s11 }
 0x9c6   :  { %v7437_v34 = vpop.xlane.xlu0 %7436 }
 0x9c7   :  { %14894 = vrcp.f32 %v7437_v34  ;;  %v19471_v34 = vld [vmem:[#allocation41_spill] sm:$0xff] }
 0x9c8   :  { %9397 = vrot.lane.b32.xlu0 %v19385_v1, %s15229_s12  ;;  %v8266_v1 = vsel %vm1879_vm3, %v17572_v36, 0 }
 0x9ca   :  { %v7443_v47 = vpop.xlane.xlu0 %7442 }
 0x9cb   :  { %14896 = vrcp.f32 %v7443_v47 }
 0x9cc   :  { %9499 = vrot.lane.b32.xlu0 %v19389_v60, %s15228_s11 }
 0x9ce   :  { %v8357_v57 = vpop.permute.xlu0 %8356 }
 0x9d0   :  { %9497 = vrot.lane.b32.xlu0 %v19389_v60, %s15229_s12 }
 0x9d1   :  { %v14895_v26 = vpop.eup %14894 }
 0x9d2   :  { %v7505_v16 = vmul.f32 %v14895_v26, %v17588_v62 }
 0x9d4   :  { %v7529_v42 = vpack.c.bf16 %v7505_v16, %v7505_v16  ;;  %9599 = vrot.lane.b32.xlu0 %v19391_v51, %s15228_s11 }
 0x9d5   :  { %v14897_v52 = vpop.eup %14896  ;;  %v7296_v19 = vpop.xlane.xlu1 %7295 }
 0x9d6   :  { %14123 = vmatmul.mubr.msk.bf16.vlgmr.msra.gmra.mrb[56].mxu1 %vm411_vm2, %v7529_v42  ;;  %v7338_v38 = vsub.f32 %v17568_v58, %v7296_v19  ;;  %v7507_v60 = vmul.f32 %v14897_v52, %v17596_v32  ;;  %v8362_v58 = vsel %vm1879_vm3, %v8357_v57, 0 }
 0x9d7   :  { %14133 = vmatpush3.bf16.msra.mxu1 %v8266_v1  ;;  %14134 = vmatprep.mubr.msk.bf16.mxu1 %vm15220_vm1, %v19311_v33 }
 0x9d8   :  { %v7376_v62 = vmul.f32 1.442695, %v7338_v38  ;;  %9597 = vrot.lane.b32.xlu0 %v19391_v51, %s15229_s12  ;;  %14144 = vmatprep.subr.bf16.mxu1 %v19311_v33  ;;  %v7531_v41 = vpack.c.bf16 %v7507_v60, %v7507_v60 }
 0x9d9   :  { %v7302_v53 = vpop.xlane.xlu1 %7301 }
 0x9da   :  { %14898 = vpow2.f32 %v7376_v62  ;;  %v7340_v36 = vsub.f32 %v17570_v7, %v7302_v53  ;;  %v19462_v7 = vld [vmem:[#allocation25_spill] sm:$0xff] }
 0x9dc   :  { %v7380_v49 = vmul.f32 1.442695, %v7340_v36  ;;  %9699 = vrot.lane.b32.xlu0 %v19394_v17, %s15228_s11 }
 0x9dd   :  { %v7308_v29 = vpop.xlane.xlu1 %7307 }
 0x9de   :  { %14900 = vpow2.f32 %v7380_v49  ;;  %14135 = vmatmul.mubr.msk.bf16.vlgmr.msra.gmra.mrb[60].mxu1 %vm411_vm2, %v7531_v41  ;;  %v7342_v40 = vsub.f32 %v17577_v6, %v7308_v29 }
 0x9df   :  { %14145 = vmatpush3.bf16.msra.mxu1 %v8362_v58  ;;  %14146 = vmatprep.mubr.msk.bf16.mxu1 %vm15220_vm1, %v19311_v33 }
 0x9e0   :  { %9697 = vrot.lane.b32.xlu0 %v19394_v17, %s15229_s12  ;;  %14156 = vmatprep.subr.bf16.mxu1 %v19311_v33  ;;  %v19463_v17 = vld [vmem:[#allocation27_spill] sm:$0xff]  ;;  %v7384_v61 = vmul.f32 1.442695, %v7342_v40 }
 0x9e1   :  { %v7314_v37 = vpop.xlane.xlu1 %7313 }
 0x9e2   :  { %v7344_v3 = vsub.f32 %v17582_v21, %v7314_v37  ;;  %v19472_v21 = vld [vmem:[#allocation43_spill] sm:$0xff] }
 0x9e4   :  { %v17786_v51 = vpop.eup %14898  ;;  %9799 = vrot.lane.b32.xlu0 %v19462_v7, %s15228_s11  ;;  %v7388_v6 = vmul.f32 1.442695, %v7344_v3 }
 0x9e5   :  { %v7438_v32 = vsel %vm411_vm2, %v17786_v51, 0.0  ;;  %v7320_v0 = vpop.xlane.xlu1 %7319 }
 0x9e6   :  { %7439 = vadd.xlane.f32.xlu1 %v7438_v32 }
 0x9e8   :  { %v17792_v14 = vpop.eup %14900  ;;  %9797 = vrot.lane.b32.xlu0 %v19462_v7, %s15229_s12 }
 0x9e9   :  { %v7444_v55 = vsel %vm411_vm2, %v17792_v14, 0.0  ;;  %v8453_v5 = vpop.permute.xlu1 %8452 }
 0x9ea   :  { %7445 = vadd.xlane.f32.xlu1 %v7444_v55  ;;  %v8458_v59 = vsel %vm1879_vm3, %v8453_v5, 0 }
 0x9ec   :  { %9899 = vrot.lane.b32.xlu0 %v19463_v17, %s15228_s11 }
 0x9f0   :  { %9897 = vrot.lane.b32.xlu0 %v19463_v17, %s15229_s12 }
 0x9f4   :  { %9999 = vrot.lane.b32.xlu0 %v19464_v25, %s15228_s11 }
 0x9f8   :  { %9997 = vrot.lane.b32.xlu0 %v19464_v25, %s15229_s12 }
 0x9fb   :  { %8548 = vrot.lane.b32.xlu1 %v19465_v43, %s15227_s10 }
 0x9fc   :  { %10433 = vrot.lane.b32.xlu0 %v19466_v24, %s15230_s13 }
 0x9ff   :  { %v7449_v35 = vpop.xlane.xlu0 %7448 }
 0xa00   :  { %14902 = vrcp.f32 %v7449_v35  ;;  %10529 = vrot.lane.b32.xlu0 %v19467_v12, %s15230_s13  ;;  %v19473_v12 = vld [vmem:[#allocation59_spill] sm:$0xff] }
 0xa03   :  { %v7455_v4 = vpop.xlane.xlu0 %7454 }
 0xa04   :  { %14904 = vrcp.f32 %v7455_v4  ;;  %10625 = vrot.lane.b32.xlu0 %v19468_v8, %s15230_s13 }
 0xa05   :  { %14906 = vpow2.f32 %v7384_v61 }
 0xa06   :  { %14908 = vpow2.f32 %v7388_v6 }
 0xa08   :  { %10721 = vrot.lane.b32.xlu0 %v19469_v13, %s15230_s13 }
 0xa0a   :  { %v14903_v44 = vpop.eup %14902 }
 0xa0b   :  { %v7509_v48 = vmul.f32 %v14903_v44, %v17660_v9  ;;  %v7346_v9 = vsub.f32 %v17594_v10, %v7320_v0 }
 0xa0c   :  { %10817 = vrot.lane.b32.xlu0 %v19470_v56, %s15230_s13 }
 0xa0d   :  { %v7533_v22 = vpack.c.bf16 %v7509_v48, %v7509_v48  ;;  %v7392_v26 = vmul.f32 1.442695, %v7346_v9 }
 0xa0e   :  { %v14905_v15 = vpop.eup %14904 }
 0xa0f   :  { %14147 = vmatmul.mubr.msk.bf16.vlgmr.msra.gmra.mrb[64].mxu1 %vm411_vm2, %v7533_v22  ;;  %v7511_v47 = vmul.f32 %v14905_v15, %v17667_v54  ;;  %14910 = vpow2.f32 %v7392_v26  ;;  %v17835_v10 = vpop.eup %14906 }
 0xa10   :  { %14157 = vmatpush3.bf16.msra.mxu1 %v8458_v59  ;;  %10913 = vrot.lane.b32.xlu0 %v19471_v34, %s15230_s13  ;;  %v7450_v19 = vsel %vm411_vm2, %v17835_v10, 0.0  ;;  %v17841_v1 = vpop.eup %14908 }
 0xa11   :  { %14158 = vmatprep.mubr.msk.bf16.mxu1 %vm15220_vm1, %v19311_v33  ;;  %14168 = vmatprep.subr.bf16.mxu1 %v19311_v33  ;;  %v7535_v16 = vpack.c.bf16 %v7511_v47, %v7511_v47  ;;  %v7456_v60 = vsel %vm411_vm2, %v17841_v1, 0.0 }
 0xa14   :  { %11009 = vrot.lane.b32.xlu0 %v19472_v21, %s15230_s13 }
 0xa17   :  { %14159 = vmatmul.mubr.msk.bf16.vlgmr.msra.gmra.mrb[68].mxu1 %vm411_vm2, %v7535_v16 }
 0xa18   :  { %14170 = vmatprep.mubr.msk.bf16.mxu1 %vm15220_vm1, %v19311_v33 }
 0xa19   :  { %v17845_v62 = vpop.eup %14910 }
 0xa1a   :  { %v7462_v49 = vsel %vm411_vm2, %v17845_v62, 0.0 }
 0xa1c   :  { %v17837_v54 = vpop.f32.mrb[240].mxu0 }
 0xa1d   :  { %v14046_v42 = vpop.f32.mrb[241].mxu0 }
 0xa1e   :  { %v7585_v52 = vpop.f32.mrb[242].mxu0 }
 0xa1f   :  { %v14047_v38 = vpop.f32.mrb[243].mxu0  ;;  %7451 = vadd.xlane.f32.xlu1 %v7450_v19 }
 0xa20   :  { %v19477_v38 = vld [vmem:[#allocation18_spill] sm:$0xff] }
 0xa23   :  { %7457 = vadd.xlane.f32.xlu1 %v7456_v60 }
 0xa24   :  { %v17847_v53 = vpop.f32.mrb[32].mxu1 }
 0xa25   :  { %v8692_v36 = vpack.c.bf16 %v17847_v53, %v17837_v54  ;;  %v14052_v57 = vpop.f32.mrb[33].mxu1 }
 0xa26   :  { %v7633_v41 = vpop.f32.mrb[34].mxu1 }
 0xa27   :  { %v14053_v58 = vpop.f32.mrb[35].mxu1  ;;  %7463 = vadd.xlane.f32.xlu1 %v7462_v49 }
 0xa28   :  { %v7461_v58 = vpop.xlane.xlu0 %7460 }
 0xa2c   :  { %v17853_v7 = vpop.f32.mrb[244].mxu0 }
 0xa2d   :  { %v14058_v32 = vpop.f32.mrb[245].mxu0 }
 0xa2e   :  { %v7681_v55 = vpop.f32.mrb[246].mxu0 }
 0xa2f   :  { %v14059_v17 = vpop.f32.mrb[247].mxu0  ;;  %v19478_v55 = vld [vmem:[#allocation20_spill] sm:$0xff] }
 0xa34   :  { %v17855_v25 = vpop.f32.mrb[36].mxu1 }
 0xa35   :  { %v8693_v29 = vpack.c.bf16 %v17855_v25, %v17853_v7  ;;  %v14064_v24 = vpop.f32.mrb[37].mxu1 }
 0xa36   :  { %v7729_v35 = vpop.f32.mrb[38].mxu1 }
 0xa37   :  { %v14065_v37 = vpop.f32.mrb[39].mxu1 }
 0xa38   :  { %8644 = vrot.lane.b32.xlu1 %v19473_v12, %s15227_s10 }
 0xa3c   :  { %v17861_v4 = vpop.f32.mrb[248].mxu0  ;;  %8897 = vrot.lane.b32.xlu1 %v15361_v27, %s15229_s12 }
 0xa3d   :  { %v14070_v8 = vpop.f32.mrb[249].mxu0 }
 0xa3e   :  { %v7777_v0 = vpop.f32.mrb[250].mxu0  ;;  %v7434_v13 = vpop.xlane.xlu1 %7433 }
 0xa3f   :  { %v14071_v40 = vpop.f32.mrb[251].mxu0  ;;  %14912 = vrcp.f32 %v7434_v13  ;;  %v19479_v0 = vld [vmem:[#allocation22_spill] sm:$0xff] }
 0xa40   :  { %8947 = vrot.lane.b32.xlu1 %v15373_v31, %s15229_s12  ;;  %14914 = vrcp.f32 %v7461_v58 }
 0xa44   :  { %v17867_v44 = vpop.f32.mrb[40].mxu1  ;;  %8997 = vrot.lane.b32.xlu1 %v15353_v23, %s15229_s12  ;;  %v19474_v23 = vld [vmem:[#allocation15_spill] sm:$0xff] }
 0xa45   :  { %v8694_v48 = vpack.c.bf16 %v17867_v44, %v17861_v4  ;;  %v14076_v5 = vpop.f32.mrb[41].mxu1  ;;  %v8218_v59 = vsel %vm1879_vm3, %v19474_v23, 0 }
 0xa46   :  { %v7825_v56 = vpop.f32.mrb[42].mxu1 }
 0xa47   :  { %v14077_v61 = vpop.f32.mrb[43].mxu1 }
 0xa48   :  { %9047 = vrot.lane.b32.xlu1 %v15371_v30, %s15229_s12 }
 0xa49   :  { %v14913_v27 = vpop.eup %14912 }
 0xa4a   :  { %v7504_v3 = vmul.f32 %v14913_v27, %v17739_v20  ;;  %v14915_v61 = vpop.eup %14914 }
 0xa4c   :  { %v7528_v22 = vpack.c.bf16 %v7504_v3, %v7504_v3  ;;  %v17876_v15 = vpop.f32.mrb[252].mxu0  ;;  %9097 = vrot.lane.b32.xlu1 %v19314_v2, %s15229_s12  ;;  %v19475_v2 = vld [vmem:[#allocation14_spill] sm:$0xff]  ;;  %v7513_v3 = vmul.f32 %v14915_v61, %v17675_v50 }
 0xa4d   :  { %v14082_v31 = vpop.f32.mrb[253].mxu0 }
 0xa4e   :  { %v7873_v34 = vpop.f32.mrb[254].mxu0  ;;  %14117 = vmatmul.mubr.msk.bf16.vlgmr.msra.gmra.mrb[8].mxu0 %vm411_vm2, %v7528_v22  ;;  %v19480_v31 = vld [vmem:[#allocation24_spill] sm:$0xff] }
 0xa4f   :  { %v14083_v6 = vpop.f32.mrb[255].mxu0  ;;  %14127 = vmatpush3.bf16.msra.mxu0 %v8218_v59  ;;  %14128 = vmatprep.mubr.msk.bf16.mxu0 %vm15220_vm1, %v19311_v33  ;;  %v7537_v34 = vpack.c.bf16 %v7513_v3, %v7513_v3 }
 0xa50   :  { %9147 = vrot.lane.b32.xlu1 %v15407_v46, %s15229_s12  ;;  %14138 = vmatprep.subr.bf16.mxu0 %v19311_v33  ;;  %v19476_v46 = vld [vmem:[#allocation17_spill] sm:$0xff] }
 0xa54   :  { %v17888_v30 = vpop.f32.mrb[44].mxu1  ;;  %9249 = vrot.lane.b32.xlu1 %v19475_v2, %s15228_s11 }
 0xa55   :  { %v8695_v20 = vpack.c.bf16 %v17888_v30, %v17876_v15  ;;  %v14088_v9 = vpop.f32.mrb[45].mxu1 }
 0xa56   :  { %v7921_v47 = vpop.f32.mrb[46].mxu1  ;;  %v19481_v9 = vld [vmem:[#allocation16_spill] sm:$0xff] }
 0xa57   :  { %v14089_v21 = vpop.f32.mrb[47].mxu1  ;;  %v8314_v47 = vsel %vm1879_vm3, %v19481_v9, 0 }
 0xa58   :  { %9247 = vrot.lane.b32.xlu1 %v19475_v2, %s15229_s12 }
 0xa5c   :  { %v17896_v26 = vpop.f32.mrb[0].mxu0  ;;  %9349 = vrot.lane.b32.xlu1 %v19476_v46, %s15228_s11 }
 0xa5d   :  { %v14094_v16 = vpop.f32.mrb[1].mxu0 }
 0xa5e   :  { %v7969_v42 = vpop.f32.mrb[2].mxu0  ;;  %v8410_v16 = vsel %vm1879_vm3, %v17761_v18, 0 }
 0xa5f   :  { %v14095_v52 = vpop.f32.mrb[3].mxu0  ;;  %v19483_v42 = vld [vmem:[#allocation28_spill] sm:$0xff] }
 0xa60   :  { %9347 = vrot.lane.b32.xlu1 %v19476_v46, %s15229_s12  ;;  %v7467_v52 = vpop.xlane.xlu0 %7466 }
 0xa64   :  { %v17902_v19 = vpop.f32.mrb[48].mxu1  ;;  %9449 = vrot.lane.b32.xlu1 %v19477_v38, %s15228_s11  ;;  %v8501_v18 = vpop.permute.xlu0 %8500 }
 0xa65   :  { %v8696_v60 = vpack.c.bf16 %v17902_v19, %v17896_v26  ;;  %v14100_v57 = vpop.f32.mrb[49].mxu1 }
 0xa66   :  { %v8017_v41 = vpop.f32.mrb[50].mxu1  ;;  %v19486_v57 = vld [vmem:[#allocation34_spill] sm:$0xff] }
 0xa67   :  { %v14101_v49 = vpop.f32.mrb[51].mxu1 }
 0xa68   :  { %9447 = vrot.lane.b32.xlu1 %v19477_v38, %s15229_s12  ;;  %v19485_v38 = vld [vmem:[#allocation32_spill] sm:$0xff]  ;;  %v8597_v41 = vpop.permute.xlu0 %8596 }
 0xa69   :  { %v19487_v49 = vld [vmem:[#allocation36_spill] sm:$0xff] }
 0xa6c   :  { %v17910_v32 = vpop.f32.mrb[4].mxu0  ;;  %9549 = vrot.lane.b32.xlu1 %v19478_v55, %s15228_s11  ;;  %v8900_v58 = vpop.permute.xlu0 %8899 }
 0xa6d   :  { %v14106_v17 = vpop.f32.mrb[5].mxu0 }
 0xa6e   :  { %v8065_v24 = vpop.f32.mrb[6].mxu0 }
 0xa6f   :  { %v14107_v35 = vpop.f32.mrb[7].mxu0 }
 0xa70   :  { %9547 = vrot.lane.b32.xlu1 %v19478_v55, %s15229_s12  ;;  %v19488_v55 = vld [vmem:[#allocation38_spill] sm:$0xff] }
 0xa73   :  { %v7440_v37 = vpop.xlane.xlu1 %7439 }
 0xa74   :  { %v17916_v8 = vpop.f32.mrb[52].mxu1  ;;  %14916 = vrcp.f32 %v7440_v37  ;;  %9649 = vrot.lane.b32.xlu1 %v19479_v0, %s15228_s11 }
 0xa75   :  { %v8697_v13 = vpack.c.bf16 %v17916_v8, %v17910_v32  ;;  %v14112_v40 = vpop.f32.mrb[53].mxu1 }
 0xa76   :  { %v8113_v5 = vpop.f32.mrb[54].mxu1 }
 0xa77   :  { %v14113_v56 = vpop.f32.mrb[55].mxu1  ;;  %v7446_v27 = vpop.xlane.xlu1 %7445 }
 0xa78   :  { %9647 = vrot.lane.b32.xlu1 %v19479_v0, %s15229_s12  ;;  %14918 = vrcp.f32 %v7446_v27  ;;  %v19489_v0 = vld [vmem:[#allocation40_spill] sm:$0xff]  ;;  %v8950_v5 = vpop.permute.xlu0 %8949  ;;  %v19490_v56 = vld [vmem:[#allocation42_spill] sm:$0xff] }
 0xa79   :  { %14920 = vrcp.f32 %v7467_v52  ;;  %v8506_v52 = vsel %vm1879_vm3, %v8501_v18, 0  ;;  %v8905_v18 = vsel %vm411_vm2, %v8900_v58, 0 }
 0xa7b   :  { %v8549_v22 = vpop.permute.xlu1 %8548 }
 0xa7c   :  { %9749 = vrot.lane.b32.xlu1 %v19480_v31, %s15228_s11  ;;  %v8554_v23 = vsel %vm1879_vm3, %v8549_v22, 0  ;;  %v9000_v22 = vpop.permute.xlu0 %8999 }
 0xa7d   :  { %14169 = vmatpush3.bf16.msra.mxu1 %v8554_v23 }
 0xa7e   :  { %v14917_v59 = vpop.eup %14916  ;;  %14180 = vmatprep.subr.bf16.mxu1 %v19311_v33 }
 0xa7f   :  { %v7506_v6 = vmul.f32 %v14917_v59, %v17786_v51  ;;  %v19482_v51 = vld [vmem:[#allocation26_spill] sm:$0xff] }
 0xa80   :  { %9747 = vrot.lane.b32.xlu1 %v19480_v31, %s15229_s12  ;;  %14171 = vmatmul.mubr.msk.bf16.vlgmr.msra.gmra.mrb[72].mxu1 %vm411_vm2, %v7537_v34  ;;  %v19491_v34 = vld [vmem:[#allocation44_spill] sm:$0xff] }
 0xa81   :  { %v7530_v2 = vpack.c.bf16 %v7506_v6, %v7506_v6  ;;  %14182 = vmatprep.mubr.msk.bf16.mxu1 %vm15220_vm1, %v19311_v33 }
 0xa82   :  { %v14919_v50 = vpop.eup %14918 }
 0xa83   :  { %14129 = vmatmul.mubr.msk.bf16.vlgmr.msra.gmra.mrb[12].mxu0 %vm411_vm2, %v7530_v2  ;;  %v7508_v21 = vmul.f32 %v14919_v50, %v17792_v14  ;;  %v19484_v14 = vld [vmem:[#allocation30_spill] sm:$0xff]  ;;  %v14921_v23 = vpop.eup %14920 }
 0xa84   :  { %14139 = vmatpush3.bf16.msra.mxu0 %v8314_v47  ;;  %9849 = vrot.lane.b32.xlu1 %v19482_v51, %s15228_s11  ;;  %v7515_v50 = vmul.f32 %v14921_v23, %v17682_v45  ;;  %v19492_v47 = vld [vmem:[#allocation46_spill] sm:$0xff] }
 0xa85   :  { %14140 = vmatprep.mubr.msk.bf16.mxu0 %vm15220_vm1, %v19311_v33  ;;  %14150 = vmatprep.subr.bf16.mxu0 %v19311_v33  ;;  %v7532_v46 = vpack.c.bf16 %v7508_v21, %v7508_v21  ;;  %v9050_v21 = vpop.permute.xlu0 %9049 }
 0xa86   :  { %v9055_v7 = vsel %vm411_vm2, %v9050_v21, 0 }
 0xa88   :  { %9847 = vrot.lane.b32.xlu1 %v19482_v51, %s15229_s12 }
 0xa8b   :  { %14141 = vmatmul.mubr.msk.bf16.vlgmr.msra.gmra.mrb[16].mxu0 %vm411_vm2, %v7532_v46 }
 0xa8c   :  { %14151 = vmatpush3.bf16.msra.mxu0 %v8410_v16  ;;  %9949 = vrot.lane.b32.xlu1 %v19483_v42, %s15228_s11 }
 0xa8d   :  { %14152 = vmatprep.mubr.msk.bf16.mxu0 %vm15220_vm1, %v19311_v33  ;;  %14162 = vmatprep.subr.bf16.mxu0 %v19311_v33 }
 0xa90   :  { %9947 = vrot.lane.b32.xlu1 %v19483_v42, %s15229_s12 }
 0xa94   :  { %10049 = vrot.lane.b32.xlu1 %v19484_v14, %s15228_s11 }
 0xa98   :  { %10047 = vrot.lane.b32.xlu1 %v19484_v14, %s15229_s12  ;;  %v7539_v14 = vpack.c.bf16 %v7515_v50, %v7515_v50 }
 0xa9c   :  { %10385 = vrot.lane.b32.xlu1 %v19485_v38, %s15230_s13  ;;  %v9100_v38 = vpop.permute.xlu0 %9099 }
 0xa9d   :  { %v9105_v44 = vsel %vm411_vm2, %v9100_v38, 0 }
 0xaa0   :  { %10481 = vrot.lane.b32.xlu1 %v19486_v57, %s15230_s13 }
 0xaa4   :  { %10577 = vrot.lane.b32.xlu1 %v19487_v49, %s15230_s13 }
 0xaa8   :  { %10673 = vrot.lane.b32.xlu1 %v19488_v55, %s15230_s13 }
 0xaa9   :  { %v17968_v17 = vpop.f32.mrb[56].mxu1 }
 0xaaa   :  { %v14124_v24 = vpop.f32.mrb[57].mxu1 }
 0xaab   :  { %v8209_v35 = vpop.f32.mrb[58].mxu1  ;;  %v8704_v24 = vld [vmem:[#allocation7 + $0x8] sm:$0xf] }
 0xaac   :  { %v14125_v37 = vpop.f32.mrb[59].mxu1  ;;  %10769 = vrot.lane.b32.xlu1 %v19489_v0, %s15230_s13  ;;  %v7452_v40 = vpop.xlane.xlu1 %7451  ;;  %v8602_v35 = vsel %vm1879_vm3, %v8597_v41, 0  ;;  %v8742_v41 = vsel %vm1879_vm3, %v8704_v24, 0 }
 0xaad   :  { %14922 = vrcp.f32 %v7452_v40  ;;  %v9150_v37 = vpop.permute.xlu0 %9149  ;;  %v8955_v40 = vsel %vm411_vm2, %v8950_v5, 0 }
 0xaae   :  { %v9155_v23 = vsel %vm411_vm2, %v9150_v37, 0 }
 0xab0   :  { %10865 = vrot.lane.b32.xlu1 %v19490_v56, %s15230_s13  ;;  %v7458_v61 = vpop.xlane.xlu1 %7457 }
 0xab1   :  { %v17974_v27 = vpop.f32.mrb[60].mxu1  ;;  %14924 = vrcp.f32 %v7458_v61  ;;  %v9200_v61 = vpop.permute.xlu0 %9199 }
 0xab2   :  { %v14136_v3 = vpop.f32.mrb[61].mxu1  ;;  %v9205_v53 = vsel %vm411_vm2, %v9200_v61, 0 }
 0xab3   :  { %v8305_v31 = vpop.f32.mrb[62].mxu1 }
 0xab4   :  { %v14137_v59 = vpop.f32.mrb[63].mxu1  ;;  %10961 = vrot.lane.b32.xlu1 %v19491_v34, %s15230_s13  ;;  %v7464_v6 = vpop.xlane.xlu1 %7463  ;;  %v9005_v31 = vsel %vm411_vm2, %v9000_v22, 0 }
 0xab5   :  { %14926 = vrcp.f32 %v7464_v6  ;;  %v18013_v5 = vpop.permute.xlu0 %9197 }
 0xab7   :  { %v14923_v2 = vpop.eup %14922 }
 0xab8   :  { %v7510_v9 = vmul.f32 %v14923_v2, %v17835_v10  ;;  %11057 = vrot.lane.b32.xlu1 %v19492_v47, %s15230_s13  ;;  %v8645_v51 = vpop.permute.xlu1 %8644 }
 0xab9   :  { %v8650_v46 = vsel %vm1879_vm3, %v8645_v51, 0 }
 0xaba   :  { %v7534_v16 = vpack.c.bf16 %v7510_v9, %v7510_v9  ;;  %14181 = vmatpush3.bf16.msra.mxu1 %v8650_v46 }
 0xabb   :  { %v14925_v42 = vpop.eup %14924  ;;  %14212 = vmatprep.subr.bf16.mxu1 %v19311_v33 }
 0xabc   :  { %14153 = vmatmul.mubr.msk.bf16.vlgmr.msra.gmra.mrb[20].mxu0 %vm411_vm2, %v7534_v16  ;;  %v8898_v45 = vpop.permute.xlu1 %8897  ;;  %v7512_v10 = vmul.f32 %v14925_v42, %v17841_v1 }
 0xabd   :  { %14163 = vmatpush3.bf16.msra.mxu0 %v8506_v52  ;;  %14183 = vmatmul.mubr.msk.bf16.vlgmr.msra.gmra.mrb[76].mxu1 %vm411_vm2, %v7539_v14 }
 0xabe   :  { %14164 = vmatprep.mubr.msk.bf16.mxu0 %vm15220_vm1, %v19311_v33  ;;  %14174 = vmatprep.subr.bf16.mxu0 %v19311_v33  ;;  %v7536_v49 = vpack.c.bf16 %v7512_v10, %v7512_v10 }
 0xabf   :  { %14214 = vmatprep.mubr.msk.bf16.mxu1 %vm15220_vm1, %v19311_v33  ;;  %v14927_v55 = vpop.eup %14926 }
 0xac0   :  { %v8948_v57 = vpop.permute.xlu1 %8947  ;;  %v7514_v0 = vmul.f32 %v14927_v55, %v17845_v62 }
 0xac2   :  { %v7538_v56 = vpack.c.bf16 %v7514_v0, %v7514_v0 }
 0xac3   :  { %14213 = vmatpush3.bf16.xpose.msra.mxu1 %v8905_v18 }
 0xac4   :  { %14165 = vmatmul.mubr.msk.bf16.vlgmr.msra.gmra.mrb[24].mxu0 %vm411_vm2, %v7536_v49  ;;  %v8998_v1 = vpop.permute.xlu1 %8997  ;;  %14218 = vmatprep.subr.bf16.mxu1 %v19311_v33 }
 0xac5   :  { %14175 = vmatpush3.bf16.msra.mxu0 %v8602_v35  ;;  %14176 = vmatprep.mubr.msk.bf16.mxu0 %vm15220_vm1, %v19311_v33 }
 0xac6   :  { %14604 = vmatprep.subr.msk.bf16.mxu0 %vm1879_vm3, %v8704_v24 }
 0xac8   :  { %v9048_v58 = vpop.permute.xlu1 %9047 }
 0xaca   :  { %14215 = vmatmul.mubr.msk.bf16.vlgmr.msra.gmra.mrb[80].mxu1 %vm411_vm2, %v8898_v45 }
 0xacb   :  { %14219 = vmatpush3.bf16.xpose.msra.mxu1 %v8955_v40  ;;  %14220 = vmatprep.mubr.msk.bf16.mxu1 %vm15220_vm1, %v19311_v33 }
 0xacc   :  { %14177 = vmatmul.mubr.msk.bf16.vlgmr.msra.gmra.mrb[28].mxu0 %vm411_vm2, %v7538_v56  ;;  %v9098_v3 = vpop.permute.xlu1 %9097  ;;  %14224 = vmatprep.subr.bf16.mxu1 %v19311_v33 }
 0xacd   :  { %14187 = vmatpush3.bf16.msra.mxu0 %v8742_v41  ;;  %14188 = vmatprep.mubr.msk.bf16.mxu0 %vm411_vm2, %v8692_v36  ;;  %v18029_v36 = vpop.permute.xlu0 %9299 }
 0xace   :  { %14248 = vmatprep.subr.bf16.mxu0 %v19311_v33 }
 0xad0   :  { %v9148_v62 = vpop.permute.xlu1 %9147 }
 0xad2   :  { %14221 = vmatmul.mubr.msk.bf16.vlgmr.msra.gmra.mrb[84].mxu1 %vm411_vm2, %v8948_v57 }
 0xad3   :  { %14225 = vmatpush3.bf16.xpose.msra.mxu1 %v9005_v31  ;;  %14226 = vmatprep.mubr.msk.bf16.mxu1 %vm15220_vm1, %v19311_v33 }
 0xad4   :  { %14189 = vmatmul.mubr.msk.bf16.vlgmr.msra.gmra.mrb[192].mxu0 %vm411_vm2, %v8693_v29  ;;  %v9250_v54 = vpop.permute.xlu1 %9249  ;;  %14230 = vmatprep.subr.bf16.mxu1 %v19311_v33  ;;  %v18041_v29 = vpop.permute.xlu0 %9297 }
 0xad5   :  { %14192 = vmatprep.mubr.msk.bf16.mxu0 %vm411_vm2, %v8694_v48  ;;  %v9255_v2 = vsel %vm411_vm2, %v9250_v54, 0 }
 0xad6   :  { %14249 = vmatpush3.bf16.xpose.msra.mxu0 %v9205_v53 }
 0xad7   :  { %14260 = vmatprep.subr.bf16.mxu0 %v19311_v33 }
 0xad8   :  { %v9248_v22 = vpop.permute.xlu1 %9247  ;;  %v18051_v15 = vpop.permute.xlu0 %9399 }
 0xada   :  { %14227 = vmatmul.mubr.msk.bf16.vlgmr.msra.gmra.mrb[88].mxu1 %vm411_vm2, %v8998_v1 }
 0xadb   :  { %14231 = vmatpush3.bf16.xpose.msra.mxu1 %v9055_v7  ;;  %14232 = vmatprep.mubr.msk.bf16.mxu1 %vm15220_vm1, %v19311_v33 }
 0xadc   :  { %14193 = vmatmul.mubr.msk.bf16.gmra.mrb[196].mxu0 %vm411_vm2, %v8695_v20  ;;  %v9350_v25 = vpop.permute.xlu1 %9349  ;;  %14236 = vmatprep.subr.bf16.mxu1 %v19311_v33 }
 0xadd   :  { %14196 = vmatprep.mubr.msk.bf16.mxu0 %vm411_vm2, %v8696_v60  ;;  %v18060_v60 = vpop.permute.xlu0 %9397  ;;  %v9355_v51 = vsel %vm411_vm2, %v9350_v25, 0 }
 0xae0   :  { %v9348_v4 = vpop.permute.xlu1 %9347 }
 0xae1   :  { %v18069_v6 = vpop.permute.xlu0 %9499 }
 0xae2   :  { %v18048_v48 = vpop.f32.mrb[64].mxu1  ;;  %14233 = vmatmul.mubr.msk.bf16.vlgmr.msra.gmra.mrb[92].mxu1 %vm411_vm2, %v9048_v58 }
 0xae3   :  { %v14148_v30 = vpop.f32.mrb[65].mxu1  ;;  %14237 = vmatpush3.bf16.xpose.msra.mxu1 %v9105_v44  ;;  %14238 = vmatprep.mubr.msk.bf16.mxu1 %vm15220_vm1, %v19311_v33 }
 0xae4   :  { %v8401_v20 = vpop.f32.mrb[66].mxu1  ;;  %14197 = vmatmul.mubr.msk.bf16.gmra.mrb[200].mxu0 %vm411_vm2, %v8697_v13  ;;  %14242 = vmatprep.subr.bf16.mxu1 %v19311_v33  ;;  %v9450_v19 = vpop.permute.xlu1 %9449 }
 0xae5   :  { %v14149_v26 = vpop.f32.mrb[67].mxu1  ;;  %v18076_v9 = vpop.permute.xlu0 %9497  ;;  %v9455_v42 = vsel %vm411_vm2, %v9450_v19, 0 }
 0xae8   :  { %v9448_v8 = vpop.permute.xlu1 %9447 }
 0xae9   :  { %v18080_v21 = vpop.permute.xlu0 %9599 }
 0xaea   :  { %v18063_v59 = vpop.f32.mrb[68].mxu1  ;;  %14239 = vmatmul.mubr.msk.bf16.vlgmr.msra.gmra.mrb[96].mxu1 %vm411_vm2, %v9098_v3 }
 0xaeb   :  { %v14160_v34 = vpop.f32.mrb[69].mxu1  ;;  %14243 = vmatpush3.bf16.xpose.msra.mxu1 %v9155_v23  ;;  %14244 = vmatprep.mubr.msk.bf16.mxu1 %vm15220_vm1, %v19311_v33 }
 0xaec   :  { %v8497_v32 = vpop.f32.mrb[70].mxu1  ;;  %14254 = vmatprep.subr.bf16.mxu1 %v19311_v33  ;;  %v9550_v50 = vpop.permute.xlu1 %9549 }
 0xaed   :  { %v14161_v13 = vpop.f32.mrb[71].mxu1  ;;  %v18085_v16 = vpop.permute.xlu0 %9597  ;;  %v9555_v45 = vsel %vm411_vm2, %v9550_v50, 0 }
 0xaf0   :  { %v9548_v47 = vpop.permute.xlu1 %9547 }
 0xaf1   :  { %v18092_v52 = vpop.permute.xlu0 %9699 }
 0xaf2   :  { %14245 = vmatmul.mubr.msk.bf16.vlgmr.msra.gmra.mrb[100].mxu1 %vm411_vm2, %v9148_v62 }
 0xaf3   :  { %14255 = vmatpush3.bf16.xpose.msra.mxu1 %v9255_v2  ;;  %14256 = vmatprep.mubr.msk.bf16.mxu1 %vm15220_vm1, %v19311_v33 }
 0xaf4   :  { %14266 = vmatprep.subr.bf16.mxu1 %v19311_v33  ;;  %v9650_v46 = vpop.permute.xlu1 %9649 }
 0xaf5   :  { %v18099_v38 = vpop.permute.xlu0 %9697  ;;  %v9655_v18 = vsel %vm411_vm2, %v9650_v46, 0 }
 0xaf8   :  { %v9648_v14 = vpop.permute.xlu1 %9647 }
 0xaf9   :  { %v18103_v49 = vpop.permute.xlu0 %9799 }
 0xafa   :  { %14257 = vmatmul.mubr.msk.bf16.vlgmr.msra.gmra.mrb[104].mxu1 %vm411_vm2, %v9248_v22 }
 0xafb   :  { %14267 = vmatpush3.bf16.xpose.msra.mxu1 %v9355_v51  ;;  %14268 = vmatprep.mubr.msk.bf16.mxu1 %vm15220_vm1, %v19311_v33 }
 0xafc   :  { %14278 = vmatprep.subr.bf16.mxu1 %v19311_v33  ;;  %v9750_v10 = vpop.permute.xlu1 %9749 }
 0xafd   :  { %v18108_v24 = vpop.permute.xlu0 %9797  ;;  %v9755_v35 = vsel %vm411_vm2, %v9750_v10, 0 }
 0xb00   :  { %v9748_v57 = vpop.permute.xlu1 %9747 }
 0xb01   :  { %v18115_v37 = vpop.permute.xlu0 %9899 }
 0xb02   :  { %14269 = vmatmul.mubr.msk.bf16.vlgmr.msra.gmra.mrb[108].mxu1 %vm411_vm2, %v9348_v4 }
 0xb03   :  { %14279 = vmatpush3.bf16.xpose.msra.mxu1 %v9455_v42  ;;  %14280 = vmatprep.mubr.msk.bf16.mxu1 %vm15220_vm1, %v19311_v33 }
 0xb04   :  { %14290 = vmatprep.subr.bf16.mxu1 %v19311_v33  ;;  %v9850_v55 = vpop.permute.xlu1 %9849 }
 0xb05   :  { %v9855_v58 = vsel %vm411_vm2, %v9850_v55, 0  ;;  %v18124_v62 = vpop.permute.xlu0 %9897 }
 0xb08   :  { %v9848_v1 = vpop.permute.xlu1 %9847 }
 0xb0a   :  { %14281 = vmatmul.mubr.msk.bf16.vlgmr.msra.gmra.mrb[112].mxu1 %vm411_vm2, %v9448_v8 }
 0xb0b   :  { %14291 = vmatpush3.bf16.xpose.msra.mxu1 %v9555_v45  ;;  %14292 = vmatprep.mubr.msk.bf16.mxu1 %vm15220_vm1, %v19311_v33 }
 0xb0c   :  { %14302 = vmatprep.subr.bf16.mxu1 %v19311_v33  ;;  %v9950_v41 = vpop.permute.xlu1 %9949 }
 0xb0d   :  { %v9955_v54 = vsel %vm411_vm2, %v9950_v41, 0 }
 0xb10   :  { %v9948_v31 = vpop.permute.xlu1 %9947 }
 0xb12   :  { %14293 = vmatmul.mubr.msk.bf16.vlgmr.msra.gmra.mrb[116].mxu1 %vm411_vm2, %v9548_v47 }
 0xb13   :  { %14303 = vmatpush3.bf16.xpose.msra.mxu1 %v9655_v18  ;;  %14304 = vmatprep.mubr.msk.bf16.mxu1 %vm15220_vm1, %v19311_v33 }
 0xb14   :  { %14314 = vmatprep.subr.bf16.mxu1 %v19311_v33  ;;  %v10050_v53 = vpop.permute.xlu1 %10049 }
 0xb15   :  { %v10055_v7 = vsel %vm411_vm2, %v10050_v53, 0 }
 0xb18   :  { %v10048_v4 = vpop.permute.xlu1 %10047 }
 0xb1a   :  { %14305 = vmatmul.mubr.msk.bf16.vlgmr.msra.gmra.mrb[120].mxu1 %vm411_vm2, %v9648_v14 }
 0xb1b   :  { %14315 = vmatpush3.bf16.xpose.msra.mxu1 %v9755_v35  ;;  %14316 = vmatprep.mubr.msk.bf16.mxu1 %vm15220_vm1, %v19311_v33 }
 0xb1c   :  { %14326 = vmatprep.subr.bf16.mxu1 %v19311_v33 }
 0xb21   :  { %v8158_v0 = vpop.f32.mrb[8].mxu0 }
 0xb22   :  { %v8698_v40 = vpack.c.bf16 %v17968_v17, %v8158_v0  ;;  %v14118_v56 = vpop.f32.mrb[9].mxu0  ;;  %14317 = vmatmul.mubr.msk.bf16.vlgmr.msra.gmra.mrb[124].mxu1 %vm411_vm2, %v9748_v57  ;;  %v18128_v17 = vpop.permute.xlu0 %9999 }
 0xb23   :  { %v8161_v61 = vpop.f32.mrb[10].mxu0  ;;  %14327 = vmatpush3.bf16.xpose.msra.mxu1 %v9855_v58  ;;  %14328 = vmatprep.mubr.msk.bf16.mxu1 %vm15220_vm1, %v19311_v33 }
 0xb24   :  { %v14119_v3 = vpop.f32.mrb[11].mxu0  ;;  %14200 = vmatprep.mubr.msk.bf16.mxu0 %vm411_vm2, %v8698_v40  ;;  %14338 = vmatprep.subr.bf16.mxu1 %v19311_v33 }
 0xb26   :  { %v18133_v22 = vpop.permute.xlu0 %9997 }
 0xb2a   :  { %14329 = vmatmul.mubr.msk.bf16.vlgmr.msra.gmra.mrb[128].mxu1 %vm411_vm2, %v9848_v1  ;;  %v10434_v25 = vpop.permute.xlu0 %10433 }
 0xb2b   :  { %14339 = vmatpush3.bf16.xpose.msra.mxu1 %v9955_v54  ;;  %14340 = vmatprep.mubr.msk.bf16.mxu1 %vm15220_vm1, %v19311_v33  ;;  %v10439_v44 = vsel %vm1879_vm3, %v10434_v25, 0 }
 0xb2c   :  { %14350 = vmatprep.subr.bf16.mxu1 %v19311_v33 }
 0xb32   :  { %14341 = vmatmul.mubr.msk.bf16.vlgmr.msra.gmra.mrb[132].mxu1 %vm411_vm2, %v9948_v31 }
 0xb33   :  { %14351 = vmatpush3.bf16.xpose.msra.mxu1 %v10055_v7  ;;  %14352 = vmatprep.mubr.msk.bf16.mxu1 %vm15220_vm1, %v19311_v33 }
 0xb34   :  { %14362 = vmatprep.subr.bf16.mxu1 %v19311_v33 }
 0xb3a   :  { %14353 = vmatmul.mubr.msk.bf16.vlgmr.msra.gmra.mrb[136].mxu1 %vm411_vm2, %v10048_v4 }
 0xb3b   :  { %14363 = vmatpush3.bf16.msra.mxu1 %v10439_v44  ;;  %14364 = vmatprep.mubr.msk.bf16.mxu1 %vm15220_vm1, %v19311_v33 }
 0xb3c   :  { %14374 = vmatprep.subr.bf16.mxu1 %v19311_v33 }
 0xb53   :  { %v8590_v30 = vpop.f32.mrb[72].mxu1 }
 0xb54   :  { %v14172_v20 = vpop.f32.mrb[73].mxu1 }
 0xb55   :  { %v8593_v26 = vpop.f32.mrb[74].mxu1 }
 0xb56   :  { %v8254_v19 = vpop.f32.mrb[12].mxu0  ;;  %v14173_v34 = vpop.f32.mrb[75].mxu1 }
 0xb57   :  { %v8699_v23 = vpack.c.bf16 %v17974_v27, %v8254_v19  ;;  %v14130_v32 = vpop.f32.mrb[13].mxu0  ;;  %v9305_v19 = vsel %vm411_vm2, %v18029_v36, 0  ;;  %v9405_v36 = vsel %vm411_vm2, %v18051_v15, 0  ;;  %v9505_v15 = vsel %vm411_vm2, %v18069_v6, 0 }
 0xb58   :  { %v8257_v8 = vpop.f32.mrb[14].mxu0  ;;  %v9605_v6 = vsel %vm411_vm2, %v18080_v21, 0  ;;  %v9705_v21 = vsel %vm411_vm2, %v18092_v52, 0 }
 0xb59   :  { %v14131_v13 = vpop.f32.mrb[15].mxu0  ;;  %14201 = vmatmul.mubr.msk.bf16.gmra.mrb[204].mxu0 %vm411_vm2, %v8699_v23 }
 0xb5e   :  { %v8350_v2 = vpop.f32.mrb[16].mxu0 }
 0xb5f   :  { %v8700_v50 = vpack.c.bf16 %v18048_v48, %v8350_v2  ;;  %v14142_v47 = vpop.f32.mrb[17].mxu0 }
 0xb60   :  { %v8353_v51 = vpop.f32.mrb[18].mxu0 }
 0xb61   :  { %v14143_v46 = vpop.f32.mrb[19].mxu0  ;;  %14204 = vmatprep.mubr.msk.bf16.mxu0 %vm411_vm2, %v8700_v50 }
 0xb8f   :  { %v8446_v42 = vpop.f32.mrb[20].mxu0 }
 0xb90   :  { %v8701_v14 = vpack.c.bf16 %v18063_v59, %v8446_v42  ;;  %v14154_v45 = vpop.f32.mrb[21].mxu0  ;;  %v8686_v10 = vpop.f32.mrb[76].mxu1 }
 0xb91   :  { %v8449_v27 = vpop.f32.mrb[22].mxu0  ;;  %v14184_v57 = vpop.f32.mrb[77].mxu1 }
 0xb92   :  { %v14155_v18 = vpop.f32.mrb[23].mxu0  ;;  %v8689_v55 = vpop.f32.mrb[78].mxu1  ;;  %14205 = vmatmul.mubr.msk.bf16.gmra.mrb[208].mxu0 %vm411_vm2, %v8701_v14 }
 0xb93   :  { %v14185_v35 = vpop.f32.mrb[79].mxu1 }
 0xb97   :  { %v8542_v1 = vpop.f32.mrb[24].mxu0 }
 0xb98   :  { %v8702_v0 = vpack.c.bf16 %v8590_v30, %v8542_v1  ;;  %v14166_v48 = vpop.f32.mrb[25].mxu0 }
 0xb99   :  { %v8545_v58 = vpop.f32.mrb[26].mxu0 }
 0xb9a   :  { %v14167_v40 = vpop.f32.mrb[27].mxu0  ;;  %14208 = vmatprep.mubr.msk.bf16.mxu0 %vm411_vm2, %v8702_v0  ;;  %v19493_v0 = vld [vmem:[#allocation48_spill] sm:$0xff] }
 0xb9d   :  { %v18152_v56 = vpop.f32.mrb[80].mxu1 }
 0xb9e   :  { %v14216_v41 = vpop.f32.mrb[81].mxu1  ;;  %v10097_v59 = vsel %vm411_vm2, %v18152_v56, -inf }
 0xb9f   :  { %v8638_v61 = vpop.f32.mrb[28].mxu0  ;;  %10098 = vmax.xlane.f32.xlu0 %v10097_v59  ;;  %v8944_v3 = vpop.f32.mrb[82].mxu1 }
 0xba0   :  { %v8703_v31 = vpack.c.bf16 %v8686_v10, %v8638_v61  ;;  %v14178_v54 = vpop.f32.mrb[29].mxu0  ;;  %v14217_v53 = vpop.f32.mrb[83].mxu1 }
 0xba1   :  { %v8641_v7 = vpop.f32.mrb[30].mxu0 }
 0xba2   :  { %v14179_v25 = vpop.f32.mrb[31].mxu0  ;;  %14209 = vmatmul.mubr.msk.bf16.gmra.mrb[212].mxu0 %vm411_vm2, %v8703_v31  ;;  %v10386_v7 = vpop.permute.xlu1 %10385 }
 0xba3   :  { %14250 = vmatprep.mubr.msk.bf16.mxu0 %vm15220_vm1, %v19311_v33 }
 0xba5   :  { %v18159_v4 = vpop.f32.mrb[84].mxu1 }
 0xba6   :  { %v14222_v44 = vpop.f32.mrb[85].mxu1  ;;  %v10100_v30 = vsel %vm411_vm2, %v18159_v4, -inf }
 0xba7   :  { %10101 = vmax.xlane.f32.xlu1 %v10100_v30  ;;  %v8994_v20 = vpop.f32.mrb[86].mxu1  ;;  %v10391_v30 = vsel %vm1879_vm3, %v10386_v7, 0 }
 0xba8   :  { %v14223_v26 = vpop.f32.mrb[87].mxu1 }
 0xbaa   :  { %14251 = vmatmul.mubr.msk.bf16.vlgmr.msra.gmra.mrb[32].mxu0 %vm411_vm2, %v18013_v5 }
 0xbab   :  { %14261 = vmatpush3.bf16.xpose.msra.mxu0 %v9305_v19  ;;  %14262 = vmatprep.mubr.msk.bf16.mxu0 %vm15220_vm1, %v19311_v33  ;;  %v19494_v19 = vld [vmem:[#allocation45_spill] sm:$0xff] }
 0xbac   :  { %14272 = vmatprep.subr.bf16.mxu0 %v19311_v33 }
 0xbad   :  { %v18170_v23 = vpop.f32.mrb[88].mxu1 }
 0xbae   :  { %v14228_v34 = vpop.f32.mrb[89].mxu1  ;;  %v10103_v32 = vsel %vm411_vm2, %v18170_v23, -inf }
 0xbaf   :  { %10104 = vmax.xlane.f32.xlu0 %v10103_v32  ;;  %v9044_v8 = vpop.f32.mrb[90].mxu1 }
 0xbb0   :  { %v14229_v13 = vpop.f32.mrb[91].mxu1 }
 0xbb2   :  { %14263 = vmatmul.mubr.msk.bf16.vlgmr.msra.gmra.mrb[36].mxu0 %vm411_vm2, %v18041_v29 }
 0xbb3   :  { %14273 = vmatpush3.bf16.xpose.msra.mxu0 %v9405_v36  ;;  %14274 = vmatprep.mubr.msk.bf16.mxu0 %vm15220_vm1, %v19311_v33 }
 0xbb4   :  { %14284 = vmatprep.subr.bf16.mxu0 %v19311_v33 }
 0xbb5   :  { %v18181_v5 = vpop.f32.mrb[92].mxu1 }
 0xbb6   :  { %v14234_v2 = vpop.f32.mrb[93].mxu1  ;;  %v10106_v50 = vsel %vm411_vm2, %v18181_v5, -inf }
 0xbb7   :  { %10107 = vmax.xlane.f32.xlu0 %v10106_v50  ;;  %v9094_v47 = vpop.f32.mrb[94].mxu1 }
 0xbb8   :  { %v14235_v51 = vpop.f32.mrb[95].mxu1 }
 0xbba   :  { %14275 = vmatmul.mubr.msk.bf16.vlgmr.msra.gmra.mrb[40].mxu0 %vm411_vm2, %v18060_v60 }
 0xbbb   :  { %14285 = vmatpush3.bf16.xpose.msra.mxu0 %v9505_v15  ;;  %14286 = vmatprep.mubr.msk.bf16.mxu0 %vm15220_vm1, %v19311_v33 }
 0xbbc   :  { %14296 = vmatprep.subr.bf16.mxu0 %v19311_v33 }
 0xbbd   :  { %v18192_v29 = vpop.f32.mrb[96].mxu1 }
 0xbbe   :  { %v14240_v46 = vpop.f32.mrb[97].mxu1  ;;  %v10109_v42 = vsel %vm411_vm2, %v18192_v29, -inf }
 0xbbf   :  { %10110 = vmax.xlane.f32.xlu1 %v10109_v42  ;;  %v9144_v14 = vpop.f32.mrb[98].mxu1  ;;  %v18267_v42 = vpop.permute.xlu0 %10529 }
 0xbc0   :  { %v14241_v45 = vpop.f32.mrb[99].mxu1  ;;  %v18269_v14 = vpop.permute.xlu1 %10481 }
 0xbc2   :  { %14287 = vmatmul.mubr.msk.bf16.vlgmr.msra.gmra.mrb[44].mxu0 %vm411_vm2, %v18076_v9 }
 0xbc3   :  { %14297 = vmatpush3.bf16.xpose.msra.mxu0 %v9605_v6  ;;  %14298 = vmatprep.mubr.msk.bf16.mxu0 %vm15220_vm1, %v19311_v33 }
 0xbc4   :  { %14308 = vmatprep.subr.bf16.mxu0 %v19311_v33 }
 0xbc5   :  { %v18203_v60 = vpop.f32.mrb[100].mxu1 }
 0xbc6   :  { %v14246_v10 = vpop.f32.mrb[101].mxu1  ;;  %v10112_v27 = vsel %vm411_vm2, %v18203_v60, -inf }
 0xbc7   :  { %10113 = vmax.xlane.f32.xlu0 %v10112_v27  ;;  %v9194_v57 = vpop.f32.mrb[102].mxu1  ;;  %v18273_v27 = vpop.permute.xlu0 %10625 }
 0xbc8   :  { %v14247_v18 = vpop.f32.mrb[103].mxu1 }
 0xbc9   :  { %v18275_v18 = vpop.permute.xlu1 %10577 }
 0xbca   :  { %14299 = vmatmul.mubr.msk.bf16.vlgmr.msra.gmra.mrb[48].mxu0 %vm411_vm2, %v18085_v16  ;;  %v9805_v16 = vsel %vm411_vm2, %v18103_v49, 0  ;;  %v9905_v49 = vsel %vm411_vm2, %v18115_v37, 0  ;;  %v10005_v37 = vsel %vm411_vm2, %v18128_v17, 0 }
 0xbcb   :  { %14309 = vmatpush3.bf16.xpose.msra.mxu0 %v9705_v21  ;;  %14310 = vmatprep.mubr.msk.bf16.mxu0 %vm15220_vm1, %v19311_v33 }
 0xbcc   :  { %14320 = vmatprep.subr.bf16.mxu0 %v19311_v33 }
 0xbcd   :  { %v18214_v9 = vpop.f32.mrb[104].mxu1 }
 0xbce   :  { %v14258_v55 = vpop.f32.mrb[105].mxu1  ;;  %v10118_v35 = vsel %vm411_vm2, %v18214_v9, -inf }
 0xbcf   :  { %10119 = vmax.xlane.f32.xlu0 %v10118_v35  ;;  %v9294_v1 = vpop.f32.mrb[106].mxu1  ;;  %v18279_v55 = vpop.permute.xlu0 %10721 }
 0xbd0   :  { %11153 = vrot.lane.b32.xlu1 %v19493_v0, %s15230_s13  ;;  %v14259_v52 = vpop.f32.mrb[107].mxu1  ;;  %v18283_v1 = vpop.permute.xlu1 %10673 }
 0xbd2   :  { %14311 = vmatmul.mubr.msk.bf16.vlgmr.msra.gmra.mrb[52].mxu0 %vm411_vm2, %v18099_v38 }
 0xbd3   :  { %14321 = vmatpush3.bf16.xpose.msra.mxu0 %v9805_v16  ;;  %14322 = vmatprep.mubr.msk.bf16.mxu0 %vm15220_vm1, %v19311_v33  ;;  %v18287_v52 = vpop.permute.xlu0 %10817 }
 0xbd4   :  { %14332 = vmatprep.subr.bf16.mxu0 %v19311_v33  ;;  %v18289_v16 = vpop.permute.xlu1 %10769 }
 0xbd5   :  { %v18227_v48 = vpop.f32.mrb[108].mxu1 }
 0xbd6   :  { %v14270_v58 = vpop.f32.mrb[109].mxu1  ;;  %v10124_v40 = vsel %vm411_vm2, %v18227_v48, -inf }
 0xbd7   :  { %10125 = vmax.xlane.f32.xlu0 %v10124_v40  ;;  %v9394_v41 = vpop.f32.mrb[110].mxu1  ;;  %v18293_v40 = vpop.permute.xlu0 %10913 }
 0xbd8   :  { %v14271_v59 = vpop.f32.mrb[111].mxu1 }
 0xbd9   :  { %v18297_v59 = vpop.permute.xlu1 %10865 }
 0xbda   :  { %14323 = vmatmul.mubr.msk.bf16.vlgmr.msra.gmra.mrb[56].mxu0 %vm411_vm2, %v18108_v24 }
 0xbdb   :  { %14333 = vmatpush3.bf16.xpose.msra.mxu0 %v9905_v49  ;;  %14334 = vmatprep.mubr.msk.bf16.mxu0 %vm15220_vm1, %v19311_v33 }
 0xbdc   :  { %14344 = vmatprep.subr.bf16.mxu0 %v19311_v33 }
 0xbdd   :  { %v18238_v38 = vpop.f32.mrb[112].mxu1 }
 0xbde   :  { %v14282_v61 = vpop.f32.mrb[113].mxu1  ;;  %v10130_v3 = vsel %vm411_vm2, %v18238_v38, -inf }
 0xbdf   :  { %10131 = vmax.xlane.f32.xlu0 %v10130_v3  ;;  %v9494_v31 = vpop.f32.mrb[114].mxu1  ;;  %v18301_v61 = vpop.permute.xlu0 %11009 }
 0xbe0   :  { %v14283_v54 = vpop.f32.mrb[115].mxu1  ;;  %v18303_v3 = vpop.permute.xlu1 %10961 }
 0xbe2   :  { %14335 = vmatmul.mubr.msk.bf16.vlgmr.msra.gmra.mrb[60].mxu0 %vm411_vm2, %v18124_v62 }
 0xbe3   :  { %14345 = vmatpush3.bf16.xpose.msra.mxu0 %v10005_v37  ;;  %14346 = vmatprep.mubr.msk.bf16.mxu0 %vm15220_vm1, %v19311_v33 }
 0xbe4   :  { %14356 = vmatprep.subr.bf16.mxu0 %v19311_v33 }
 0xbe5   :  { %v18249_v24 = vpop.f32.mrb[116].mxu1 }
 0xbe6   :  { %v14294_v53 = vpop.f32.mrb[117].mxu1  ;;  %v10136_v21 = vsel %vm411_vm2, %v18249_v24, -inf }
 0xbe7   :  { %v9594_v25 = vpop.f32.mrb[118].mxu1  ;;  %v18306_v53 = vpop.permute.xlu1 %11057 }
 0xbe8   :  { %v14295_v44 = vpop.f32.mrb[119].mxu1 }
 0xbea   :  { %14347 = vmatmul.mubr.msk.bf16.vlgmr.msra.gmra.mrb[64].mxu0 %vm411_vm2, %v18133_v22 }
 0xbeb   :  { %14357 = vmatpush3.bf16.msra.mxu0 %v10391_v30  ;;  %14358 = vmatprep.mubr.msk.bf16.mxu0 %vm15220_vm1, %v19311_v33 }
 0xbec   :  { %14368 = vmatprep.subr.bf16.mxu0 %v19311_v33 }
 0xbed   :  { %v18257_v62 = vpop.f32.mrb[120].mxu1 }
 0xbee   :  { %v14306_v17 = vpop.f32.mrb[121].mxu1  ;;  %v10142_v35 = vsel %vm411_vm2, %v18257_v62, -inf }
 0xbef   :  { %v9694_v20 = vpop.f32.mrb[122].mxu1 }
 0xbf0   :  { %v14307_v26 = vpop.f32.mrb[123].mxu1 }
 0xbf5   :  { %11105 = vrot.lane.b32.xlu0 %v19494_v19, %s15230_s13  ;;  %v18261_v34 = vpop.f32.mrb[124].mxu1 }
 0xbf6   :  { %v14318_v32 = vpop.f32.mrb[125].mxu1  ;;  %v10148_v0 = vsel %vm411_vm2, %v18261_v34, -inf }
 0xbf7   :  { %v9794_v8 = vpop.f32.mrb[126].mxu1 }
 0xbf8   :  { %v14319_v13 = vpop.f32.mrb[127].mxu1 }
 0xbfd   :  { %v18263_v22 = vpop.f32.mrb[128].mxu1 }
 0xbfe   :  { %v14330_v36 = vpop.f32.mrb[129].mxu1  ;;  %v10154_v58 = vsel %vm411_vm2, %v18263_v22, -inf }
 0xbff   :  { %v9894_v2 = vpop.f32.mrb[130].mxu1 }
 0xc00   :  { %v14331_v50 = vpop.f32.mrb[131].mxu1 }
 0xc05   :  { %v18265_v47 = vpop.f32.mrb[132].mxu1 }
 0xc06   :  { %v14342_v51 = vpop.f32.mrb[133].mxu1  ;;  %v10160_v41 = vsel %vm411_vm2, %v18265_v47, -inf }
 0xc07   :  { %v9994_v15 = vpop.f32.mrb[134].mxu1 }
 0xc08   :  { %v14343_v46 = vpop.f32.mrb[135].mxu1 }
 0xc0d   :  { %v18271_v45 = vpop.f32.mrb[136].mxu1 }
 0xc0e   :  { %v14354_v6 = vpop.f32.mrb[137].mxu1  ;;  %v10166_v49 = vsel %vm411_vm2, %v18271_v45, -inf }
 0xc0f   :  { %v10094_v10 = vpop.f32.mrb[138].mxu1 }
 0xc10   :  { %v14355_v57 = vpop.f32.mrb[139].mxu1 }
 0xc14   :  { %10137 = vmax.xlane.f32.xlu0 %v10136_v21 }
 0xc18   :  { %10143 = vmax.xlane.f32.xlu0 %v10142_v35 }
 0xc1c   :  { %10149 = vmax.xlane.f32.xlu0 %v10148_v0 }
 0xc20   :  { %10155 = vmax.xlane.f32.xlu0 %v10154_v58 }
 0xc24   :  { %10161 = vmax.xlane.f32.xlu0 %v10160_v41 }
 0xc28   :  { %10167 = vmax.xlane.f32.xlu0 %v10166_v49 }
 0xc2c   :  { %v10099_v31 = vpop.xlane.xlu0 %10098 }
 0xc2d   :  { %v10169_v54 = vsub.f32 %v18152_v56, %v10099_v31 }
 0xc2f   :  { %v10193_v37 = vmul.f32 1.442695, %v10169_v54 }
 0xc31   :  { %14928 = vpow2.f32 %v10193_v37 }
 0xc34   :  { %v10102_v7 = vpop.xlane.xlu1 %10101 }
 0xc35   :  { %v10170_v25 = vsub.f32 %v18159_v4, %v10102_v7 }
 0xc37   :  { %v10195_v44 = vmul.f32 1.442695, %v10170_v25  ;;  %v19495_v25 = vld [vmem:[#allocation49_spill] sm:$0xff] }
 0xc39   :  { %14930 = vpow2.f32 %v10195_v44 }
 0xc3b   :  { %v18309_v30 = vpop.eup %14928 }
 0xc3c   :  { %v10105_v17 = vpop.xlane.xlu0 %10104  ;;  %v10241_v20 = vsel %vm411_vm2, %v18309_v30, 0.0 }
 0xc3d   :  { %v10171_v26 = vsub.f32 %v18170_v23, %v10105_v17  ;;  %10242 = vadd.xlane.f32.xlu1 %v10241_v20 }
 0xc3f   :  { %v10197_v19 = vmul.f32 1.442695, %v10171_v26 }
 0xc41   :  { %14932 = vpow2.f32 %v10197_v19 }
 0xc43   :  { %v18314_v56 = vpop.eup %14930 }
 0xc44   :  { %v10108_v32 = vpop.xlane.xlu0 %10107  ;;  %v10244_v8 = vsel %vm411_vm2, %v18314_v56, 0.0 }
 0xc45   :  { %v10172_v4 = vsub.f32 %v18181_v5, %v10108_v32  ;;  %10245 = vadd.xlane.f32.xlu0 %v10244_v8 }
 0xc47   :  { %v10199_v13 = vmul.f32 1.442695, %v10172_v4 }
 0xc49   :  { %14934 = vpow2.f32 %v10199_v13 }
 0xc4b   :  { %v18319_v36 = vpop.eup %14932 }
 0xc4c   :  { %v10111_v2 = vpop.xlane.xlu1 %10110  ;;  %v10247_v23 = vsel %vm411_vm2, %v18319_v36, 0.0 }
 0xc4d   :  { %v10173_v50 = vsub.f32 %v18192_v29, %v10111_v2  ;;  %10248 = vadd.xlane.f32.xlu1 %v10247_v23 }
 0xc4f   :  { %v10201_v51 = vmul.f32 1.442695, %v10173_v50 }
 0xc51   :  { %14936 = vpow2.f32 %v10201_v51 }
 0xc53   :  { %v18324_v15 = vpop.eup %14934 }
 0xc54   :  { %v10114_v46 = vpop.xlane.xlu0 %10113  ;;  %v10250_v5 = vsel %vm411_vm2, %v18324_v15, 0.0 }
 0xc55   :  { %v10174_v6 = vsub.f32 %v18203_v60, %v10114_v46  ;;  %10251 = vadd.xlane.f32.xlu0 %v10250_v5 }
 0xc57   :  { %v10203_v10 = vmul.f32 1.442695, %v10174_v6 }
 0xc59   :  { %14938 = vpow2.f32 %v10203_v10 }
 0xc5b   :  { %v18329_v57 = vpop.eup %14936 }
 0xc5c   :  { %v10120_v21 = vpop.xlane.xlu0 %10119  ;;  %v10253_v29 = vsel %vm411_vm2, %v18329_v57, 0.0 }
 0xc5d   :  { %v10176_v35 = vsub.f32 %v18214_v9, %v10120_v21  ;;  %10254 = vadd.xlane.f32.xlu1 %v10253_v29 }
 0xc5f   :  { %v10207_v0 = vmul.f32 1.442695, %v10176_v35 }
 0xc61   :  { %14940 = vpow2.f32 %v10207_v0 }
 0xc63   :  { %v18334_v58 = vpop.eup %14938 }
 0xc64   :  { %v10126_v41 = vpop.xlane.xlu0 %10125  ;;  %v10256_v60 = vsel %vm411_vm2, %v18334_v58, 0.0 }
 0xc65   :  { %v10178_v49 = vsub.f32 %v18227_v48, %v10126_v41  ;;  %10257 = vadd.xlane.f32.xlu0 %v10256_v60 }
 0xc67   :  { %v10211_v31 = vmul.f32 1.442695, %v10178_v49 }
 0xc69   :  { %14942 = vpow2.f32 %v10211_v31 }
 0xc6b   :  { %v18339_v54 = vpop.eup %14940 }
 0xc6c   :  { %v10132_v37 = vpop.xlane.xlu0 %10131  ;;  %v10262_v9 = vsel %vm411_vm2, %v18339_v54, 0.0 }
 0xc6d   :  { %v10180_v7 = vsub.f32 %v18238_v38, %v10132_v37  ;;  %10263 = vadd.xlane.f32.xlu0 %v10262_v9 }
 0xc6e   :  { %11249 = vrot.lane.b32.xlu1 %v19495_v25, %s15230_s13 }
 0xc6f   :  { %v10215_v44 = vmul.f32 1.442695, %v10180_v7 }
 0xc70   :  { %v18368_v60 = vpop.permute.xlu0 %11105 }
 0xc71   :  { %14944 = vpow2.f32 %v10215_v44 }
 0xc73   :  { %v18346_v17 = vpop.eup %14942 }
 0xc74   :  { %v10268_v48 = vsel %vm411_vm2, %v18346_v17, 0.0 }
 0xc75   :  { %10269 = vadd.xlane.f32.xlu0 %v10268_v48 }
 0xc7b   :  { %v18350_v20 = vpop.eup %14944 }
 0xc7c   :  { %v10274_v26 = vsel %vm411_vm2, %v18350_v20, 0.0 }
 0xc7d   :  { %v18354_v19 = vpop.f32.mrb[32].mxu0  ;;  %10275 = vadd.xlane.f32.xlu0 %v10274_v26 }
 0xc7e   :  { %v14252_v38 = vpop.f32.mrb[33].mxu0  ;;  %v10115_v6 = vsel %vm411_vm2, %v18354_v19, -inf }
 0xc7f   :  { %v9244_v32 = vpop.f32.mrb[34].mxu0 }
 0xc80   :  { %v14253_v8 = vpop.f32.mrb[35].mxu0 }
 0xc85   :  { %v18356_v4 = vpop.f32.mrb[36].mxu0 }
 0xc86   :  { %v14264_v13 = vpop.f32.mrb[37].mxu0  ;;  %v10121_v21 = vsel %vm411_vm2, %v18356_v4, -inf }
 0xc87   :  { %v9344_v2 = vpop.f32.mrb[38].mxu0 }
 0xc88   :  { %v14265_v23 = vpop.f32.mrb[39].mxu0 }
 0xc8d   :  { %v18358_v50 = vpop.f32.mrb[40].mxu0 }
 0xc8e   :  { %v14276_v51 = vpop.f32.mrb[41].mxu0  ;;  %v10127_v41 = vsel %vm411_vm2, %v18358_v50, -inf }
 0xc8f   :  { %v9444_v46 = vpop.f32.mrb[42].mxu0 }
 0xc90   :  { %v14277_v5 = vpop.f32.mrb[43].mxu0 }
 0xc92   :  { %10116 = vmax.xlane.f32.xlu1 %v10115_v6 }
 0xc95   :  { %v18362_v10 = vpop.f32.mrb[44].mxu0 }
 0xc96   :  { %v14288_v29 = vpop.f32.mrb[45].mxu0  ;;  %10122 = vmax.xlane.f32.xlu1 %v10121_v21  ;;  %v10133_v31 = vsel %vm411_vm2, %v18362_v10, -inf }
 0xc97   :  { %v9544_v35 = vpop.f32.mrb[46].mxu0 }
 0xc98   :  { %v14289_v0 = vpop.f32.mrb[47].mxu0 }
 0xc9a   :  { %10128 = vmax.xlane.f32.xlu1 %v10127_v41 }
 0xc9d   :  { %v18370_v49 = vpop.f32.mrb[48].mxu0 }
 0xc9e   :  { %v14300_v37 = vpop.f32.mrb[49].mxu0  ;;  %10134 = vmax.xlane.f32.xlu1 %v10133_v31  ;;  %v10139_v44 = vsel %vm411_vm2, %v18370_v49, -inf }
 0xc9f   :  { %v9644_v9 = vpop.f32.mrb[50].mxu0 }
 0xca0   :  { %v14301_v7 = vpop.f32.mrb[51].mxu0 }
 0xca1   :  { %v10138_v25 = vpop.xlane.xlu0 %10137 }
 0xca2   :  { %v10182_v48 = vsub.f32 %v18249_v24, %v10138_v25  ;;  %10140 = vmax.xlane.f32.xlu1 %v10139_v44 }
 0xca4   :  { %v10219_v26 = vmul.f32 1.442695, %v10182_v48 }
 0xca5   :  { %v18377_v38 = vpop.f32.mrb[52].mxu0  ;;  %v10144_v32 = vpop.xlane.xlu0 %10143 }
 0xca6   :  { %14946 = vpow2.f32 %v10219_v26  ;;  %v10184_v8 = vsub.f32 %v18257_v62, %v10144_v32  ;;  %v14312_v13 = vpop.f32.mrb[53].mxu0  ;;  %v10145_v2 = vsel %vm411_vm2, %v18377_v38, -inf }
 0xca7   :  { %v9744_v23 = vpop.f32.mrb[54].mxu0  ;;  %10146 = vmax.xlane.f32.xlu1 %v10145_v2 }
 0xca8   :  { %v10223_v51 = vmul.f32 1.442695, %v10184_v8  ;;  %v14313_v46 = vpop.f32.mrb[55].mxu0  ;;  %v18398_v8 = vpop.permute.xlu1 %11153 }
 0xca9   :  { %v10150_v7 = vpop.xlane.xlu0 %10149 }
 0xcaa   :  { %14948 = vpow2.f32 %v10223_v51 }
 0xcad   :  { %v18382_v5 = vpop.f32.mrb[56].mxu0  ;;  %v10156_v32 = vpop.xlane.xlu0 %10155 }
 0xcae   :  { %v14324_v24 = vpop.f32.mrb[57].mxu0 }
 0xcaf   :  { %v9844_v6 = vpop.f32.mrb[58].mxu0 }
 0xcb0   :  { %v18384_v21 = vpop.eup %14946  ;;  %v14325_v29 = vpop.f32.mrb[59].mxu0 }
 0xcb1   :  { %v10280_v35 = vsel %vm411_vm2, %v18384_v21, 0.0  ;;  %v10162_v13 = vpop.xlane.xlu0 %10161 }
 0xcb2   :  { %10281 = vadd.xlane.f32.xlu0 %v10280_v35  ;;  %v10188_v35 = vsub.f32 %v18263_v22, %v10156_v32 }
 0xcb4   :  { %v18388_v62 = vpop.eup %14948  ;;  %v10231_v22 = vmul.f32 1.442695, %v10188_v35 }
 0xcb5   :  { %v18390_v0 = vpop.f32.mrb[60].mxu0  ;;  %v10286_v41 = vsel %vm411_vm2, %v18388_v62, 0.0  ;;  %v10168_v23 = vpop.xlane.xlu0 %10167 }
 0xcb6   :  { %v14336_v31 = vpop.f32.mrb[61].mxu0  ;;  %10287 = vadd.xlane.f32.xlu0 %v10286_v41  ;;  %v10487_v41 = vsel %vm1879_vm3, %v18269_v14, 0 }
 0xcb7   :  { %v9944_v37 = vpop.f32.mrb[62].mxu0 }
 0xcb8   :  { %v14337_v9 = vpop.f32.mrb[63].mxu0  ;;  %11297 = vrot.lane.b32.xlu1 %v19460_v63, %s15230_s13  ;;  %v10186_v63 = vsub.f32 %v18261_v34, %v10150_v7  ;;  %v10157_v37 = vsel %vm411_vm2, %v18390_v0, -inf }
 0xcba   :  { %v10227_v29 = vmul.f32 1.442695, %v10186_v63 }
 0xcbd   :  { %v18396_v25 = vpop.f32.mrb[64].mxu0 }
 0xcbe   :  { %v14348_v44 = vpop.f32.mrb[65].mxu0 }
 0xcbf   :  { %v10044_v48 = vpop.f32.mrb[66].mxu0  ;;  %v10192_v44 = vsub.f32 %v18271_v45, %v10168_v23 }
 0xcc0   :  { %v14349_v26 = vpop.f32.mrb[67].mxu0  ;;  %v10535_v48 = vsel %vm1879_vm3, %v18267_v42, 0 }
 0xcc1   :  { %v10239_v45 = vmul.f32 1.442695, %v10192_v44 }
 0xcca   :  { %v10243_v2 = vpop.xlane.xlu1 %10242 }
 0xccb   :  { %14950 = vrcp.f32 %v10243_v2  ;;  %v10583_v2 = vsel %vm1879_vm3, %v18275_v18, 0 }
 0xccc   :  { %11201 = vrot.lane.b32.xlu0 %v19459_v39, %s15230_s13  ;;  %v10151_v39 = vsel %vm411_vm2, %v18382_v5, -inf }
 0xcd2   :  { %v10246_v51 = vpop.xlane.xlu0 %10245 }
 0xcd3   :  { %14952 = vrcp.f32 %v10246_v51 }
 0xcd5   :  { %v14951_v46 = vpop.eup %14950 }
 0xcd6   :  { %v10337_v24 = vmul.f32 %v14951_v46, %v18309_v30  ;;  %v10190_v30 = vsub.f32 %v18265_v47, %v10162_v13  ;;  %v10163_v47 = vsel %vm411_vm2, %v18396_v25, -inf }
 0xcd8   :  { %v10361_v6 = vpack.c.bf16 %v10337_v24, %v10337_v24  ;;  %v10235_v7 = vmul.f32 1.442695, %v10190_v30 }
 0xcda   :  { %14359 = vmatmul.mubr.msk.bf16.vlgmr.msra.gmra.mrb[68].mxu0 %vm411_vm2, %v10361_v6  ;;  %v10249_v31 = vpop.xlane.xlu1 %10248 }
 0xcdb   :  { %14369 = vmatpush3.bf16.msra.mxu0 %v10487_v41  ;;  %14954 = vrcp.f32 %v10249_v31  ;;  %14370 = vmatprep.mubr.msk.bf16.mxu0 %vm15220_vm1, %v19311_v33 }
 0xcdc   :  { %10152 = vmax.xlane.f32.xlu1 %v10151_v39  ;;  %14380 = vmatprep.subr.bf16.mxu0 %v19311_v33  ;;  %14956 = vpow2.f32 %v10227_v29  ;;  %v10631_v29 = vsel %vm1879_vm3, %v18273_v27, 0 }
 0xcdd   :  { %v14953_v34 = vpop.eup %14952  ;;  %14958 = vpow2.f32 %v10231_v22  ;;  %v10679_v22 = vsel %vm1879_vm3, %v18283_v1, 0 }
 0xcde   :  { %v10338_v14 = vmul.f32 %v14953_v34, %v18314_v56 }
 0xce0   :  { %v10362_v9 = vpack.c.bf16 %v10338_v14, %v10338_v14  ;;  %10158 = vmax.xlane.f32.xlu1 %v10157_v37 }
 0xce2   :  { %14365 = vmatmul.mubr.msk.bf16.vlgmr.msra.gmra.mrb[140].mxu1 %vm411_vm2, %v10362_v9  ;;  %v10252_v26 = vpop.xlane.xlu0 %10251  ;;  %v10727_v9 = vsel %vm1879_vm3, %v18279_v55, 0 }
 0xce3   :  { %14375 = vmatpush3.bf16.msra.mxu1 %v10535_v48  ;;  %14960 = vrcp.f32 %v10252_v26  ;;  %14376 = vmatprep.mubr.msk.bf16.mxu1 %vm15220_vm1, %v19311_v33 }
 0xce4   :  { %10164 = vmax.xlane.f32.xlu1 %v10163_v47  ;;  %14386 = vmatprep.subr.bf16.mxu1 %v19311_v33  ;;  %14962 = vpow2.f32 %v10235_v7 }
 0xce5   :  { %v14955_v56 = vpop.eup %14954  ;;  %14964 = vpow2.f32 %v10239_v45 }
 0xce6   :  { %v10339_v32 = vmul.f32 %v14955_v56, %v18319_v36  ;;  %v18427_v42 = vpop.eup %14956 }
 0xce7   :  { %v10292_v51 = vsel %vm411_vm2, %v18427_v42, 0.0  ;;  %v18434_v46 = vpop.eup %14958 }
 0xce8   :  { %v10363_v13 = vpack.c.bf16 %v10339_v32, %v10339_v32  ;;  %v10298_v18 = vsel %vm411_vm2, %v18434_v46, 0.0 }
 0xcea   :  { %14371 = vmatmul.mubr.msk.bf16.vlgmr.msra.gmra.mrb[72].mxu0 %vm411_vm2, %v10363_v13  ;;  %v10255_v23 = vpop.xlane.xlu1 %10254 }
 0xceb   :  { %14381 = vmatpush3.bf16.msra.mxu0 %v10583_v2  ;;  %14966 = vrcp.f32 %v10255_v23  ;;  %10293 = vadd.xlane.f32.xlu0 %v10292_v51 }
 0xcec   :  { %14382 = vmatprep.mubr.msk.bf16.mxu0 %vm15220_vm1, %v19311_v33  ;;  %14392 = vmatprep.subr.bf16.mxu0 %v19311_v33 }
 0xced   :  { %v14961_v36 = vpop.eup %14960 }
 0xcee   :  { %v10340_v63 = vmul.f32 %v14961_v36, %v18324_v15  ;;  %v18442_v24 = vpop.eup %14962 }
 0xcef   :  { %10299 = vadd.xlane.f32.xlu0 %v10298_v18  ;;  %v10304_v41 = vsel %vm411_vm2, %v18442_v24, 0.0  ;;  %v18449_v31 = vpop.eup %14964 }
 0xcf0   :  { %v10364_v6 = vpack.c.bf16 %v10340_v63, %v10340_v63  ;;  %v10310_v27 = vsel %vm411_vm2, %v18449_v31, 0.0 }
 0xcf2   :  { %14377 = vmatmul.mubr.msk.bf16.vlgmr.msra.gmra.mrb[144].mxu1 %vm411_vm2, %v10364_v6  ;;  %v10258_v35 = vpop.xlane.xlu0 %10257 }
 0xcf3   :  { %14387 = vmatpush3.bf16.msra.mxu1 %v10631_v29  ;;  %14968 = vrcp.f32 %v10258_v35  ;;  %10305 = vadd.xlane.f32.xlu0 %v10304_v41 }
 0xcf4   :  { %14388 = vmatprep.mubr.msk.bf16.mxu1 %vm15220_vm1, %v19311_v33  ;;  %14398 = vmatprep.subr.bf16.mxu1 %v19311_v33 }
 0xcf5   :  { %v14967_v15 = vpop.eup %14966 }
 0xcf6   :  { %v10341_v39 = vmul.f32 %v14967_v15, %v18329_v57 }
 0xcf7   :  { %10311 = vadd.xlane.f32.xlu0 %v10310_v27 }
 0xcf8   :  { %v10365_v34 = vpack.c.bf16 %v10341_v39, %v10341_v39 }
 0xcfa   :  { %v10264_v30 = vpop.xlane.xlu0 %10263  ;;  %14383 = vmatmul.mubr.msk.bf16.vlgmr.msra.gmra.mrb[76].mxu0 %vm411_vm2, %v10365_v34 }
 0xcfb   :  { %14970 = vrcp.f32 %v10264_v30  ;;  %14393 = vmatpush3.bf16.msra.mxu0 %v10679_v22  ;;  %14394 = vmatprep.mubr.msk.bf16.mxu0 %vm15220_vm1, %v19311_v33 }
 0xcfc   :  { %14404 = vmatprep.subr.bf16.mxu0 %v19311_v33 }
 0xcfd   :  { %v14969_v14 = vpop.eup %14968 }
 0xcfe   :  { %v10342_v57 = vmul.f32 %v14969_v14, %v18334_v58  ;;  %v10823_v58 = vsel %vm1879_vm3, %v18287_v52, 0  ;;  %v10919_v52 = vsel %vm1879_vm3, %v18293_v40, 0 }
 0xd00   :  { %v10366_v37 = vpack.c.bf16 %v10342_v57, %v10342_v57 }
 0xd02   :  { %14389 = vmatmul.mubr.msk.bf16.vlgmr.msra.gmra.mrb[148].mxu1 %vm411_vm2, %v10366_v37  ;;  %v10270_v1 = vpop.xlane.xlu0 %10269 }
 0xd03   :  { %14399 = vmatpush3.bf16.msra.mxu1 %v10727_v9  ;;  %14972 = vrcp.f32 %v10270_v1  ;;  %14400 = vmatprep.mubr.msk.bf16.mxu1 %vm15220_vm1, %v19311_v33 }
 0xd04   :  { %14410 = vmatprep.subr.bf16.mxu1 %v19311_v33 }
 0xd05   :  { %v14971_v7 = vpop.eup %14970 }
 0xd06   :  { %v10344_v44 = vmul.f32 %v14971_v7, %v18339_v54 }
 0xd08   :  { %v10368_v48 = vpack.c.bf16 %v10344_v44, %v10344_v44 }
 0xd0a   :  { %14401 = vmatmul.mubr.msk.bf16.vlgmr.msra.gmra.mrb[152].mxu1 %vm411_vm2, %v10368_v48  ;;  %v10276_v55 = vpop.xlane.xlu0 %10275 }
 0xd0b   :  { %14411 = vmatpush3.bf16.msra.mxu1 %v10823_v58  ;;  %14974 = vrcp.f32 %v10276_v55  ;;  %14412 = vmatprep.mubr.msk.bf16.mxu1 %vm15220_vm1, %v19311_v33  ;;  %v11111_v55 = vsel %vm1879_vm3, %v18368_v60, 0 }
 0xd0c   :  { %14422 = vmatprep.subr.bf16.mxu1 %v19311_v33 }
 0xd0d   :  { %v14973_v26 = vpop.eup %14972  ;;  %11345 = vrot.lane.b32.xlu0 %v19461_v28, %s15230_s13 }
 0xd0e   :  { %v10346_v54 = vmul.f32 %v14973_v26, %v18346_v17  ;;  %v11015_v17 = vsel %vm1879_vm3, %v18301_v61, 0 }
 0xd10   :  { %v10370_v47 = vpack.c.bf16 %v10346_v54, %v10346_v54 }
 0xd11   :  { %11441 = vrot.lane.b32.xlu0 %v16069_v11, %s15230_s13  ;;  %v18492_v11 = vpop.permute.xlu1 %11249 }
 0xd12   :  { %14413 = vmatmul.mubr.msk.bf16.vlgmr.msra.gmra.mrb[156].mxu1 %vm411_vm2, %v10370_v47 }
 0xd13   :  { %14423 = vmatpush3.bf16.msra.mxu1 %v10919_v52  ;;  %14424 = vmatprep.mubr.msk.bf16.mxu1 %vm15220_vm1, %v19311_v33 }
 0xd14   :  { %14434 = vmatprep.subr.bf16.mxu1 %v19311_v33 }
 0xd15   :  { %v14975_v56 = vpop.eup %14974 }
 0xd16   :  { %v10348_v28 = vmul.f32 %v14975_v56, %v18350_v20 }
 0xd18   :  { %v10372_v45 = vpack.c.bf16 %v10348_v28, %v10348_v28 }
 0xd1a   :  { %14425 = vmatmul.mubr.msk.bf16.vlgmr.msra.gmra.mrb[160].mxu1 %vm411_vm2, %v10372_v45 }
 0xd1b   :  { %14435 = vmatpush3.bf16.msra.mxu1 %v11015_v17  ;;  %14436 = vmatprep.mubr.msk.bf16.mxu1 %vm15220_vm1, %v19311_v33 }
 0xd1c   :  { %14446 = vmatprep.subr.bf16.mxu1 %v19311_v33 }
 0xd1f   :  { %v10117_v40 = vpop.xlane.xlu1 %10116 }
 0xd20   :  { %v10175_v32 = vsub.f32 %v18354_v19, %v10117_v40 }
 0xd22   :  { %v10205_v13 = vmul.f32 1.442695, %v10175_v32 }
 0xd23   :  { %v10123_v2 = vpop.xlane.xlu1 %10122 }
 0xd24   :  { %14976 = vpow2.f32 %v10205_v13  ;;  %v10177_v20 = vsub.f32 %v18356_v4, %v10123_v2 }
 0xd26   :  { %v10209_v23 = vmul.f32 1.442695, %v10177_v20 }
 0xd27   :  { %v10129_v61 = vpop.xlane.xlu1 %10128 }
 0xd28   :  { %14978 = vpow2.f32 %v10209_v23  ;;  %v10179_v51 = vsub.f32 %v18358_v50, %v10129_v61 }
 0xd2a   :  { %v10213_v36 = vmul.f32 1.442695, %v10179_v51 }
 0xd2b   :  { %v10135_v63 = vpop.xlane.xlu1 %10134 }
 0xd2c   :  { %14980 = vpow2.f32 %v10213_v36  ;;  %v10181_v18 = vsub.f32 %v18362_v10, %v10135_v63 }
 0xd2e   :  { %v18501_v6 = vpop.eup %14976  ;;  %v10217_v29 = vmul.f32 1.442695, %v10181_v18 }
 0xd2f   :  { %v10141_v35 = vpop.xlane.xlu1 %10140  ;;  %v10259_v19 = vsel %vm411_vm2, %v18501_v6, 0.0 }
 0xd30   :  { %14982 = vpow2.f32 %v10217_v29  ;;  %v10183_v4 = vsub.f32 %v18370_v49, %v10141_v35  ;;  %10260 = vadd.xlane.f32.xlu1 %v10259_v19 }
 0xd32   :  { %v18506_v41 = vpop.eup %14978  ;;  %v10221_v15 = vmul.f32 1.442695, %v10183_v4 }
 0xd33   :  { %v10265_v50 = vsel %vm411_vm2, %v18506_v41, 0.0 }
 0xd34   :  { %14984 = vpow2.f32 %v10221_v15  ;;  %10266 = vadd.xlane.f32.xlu1 %v10265_v50  ;;  %v10147_v10 = vpop.xlane.xlu1 %10146 }
 0xd35   :  { %v10185_v39 = vsub.f32 %v18377_v38, %v10147_v10 }
 0xd36   :  { %v18511_v27 = vpop.eup %14980 }
 0xd37   :  { %v10225_v34 = vmul.f32 1.442695, %v10185_v39  ;;  %v10271_v22 = vsel %vm411_vm2, %v18511_v27, 0.0 }
 0xd38   :  { %10272 = vadd.xlane.f32.xlu1 %v10271_v22  ;;  %v11298_v60 = vpop.permute.xlu1 %11297 }
 0xd39   :  { %14986 = vpow2.f32 %v10225_v34  ;;  %v11303_v29 = vsel %vm1879_vm3, %v11298_v60, 0 }
 0xd3a   :  { %v18515_v49 = vpop.eup %14982 }
 0xd3b   :  { %v10277_v30 = vsel %vm411_vm2, %v18515_v49, 0.0 }
 0xd3c   :  { %10278 = vadd.xlane.f32.xlu1 %v10277_v30 }
 0xd3e   :  { %v18519_v14 = vpop.eup %14984 }
 0xd3f   :  { %v10282_v57 = vpop.xlane.xlu0 %10281  ;;  %v10283_v38 = vsel %vm411_vm2, %v18519_v14, 0.0 }
 0xd40   :  { %14988 = vrcp.f32 %v10282_v57  ;;  %10284 = vadd.xlane.f32.xlu1 %v10283_v38 }
 0xd43   :  { %v18523_v37 = vpop.eup %14986  ;;  %v10288_v9 = vpop.xlane.xlu0 %10287 }
 0xd44   :  { %14990 = vrcp.f32 %v10288_v9  ;;  %v10289_v1 = vsel %vm411_vm2, %v18523_v37, 0.0 }
 0xd45   :  { %10290 = vadd.xlane.f32.xlu1 %v10289_v1 }
 0xd47   :  { %v11202_v54 = vpop.permute.xlu0 %11201 }
 0xd4a   :  { %v14989_v7 = vpop.eup %14988 }
 0xd4b   :  { %v10350_v44 = vmul.f32 %v14989_v7, %v18384_v21  ;;  %v11207_v21 = vsel %vm1879_vm3, %v11202_v54, 0 }
 0xd4d   :  { %v10374_v48 = vpack.c.bf16 %v10350_v44, %v10350_v44 }
 0xd4e   :  { %v14991_v58 = vpop.eup %14990 }
 0xd4f   :  { %14437 = vmatmul.mubr.msk.bf16.vlgmr.msra.gmra.mrb[164].mxu1 %vm411_vm2, %v10374_v48  ;;  %v10352_v26 = vmul.f32 %v14991_v58, %v18388_v62 }
 0xd50   :  { %14447 = vmatpush3.bf16.msra.mxu1 %v11111_v55  ;;  %14448 = vmatprep.mubr.msk.bf16.mxu1 %vm15220_vm1, %v19311_v33 }
 0xd51   :  { %14458 = vmatprep.subr.bf16.mxu1 %v19311_v33  ;;  %v10376_v47 = vpack.c.bf16 %v10352_v26, %v10352_v26 }
 0xd56   :  { %11393 = vrot.lane.b32.xlu1 %v19465_v43, %s15230_s13 }
 0xd57   :  { %14449 = vmatmul.mubr.msk.bf16.vlgmr.msra.gmra.mrb[168].mxu1 %vm411_vm2, %v10376_v47 }
 0xd58   :  { %14459 = vmatpush3.bf16.msra.mxu1 %v11207_v21  ;;  %14460 = vmatprep.mubr.msk.bf16.mxu1 %vm15220_vm1, %v19311_v33 }
 0xd59   :  { %14470 = vmatprep.subr.bf16.mxu1 %v19311_v33 }
 0xd69   :  { %v10153_v52 = vpop.xlane.xlu1 %10152 }
 0xd6a   :  { %v10187_v62 = vsub.f32 %v18382_v5, %v10153_v52 }
 0xd6c   :  { %v10229_v56 = vmul.f32 1.442695, %v10187_v62 }
 0xd6d   :  { %v10159_v28 = vpop.xlane.xlu1 %10158 }
 0xd6e   :  { %14992 = vpow2.f32 %v10229_v56  ;;  %v10189_v45 = vsub.f32 %v18390_v0, %v10159_v28  ;;  %v10775_v56 = vsel %vm1879_vm3, %v18289_v16, 0 }
 0xd70   :  { %v10233_v43 = vmul.f32 1.442695, %v10189_v45 }
 0xd71   :  { %v10165_v17 = vpop.xlane.xlu1 %10164 }
 0xd72   :  { %14994 = vpow2.f32 %v10233_v43  ;;  %v10191_v40 = vsub.f32 %v18396_v25, %v10165_v17 }
 0xd74   :  { %v10237_v32 = vmul.f32 1.442695, %v10191_v40 }
 0xd76   :  { %14996 = vpow2.f32 %v10237_v32 }
 0xd78   :  { %v18545_v13 = vpop.eup %14992  ;;  %v10294_v2 = vpop.xlane.xlu0 %10293 }
 0xd79   :  { %14998 = vrcp.f32 %v10294_v2  ;;  %v10295_v20 = vsel %vm411_vm2, %v18545_v13, 0.0 }
 0xd7a   :  { %10296 = vadd.xlane.f32.xlu1 %v10295_v20 }
 0xd7c   :  { %v18549_v5 = vpop.eup %14994  ;;  %v10300_v23 = vpop.xlane.xlu0 %10299 }
 0xd7d   :  { %15000 = vrcp.f32 %v10300_v23  ;;  %v10301_v0 = vsel %vm411_vm2, %v18549_v5, 0.0  ;;  %v10871_v23 = vsel %vm1879_vm3, %v18297_v59, 0 }
 0xd7e   :  { %10302 = vadd.xlane.f32.xlu1 %v10301_v0 }
 0xd80   :  { %v18553_v61 = vpop.eup %14996  ;;  %v10306_v7 = vpop.xlane.xlu0 %10305 }
 0xd81   :  { %v10307_v25 = vsel %vm411_vm2, %v18553_v61, 0.0 }
 0xd82   :  { %10308 = vadd.xlane.f32.xlu1 %v10307_v25 }
 0xd83   :  { %v14999_v51 = vpop.eup %14998 }
 0xd84   :  { %v10354_v36 = vmul.f32 %v14999_v51, %v18427_v42 }
 0xd86   :  { %v10378_v63 = vpack.c.bf16 %v10354_v36, %v10354_v36 }
 0xd87   :  { %v15001_v18 = vpop.eup %15000 }
 0xd88   :  { %14461 = vmatmul.mubr.msk.bf16.vlgmr.msra.gmra.mrb[172].mxu1 %vm411_vm2, %v10378_v63  ;;  %v10356_v35 = vmul.f32 %v15001_v18, %v18434_v46 }
 0xd89   :  { %14471 = vmatpush3.bf16.msra.mxu1 %v11303_v29  ;;  %14472 = vmatprep.mubr.msk.bf16.mxu1 %vm15220_vm1, %v19311_v33 }
 0xd8a   :  { %14482 = vmatprep.subr.bf16.mxu1 %v19311_v33  ;;  %v10380_v19 = vpack.c.bf16 %v10356_v35, %v10356_v35 }
 0xd90   :  { %14473 = vmatmul.mubr.msk.bf16.vlgmr.msra.gmra.mrb[176].mxu1 %vm411_vm2, %v10380_v19 }
 0xd91   :  { %14484 = vmatprep.mubr.msk.bf16.mxu1 %vm15220_vm1, %v19311_v33 }
 0xd93   :  { %11489 = vrot.lane.b32.xlu1 %v19473_v12, %s15230_s13 }
 0xdad   :  { %v18569_v42 = vpop.f32.mrb[68].mxu0 }
 0xdae   :  { %v14360_v4 = vpop.f32.mrb[69].mxu0 }
 0xdaf   :  { %v10430_v15 = vpop.f32.mrb[70].mxu0 }
 0xdb0   :  { %v14361_v50 = vpop.f32.mrb[71].mxu0 }
 0xdb5   :  { %v18571_v10 = vpop.f32.mrb[140].mxu1 }
 0xdb6   :  { %v11537_v46 = vpack.c.bf16 %v18571_v10, %v18569_v42  ;;  %v14366_v39 = vpop.f32.mrb[141].mxu1 }
 0xdb7   :  { %v10478_v34 = vpop.f32.mrb[142].mxu1 }
 0xdb8   :  { %v14367_v22 = vpop.f32.mrb[143].mxu1 }
 0xdbd   :  { %v18575_v30 = vpop.f32.mrb[72].mxu0  ;;  %v10261_v57 = vpop.xlane.xlu1 %10260 }
 0xdbe   :  { %15002 = vrcp.f32 %v10261_v57  ;;  %v14372_v38 = vpop.f32.mrb[73].mxu0 }
 0xdbf   :  { %v10526_v9 = vpop.f32.mrb[74].mxu0 }
 0xdc0   :  { %v14373_v12 = vpop.f32.mrb[75].mxu0 }
 0xdc1   :  { %v10267_v1 = vpop.xlane.xlu1 %10266 }
 0xdc2   :  { %15004 = vrcp.f32 %v10267_v1 }
 0xdc3   :  { %15006 = vrcp.f32 %v10306_v7 }
 0xdc5   :  { %v18577_v44 = vpop.f32.mrb[144].mxu1  ;;  %v10273_v48 = vpop.xlane.xlu1 %10272 }
 0xdc6   :  { %v11538_v58 = vpack.c.bf16 %v18577_v44, %v18575_v30  ;;  %v14378_v55 = vpop.f32.mrb[145].mxu1  ;;  %15008 = vrcp.f32 %v10273_v48 }
 0xdc7   :  { %v10574_v26 = vpop.f32.mrb[146].mxu1 }
 0xdc8   :  { %v15003_v54 = vpop.eup %15002  ;;  %v14379_v47 = vpop.f32.mrb[147].mxu1 }
 0xdc9   :  { %v10343_v21 = vmul.f32 %v15003_v54, %v18501_v6  ;;  %v10279_v60 = vpop.xlane.xlu1 %10278 }
 0xdca   :  { %15010 = vrcp.f32 %v10279_v60  ;;  %v11255_v60 = vsel %vm1879_vm3, %v18492_v11, 0 }
 0xdcb   :  { %v10367_v52 = vpack.c.bf16 %v10343_v21, %v10343_v21 }
 0xdcc   :  { %v15005_v62 = vpop.eup %15004 }
 0xdcd   :  { %v18584_v28 = vpop.f32.mrb[76].mxu0  ;;  %14395 = vmatmul.mubr.msk.bf16.vlgmr.msra.gmra.mrb[80].mxu0 %vm411_vm2, %v10367_v52  ;;  %v10285_v45 = vpop.xlane.xlu1 %10284  ;;  %v10345_v17 = vmul.f32 %v15005_v62, %v18506_v41 }
 0xdce   :  { %14405 = vmatpush3.bf16.msra.mxu0 %v10775_v56  ;;  %v14384_v43 = vpop.f32.mrb[77].mxu0  ;;  %14406 = vmatprep.mubr.msk.bf16.mxu0 %vm15220_vm1, %v19311_v33  ;;  %v15007_v32 = vpop.eup %15006  ;;  %15012 = vrcp.f32 %v10285_v45 }
 0xdcf   :  { %v10622_v6 = vpop.f32.mrb[78].mxu0  ;;  %14416 = vmatprep.subr.bf16.mxu0 %v19311_v33  ;;  %v10369_v16 = vpack.c.bf16 %v10345_v17, %v10345_v17  ;;  %v10358_v0 = vmul.f32 %v15007_v32, %v18442_v24 }
 0xdd0   :  { %v14385_v40 = vpop.f32.mrb[79].mxu0  ;;  %v15009_v20 = vpop.eup %15008 }
 0xdd1   :  { %v10347_v63 = vmul.f32 %v15009_v20, %v18511_v27  ;;  %v10382_v29 = vpack.c.bf16 %v10358_v0, %v10358_v0  ;;  %v10967_v27 = vsel %vm1879_vm3, %v18303_v3, 0  ;;  %v11063_v3 = vsel %vm1879_vm3, %v18306_v53, 0 }
 0xdd2   :  { %v10291_v2 = vpop.xlane.xlu1 %10290  ;;  %v11159_v53 = vsel %vm1879_vm3, %v18398_v8, 0  ;;  %v10312_v8 = vpop.xlane.xlu0 %10311 }
 0xdd3   :  { %v10371_v35 = vpack.c.bf16 %v10347_v63, %v10347_v63  ;;  %15014 = vrcp.f32 %v10291_v2 }
 0xdd4   :  { %v15011_v19 = vpop.eup %15010  ;;  %15016 = vrcp.f32 %v10312_v8 }
 0xdd5   :  { %v18594_v25 = vpop.f32.mrb[148].mxu1  ;;  %14407 = vmatmul.mubr.msk.bf16.vlgmr.msra.gmra.mrb[84].mxu0 %vm411_vm2, %v10369_v16  ;;  %v10349_v50 = vmul.f32 %v15011_v19, %v18515_v49 }
 0xdd6   :  { %v11539_v41 = vpack.c.bf16 %v18594_v25, %v18584_v28  ;;  %14417 = vmatpush3.bf16.msra.mxu0 %v10871_v23  ;;  %v14390_v51 = vpop.f32.mrb[149].mxu1  ;;  %v11394_v36 = vpop.permute.xlu1 %11393  ;;  %14418 = vmatprep.mubr.msk.bf16.mxu0 %vm15220_vm1, %v19311_v33 }
 0xdd7   :  { %v11399_v18 = vsel %vm1879_vm3, %v11394_v36, 0  ;;  %v10670_v59 = vpop.f32.mrb[150].mxu1  ;;  %14428 = vmatprep.subr.bf16.mxu0 %v19311_v33  ;;  %v10373_v22 = vpack.c.bf16 %v10349_v50, %v10349_v50  ;;  %v11346_v6 = vpop.permute.xlu0 %11345  ;;  %v11549_v51 = vld [vmem:[#allocation7 + $0xc] sm:$0xf] }
 0xdd8   :  { %v14391_v24 = vpop.f32.mrb[151].mxu1  ;;  %14483 = vmatpush3.bf16.msra.mxu1 %v11399_v18  ;;  %v15013_v57 = vpop.eup %15012  ;;  %v11351_v20 = vsel %vm1879_vm3, %v11346_v6, 0 }
 0xdd9   :  { %14494 = vmatprep.subr.bf16.mxu1 %v19311_v33  ;;  %v10351_v49 = vmul.f32 %v15013_v57, %v18519_v14 }
 0xddb   :  { %14485 = vmatmul.mubr.msk.bf16.vlgmr.msra.gmra.mrb[180].mxu1 %vm411_vm2, %v10382_v29  ;;  %v10375_v7 = vpack.c.bf16 %v10351_v49, %v10351_v49 }
 0xddc   :  { %14496 = vmatprep.mubr.msk.bf16.mxu1 %vm15220_vm1, %v19311_v33 }
 0xddd   :  { %v18610_v4 = vpop.f32.mrb[152].mxu1  ;;  %14419 = vmatmul.mubr.msk.bf16.vlgmr.msra.gmra.mrb[88].mxu0 %vm411_vm2, %v10371_v35  ;;  %v15015_v48 = vpop.eup %15014  ;;  %v11587_v35 = vsel %vm1879_vm3, %v11549_v51, 0 }
 0xdde   :  { %14429 = vmatpush3.bf16.msra.mxu0 %v10967_v27  ;;  %v14402_v15 = vpop.f32.mrb[153].mxu1  ;;  %14430 = vmatprep.mubr.msk.bf16.mxu0 %vm15220_vm1, %v19311_v33  ;;  %v10353_v14 = vmul.f32 %v15015_v48, %v18523_v37  ;;  %v15017_v62 = vpop.eup %15016 }
 0xddf   :  { %v10766_v39 = vpop.f32.mrb[154].mxu1  ;;  %14440 = vmatprep.subr.bf16.mxu0 %v19311_v33  ;;  %v10360_v43 = vmul.f32 %v15017_v62, %v18449_v31 }
 0xde0   :  { %v14403_v34 = vpop.f32.mrb[155].mxu1  ;;  %v10377_v21 = vpack.c.bf16 %v10353_v14, %v10353_v14 }
 0xde1   :  { %v10384_v16 = vpack.c.bf16 %v10360_v43, %v10360_v43 }
 0xde5   :  { %v18619_v38 = vpop.f32.mrb[156].mxu1  ;;  %14431 = vmatmul.mubr.msk.bf16.vlgmr.msra.gmra.mrb[92].mxu0 %vm411_vm2, %v10373_v22 }
 0xde6   :  { %14441 = vmatpush3.bf16.msra.mxu0 %v11063_v3  ;;  %v14414_v9 = vpop.f32.mrb[157].mxu1  ;;  %14442 = vmatprep.mubr.msk.bf16.mxu0 %vm15220_vm1, %v19311_v33 }
 0xde7   :  { %v10862_v12 = vpop.f32.mrb[158].mxu1  ;;  %14452 = vmatprep.subr.bf16.mxu0 %v19311_v33 }
 0xde8   :  { %v14415_v1 = vpop.f32.mrb[159].mxu1 }
 0xded   :  { %v18628_v55 = vpop.f32.mrb[160].mxu1  ;;  %14443 = vmatmul.mubr.msk.bf16.vlgmr.msra.gmra.mrb[96].mxu0 %vm411_vm2, %v10375_v7 }
 0xdee   :  { %14453 = vmatpush3.bf16.msra.mxu0 %v11159_v53  ;;  %v14426_v26 = vpop.f32.mrb[161].mxu1  ;;  %14454 = vmatprep.mubr.msk.bf16.mxu0 %vm15220_vm1, %v19311_v33 }
 0xdef   :  { %v10958_v54 = vpop.f32.mrb[162].mxu1  ;;  %14464 = vmatprep.subr.bf16.mxu0 %v19311_v33 }
 0xdf0   :  { %v14427_v47 = vpop.f32.mrb[163].mxu1 }
 0xdf5   :  { %14455 = vmatmul.mubr.msk.bf16.vlgmr.msra.gmra.mrb[100].mxu0 %vm411_vm2, %v10377_v21 }
 0xdf6   :  { %14465 = vmatpush3.bf16.msra.mxu0 %v11255_v60  ;;  %14466 = vmatprep.mubr.msk.bf16.mxu0 %vm15220_vm1, %v19311_v33 }
 0xdf7   :  { %14476 = vmatprep.subr.bf16.mxu0 %v19311_v33 }
 0xe07   :  { %v10297_v52 = vpop.xlane.xlu1 %10296 }
 0xe08   :  { %15018 = vrcp.f32 %v10297_v52 }
 0xe0b   :  { %v10303_v37 = vpop.xlane.xlu1 %10302 }
 0xe0c   :  { %15020 = vrcp.f32 %v10303_v37 }
 0xe0f   :  { %v10309_v56 = vpop.xlane.xlu1 %10308 }
 0xe10   :  { %15022 = vrcp.f32 %v10309_v56 }
 0xe12   :  { %v15019_v45 = vpop.eup %15018 }
 0xe13   :  { %v10355_v11 = vmul.f32 %v15019_v45, %v18545_v13  ;;  %v11490_v17 = vpop.permute.xlu1 %11489  ;;  %v11442_v13 = vpop.permute.xlu0 %11441 }
 0xe14   :  { %v11495_v40 = vsel %vm1879_vm3, %v11490_v17, 0  ;;  %v11447_v36 = vsel %vm1879_vm3, %v11442_v13, 0 }
 0xe15   :  { %v10379_v32 = vpack.c.bf16 %v10355_v11, %v10355_v11  ;;  %14495 = vmatpush3.bf16.msra.mxu1 %v11495_v40 }
 0xe16   :  { %v15021_v2 = vpop.eup %15020 }
 0xe17   :  { %14467 = vmatmul.mubr.msk.bf16.vlgmr.msra.gmra.mrb[104].mxu0 %vm411_vm2, %v10379_v32  ;;  %v10357_v31 = vmul.f32 %v15021_v2, %v18549_v5 }
 0xe18   :  { %14477 = vmatpush3.bf16.msra.mxu0 %v11351_v20  ;;  %14497 = vmatmul.mubr.msk.bf16.vlgmr.msra.gmra.mrb[184].mxu1 %vm411_vm2, %v10384_v16 }
 0xe19   :  { %14478 = vmatprep.mubr.msk.bf16.mxu0 %vm15220_vm1, %v19311_v33  ;;  %14488 = vmatprep.subr.bf16.mxu0 %v19311_v33  ;;  %v10381_v23 = vpack.c.bf16 %v10357_v31, %v10357_v31 }
 0xe1a   :  { %v15023_v0 = vpop.eup %15022 }
 0xe1b   :  { %v10359_v63 = vmul.f32 %v15023_v0, %v18553_v61 }
 0xe1d   :  { %v10383_v24 = vpack.c.bf16 %v10359_v63, %v10359_v63 }
 0xe1f   :  { %14479 = vmatmul.mubr.msk.bf16.vlgmr.msra.gmra.mrb[108].mxu0 %vm411_vm2, %v10381_v23 }
 0xe20   :  { %14489 = vmatpush3.bf16.msra.mxu0 %v11447_v36  ;;  %14490 = vmatprep.mubr.msk.bf16.mxu0 %vm15220_vm1, %v19311_v33 }
 0xe21   :  { %14605 = vmatprep.subr.msk.bf16.mxu0 %vm1879_vm3, %v11549_v51 }
 0xe22   :  { %v11051_v5 = vpop.f32.mrb[164].mxu1 }
 0xe23   :  { %v14438_v18 = vpop.f32.mrb[165].mxu1 }
 0xe24   :  { %v11054_v59 = vpop.f32.mrb[166].mxu1 }
 0xe25   :  { %v14439_v29 = vpop.f32.mrb[167].mxu1 }
 0xe27   :  { %14491 = vmatmul.mubr.msk.bf16.vlgmr.msra.gmra.mrb[112].mxu0 %vm411_vm2, %v10383_v24 }
 0xe28   :  { %14502 = vmatprep.mubr.msk.bf16.mxu0 %vm411_vm2, %v11537_v46  ;;  %14501 = vmatpush3.bf16.msra.mxu0 %v11587_v35 }
 0xe2a   :  { %v11147_v33 = vpop.f32.mrb[168].mxu1 }
 0xe2b   :  { %v14450_v19 = vpop.f32.mrb[169].mxu1 }
 0xe2c   :  { %v11150_v61 = vpop.f32.mrb[170].mxu1  ;;  %v18686_v19 = vld [vmem:[%s19126_s4] ss:$0 sm:$0xff]  ;;  %s15231_s4 = smov [#allocation8]  }
 0xe2d   :  { %v14451_v27 = vpop.f32.mrb[171].mxu1  ;;  %s12511_s16 = sshll.u32 %s15231_s4, 4  ;;  %s12512_s16 = int_to_ptr.vmem [resolvable:$true] %s12511_s16 }
 0xe2e   :  { %s15186_s1 = scalar_lea.vmem %s12512_s16, 384  ;;  %p15191_p11 = scmp.lt.s32.totalorder %s12512_s16, %s12512_s16 }
 0xe2f   :  { %14503 = vmatmul.mubr.msk.bf16.vlgmr.msra.gmra.mrb[192].mxu0 %vm411_vm2, %v11538_v58  ;;  %p15187_p10 = scmp.ne.s32.totalorder %s12512_s16, %s15186_s1  ;;  %p15192_p12 = scmp.lt.s32.totalorder %s15186_s1, %s15186_s1 }
 0xe30   :  { %14506 = vmatprep.mubr.msk.bf16.mxu0 %vm411_vm2, %v11539_v41 }
 0xe31   :  { %p15193_p13 = por %p15192_p12, %p15191_p11 }
 0xe33   :  { %p15194_p0 = pnand %p15193_p13, %p15187_p10 }
 0xe5b   :  { %v11243_v15 = vpop.f32.mrb[172].mxu1 }
 0xe5c   :  { %v14462_v50 = vpop.f32.mrb[173].mxu1 }
 0xe5d   :  { %v11246_v42 = vpop.f32.mrb[174].mxu1 }
 0xe5e   :  { %v14463_v10 = vpop.f32.mrb[175].mxu1 }
 0xe63   :  { %v11339_v46 = vpop.f32.mrb[176].mxu1 }
 0xe64   :  { %v14474_v39 = vpop.f32.mrb[177].mxu1 }
 0xe65   :  { %v11342_v34 = vpop.f32.mrb[178].mxu1 }
 0xe66   :  { %v14475_v22 = vpop.f32.mrb[179].mxu1 }
 0xea0   :  { %v10715_v57 = vpop.f32.mrb[80].mxu0 }
 0xea1   :  { %v11540_v3 = vpack.c.bf16 %v18610_v4, %v10715_v57  ;;  %v14396_v9 = vpop.f32.mrb[81].mxu0 }
 0xea2   :  { %v10718_v30 = vpop.f32.mrb[82].mxu0 }
 0xea3   :  { %v14397_v44 = vpop.f32.mrb[83].mxu0  ;;  %14507 = vmatmul.mubr.msk.bf16.gmra.mrb[196].mxu0 %vm411_vm2, %v11540_v3 }
 0xea8   :  { %v10811_v58 = vpop.f32.mrb[84].mxu0 }
 0xea9   :  { %v11541_v28 = vpack.c.bf16 %v18619_v38, %v10811_v58  ;;  %v14408_v25 = vpop.f32.mrb[85].mxu0 }
 0xeaa   :  { %v10814_v41 = vpop.f32.mrb[86].mxu0 }
 0xeab   :  { %v14409_v49 = vpop.f32.mrb[87].mxu0  ;;  %14510 = vmatprep.mubr.msk.bf16.mxu0 %vm411_vm2, %v11541_v28 }
 0xeae   :  { %v11435_v12 = vpop.f32.mrb[180].mxu1 }
 0xeaf   :  { %v14486_v1 = vpop.f32.mrb[181].mxu1 }
 0xeb0   :  { %v10907_v7 = vpop.f32.mrb[88].mxu0  ;;  %v11438_v48 = vpop.f32.mrb[182].mxu1 }
 0xeb1   :  { %v11542_v53 = vpack.c.bf16 %v18628_v55, %v10907_v7  ;;  %v14420_v4 = vpop.f32.mrb[89].mxu0  ;;  %v14487_v26 = vpop.f32.mrb[183].mxu1 }
 0xeb2   :  { %v10910_v14 = vpop.f32.mrb[90].mxu0 }
 0xeb3   :  { %v14421_v54 = vpop.f32.mrb[91].mxu0  ;;  %14511 = vmatmul.mubr.msk.bf16.gmra.mrb[200].mxu0 %vm411_vm2, %v11542_v53 }
 0xeb8   :  { %v11003_v47 = vpop.f32.mrb[92].mxu0 }
 0xeb9   :  { %v11543_v21 = vpack.c.bf16 %v11051_v5, %v11003_v47  ;;  %v14432_v38 = vpop.f32.mrb[93].mxu0 }
 0xeba   :  { %v11006_v60 = vpop.f32.mrb[94].mxu0 }
 0xebb   :  { %v14433_v8 = vpop.f32.mrb[95].mxu0  ;;  %14514 = vmatprep.mubr.msk.bf16.mxu0 %vm411_vm2, %v11543_v21 }
 0xec0   :  { %v11099_v52 = vpop.f32.mrb[96].mxu0 }
 0xec1   :  { %v11544_v37 = vpack.c.bf16 %v11147_v33, %v11099_v52  ;;  %v14444_v62 = vpop.f32.mrb[97].mxu0 }
 0xec2   :  { %v11102_v56 = vpop.f32.mrb[98].mxu0 }
 0xec3   :  { %v14445_v45 = vpop.f32.mrb[99].mxu0  ;;  %14515 = vmatmul.mubr.msk.bf16.gmra.mrb[204].mxu0 %vm411_vm2, %v11544_v37 }
 0xec8   :  { %v11195_v55 = vpop.f32.mrb[100].mxu0 }
 0xec9   :  { %v11545_v43 = vpack.c.bf16 %v11243_v15, %v11195_v55  ;;  %v14456_v11 = vpop.f32.mrb[101].mxu0 }
 0xeca   :  { %v11198_v17 = vpop.f32.mrb[102].mxu0 }
 0xecb   :  { %v14457_v6 = vpop.f32.mrb[103].mxu0  ;;  %14518 = vmatprep.mubr.msk.bf16.mxu0 %vm411_vm2, %v11545_v43 }
 0xeea   :  { %v11291_v40 = vpop.f32.mrb[104].mxu0 }
 0xeeb   :  { %v11546_v32 = vpack.c.bf16 %v11339_v46, %v11291_v40  ;;  %v14468_v2 = vpop.f32.mrb[105].mxu0  ;;  %v11531_v16 = vpop.f32.mrb[184].mxu1 }
 0xeec   :  { %v11294_v20 = vpop.f32.mrb[106].mxu0  ;;  %v14498_v31 = vpop.f32.mrb[185].mxu1 }
 0xeed   :  { %v14469_v13 = vpop.f32.mrb[107].mxu0  ;;  %v11534_v23 = vpop.f32.mrb[186].mxu1  ;;  %14519 = vmatmul.mubr.msk.bf16.gmra.mrb[208].mxu0 %vm411_vm2, %v11546_v32 }
 0xeee   :  { %v14499_v0 = vpop.f32.mrb[187].mxu1 }
 0xef2   :  { %v11387_v51 = vpop.f32.mrb[108].mxu0 }
 0xef3   :  { %v11547_v36 = vpack.c.bf16 %v11435_v12, %v11387_v51  ;;  %v14480_v63 = vpop.f32.mrb[109].mxu0 }
 0xef4   :  { %v11390_v5 = vpop.f32.mrb[110].mxu0 }
 0xef5   :  { %v14481_v18 = vpop.f32.mrb[111].mxu0  ;;  %14522 = vmatprep.mubr.msk.bf16.mxu0 %vm411_vm2, %v11547_v36 }
 0xefa   :  { %v11483_v59 = vpop.f32.mrb[112].mxu0 }
 0xefb   :  { %v11548_v24 = vpack.c.bf16 %v11531_v16, %v11483_v59  ;;  %v14492_v29 = vpop.f32.mrb[113].mxu0 }
 0xefc   :  { %v11486_v35 = vpop.f32.mrb[114].mxu0 }
 0xefd   :  { %v14493_v33 = vpop.f32.mrb[115].mxu0  ;;  %14523 = vmatmul.mubr.msk.bf16.gmra.mrb[212].mxu0 %vm411_vm2, %v11548_v24 }
 0xf02   :  { %v14504_v61 = vpop.f32.mrb[192].mxu0 }
 0xf03   :  { %v18689_v27 = vadd.f32 %v14504_v61, %v18686_v19  ;;  %v11623_v15 = vpop.f32.mrb[193].mxu0 }
 0xf04   :  { %v18692_v50 = vadd.f32 %v18686_v19, %v11623_v15  ;;  %v14505_v42 = vpop.f32.mrb[194].mxu0 }
 0xf05   :  { %v11626_v10 = vpop.f32.mrb[195].mxu0  ;;  %v11779_v46 = vsel %vm163_vm0, %v18689_v27, 0.0  ;;  %v18697_v39 = vadd.f32 %v14505_v42, %v18686_v19 }
 0xf06   :  { %v18700_v34 = vadd.f32 %v18686_v19, %v11626_v10  ;;  %11780 = vadd.xlane.f32.xlu1 %v11779_v46  ;;  %v11773_v22 = vsel %vm163_vm0, %v18692_v50, 0.0 }
 0xf07   :  { %11774 = vadd.xlane.f32.xlu0 %v11773_v22  ;;  %v11782_v3 = vsel %vm163_vm0, %v18697_v39, 0.0 }
 0xf08   :  { %v11776_v57 = vsel %vm163_vm0, %v18700_v34, 0.0 }
 0xf0a   :  { %11777 = vadd.xlane.f32.xlu1 %v11776_v57 }
 0xf0b   :  { %11783 = vadd.xlane.f32.xlu0 %v11782_v3 }
 0xf76   :  { %v14508_v9 = vpop.f32.mrb[196].mxu0 }
 0xf77   :  { %v18709_v30 = vadd.f32 %v14508_v9, %v18686_v19  ;;  %v11639_v44 = vpop.f32.mrb[197].mxu0 }
 0xf78   :  { %v14509_v58 = vpop.f32.mrb[198].mxu0  ;;  %v18712_v28 = vadd.f32 %v18686_v19, %v11639_v44 }
 0xf79   :  { %v18715_v25 = vadd.f32 %v14509_v58, %v18686_v19  ;;  %v11642_v41 = vpop.f32.mrb[199].mxu0  ;;  %v11791_v49 = vsel %vm163_vm0, %v18709_v30, 0.0 }
 0xf7a   :  { %11792 = vadd.xlane.f32.xlu1 %v11791_v49  ;;  %v18720_v12 = vadd.f32 %v18686_v19, %v11642_v41  ;;  %v11785_v7 = vsel %vm163_vm0, %v18712_v28, 0.0 }
 0xf7b   :  { %v11794_v1 = vsel %vm163_vm0, %v18715_v25, 0.0 }
 0xf7c   :  { %11795 = vadd.xlane.f32.xlu0 %v11794_v1  ;;  %v11788_v48 = vsel %vm163_vm0, %v18720_v12, 0.0 }
 0xf7e   :  { %11786 = vadd.xlane.f32.xlu1 %v11785_v7 }
 0xf80   :  { %11789 = vadd.xlane.f32.xlu0 %v11788_v48 }
 0xf86   :  { %v14512_v53 = vpop.f32.mrb[200].mxu0 }
 0xf87   :  { %v18729_v4 = vadd.f32 %v14512_v53, %v18686_v19  ;;  %v11655_v26 = vpop.f32.mrb[201].mxu0 }
 0xf88   :  { %v14513_v14 = vpop.f32.mrb[202].mxu0  ;;  %v18732_v54 = vadd.f32 %v18686_v19, %v11655_v26 }
 0xf89   :  { %v18735_v47 = vadd.f32 %v14513_v14, %v18686_v19  ;;  %v11658_v21 = vpop.f32.mrb[203].mxu0  ;;  %v11803_v38 = vsel %vm163_vm0, %v18729_v4, 0.0 }
 0xf8a   :  { %11804 = vadd.xlane.f32.xlu0 %v11803_v38  ;;  %v18742_v8 = vadd.f32 %v18686_v19, %v11658_v21  ;;  %v11797_v52 = vsel %vm163_vm0, %v18732_v54, 0.0 }
 0xf8b   :  { %v11806_v60 = vsel %vm163_vm0, %v18735_v47, 0.0 }
 0xf8c   :  { %11807 = vadd.xlane.f32.xlu1 %v11806_v60  ;;  %v11800_v37 = vsel %vm163_vm0, %v18742_v8, 0.0 }
 0xf8e   :  { %11798 = vadd.xlane.f32.xlu0 %v11797_v52 }
 0xf92   :  { %11801 = vadd.xlane.f32.xlu0 %v11800_v37 }
 0xf93   :  { %v11781_v24 = vpop.xlane.xlu1 %11780 }
 0xf94   :  { %v11775_v46 = vpop.xlane.xlu0 %11774  ;;  %v11857_v7 = vrot.slane %v11781_v24, 4 }
 0xf95   :  { %v11845_v58 = vrot.slane %v11775_v46, 4 }
 0xf96   :  { %v14516_v62 = vpop.f32.mrb[204].mxu0  ;;  %v11858_v26 = vmax.f32 %v11781_v24, %v11857_v7 }
 0xf97   :  { %v18749_v56 = vadd.f32 %v14516_v62, %v18686_v19  ;;  %v11671_v45 = vpop.f32.mrb[205].mxu0  ;;  %v11778_v3 = vpop.xlane.xlu1 %11777  ;;  %v11846_v48 = vmax.f32 %v11775_v46, %v11845_v58 }
 0xf98   :  { %v14517_v55 = vpop.f32.mrb[206].mxu0  ;;  %v18752_v43 = vadd.f32 %v18686_v19, %v11671_v45  ;;  %v11851_v41 = vrot.slane %v11778_v3, 4  ;;  %v11784_v53 = vpop.xlane.xlu0 %11783  ;;  %v11859_v60 = vrot.slane %v11858_v26, 2 }
 0xf99   :  { %v11674_v11 = vpop.f32.mrb[207].mxu0  ;;  %v11815_v17 = vsel %vm163_vm0, %v18749_v56, 0.0  ;;  %v18800_v9 = vadd.f32 %v14517_v55, %v18686_v19  ;;  %v11863_v14 = vrot.slane %v11784_v53, 4  ;;  %v11847_v21 = vrot.slane %v11846_v48, 2 }
 0xf9a   :  { %v18757_v6 = vadd.f32 %v18686_v19, %v11674_v11  ;;  %11816 = vadd.xlane.f32.xlu0 %v11815_v17  ;;  %v11809_v32 = vsel %vm163_vm0, %v18752_v43, 0.0  ;;  %v11860_v45 = vmax.f32 %v11858_v26, %v11859_v60 }
 0xf9b   :  { %19496 = vst [vmem:[#allocation19_spill] sm:$0xff] %v18800_v9  ;;  %v11818_v1 = vsel %vm163_vm0, %v18800_v9, 0.0  ;;  %v11864_v52 = vmax.f32 %v11784_v53, %v11863_v14  ;;  %v11848_v37 = vmax.f32 %v11846_v48, %v11847_v21 }
 0xf9c   :  { %v11812_v40 = vsel %vm163_vm0, %v18757_v6, 0.0 }
 0xf9d   :  { %11813 = vadd.xlane.f32.xlu1 %v11812_v40  ;;  %v11865_v55 = vrot.slane %v11864_v52, 2  ;;  %v11849_v11 = vrot.slane %v11848_v37, 1  ;;  %v11861_v40 = vrot.slane %v11860_v45, 1 }
 0xf9e   :  { %11810 = vadd.xlane.f32.xlu0 %v11809_v32 }
 0xf9f   :  { %v11866_v32 = vmax.f32 %v11864_v52, %v11865_v55 }
 0xfc0   :  { %v14520_v2 = vpop.f32.mrb[208].mxu0 }
 0xfc1   :  { %v18764_v16 = vadd.f32 %v14520_v2, %v18686_v19  ;;  %v11687_v20 = vpop.f32.mrb[209].mxu0  ;;  %v11850_v2 = vmax.f32 %v11848_v37, %v11849_v11 }
 0xfc2   :  { %v14521_v31 = vpop.f32.mrb[210].mxu0  ;;  %v18767_v13 = vadd.f32 %v18686_v19, %v11687_v20 }
 0xfc3   :  { %v18770_v23 = vadd.f32 %v14521_v31, %v18686_v19  ;;  %v11690_v0 = vpop.f32.mrb[211].mxu0  ;;  %v11827_v51 = vsel %vm163_vm0, %v18764_v16, 0.0  ;;  %v11862_v31 = vmax.f32 %v11860_v45, %v11861_v40 }
 0xfc4   :  { %11828 = vadd.xlane.f32.xlu1 %v11827_v51  ;;  %v18775_v36 = vadd.f32 %v18686_v19, %v11690_v0  ;;  %v11821_v5 = vsel %vm163_vm0, %v18767_v13, 0.0  ;;  %v11867_v0 = vrot.slane %v11866_v32, 1  ;;  %v11989_v51 = vsub.f32 %v11775_v46, %v11850_v2 }
 0xfc5   :  { %v11830_v63 = vsel %vm163_vm0, %v18770_v23, 0.0 }
 0xfc6   :  { %11831 = vadd.xlane.f32.xlu0 %v11830_v63  ;;  %v11824_v18 = vsel %vm163_vm0, %v18775_v36, 0.0 }
 0xfc8   :  { %11822 = vadd.xlane.f32.xlu1 %v11821_v5  ;;  %v11991_v5 = vsub.f32 %v11781_v24, %v11862_v31 }
 0xfca   :  { %11825 = vadd.xlane.f32.xlu0 %v11824_v18  ;;  %v11868_v18 = vmax.f32 %v11866_v32, %v11867_v0 }
 0xfd0   :  { %v14524_v59 = vpop.f32.mrb[212].mxu0 }
 0xfd1   :  { %v18784_v29 = vadd.f32 %v14524_v59, %v18686_v19  ;;  %v11703_v35 = vpop.f32.mrb[213].mxu0  ;;  %v12013_v59 = vmul.f32 1.442695, %v11989_v51 }
 0xfd2   :  { %v14525_v33 = vpop.f32.mrb[214].mxu0  ;;  %v18787_v61 = vadd.f32 %v18686_v19, %v11703_v35 }
 0xfd3   :  { %v11706_v15 = vpop.f32.mrb[215].mxu0  ;;  %v11839_v42 = vsel %vm163_vm0, %v18784_v29, 0.0  ;;  %v18795_v22 = vadd.f32 %v14525_v33, %v18686_v19  ;;  %v12017_v33 = vmul.f32 1.442695, %v11991_v5  ;;  %15024 = vpow2.f32 %v12013_v59 }
 0xfd4   :  { %v18792_v10 = vadd.f32 %v18686_v19, %v11706_v15  ;;  %11840 = vadd.xlane.f32.xlu1 %v11839_v42  ;;  %v11833_v44 = vsel %vm163_vm0, %v18787_v61, 0.0  ;;  %v11852_v19 = vmax.f32 %v11778_v3, %v11851_v41  ;;  %v11992_v15 = vsub.f32 %v11784_v53, %v11868_v18 }
 0xfd5   :  { %v11842_v49 = vsel %vm163_vm0, %v18795_v22, 0.0 }
 0xfd6   :  { %v11836_v57 = vsel %vm163_vm0, %v18792_v10, 0.0  ;;  %v11853_v38 = vrot.slane %v11852_v19, 2  ;;  %v12019_v42 = vmul.f32 1.442695, %v11992_v15 }
 0xfd7   :  { %11837 = vadd.xlane.f32.xlu0 %v11836_v57 }
 0xfd8   :  { %11834 = vadd.xlane.f32.xlu1 %v11833_v44  ;;  %v11854_v62 = vmax.f32 %v11852_v19, %v11853_v38 }
 0xfda   :  { %v11855_v17 = vrot.slane %v11854_v62, 1 }
 0xfdb   :  { %11843 = vadd.xlane.f32.xlu0 %v11842_v49 }
 0xfdc   :  { %11819 = vadd.xlane.f32.xlu1 %v11818_v1  ;;  %v11856_v20 = vmax.f32 %v11854_v62, %v11855_v17 }
 0xfdd   :  { %v18808_v57 = vpop.eup %15024 }
 0xfde   :  { %v11990_v63 = vsub.f32 %v11778_v3, %v11856_v20  ;;  %v12061_v46 = vrot.slane %v18808_v57, 4 }
 0xfe0   :  { %v12015_v35 = vmul.f32 1.442695, %v11990_v63  ;;  %v12062_v19 = vadd.f32 %v18808_v57, %v12061_v46 }
 0xfe2   :  { %15026 = vpow2.f32 %v12015_v35  ;;  %v12063_v40 = vrot.slane %v12062_v19, 2 }
 0xfe3   :  { %15028 = vpow2.f32 %v12017_v33 }
 0xfe4   :  { %15030 = vpow2.f32 %v12019_v42  ;;  %v12064_v33 = vadd.f32 %v12063_v40, %v12062_v19 }
 0xfec   :  { %v18810_v44 = vpop.eup %15026 }
 0xfed   :  { %v18812_v58 = vpop.eup %15028  ;;  %v12067_v24 = vrot.slane %v18810_v44, 4 }
 0xfee   :  { %v12073_v49 = vrot.slane %v18812_v58, 4  ;;  %v18817_v7 = vpop.eup %15030 }
 0xfef   :  { %v12068_v26 = vadd.f32 %v18810_v44, %v12067_v24  ;;  %v12079_v37 = vrot.slane %v18817_v7, 4 }
 0xff0   :  { %v12074_v52 = vadd.f32 %v18812_v58, %v12073_v49 }
 0xff1   :  { %v12069_v32 = vrot.slane %v12068_v26, 2  ;;  %v12080_v63 = vadd.f32 %v18817_v7, %v12079_v37 }
 0xff2   :  { %v12075_v51 = vrot.slane %v12074_v52, 2 }
 0xff3   :  { %v12070_v15 = vadd.f32 %v12069_v32, %v12068_v26 }
 0xff4   :  { %v12076_v49 = vadd.f32 %v12075_v51, %v12074_v52 }
0x1007   :  { %v11793_v3 = vpop.xlane.xlu1 %11792 }
0x1008   :  { %v11881_v41 = vrot.slane %v11793_v3, 4 }
0x1009   :  { %v11796_v1 = vpop.xlane.xlu0 %11795 }
0x100a   :  { %v11882_v48 = vmax.f32 %v11793_v3, %v11881_v41  ;;  %v11887_v53 = vrot.slane %v11796_v1, 4 }
0x100b   :  { %v11787_v14 = vpop.xlane.xlu1 %11786 }
0x100c   :  { %v11883_v21 = vrot.slane %v11882_v48, 2  ;;  %v11888_v38 = vmax.f32 %v11796_v1, %v11887_v53  ;;  %v11869_v60 = vrot.slane %v11787_v14, 4 }
0x100d   :  { %v11790_v62 = vpop.xlane.xlu0 %11789 }
0x100e   :  { %v11884_v45 = vmax.f32 %v11882_v48, %v11883_v21  ;;  %v11889_v55 = vrot.slane %v11888_v38, 2  ;;  %v11870_v11 = vmax.f32 %v11787_v14, %v11869_v60  ;;  %v11875_v17 = vrot.slane %v11790_v62, 4 }
0x100f   :  { %v12081_v48 = vrot.slane %v12080_v63, 2 }
0x1010   :  { %v11885_v2 = vrot.slane %v11884_v45, 1  ;;  %v11890_v20 = vmax.f32 %v11888_v38, %v11889_v55  ;;  %v11871_v31 = vrot.slane %v11870_v11, 2  ;;  %v11876_v0 = vmax.f32 %v11790_v62, %v11875_v17 }
0x1011   :  { %v12065_v55 = vrot.slane %v12064_v33, 1  ;;  %v12071_v17 = vrot.slane %v12070_v15, 1  ;;  %v12082_v19 = vadd.f32 %v12081_v48, %v12080_v63 }
0x1012   :  { %v11886_v5 = vmax.f32 %v11884_v45, %v11885_v2  ;;  %v11891_v18 = vrot.slane %v11890_v20, 1  ;;  %v11872_v59 = vmax.f32 %v11870_v11, %v11871_v31  ;;  %v11877_v35 = vrot.slane %v11876_v0, 2 }
0x1013   :  { %v12077_v2 = vrot.slane %v12076_v49, 1  ;;  %v12072_v31 = vadd.f32 %v12071_v17, %v12070_v15 }
0x1014   :  { %v11995_v42 = vsub.f32 %v11793_v3, %v11886_v5  ;;  %v11892_v46 = vmax.f32 %v11890_v20, %v11891_v18  ;;  %v11873_v24 = vrot.slane %v11872_v59, 1  ;;  %v11878_v41 = vmax.f32 %v11876_v0, %v11877_v35 }
0x1015   :  { %v12066_v20 = vadd.f32 %v12065_v55, %v12064_v33 }
0x1016   :  { %v12025_v53 = vmul.f32 1.442695, %v11995_v42  ;;  %v11996_v21 = vsub.f32 %v11796_v1, %v11892_v46  ;;  %v11874_v38 = vmax.f32 %v11872_v59, %v11873_v24  ;;  %v11879_v60 = vrot.slane %v11878_v41, 1 }
0x1017   :  { %v11805_v9 = vpop.xlane.xlu0 %11804  ;;  %v12078_v59 = vadd.f32 %v12077_v2, %v12076_v49 }
0x1018   :  { %15032 = vpow2.f32 %v12025_v53  ;;  %v12027_v37 = vmul.f32 1.442695, %v11996_v21  ;;  %v11993_v45 = vsub.f32 %v11787_v14, %v11874_v38  ;;  %v11880_v11 = vmax.f32 %v11878_v41, %v11879_v60 }
0x1019   :  { %v11905_v26 = vrot.slane %v11805_v9, 4  ;;  %v11808_v3 = vpop.xlane.xlu1 %11807  ;;  %v12083_v14 = vrot.slane %v12082_v19, 1 }
0x101a   :  { %15034 = vpow2.f32 %v12027_v37  ;;  %v12021_v40 = vmul.f32 1.442695, %v11993_v45  ;;  %v11994_v32 = vsub.f32 %v11790_v62, %v11880_v11  ;;  %v11911_v52 = vrot.slane %v11808_v3, 4 }
0x101b   :  { %v11906_v1 = vmax.f32 %v11805_v9, %v11905_v26  ;;  %v11799_v0 = vpop.xlane.xlu0 %11798  ;;  %v12084_v53 = vadd.f32 %v12083_v14, %v12082_v19 }
0x101c   :  { %15036 = vpow2.f32 %v12021_v40  ;;  %v12023_v51 = vmul.f32 1.442695, %v11994_v32  ;;  %v11912_v5 = vmax.f32 %v11808_v3, %v11911_v52  ;;  %v11893_v18 = vrot.slane %v11799_v0, 4 }
0x101d   :  { %v11907_v35 = vrot.slane %v11906_v1, 2 }
0x101e   :  { %15038 = vpow2.f32 %v12023_v51  ;;  %v11913_v42 = vrot.slane %v11912_v5, 2  ;;  %v11894_v63 = vmax.f32 %v11799_v0, %v11893_v18 }
0x101f   :  { %15040 = vrcp.f32 %v12066_v20  ;;  %v11908_v46 = vmax.f32 %v11906_v1, %v11907_v35  ;;  %v18824_v24 = vpop.xlane.xlu0 %11801 }
0x1020   :  { %15042 = vrcp.f32 %v12072_v31  ;;  %v11914_v62 = vmax.f32 %v11912_v5, %v11913_v42  ;;  %v11895_v33 = vrot.slane %v11894_v63, 2  ;;  %v11899_v15 = vrot.slane %v18824_v24, 4 }
0x1021   :  { %15044 = vrcp.f32 %v12078_v59  ;;  %v11909_v41 = vrot.slane %v11908_v46, 1 }
0x1022   :  { %v18827_v48 = vpop.eup %15032  ;;  %v11915_v49 = vrot.slane %v11914_v62, 1  ;;  %v11896_v21 = vmax.f32 %v11894_v63, %v11895_v33  ;;  %v11900_v38 = vmax.f32 %v18824_v24, %v11899_v15  ;;  %15046 = vrcp.f32 %v12084_v53 }
0x1023   :  { %v12097_v60 = vrot.slane %v18827_v48, 4  ;;  %v11910_v55 = vmax.f32 %v11908_v46, %v11909_v41 }
0x1024   :  { %v18831_v17 = vpop.eup %15034  ;;  %v11916_v37 = vmax.f32 %v11914_v62, %v11915_v49  ;;  %v11897_v45 = vrot.slane %v11896_v21, 1  ;;  %v11901_v11 = vrot.slane %v11900_v38, 2 }
0x1025   :  { %v12098_v2 = vadd.f32 %v18827_v48, %v12097_v60  ;;  %v12103_v26 = vrot.slane %v18831_v17, 4  ;;  %v11999_v40 = vsub.f32 %v11805_v9, %v11910_v55 }
0x1026   :  { %v18835_v32 = vpop.eup %15036  ;;  %v12000_v19 = vsub.f32 %v11808_v3, %v11916_v37  ;;  %v11898_v52 = vmax.f32 %v11896_v21, %v11897_v45  ;;  %v11902_v20 = vmax.f32 %v11900_v38, %v11901_v11 }
0x1027   :  { %v12099_v31 = vrot.slane %v12098_v2, 2  ;;  %v12104_v1 = vadd.f32 %v18831_v17, %v12103_v26  ;;  %v12085_v51 = vrot.slane %v18835_v32, 4  ;;  %v12033_v5 = vmul.f32 1.442695, %v11999_v40  ;;  %v18839_v18 = vpop.xlane.xlu0 %11816 }
0x1028   :  { %v18841_v59 = vpop.eup %15038  ;;  %v12035_v35 = vmul.f32 1.442695, %v12000_v19  ;;  %v11997_v14 = vsub.f32 %v11799_v0, %v11898_v52  ;;  %v11903_v42 = vrot.slane %v11902_v20, 1  ;;  %v11929_v9 = vrot.slane %v18839_v18, 4 }
0x1029   :  { %v15041_v63 = vpop.eup %15040  ;;  %v12100_v46 = vadd.f32 %v12099_v31, %v12098_v2  ;;  %v12105_v3 = vrot.slane %v12104_v1, 2  ;;  %v12086_v62 = vadd.f32 %v18835_v32, %v12085_v51  ;;  %v12091_v33 = vrot.slane %v18841_v59, 4 }
0x102a   :  { %v15043_v15 = vpop.eup %15042  ;;  %15048 = vpow2.f32 %v12033_v5  ;;  %v12029_v41 = vmul.f32 1.442695, %v11997_v14  ;;  %v11904_v53 = vmax.f32 %v11902_v20, %v11903_v42  ;;  %v11930_v49 = vmax.f32 %v18839_v18, %v11929_v9  ;;  %v18847_v21 = vpop.xlane.xlu1 %11813 }
0x102b   :  { %v15045_v38 = vpop.eup %15044  ;;  %v12101_v0 = vrot.slane %v12100_v46, 1  ;;  %v12106_v60 = vadd.f32 %v12105_v3, %v12104_v1  ;;  %v12087_v55 = vrot.slane %v12086_v62, 2  ;;  %v12092_v37 = vadd.f32 %v18841_v59, %v12091_v33  ;;  %v18854_v31 = vpop.xlane.xlu0 %11810 }
0x102c   :  { %v12206_v45 = vmul.f32 %v15041_v63, %v18808_v57  ;;  %v11998_v11 = vsub.f32 %v18824_v24, %v11904_v53  ;;  %v11931_v2 = vrot.slane %v11930_v49, 2  ;;  %v11923_v26 = vrot.slane %v18847_v21, 4  ;;  %v15047_v24 = vpop.eup %15046 }
0x102d   :  { %v12208_v40 = vmul.f32 %v15043_v15, %v18810_v44  ;;  %v12102_v19 = vadd.f32 %v12101_v0, %v12100_v46  ;;  %v12088_v52 = vadd.f32 %v12087_v55, %v12086_v62  ;;  %v12093_v20 = vrot.slane %v12092_v37, 2 }
0x102e   :  { %v12210_v51 = vmul.f32 %v15045_v38, %v18812_v58  ;;  %15050 = vpow2.f32 %v12035_v35  ;;  %v11932_v1 = vmax.f32 %v11930_v49, %v11931_v2  ;;  %v11924_v5 = vmax.f32 %v18847_v21, %v11923_v26 }
0x102f   :  { %v12107_v14 = vrot.slane %v12106_v60, 1  ;;  %v12089_v57 = vrot.slane %v12088_v52, 1  ;;  %v12094_v42 = vadd.f32 %v12093_v20, %v12092_v37  ;;  %15052 = vpow2.f32 %v12029_v41 }
0x1030   :  { %v12031_v9 = vmul.f32 1.442695, %v11998_v11  ;;  %v11933_v63 = vrot.slane %v11932_v1, 1  ;;  %v11925_v3 = vrot.slane %v11924_v5, 2  ;;  %v11917_v44 = vrot.slane %v18854_v31, 4 }
0x1031   :  { %v12253_v46 = vmul.f32 %v12206_v45, %v18692_v50  ;;  %v12254_v62 = vmul.f32 %v12208_v40, %v18700_v34  ;;  %15054 = vrcp.f32 %v12102_v19  ;;  %v12095_v58 = vrot.slane %v12094_v42, 1 }
0x1032   :  { %v12090_v35 = vadd.f32 %v12089_v57, %v12088_v52  ;;  %v11934_v33 = vmax.f32 %v11932_v1, %v11933_v63  ;;  %v11926_v15 = vmax.f32 %v11924_v5, %v11925_v3  ;;  %v11918_v53 = vmax.f32 %v18854_v31, %v11917_v44 }
0x1033   :  { %v12108_v49 = vadd.f32 %v12107_v14, %v12106_v60  ;;  %v12212_v41 = vmul.f32 %v15047_v24, %v18817_v7  ;;  %15056 = vpow2.f32 %v12031_v9  ;;  %v12255_v55 = vmul.f32 %v12210_v51, %v18689_v27 }
0x1034   :  { %v18862_v38 = vpop.eup %15048  ;;  %v11919_v0 = vrot.slane %v11918_v53, 2  ;;  %v12277_v50 = vsel %vm163_vm0, %v12253_v46, 0.0  ;;  %v12284_v34 = vsel %vm163_vm0, %v12254_v62, 0.0  ;;  %v12096_v37 = vadd.f32 %v12095_v58, %v12094_v42 }
0x1035   :  { %15058 = vrcp.f32 %v12090_v35  ;;  %v12003_v45 = vsub.f32 %v18839_v18, %v11934_v33  ;;  %v11927_v11 = vrot.slane %v11926_v15, 1  ;;  %v12285_v26 = vrot.slane %v12284_v34, 4 }
0x1036   :  { %v11920_v2 = vmax.f32 %v11918_v53, %v11919_v0  ;;  %15060 = vrcp.f32 %v12108_v49  ;;  %v12256_v7 = vmul.f32 %v12212_v41, %v18697_v39  ;;  %v12121_v40 = vrot.slane %v18862_v38, 4 }
0x1037   :  { %v12278_v27 = vrot.slane %v12277_v50, 4  ;;  %15062 = vrcp.f32 %v12096_v37  ;;  %v12291_v52 = vsel %vm163_vm0, %v12255_v55, 0.0  ;;  %v12041_v20 = vmul.f32 1.442695, %v12003_v45 }
0x1038   :  { %v18869_v60 = vpop.eup %15050  ;;  %v11928_v51 = vmax.f32 %v11926_v15, %v11927_v11  ;;  %v11921_v1 = vrot.slane %v11920_v2, 1  ;;  %v12286_v5 = vadd.f32 %v12285_v26, %v12284_v34  ;;  %v12122_v14 = vadd.f32 %v18862_v38, %v12121_v40 }
0x1039   :  { %v18873_v19 = vpop.eup %15052  ;;  %v12127_v57 = vrot.slane %v18869_v60, 4  ;;  %v12298_v42 = vsel %vm163_vm0, %v12256_v7, 0.0  ;;  %v12292_v39 = vrot.slane %v12291_v52, 4  ;;  %v12279_v24 = vadd.f32 %v12278_v27, %v12277_v50 }
0x103a   :  { %v12109_v9 = vrot.slane %v18873_v19, 4  ;;  %15064 = vpow2.f32 %v12041_v20  ;;  %v12002_v44 = vsub.f32 %v18847_v21, %v11928_v51  ;;  %v11922_v46 = vmax.f32 %v11920_v2, %v11921_v1 }
0x103b   :  { %v15055_v18 = vpop.eup %15054  ;;  %v12299_v62 = vrot.slane %v12298_v42, 4  ;;  %v12123_v35 = vrot.slane %v12122_v14, 2  ;;  %v12128_v33 = vadd.f32 %v18869_v60, %v12127_v57  ;;  %v12287_v15 = vrot.slane %v12286_v5, 2 }
0x103c   :  { %v12218_v3 = vmul.f32 %v15055_v18, %v18827_v48  ;;  %v12110_v49 = vadd.f32 %v18873_v19, %v12109_v9  ;;  %v12280_v0 = vrot.slane %v12279_v24, 2  ;;  %v12293_v55 = vadd.f32 %v12292_v39, %v12291_v52 }
0x103d   :  { %v18880_v63 = vpop.eup %15056  ;;  %v12039_v50 = vmul.f32 1.442695, %v12002_v44  ;;  %v12001_v48 = vsub.f32 %v18854_v31, %v11922_v46  ;;  %v12300_v45 = vadd.f32 %v12299_v62, %v12298_v42  ;;  %v12124_v11 = vadd.f32 %v12123_v35, %v12122_v14 }
0x103e   :  { %v12115_v41 = vrot.slane %v18880_v63, 4  ;;  %v12259_v34 = vmul.f32 %v12218_v3, %v18709_v30  ;;  %v12129_v2 = vrot.slane %v12128_v33, 2  ;;  %v12288_v7 = vadd.f32 %v12287_v15, %v12286_v5 }
0x103f   :  { %v15059_v58 = vpop.eup %15058  ;;  %v12111_v40 = vrot.slane %v12110_v49, 2  ;;  %v12281_v20 = vadd.f32 %v12280_v0, %v12279_v24  ;;  %v12294_v51 = vrot.slane %v12293_v55, 2  ;;  %15066 = vpow2.f32 %v12039_v50 }
0x1040   :  { %v15061_v53 = vpop.eup %15060  ;;  %v12214_v37 = vmul.f32 %v15059_v58, %v18835_v32  ;;  %v12116_v27 = vadd.f32 %v18880_v63, %v12115_v41  ;;  %v12037_v31 = vmul.f32 1.442695, %v12001_v48  ;;  %v12319_v30 = vsel %vm163_vm0, %v12259_v34, 0.0 }
0x1041   :  { %v15063_v21 = vpop.eup %15062  ;;  %v12220_v26 = vmul.f32 %v15061_v53, %v18831_v17  ;;  %v12301_v32 = vrot.slane %v12300_v45, 2  ;;  %v12125_v14 = vrot.slane %v12124_v11, 1  ;;  %v12130_v57 = vadd.f32 %v12129_v2, %v12128_v33 }
0x1042   :  { %v12216_v52 = vmul.f32 %v15063_v21, %v18841_v59  ;;  %v12257_v1 = vmul.f32 %v12214_v37, %v18712_v28  ;;  %v12289_v5 = vrot.slane %v12288_v7, 1  ;;  %v12112_v42 = vadd.f32 %v12111_v40, %v12110_v49 }
0x1043   :  { %v12260_v17 = vmul.f32 %v12220_v26, %v18715_v25  ;;  %v12117_v39 = vrot.slane %v12116_v27, 2  ;;  %v12320_v24 = vrot.slane %v12319_v30, 4  ;;  %15068 = vpow2.f32 %v12037_v31 }
0x1044   :  { %v18895_v18 = vpop.eup %15064  ;;  %v12258_v59 = vmul.f32 %v12216_v52, %v18720_v12  ;;  %v12282_v9 = vrot.slane %v12281_v20, 1  ;;  %v12295_v3 = vadd.f32 %v12294_v51, %v12293_v55  ;;  %v12302_v46 = vadd.f32 %v12301_v32, %v12300_v45 }
0x1045   :  { %v12145_v44 = vrot.slane %v18895_v18, 4  ;;  %v12305_v28 = vsel %vm163_vm0, %v12257_v1, 0.0  ;;  %v12126_v62 = vadd.f32 %v12125_v14, %v12124_v11  ;;  %v12131_v58 = vrot.slane %v12130_v57, 1 }
0x1046   :  { %v12290_v35 = vadd.f32 %v12289_v5, %v12288_v7  ;;  %v12326_v33 = vsel %vm163_vm0, %v12260_v17, 0.0  ;;  %v12113_v25 = vrot.slane %v12112_v42, 1  ;;  %v12118_v15 = vadd.f32 %v12117_v39, %v12116_v27 }
0x1047   :  { %v12321_v53 = vadd.f32 %v12320_v24, %v12319_v30  ;;  %v12283_v49 = vadd.f32 %v12282_v9, %v12281_v20  ;;  %v12296_v41 = vrot.slane %v12295_v3, 1  ;;  %v12306_v0 = vrot.slane %v12305_v28, 4 }
0x1048   :  { %v12312_v12 = vsel %vm163_vm0, %v12258_v59, 0.0  ;;  %v12146_v55 = vadd.f32 %v18895_v18, %v12145_v44  ;;  %v12303_v50 = vrot.slane %v12302_v46, 1  ;;  %v12327_v48 = vrot.slane %v12326_v33, 4 }
0x1049   :  { %v18904_v34 = vpop.eup %15066  ;;  %15070 = vrcp.f32 %v12126_v62  ;;  %v12132_v21 = vadd.f32 %v12131_v58, %v12130_v57  ;;  %v12470_v37 = vsel %vm12469_vm4, %v12290_v35, %v12283_v49  ;;  %v12114_v45 = vadd.f32 %v12113_v25, %v12112_v42 }
0x104a   :  { %v12119_v11 = vrot.slane %v12118_v15, 1  ;;  %v12313_v26 = vrot.slane %v12312_v12, 4  ;;  %v12322_v7 = vrot.slane %v12321_v53, 2  ;;  %v12297_v27 = vadd.f32 %v12296_v41, %v12295_v3 }
0x104b   :  { %v12307_v20 = vadd.f32 %v12306_v0, %v12305_v28  ;;  %v12147_v51 = vrot.slane %v12146_v55, 2  ;;  %v12139_v52 = vrot.slane %v18904_v34, 4  ;;  %v12304_v30 = vadd.f32 %v12303_v50, %v12302_v46 }
0x104c   :  { %v12328_v1 = vadd.f32 %v12327_v48, %v12326_v33  ;;  %15072 = vrcp.f32 %v12132_v21  ;;  %v12472_v17 = vsel %vm12471_vm5, %v12297_v27, %v12470_v37  ;;  %v12120_v5 = vadd.f32 %v12119_v11, %v12118_v15 }
0x104d   :  { %v18913_v32 = vpop.eup %15068  ;;  %15074 = vrcp.f32 %v12114_v45  ;;  %v12314_v39 = vadd.f32 %v12313_v26, %v12312_v12  ;;  %v12323_v24 = vadd.f32 %v12322_v7, %v12321_v53  ;;  %v12308_v44 = vrot.slane %v12307_v20, 2 }
0x104e   :  { %v12148_v46 = vadd.f32 %v12147_v51, %v12146_v55  ;;  %v12140_v28 = vadd.f32 %v18904_v34, %v12139_v52  ;;  %v12133_v62 = vrot.slane %v18913_v32, 4  ;;  %v12329_v35 = vrot.slane %v12328_v1, 2 }
0x104f   :  { %15076 = vrcp.f32 %v12120_v5  ;;  %v12315_v49 = vrot.slane %v12314_v39, 2  ;;  %v12324_v41 = vrot.slane %v12323_v24, 1  ;;  %v18929_v0 = vsel %vm12473_vm6, %v12304_v30, %v12472_v17 }
0x1050   :  { %v12309_v21 = vadd.f32 %v12308_v44, %v12307_v20  ;;  %v12149_v37 = vrot.slane %v12148_v46, 1  ;;  %v12141_v45 = vrot.slane %v12140_v28, 2  ;;  %v12330_v26 = vadd.f32 %v12329_v35, %v12328_v1 }
0x1051   :  { %v18907_v2 = vpop.xlane.xlu1 %11828  ;;  %v12134_v7 = vadd.f32 %v18913_v32, %v12133_v62  ;;  %v12316_v30 = vadd.f32 %v12315_v49, %v12314_v39 }
0x1052   :  { %v11953_v40 = vrot.slane %v18907_v2, 4  ;;  %v12150_v1 = vadd.f32 %v12149_v37, %v12148_v46  ;;  %v12142_v44 = vadd.f32 %v12141_v45, %v12140_v28  ;;  %v12331_v35 = vrot.slane %v12330_v26, 1 }
0x1053   :  { %v18911_v31 = vpop.xlane.xlu0 %11831  ;;  %v15071_v12 = vpop.eup %15070  ;;  %v12317_v49 = vrot.slane %v12316_v30, 1 }
0x1054   :  { %v11954_v14 = vmax.f32 %v18907_v2, %v11953_v40  ;;  %v11959_v57 = vrot.slane %v18911_v31, 4  ;;  %v12226_v52 = vmul.f32 %v15071_v12, %v18862_v38 }
0x1055   :  { %v18918_v42 = vpop.xlane.xlu1 %11822 }
0x1056   :  { %v11955_v59 = vrot.slane %v11954_v14, 2  ;;  %v11960_v9 = vmax.f32 %v18911_v31, %v11959_v57  ;;  %v11941_v3 = vrot.slane %v18918_v42, 4  ;;  %v18934_v57 = vadd.f32 %v12324_v41, %v12323_v24  ;;  %v15073_v17 = vpop.eup %15072 }
0x1057   :  { %v18924_v58 = vpop.xlane.xlu0 %11825  ;;  %v12263_v39 = vmul.f32 %v12226_v52, %v18729_v4  ;;  %v12228_v24 = vmul.f32 %v15073_v17, %v18869_v60 }
0x1058   :  { %v11956_v33 = vmax.f32 %v11954_v14, %v11955_v59  ;;  %v11961_v25 = vrot.slane %v11960_v9, 2  ;;  %v11942_v15 = vmax.f32 %v18918_v42, %v11941_v3  ;;  %v11947_v53 = vrot.slane %v18924_v58, 4  ;;  %v15075_v3 = vpop.eup %15074 }
0x1059   :  { %v15077_v12 = vpop.eup %15076  ;;  %v18949_v45 = vsel %vm163_vm0, %v12263_v39, 0.0 }
0x105a   :  { %v11957_v55 = vrot.slane %v11956_v33, 1  ;;  %v11962_v50 = vmax.f32 %v11960_v9, %v11961_v25  ;;  %v11943_v48 = vrot.slane %v11942_v15, 2  ;;  %v11948_v11 = vmax.f32 %v18924_v58, %v11947_v53 }
0x105b   :  { %v12310_v9 = vrot.slane %v12309_v21, 1 }
0x105c   :  { %v11958_v40 = vmax.f32 %v11956_v33, %v11957_v55  ;;  %v11963_v27 = vrot.slane %v11962_v50, 1  ;;  %v11944_v51 = vmax.f32 %v11942_v15, %v11943_v48  ;;  %v11949_v14 = vrot.slane %v11948_v11, 2 }
0x105d   :  { %v12135_v33 = vrot.slane %v12134_v7, 2  ;;  %v12311_v28 = vadd.f32 %v12310_v9, %v12309_v21  ;;  %v12143_v48 = vrot.slane %v12142_v44, 1 }
0x105e   :  { %v12007_v20 = vsub.f32 %v18907_v2, %v11958_v40  ;;  %v11964_v5 = vmax.f32 %v11962_v50, %v11963_v27  ;;  %v11945_v59 = vrot.slane %v11944_v51, 1  ;;  %v11950_v62 = vmax.f32 %v11948_v11, %v11949_v14 }
0x105f   :  { %v18944_v50 = vadd.f32 %v12331_v35, %v12330_v26  ;;  %v12136_v4 = vadd.f32 %v12135_v33, %v12134_v7  ;;  %v12222_v26 = vmul.f32 %v15075_v3, %v18873_v19  ;;  %v12318_v27 = vadd.f32 %v12317_v49, %v12316_v30 }
0x1060   :  { %v12049_v25 = vmul.f32 1.442695, %v12007_v20  ;;  %v12008_v38 = vsub.f32 %v18911_v31, %v11964_v5  ;;  %v11946_v15 = vmax.f32 %v11944_v51, %v11945_v59  ;;  %v11951_v53 = vrot.slane %v11950_v62, 1 }
0x1061   :  { %v18940_v2 = vpop.xlane.xlu1 %11840  ;;  %v18959_v51 = vmul.f32 %v12228_v24, %v18735_v47  ;;  %v12137_v20 = vrot.slane %v12136_v4, 1  ;;  %v12476_v19 = vsel %vm12475_vm7, %v12311_v28, %v18929_v0  ;;  %v12224_v24 = vmul.f32 %v15077_v12, %v18880_v63 }
0x1062   :  { %15078 = vpow2.f32 %v12049_v25  ;;  %v12051_v41 = vmul.f32 1.442695, %v12008_v38  ;;  %v12005_v46 = vsub.f32 %v18918_v42, %v11946_v15  ;;  %v11952_v55 = vmax.f32 %v11950_v62, %v11951_v53 }
0x1063   :  { %15080 = vrcp.f32 %v12150_v1  ;;  %v11977_v31 = vrot.slane %v18940_v2, 4  ;;  %v12261_v1 = vmul.f32 %v12222_v26, %v18732_v54  ;;  %v12144_v62 = vadd.f32 %v12143_v48, %v12142_v44 }
0x1064   :  { %15082 = vpow2.f32 %v12051_v41  ;;  %v12045_v60 = vmul.f32 1.442695, %v12005_v46  ;;  %v18946_v37 = vpop.xlane.xlu0 %11837  ;;  %v12006_v11 = vsub.f32 %v18924_v58, %v11952_v55  ;;  %v12348_v58 = vrot.slane %v18949_v45, 4 }
0x1065   :  { %v11978_v42 = vmax.f32 %v18940_v2, %v11977_v31  ;;  %v11971_v21 = vrot.slane %v18946_v37, 4  ;;  %v18954_v40 = vpop.xlane.xlu1 %11834  ;;  %v12478_v39 = vsel %vm12477_vm8, %v12318_v27, %v12476_v19  ;;  %v12138_v53 = vadd.f32 %v12137_v20, %v12136_v4 }
0x1066   :  { %15084 = vpow2.f32 %v12045_v60  ;;  %v11965_v7 = vrot.slane %v18954_v40, 4  ;;  %v12047_v52 = vmul.f32 1.442695, %v12006_v11  ;;  %v18985_v48 = vsel %vm163_vm0, %v12261_v1, 0.0 }
0x1067   :  { %v11979_v14 = vrot.slane %v11978_v42, 2  ;;  %v11972_v17 = vmax.f32 %v18946_v37, %v11971_v21 }
0x1068   :  { %v11966_v5 = vmax.f32 %v18954_v40, %v11965_v7  ;;  %v18964_v59 = vpop.xlane.xlu0 %11843  ;;  %15086 = vpow2.f32 %v12047_v52 }
0x1069   :  { %v11980_v9 = vmax.f32 %v11978_v42, %v11979_v14  ;;  %v11973_v30 = vrot.slane %v11972_v17, 2  ;;  %v11983_v47 = vrot.slane %v18964_v59, 4  ;;  %v18969_v3 = vpop.xlane.xlu1 %11819  ;;  %15088 = vrcp.f32 %v12144_v62 }
0x106a   :  { %v11967_v35 = vrot.slane %v11966_v5, 2  ;;  %v11935_v33 = vrot.slane %v18969_v3, 4  ;;  %15090 = vrcp.f32 %v12138_v53 }
0x106b   :  { %v11981_v25 = vrot.slane %v11980_v9, 1  ;;  %v11974_v38 = vmax.f32 %v11972_v17, %v11973_v30  ;;  %v11984_v15 = vmax.f32 %v18964_v59, %v11983_v47 }
0x106c   :  { %v18975_v0 = vpop.eup %15078  ;;  %v11968_v49 = vmax.f32 %v11966_v5, %v11967_v35  ;;  %v11936_v41 = vmax.f32 %v18969_v3, %v11935_v33 }
0x106d   :  { %v18979_v54 = vpop.eup %15080  ;;  %v12169_v44 = vrot.slane %v18975_v0, 4  ;;  %v11982_v46 = vmax.f32 %v11980_v9, %v11981_v25  ;;  %v11975_v28 = vrot.slane %v11974_v38, 1  ;;  %v11985_v55 = vrot.slane %v11984_v15, 2 }
0x106e   :  { %v18982_v31 = vpop.eup %15082  ;;  %v11969_v60 = vrot.slane %v11968_v49, 1  ;;  %v11937_v11 = vrot.slane %v11936_v41, 2 }
0x106f   :  { %v12170_v63 = vadd.f32 %v18975_v0, %v12169_v44  ;;  %v12175_v12 = vrot.slane %v18982_v31, 4  ;;  %v12011_v4 = vsub.f32 %v18940_v2, %v11982_v46  ;;  %v11976_v42 = vmax.f32 %v11974_v38, %v11975_v28 }
0x1070   :  { %v18990_v21 = vpop.eup %15084  ;;  %v11970_v26 = vmax.f32 %v11968_v49, %v11969_v60  ;;  %v11986_v7 = vmax.f32 %v11984_v15, %v11985_v55  ;;  %v11938_v27 = vmax.f32 %v11936_v41, %v11937_v11  ;;  %v12480_v44 = vsel %vm12479_vm9, %v18934_v57, %v12478_v39 }
0x1071   :  { %v12171_v52 = vrot.slane %v12170_v63, 2  ;;  %v12176_v14 = vadd.f32 %v18982_v31, %v12175_v12  ;;  %v12157_v17 = vrot.slane %v18990_v21, 4  ;;  %v12057_v20 = vmul.f32 1.442695, %v12011_v4 }
0x1072   :  { %v12010_v5 = vsub.f32 %v18946_v37, %v11976_v42  ;;  %v12009_v19 = vsub.f32 %v18954_v40, %v11970_v26  ;;  %v11987_v9 = vrot.slane %v11986_v7, 1  ;;  %v11939_v30 = vrot.slane %v11938_v27, 1  ;;  %v18996_v2 = vpop.eup %15086 }
0x1073   :  { %v12172_v47 = vadd.f32 %v12171_v52, %v12170_v63  ;;  %v12177_v1 = vrot.slane %v12176_v14, 2  ;;  %v12158_v62 = vadd.f32 %v18990_v21, %v12157_v17  ;;  %15092 = vpow2.f32 %v12057_v20  ;;  %v15089_v60 = vpop.eup %15088 }
0x1074   :  { %v12163_v35 = vrot.slane %v18996_v2, 4  ;;  %v12055_v33 = vmul.f32 1.442695, %v12010_v5  ;;  %v12053_v25 = vmul.f32 1.442695, %v12009_v19  ;;  %v11988_v38 = vmax.f32 %v11986_v7, %v11987_v9  ;;  %v15091_v7 = vpop.eup %15090 }
0x1075   :  { %v12173_v15 = vrot.slane %v12172_v47, 1  ;;  %v12178_v53 = vadd.f32 %v12177_v1, %v12176_v14  ;;  %v12159_v49 = vrot.slane %v12158_v62, 2  ;;  %v11940_v37 = vmax.f32 %v11938_v27, %v11939_v30 }
0x1076   :  { %v12164_v40 = vadd.f32 %v18996_v2, %v12163_v35  ;;  %15094 = vpow2.f32 %v12055_v33  ;;  %v12012_v41 = vsub.f32 %v18964_v59, %v11988_v38  ;;  %v12262_v11 = vmul.f32 %v12224_v24, %v18742_v8 }
0x1077   :  { %v12174_v46 = vadd.f32 %v12173_v15, %v12172_v47  ;;  %v12179_v28 = vrot.slane %v12178_v53, 1  ;;  %v12160_v55 = vadd.f32 %v12159_v49, %v12158_v62  ;;  %15096 = vpow2.f32 %v12053_v25 }
0x1078   :  { %v12165_v63 = vrot.slane %v12164_v40, 2  ;;  %v12059_v12 = vmul.f32 1.442695, %v12012_v41  ;;  %v12004_v4 = vsub.f32 %v18969_v3, %v11940_v37  ;;  %v12482_v59 = vsel %vm12481_vm10, %v18944_v50, %v12480_v44 }
0x1079   :  { %15098 = vrcp.f32 %v12174_v46  ;;  %v12180_v42 = vadd.f32 %v12179_v28, %v12178_v53  ;;  %v12161_v26 = vrot.slane %v12160_v55, 1  ;;  %v12334_v57 = vrot.slane %v18985_v48, 4 }
0x107a   :  { %v12166_v39 = vadd.f32 %v12165_v63, %v12164_v40  ;;  %15100 = vpow2.f32 %v12059_v12  ;;  %v12043_v27 = vmul.f32 1.442695, %v12004_v4  ;;  %v12500_v8 = vsel %vm163_vm0, %v12482_v59, 0.0 }
0x107b   :  { %15102 = vrcp.f32 %v12180_v42  ;;  %v12162_v52 = vadd.f32 %v12161_v26, %v12160_v55  ;;  %v12349_v3 = vadd.f32 %v12348_v58, %v18949_v45  ;;  %v12354_v14 = vsel %vm163_vm0, %v18959_v51, 0.0  ;;  %12503 = vst [vmem:[#allocation8] sm:$0xff] %v12500_v8 }
0x107c   :  { %v12167_v24 = vrot.slane %v12166_v39, 1  ;;  %15104 = vpow2.f32 %v12043_v27  ;;  %v12335_v17 = vadd.f32 %v12334_v57, %v18985_v48  ;;  %v12340_v20 = vsel %vm163_vm0, %v12262_v11, 0.0 }
0x107d   :  { %v19015_v50 = vpop.eup %15092  ;;  %15106 = vrcp.f32 %v12162_v52  ;;  %v12355_v9 = vrot.slane %v12354_v14, 4  ;;  %v12350_v58 = vrot.slane %v12349_v3, 2  ;;  %v12341_v51 = vrot.slane %v12340_v20, 4 }
0x107e   :  { %v12168_v5 = vadd.f32 %v12167_v24, %v12166_v39  ;;  %v12193_v19 = vrot.slane %v19015_v50, 4  ;;  %v12230_v62 = vmul.f32 %v15091_v7, %v18913_v32  ;;  %v12336_v33 = vrot.slane %v12335_v17, 2 }
0x107f   :  { %v12234_v38 = vmul.f32 %v18979_v54, %v18895_v18  ;;  %v19031_v53 = vadd.f32 %v12355_v9, %v12354_v14  ;;  %v19037_v32 = vadd.f32 %v12350_v58, %v12349_v3  ;;  %v19039_v46 = vadd.f32 %v12341_v51, %v12340_v20 }
0x1080   :  { %v19020_v30 = vpop.eup %15094  ;;  %15108 = vrcp.f32 %v12168_v5  ;;  %v12194_v45 = vadd.f32 %v19015_v50, %v12193_v19  ;;  %v12232_v28 = vmul.f32 %v15089_v60, %v18904_v34  ;;  %v12265_v11 = vmul.f32 %v12230_v62, %v18752_v43 }
0x1081   :  { %v19023_v47 = vpop.eup %15096  ;;  %v12187_v1 = vrot.slane %v19020_v30, 4  ;;  %v12267_v7 = vmul.f32 %v12234_v38, %v18749_v56 }
0x1082   :  { %v12195_v48 = vrot.slane %v12194_v45, 2  ;;  %v12181_v35 = vrot.slane %v19023_v47, 4  ;;  %v12266_v8 = vmul.f32 %v12232_v28, %v18757_v6  ;;  %v12361_v56 = vsel %vm163_vm0, %v12265_v11, 0.0 }
0x1083   :  { %v15099_v25 = vpop.eup %15098  ;;  %v12188_v15 = vadd.f32 %v19020_v30, %v12187_v1 }
0x1084   :  { %v19033_v49 = vpop.eup %15100  ;;  %v12242_v37 = vmul.f32 %v15099_v25, %v18975_v0  ;;  %v12196_v40 = vadd.f32 %v12195_v48, %v12194_v45  ;;  %v12182_v41 = vadd.f32 %v19023_v47, %v12181_v35  ;;  %v19046_v0 = vadd.f32 %v12336_v33, %v12335_v17 }
0x1085   :  { %v15103_v44 = vpop.eup %15102  ;;  %v12189_v55 = vrot.slane %v12188_v15, 2  ;;  %v12199_v18 = vrot.slane %v19033_v49, 4  ;;  %v12375_v45 = vsel %vm163_vm0, %v12267_v7, 0.0  ;;  %v12362_v35 = vrot.slane %v12361_v56, 4 }
0x1086   :  { %v19043_v54 = vpop.eup %15104  ;;  %v12197_v63 = vrot.slane %v12196_v40, 1  ;;  %v12183_v12 = vrot.slane %v12182_v41, 2  ;;  %v12271_v34 = vmul.f32 %v12242_v37, %v18764_v16  ;;  %v12244_v60 = vmul.f32 %v15103_v44, %v18982_v31 }
0x1087   :  { %v15107_v4 = vpop.eup %15106  ;;  %v12190_v42 = vadd.f32 %v12189_v55, %v12188_v15  ;;  %v12200_v26 = vadd.f32 %v19033_v49, %v12199_v18  ;;  %v12151_v59 = vrot.slane %v19043_v54, 4  ;;  %v12357_v15 = vrot.slane %v19031_v53, 2 }
0x1088   :  { %v12238_v57 = vmul.f32 %v15107_v4, %v18990_v21  ;;  %v12198_v39 = vadd.f32 %v12197_v63, %v12196_v40  ;;  %v12184_v27 = vadd.f32 %v12183_v12, %v12182_v41  ;;  %v12403_v21 = vsel %vm163_vm0, %v12271_v34, 0.0 }
0x1089   :  { %v12191_v43 = vrot.slane %v12190_v42, 1  ;;  %v12201_v52 = vrot.slane %v12200_v26, 2  ;;  %v12152_v14 = vadd.f32 %v19043_v54, %v12151_v59  ;;  %v12272_v5 = vmul.f32 %v12244_v60, %v18770_v23 }
0x108a   :  { %v15109_v24 = vpop.eup %15108  ;;  %v12269_v3 = vmul.f32 %v12238_v57, %v18767_v13  ;;  %15110 = vrcp.f32 %v12198_v39  ;;  %v12185_v31 = vrot.slane %v12184_v27, 1  ;;  %v12404_v62 = vrot.slane %v12403_v21, 4 }
0x108b   :  { %v12240_v16 = vmul.f32 %v15109_v24, %v18996_v2  ;;  %v12192_v17 = vadd.f32 %v12191_v43, %v12190_v42  ;;  %v12202_v20 = vadd.f32 %v12201_v52, %v12200_v26  ;;  %v12153_v6 = vrot.slane %v12152_v14, 2 }
0x108c   :  { %v12389_v19 = vsel %vm163_vm0, %v12269_v3, 0.0  ;;  %v12186_v13 = vadd.f32 %v12185_v31, %v12184_v27  ;;  %v12368_v2 = vsel %vm163_vm0, %v12266_v8, 0.0  ;;  %v12410_v38 = vsel %vm163_vm0, %v12272_v5, 0.0 }
0x108d   :  { %v12270_v9 = vmul.f32 %v12240_v16, %v18775_v36  ;;  %15112 = vrcp.f32 %v12192_v17  ;;  %v12390_v58 = vrot.slane %v12389_v19, 4  ;;  %v12203_v51 = vrot.slane %v12202_v20, 1 }
0x108e   :  { %v12154_v1 = vadd.f32 %v12153_v6, %v12152_v14  ;;  %15114 = vrcp.f32 %v12186_v13  ;;  %v12343_v36 = vrot.slane %v19039_v46, 2  ;;  %v12369_v37 = vrot.slane %v12368_v2, 4 }
0x108f   :  { %v12396_v48 = vsel %vm163_vm0, %v12270_v9, 0.0  ;;  %v12204_v33 = vadd.f32 %v12203_v51, %v12202_v20  ;;  %v12376_v40 = vrot.slane %v12375_v45, 4  ;;  %v12391_v41 = vadd.f32 %v12390_v58, %v12389_v19 }
0x1090   :  { %v12397_v23 = vrot.slane %v12396_v48, 4  ;;  %v12155_v25 = vrot.slane %v12154_v1, 1  ;;  %v12363_v55 = vadd.f32 %v12362_v35, %v12361_v56  ;;  %v12405_v18 = vadd.f32 %v12404_v62, %v12403_v21 }
0x1091   :  { %15116 = vrcp.f32 %v12204_v33  ;;  %v12411_v11 = vrot.slane %v12410_v38, 4  ;;  %v12338_v12 = vrot.slane %v19046_v0, 1  ;;  %v12352_v4 = vrot.slane %v19037_v32, 1 }
0x1092   :  { %v12398_v44 = vadd.f32 %v12397_v23, %v12396_v48  ;;  %v12156_v28 = vadd.f32 %v12155_v25, %v12154_v1  ;;  %v12344_v59 = vadd.f32 %v12343_v36, %v19039_v46  ;;  %v12370_v7 = vadd.f32 %v12369_v37, %v12368_v2 }
0x1093   :  { %v12377_v34 = vadd.f32 %v12376_v40, %v12375_v45  ;;  %v19074_v60 = vadd.f32 %v12357_v15, %v19031_v53  ;;  %v12392_v57 = vrot.slane %v12391_v41, 2  ;;  %v12364_v27 = vrot.slane %v12363_v55, 2 }
0x1094   :  { %v15111_v63 = vpop.eup %15110  ;;  %15118 = vrcp.f32 %v12156_v28  ;;  %v12399_v42 = vrot.slane %v12398_v44, 2  ;;  %v12406_v52 = vrot.slane %v12405_v18, 2  ;;  %v12412_v8 = vadd.f32 %v12411_v11, %v12410_v38 }
0x1095   :  { %v12250_v26 = vmul.f32 %v15111_v63, %v19015_v50  ;;  %v12339_v3 = vadd.f32 %v12338_v12, %v19046_v0  ;;  %v12353_v50 = vadd.f32 %v12352_v4, %v19037_v32  ;;  %v12345_v56 = vrot.slane %v12344_v59, 1 }
0x1096   :  { %v12400_v14 = vadd.f32 %v12399_v42, %v12398_v44  ;;  %v12371_v16 = vrot.slane %v12370_v7, 2  ;;  %v12378_v17 = vrot.slane %v12377_v34, 2  ;;  %v12393_v20 = vadd.f32 %v12392_v57, %v12391_v41 }
0x1097   :  { %v15113_v39 = vpop.eup %15112  ;;  %v12275_v43 = vmul.f32 %v12250_v26, %v18784_v29  ;;  %v12359_v5 = vrot.slane %v19074_v60, 1  ;;  %v12407_v19 = vadd.f32 %v12406_v52, %v12405_v18  ;;  %v12413_v0 = vrot.slane %v12412_v8, 2 }
0x1098   :  { %v12248_v24 = vmul.f32 %v15113_v39, %v19020_v30  ;;  %v15115_v46 = vpop.eup %15114  ;;  %v12365_v30 = vadd.f32 %v12364_v27, %v12363_v55  ;;  %v12401_v9 = vrot.slane %v12400_v14, 1  ;;  %v12346_v51 = vadd.f32 %v12345_v56, %v12344_v59 }
0x1099   :  { %v12431_v53 = vsel %vm163_vm0, %v12275_v43, 0.0  ;;  %v12246_v31 = vmul.f32 %v15115_v46, %v19023_v47  ;;  %v12372_v47 = vadd.f32 %v12371_v16, %v12370_v7  ;;  %v12379_v2 = vadd.f32 %v12378_v17, %v12377_v34 }
0x109a   :  { %v12274_v29 = vmul.f32 %v12248_v24, %v18792_v10  ;;  %v12432_v21 = vrot.slane %v12431_v53, 4  ;;  %v12394_v62 = vrot.slane %v12393_v20, 1  ;;  %v12366_v38 = vrot.slane %v12365_v30, 1 }
0x109b   :  { %v15117_v6 = vpop.eup %15116  ;;  %v12273_v32 = vmul.f32 %v12246_v31, %v18787_v61  ;;  %v12402_v36 = vadd.f32 %v12401_v9, %v12400_v14  ;;  %v12408_v15 = vrot.slane %v12407_v19, 1  ;;  %v12414_v37 = vadd.f32 %v12413_v0, %v12412_v8 }
0x109c   :  { %v12424_v13 = vsel %vm163_vm0, %v12274_v29, 0.0  ;;  %v12433_v45 = vadd.f32 %v12432_v21, %v12431_v53  ;;  %v12252_v58 = vmul.f32 %v15117_v6, %v19033_v49  ;;  %v19497_v49 = vld [vmem:[#allocation19_spill] sm:$0xff]  ;;  %v12373_v55 = vrot.slane %v12372_v47, 1 }
0x109d   :  { %v12425_v1 = vrot.slane %v12424_v13, 4  ;;  %v12417_v48 = vsel %vm163_vm0, %v12273_v32, 0.0  ;;  %v12395_v18 = vadd.f32 %v12394_v62, %v12393_v20  ;;  %v12483_v63 = vsel %vm12469_vm4, %v12346_v51, %v12339_v3 }
0x109e   :  { %v15119_v10 = vpop.eup %15118  ;;  %v12434_v35 = vrot.slane %v12433_v45, 2  ;;  %v12276_v33 = vmul.f32 %v12252_v58, %v18795_v22  ;;  %v12418_v61 = vrot.slane %v12417_v48, 4  ;;  %v12415_v26 = vrot.slane %v12414_v37, 1 }
0x109f   :  { %v12236_v23 = vmul.f32 %v15119_v10, %v19043_v54  ;;  %v12426_v25 = vadd.f32 %v12425_v1, %v12424_v13  ;;  %v12490_v7 = vsel %vm12469_vm4, %v12402_v36, %v12395_v18  ;;  %v12367_v34 = vadd.f32 %v12366_v38, %v12365_v30 }
0x10a0   :  { %v12419_v41 = vadd.f32 %v12418_v61, %v12417_v48  ;;  %v12438_v28 = vsel %vm163_vm0, %v12276_v33, 0.0  ;;  %v12435_v4 = vadd.f32 %v12434_v35, %v12433_v45  ;;  %v12409_v57 = vadd.f32 %v12408_v15, %v12407_v19 }
0x10a1   :  { %v12268_v40 = vmul.f32 %v12236_v23, %v19497_v49  ;;  %v12427_v44 = vrot.slane %v12426_v25, 2  ;;  %v12439_v11 = vrot.slane %v12438_v28, 4  ;;  %v12484_v43 = vsel %vm12471_vm5, %v12353_v50, %v12483_v63 }
0x10a2   :  { %v12420_v22 = vrot.slane %v12419_v41, 2  ;;  %v12360_v27 = vadd.f32 %v12359_v5, %v19074_v60  ;;  %v12436_v14 = vrot.slane %v12435_v4, 1  ;;  %v12491_v46 = vsel %vm12471_vm5, %v12409_v57, %v12490_v7 }
0x10a3   :  { %v12382_v54 = vsel %vm163_vm0, %v12268_v40, 0.0  ;;  %v12428_v12 = vadd.f32 %v12427_v44, %v12426_v25  ;;  %v12440_v59 = vadd.f32 %v12439_v11, %v12438_v28  ;;  %v12416_v16 = vadd.f32 %v12415_v26, %v12414_v37 }
0x10a4   :  { %v12383_v42 = vrot.slane %v12382_v54, 4  ;;  %v12421_v39 = vadd.f32 %v12420_v22, %v12419_v41  ;;  %v12485_v53 = vsel %vm12473_vm6, %v12360_v27, %v12484_v43  ;;  %v12374_v31 = vadd.f32 %v12373_v55, %v12372_v47 }
0x10a5   :  { %v12429_v8 = vrot.slane %v12428_v12, 1  ;;  %v12441_v24 = vrot.slane %v12440_v59, 2  ;;  %v12380_v29 = vrot.slane %v12379_v2, 1  ;;  %v12486_v21 = vsel %vm12475_vm7, %v12367_v34, %v12485_v53 }
0x10a6   :  { %v12384_v52 = vadd.f32 %v12383_v42, %v12382_v54  ;;  %v12422_v3 = vrot.slane %v12421_v39, 1  ;;  %v12492_v5 = vsel %vm12473_vm6, %v12416_v16, %v12491_v46  ;;  %v12437_v19 = vadd.f32 %v12436_v14, %v12435_v4 }
0x10a7   :  { %v12442_v17 = vadd.f32 %v12441_v24, %v12440_v59  ;;  %v12430_v30 = vadd.f32 %v12429_v8, %v12428_v12  ;;  %v12487_v9 = vsel %vm12477_vm8, %v12374_v31, %v12486_v21  ;;  %v12381_v45 = vadd.f32 %v12380_v29, %v12379_v2 }
0x10a8   :  { %v12385_v56 = vrot.slane %v12384_v52, 2  ;;  %v12423_v20 = vadd.f32 %v12422_v3, %v12421_v39 }
0x10a9   :  { %v12443_v60 = vrot.slane %v12442_v17, 1  ;;  %v12488_v1 = vsel %vm12479_vm9, %v12381_v45, %v12487_v9 }
0x10aa   :  { %v12386_v50 = vadd.f32 %v12385_v56, %v12384_v52  ;;  %v12493_v0 = vsel %vm12475_vm7, %v12423_v20, %v12492_v5 }
0x10ab   :  { %v12444_v32 = vadd.f32 %v12443_v60, %v12442_v17  ;;  %v12494_v13 = vsel %vm12477_vm8, %v12430_v30, %v12493_v0 }
0x10ac   :  { %v12387_v6 = vrot.slane %v12386_v50, 1  ;;  %v12495_v58 = vsel %vm12479_vm9, %v12437_v19, %v12494_v13 }
0x10ad   :  { %v12496_v47 = vsel %vm12481_vm10, %v12444_v32, %v12495_v58 }
0x10ae   :  { %v12388_v51 = vadd.f32 %v12387_v6, %v12386_v50  ;;  %v12502_v10 = vsel %vm163_vm0, %v12496_v47, 0.0 }
0x10af   :  { %12505 = vst [vmem:[#allocation8 + $0x10] sm:$0xff] %v12502_v10 }
0x10b0   :  { %v12489_v62 = vsel %vm12481_vm10, %v12388_v51, %v12488_v1 }
0x10b1   :  { %v12501_v48 = vsel %vm163_vm0, %v12489_v62, 0.0 }
0x10b2   :  { %12504 = vst [vmem:[#allocation8 + $0x8] sm:$0xff] %v12501_v48 }
0x10b3   :  { %15197 = shalt.err (!%p15194_p0)
}
0x10b4   :  { %s15198_s19 = scalar_lea.hbm %s19127_s5, 384 }
0x10b5   :  { %p15199_p1 = scmp.ne.s32.totalorder %s19127_s5, %s15198_s19  ;;  %p15202_p2 = scmp.lt.u32.totalorder %s15198_s19, %s19127_s5 }
0x10b7   :  { %p15204_p3 = pnand %p15202_p2, %p15199_p1 }
0x10b9   :  { %15207 = shalt.err (!%p15204_p3)
}
0x10ba   :  { %s15232_s25 = smov 128   ;;  %s15233_s26 = smov 8  }
0x10bb   :  { %12517 = dma.vmem_to_hbm [thread:$0]  %s12512_s16, 384, %s19127_s5, [#allocation4], %s15232_s25, %s15232_s25, %s15233_s26  }
0x10bc   :  { %15212 = dma.done.wait [#allocation4], 384  }
0x10bd   :  { %15213 = vsyncadd [#allocation4], 4294966912 }
0x10be   :  { %12521 = vsyncpa [#allocation3], 1 }
0x10bf   :  { %12522 = vsyncpa [#allocation6], 1 }
0x10c0   :  { %12523 = vsyncpa [#allocation4], 1 }

</bundles_post_ra>
